<compile_context>
chip_gen: v7x
topology: tpu7x:2x2x1
jax: 0.10.0
libtpu: 0.0.40
codegen_flags: <defaults>
</compile_context>

<pallas_src>
import functools

import jax
import jax.numpy as jnp
from jax import lax
from jax.experimental import pallas as pl
from jax.experimental.pallas import tpu as pltpu


# bf16 MXU operands (f32 accumulate; all norm / elementwise math stays f32).
# ~2-3x MXU throughput and half the operand VMEM/DMA on v5e/v6e/v7x.
MXU_BF16 = True

_TAPS = tuple((dy, dx) for dy in range(3) for dx in range(3))
_DIMS_T = (((0,), (0,)), ((), ()))   # contract dim 0 of both operands (A^T @ B)


def _mxu_cast(x):
    return x.astype(jnp.bfloat16) if MXU_BF16 else x


def _vmem_limit(block_bytes):
    # double-buffered blocks + in-kernel temporaries + headroom, capped at
    # 48 MiB so v7x (64 MiB physical VMEM / TC) keeps compiler-scratch room.
    need = 3 * block_bytes + (4 << 20)
    return int(min(max(need, 16 << 20), 48 << 20))


# ---------------------------------------------------------------------------
# Kernel 1: fused self.conv (3x3 + lrelu) + per-class masked sums / counts.
# Grid = (B, nH); nH is an "arbitrary" reduction over HW row tiles.
# Emits codes^T (s_dim, Npad) per batch (== PyTorch's style_codesT).
# ---------------------------------------------------------------------------
def _codes_kernel(x_ref, seg_ref, bgm_ref, msk_ref, cw_ref, cb_ref, sel_ref,
                  codes_ref, sums_acc, cnt_acc, *, TH, W):
    j = pl.program_id(1)

    @pl.when(j == 0)
    def _():
        sums_acc[...] = jnp.zeros_like(sums_acc)
        cnt_acc[...] = jnp.zeros_like(cnt_acc)

    T = TH * W
    S = cw_ref.shape[-1]

    # --- self.conv: nine shifted-slice MXU accumulations (taps built in VMEM)
    xh = x_ref[0]                                            # (TH+2, W+2, Cin)
    acc = jnp.zeros((T, S), jnp.float32)
    for t, (dy, dx) in enumerate(_TAPS):
        tap = xh[dy:dy + TH, dx:dx + W, :].reshape(T, -1)
        acc = acc + jnp.dot(_mxu_cast(tap), _mxu_cast(cw_ref[t]),
                            preferred_element_type=jnp.float32)
    acc = acc + cb_ref[...].astype(jnp.float32)
    feat = jnp.where(acc >= 0, acc, 0.2 * acc)               # lrelu(0.2), (T,S)

    # --- masked per-class sums (MXU) + counts (XLU cross-sublane sum)
    seg_c = seg_ref[0, 1:1 + TH, 1:1 + W, :].reshape(T, -1)  # (T, Npad)
    bgm_c = bgm_ref[0, 1:1 + TH, 1:1 + W, :].reshape(T, 1)
    msk_c = msk_ref[0]                                       # (T, 1)
    ctx = seg_c * bgm_c * (1.0 - msk_c)
    maskb = (ctx != 0.0).astype(jnp.float32)                 # (T, Npad)

    # kept in f32: long pixel reduction feeding per-class means
    sums_acc[...] += lax.dot_general(feat, maskb, _DIMS_T,
                                     preferred_element_type=jnp.float32)
    cnt_acc[...] += jnp.sum(maskb, axis=0, keepdims=True)    # (1, Npad)

    @pl.when(j == pl.num_programs(1) - 1)
    def _():
        counts = cnt_acc[...]                                # (1, Npad)
        valid = (counts > 0.0) & (sel_ref[...] > 0.0)
        inv = 1.0 / jnp.maximum(counts, 1.0)
        codes_ref[0] = jnp.where(valid, sums_acc[...] * inv,
                                 0.0).astype(codes_ref.dtype)   # (S, Npad)


def _codes_reduce(x_tiles, seg_tiles, bgm_tiles, msk_flat, cw9, cb, sel, *,
                  B, nH, TH, W):
    _, THp, Wp, Cin = x_tiles.shape
    Npad = seg_tiles.shape[-1]
    S = cw9.shape[-1]
    T = TH * W
    blk = 4 * (THp * Wp * (Cin + Npad + 1) + T + 9 * Cin * S + S + Npad
               + 2 * T * max(S, Npad) + S * Npad)
    return pl.pallas_call(
        functools.partial(_codes_kernel, TH=TH, W=W),
        out_shape=jax.ShapeDtypeStruct((B, S, Npad), jnp.float32),
        grid=(B, nH),
        in_specs=[
            pl.BlockSpec((1, THp, Wp, Cin), lambda b, j: (b * nH + j, 0, 0, 0)),
            pl.BlockSpec((1, THp, Wp, Npad), lambda b, j: (b * nH + j, 0, 0, 0)),
            pl.BlockSpec((1, THp, Wp, 1), lambda b, j: (b * nH + j, 0, 0, 0)),
            pl.BlockSpec((1, T, 1), lambda b, j: (b, j, 0)),
            pl.BlockSpec((9, Cin, S), lambda b, j: (0, 0, 0)),
            pl.BlockSpec((1, S), lambda b, j: (0, 0)),
            pl.BlockSpec((1, Npad), lambda b, j: (0, 0)),
        ],
        out_specs=pl.BlockSpec((1, S, Npad), lambda b, j: (b, 0, 0)),
        scratch_shapes=[pltpu.VMEM((S, Npad), jnp.float32),
                        pltpu.VMEM((1, Npad), jnp.float32)],
        compiler_params=pltpu.CompilerParams(
            dimension_semantics=("parallel", "arbitrary"),
            vmem_limit_bytes=_vmem_limit(blk)),
    )(x_tiles, seg_tiles, bgm_tiles, msk_flat, cw9, cb, sel)


# ---------------------------------------------------------------------------
# Kernel 2: SPADE mlp_shared conv (+ReLU) with style_map folded into weights.
# out_map = [bg_segmap @ codes, bg_segmap], so
#   conv(out_map, w_shared) == conv(bg_segmap, codes @ w_style + w_seg):
# style_map / out_map are never materialized (not even in VMEM).
# Grid = (B, nH), fully parallel; lane-dense 128-wide output tiles.
# ---------------------------------------------------------------------------
def _shared_conv_kernel(seg_ref, bgm_ref, codes_ref, sws_ref, swg_ref, sb_ref,
                        o_ref, *, TH, W):
    T = TH * W
    codesT = codes_ref[0]                                    # (S, Npad) f32
    bgseg = seg_ref[0] * bgm_ref[0]                          # (TH+2, W+2, Npad)

    acc = jnp.zeros((T, sws_ref.shape[-1]), jnp.float32)
    for t, (dy, dx) in enumerate(_TAPS):
        # effective tap weight: codes @ w_style[t] + w_seg[t]  -> (Npad, Ch)
        w_t = lax.dot_general(_mxu_cast(codesT), _mxu_cast(sws_ref[t]),
                              _DIMS_T, preferred_element_type=jnp.float32)
        w_t = w_t + swg_ref[t].astype(jnp.float32)
        tap = bgseg[dy:dy + TH, dx:dx + W, :].reshape(T, -1)
        acc = acc + jnp.dot(_mxu_cast(tap), _mxu_cast(w_t),
                            preferred_element_type=jnp.float32)
    acc = acc + sb_ref[...].astype(jnp.float32)
    o_ref[0] = jnp.maximum(acc, 0.0).astype(o_ref.dtype)     # ReLU, (T, 128)


def _shared_conv(seg_tiles, bgm_tiles, codes, sws9, swg9, sb, *, B, nH, TH, W):
    _, THp, Wp, Npad = seg_tiles.shape
    S = codes.shape[1]
    Ch = sws9.shape[-1]
    T = TH * W
    HW = nH * T
    blk = 4 * (THp * Wp * (Npad + 1) + S * Npad + 9 * (S + Npad) * Ch + Ch
               + 2 * T * Ch)
    return pl.pallas_call(
        functools.partial(_shared_conv_kernel, TH=TH, W=W),
        out_shape=jax.ShapeDtypeStruct((B, HW, Ch), jnp.float32),
        grid=(B, nH),
        in_specs=[
            pl.BlockSpec((1, THp, Wp, Npad), lambda b, j: (b * nH + j, 0, 0, 0)),
            pl.BlockSpec((1, THp, Wp, 1), lambda b, j: (b * nH + j, 0, 0, 0)),
            pl.BlockSpec((1, S, Npad), lambda b, j: (b, 0, 0)),
            pl.BlockSpec((9, S, Ch), lambda b, j: (0, 0, 0)),
            pl.BlockSpec((9, Npad, Ch), lambda b, j: (0, 0, 0)),
            pl.BlockSpec((1, Ch), lambda b, j: (0, 0)),
        ],
        out_specs=pl.BlockSpec((1, T, Ch), lambda b, j: (b, j, 0)),
        compiler_params=pltpu.CompilerParams(
            dimension_semantics=("parallel", "parallel"),
            vmem_limit_bytes=_vmem_limit(blk)),
    )(seg_tiles, bgm_tiles, codes, sws9, swg9, sb)


# ---------------------------------------------------------------------------
# Kernel 3: fused gamma/beta conv + conv_0 + SPADE instance-norm + modulation
# + LeakyReLU(0.2); per-batch whole image (the norm needs full-HW statistics).
# Output emitted channel-major (C, HW): lane-dense stores + free NCHW reshape.
# ---------------------------------------------------------------------------
def _spade_tail_kernel(a_ref, x_ref, gbw_ref, gbb_ref, c0w_ref, c0b_ref, o_ref,
                       *, H, W):
    HW = H * W
    Cin = c0w_ref.shape[-1]

    a = a_ref[0]                                   # (H+2, W+2, 128)
    x = x_ref[0]                                   # (H+2, W+2, Cin)

    gb = jnp.zeros((HW, gbw_ref.shape[-1]), jnp.float32)
    dx = jnp.zeros((HW, Cin), jnp.float32)
    for t, (dy, dxo) in enumerate(_TAPS):
        a_tap = a[dy:dy + H, dxo:dxo + W, :].reshape(HW, -1)
        x_tap = x[dy:dy + H, dxo:dxo + W, :].reshape(HW, -1)
        gb = gb + jnp.dot(_mxu_cast(a_tap), _mxu_cast(gbw_ref[t]),
                          preferred_element_type=jnp.float32)
        dx = dx + jnp.dot(_mxu_cast(x_tap), _mxu_cast(c0w_ref[t]),
                          preferred_element_type=jnp.float32)
    gb = gb + gbb_ref[...].astype(jnp.float32)
    dx = dx + c0b_ref[...].astype(jnp.float32)

    # InstanceNorm2d(affine=False, eps=1e-5): per-channel stats over H*W (f32)
    mean = jnp.mean(dx, axis=0, keepdims=True)
    var = jnp.mean((dx - mean) ** 2, axis=0, keepdims=True)
    norm = (dx - mean) * lax.rsqrt(var + 1e-5)

    y = norm * (1.0 + gb[:, :Cin]) + gb[:, Cin:]
    y = jnp.where(y >= 0, y, 0.2 * y)              # leaky_relu(0.2)
    o_ref[0] = jnp.transpose(y).astype(o_ref.dtype)   # channel-major (Cin, HW)


def _spade_tail(actv_pad, x_pad, gbw9, gbb, c0w9, c0b, *, H, W):
    B, Hp, Wp, Ch = actv_pad.shape
    Cin = c0w9.shape[-1]
    HW = H * W
    blk = 4 * (Hp * Wp * (Ch + Cin) + 9 * Ch * 2 * Cin + 9 * Cin * Cin
               + 3 * Cin + HW * (3 * Cin + Ch) + Cin * HW)
    return pl.pallas_call(
        functools.partial(_spade_tail_kernel, H=H, W=W),
        out_shape=jax.ShapeDtypeStruct((B, Cin, HW), jnp.float32),
        grid=(B,),
        in_specs=[
            pl.BlockSpec((1, Hp, Wp, Ch), lambda b: (b, 0, 0, 0)),
            pl.BlockSpec((1, Hp, Wp, Cin), lambda b: (b, 0, 0, 0)),
            pl.BlockSpec((9, Ch, 2 * Cin), lambda b: (0, 0, 0)),
            pl.BlockSpec((1, 2 * Cin), lambda b: (0, 0)),
            pl.BlockSpec((9, Cin, Cin), lambda b: (0, 0, 0)),
            pl.BlockSpec((1, Cin), lambda b: (0, 0)),
        ],
        out_specs=pl.BlockSpec((1, Cin, HW), lambda b: (b, 0, 0)),
        compiler_params=pltpu.CompilerParams(
            dimension_semantics=("parallel",),
            vmem_limit_bytes=_vmem_limit(blk)),
    )(actv_pad, x_pad, gbw9, gbb, c0w9, c0b)


# ---------------------------------------------------------------------------
# Glue (layout plumbing only — all compute lives in the Pallas kernels)
# ---------------------------------------------------------------------------
def _nearest_resize_nchw(x, out_h, out_w):
    # F.interpolate(mode='nearest') semantics: src = floor(dst * in/out)
    B, C, H, W = x.shape
    if (H, W) == (out_h, out_w):
        return x
    hi = jnp.floor(jnp.arange(out_h) * (H / out_h)).astype(jnp.int32)
    wi = jnp.floor(jnp.arange(out_w) * (W / out_w)).astype(jnp.int32)
    return x[:, :, hi][:, :, :, wi]


def _pad_hw1(x_nhwc):
    return jnp.pad(x_nhwc, ((0, 0), (1, 1), (1, 1), (0, 0)))


def _row_tiles(xp, TH):
    """(B, H+2, W+2, C) -> (B*nH, TH+2, W+2, C): overlapping row tiles with a
    1-row halo (duplication (TH+2)/TH ~= 1.1x, vs 9x for HBM im2col)."""
    B, Hp, Wp, C = xp.shape
    nH = (Hp - 2) // TH
    idx = jnp.arange(nH)[:, None] * TH + jnp.arange(TH + 2)[None, :]
    return xp[:, idx].reshape(B * nH, TH + 2, Wp, C)


def init_params(key, dim_in, label_nc, s_dim=64, nhidden=128):
    ks = jax.random.split(key, 5)

    def conv_p(k, cin, cout):
        kw, kb = jax.random.split(k)
        return (jax.random.normal(kw, (3, 3, cin, cout), jnp.float32) * 0.1,
                jax.random.normal(kb, (cout,), jnp.float32) * 0.01)

    p = {}
    p["conv_w"], p["conv_b"] = conv_p(ks[0], dim_in, s_dim)                  # Conv2dBlock
    p["conv0_w"], p["conv0_b"] = conv_p(ks[1], dim_in, dim_in)               # StyleLayer.conv_0
    p["shared_w"], p["shared_b"] = conv_p(ks[2], s_dim + label_nc, nhidden)  # SPADE mlp_shared
    p["gamma_w"], p["gamma_b"] = conv_p(ks[3], nhidden, dim_in)              # SPADE mlp_gamma
    p["beta_w"], p["beta_b"] = conv_p(ks[4], nhidden, dim_in)                # SPADE mlp_beta
    return p


def style_propagate_forward(params, featmap_in, segmap, bg_mask, mask,
                            class_selected=(24, 25, 26, 27, 28, 29, 30, 31,
                                            32, 33)):
    B, Cin, H, W = featmap_in.shape
    HW = H * W
    S = params["conv_w"].shape[-1]          # s_dim = 64
    nhid = params["shared_w"].shape[-1]     # 128
    N = segmap.shape[1]                     # label_nc

    # Row-tile size: largest power-of-two divisor of H up to 32 (every tile is
    # full-size: no silent whole-image fallback block).
    TH = next(t for t in (32, 16, 8, 4, 2, 1) if H % t == 0)
    nH = H // TH

    # channels-last + 1-pixel spatial zero pad (shared by self.conv / conv_0)
    x_nhwc = jnp.transpose(featmap_in, (0, 2, 3, 1))
    x_pad = _pad_hw1(x_nhwc)                                  # (B, H+2, W+2, Cin)
    x_tiles = _row_tiles(x_pad, TH)

    # nearest-resize the maps to the feature resolution
    seg_r = _nearest_resize_nchw(segmap, H, W)
    bgm_r = _nearest_resize_nchw(bg_mask, H, W)
    msk_r = _nearest_resize_nchw(mask, H, W)

    # zero-pad one-hot seg channels to a lane-aligned Npad (35 -> 64) so the
    # folded out_map width (S + Npad = 128) and all stores stay lane dense.
    Npad = max(64, -(-N // 64) * 64)
    seg_nhwc = jnp.pad(jnp.transpose(seg_r, (0, 2, 3, 1)),
                       ((0, 0), (0, 0), (0, 0), (0, Npad - N)))
    seg_tiles = _row_tiles(_pad_hw1(seg_nhwc), TH)
    bgm_tiles = _row_tiles(_pad_hw1(jnp.transpose(bgm_r, (0, 2, 3, 1))), TH)
    msk_flat = jnp.transpose(msk_r, (0, 2, 3, 1)).reshape(B, HW, 1)

    # classes receiving codes: j < N and j NOT in class_selected
    # (== the `if j not in class_selected` skip in the PyTorch loop).
    sel = jnp.array([[0.0 if (j >= N or j in class_selected) else 1.0
                      for j in range(Npad)]], jnp.float32)     # (1, Npad)

    # weights, tap-major
    cw9 = params["conv_w"].reshape(9, Cin, S)
    cb = params["conv_b"].reshape(1, S)
    sws9 = params["shared_w"][:, :, :S, :].reshape(9, S, nhid)
    swg9 = jnp.pad(params["shared_w"][:, :, S:, :],
                   ((0, 0), (0, 0), (0, Npad - N), (0, 0))).reshape(9, Npad, nhid)
    sb = params["shared_b"].reshape(1, nhid)
    gbw9 = jnp.concatenate([params["gamma_w"], params["beta_w"]],
                           axis=-1).reshape(9, nhid, 2 * Cin)
    gbb = jnp.concatenate([params["gamma_b"], params["beta_b"]],
                          axis=-1).reshape(1, 2 * Cin)
    c0w9 = params["conv0_w"].reshape(9, Cin, Cin)
    c0b = params["conv0_b"].reshape(1, Cin)

    # 1) self.conv + per-class masked means -> codes^T (B, S, Npad)
    codes = _codes_reduce(x_tiles, seg_tiles, bgm_tiles, msk_flat, cw9, cb,
                          sel, B=B, nH=nH, TH=TH, W=W)
    # 2) SPADE mlp_shared conv (+ReLU), style_map folded into the weights
    actv = _shared_conv(seg_tiles, bgm_tiles, codes, sws9, swg9, sb,
                        B=B, nH=nH, TH=TH, W=W)               # (B, HW, 128)
    # 3) gamma/beta conv + conv_0 + instance-norm + modulation + lrelu
    actv_pad = _pad_hw1(actv.reshape(B, H, W, nhid))
    # TODO(synk): for very large H*W, switch this per-batch whole-image kernel
    # to an HW-tiled two-pass (moments, then normalize) variant on v7x.
    out_cm = _spade_tail(actv_pad, x_pad, gbw9, gbb, c0w9, c0b, H=H, W=W)
    return out_cm.reshape(B, Cin, H, W)                        # NCHW, no transpose


if __name__ == "__main__":
    key = jax.random.PRNGKey(0)
    B, dim_in, H, W = 2, 64, 16, 16         # dim_in = ngf*2 (smallest real use)
    label_nc = 35                           # class_selected=[24..33] meaningful
    Hs, Ws = 32, 32                         # seg/masks at 2x -> exercises resize

    k_feat, k_seg, k_bg, k_m, k_p = jax.random.split(key, 5)
    featmap_in = jax.random.normal(k_feat, (B, dim_in, H, W), jnp.float32)
    seg_ids = jax.random.randint(k_seg, (B, Hs, Ws), 0, label_nc)
    segmap = jnp.transpose(jax.nn.one_hot(seg_ids, label_nc, dtype=jnp.float32),
                           (0, 3, 1, 2))                                   # (B,35,Hs,Ws)
    bg_mask = jax.random.bernoulli(k_bg, 0.7, (B, 1, Hs, Ws)).astype(jnp.float32)
    mask = jax.random.bernoulli(k_m, 0.3, (B, 1, Hs, Ws)).astype(jnp.float32)

    params = init_params(k_p, dim_in, label_nc)

    out = jax.jit(style_propagate_forward)(params, featmap_in, segmap,
                                           bg_mask, mask)
    jax.block_until_ready(out)
    assert out.shape == (B, dim_in, H, W) and out.dtype == jnp.float32
    print("KERNEL_OK")
</pallas_src>

<mosaic_0001>
module attributes {stable_mosaic.version = 11 : i64} {
  func.func @_codes_kernel(%arg0: i32, %arg1: i32, %arg2: memref<1x18x18x64xf32, #tpu.memory_space<vmem>>, %arg3: memref<1x18x18x64xf32, #tpu.memory_space<vmem>>, %arg4: memref<1x18x18x1xf32, #tpu.memory_space<vmem>>, %arg5: memref<1x256x1xf32, #tpu.memory_space<vmem>>, %arg6: memref<9x64x64xf32, #tpu.memory_space<vmem>>, %arg7: memref<1x64xf32, #tpu.memory_space<vmem>>, %arg8: memref<1x64xf32, #tpu.memory_space<vmem>>, %arg9: memref<1x64x64xf32, #tpu.memory_space<vmem>>, %arg10: memref<64x64xf32, #tpu.memory_space<vmem>>, %arg11: memref<1x64xf32, #tpu.memory_space<vmem>>) attributes {dimension_semantics = [#tpu.dimension_semantics<parallel>, #tpu.dimension_semantics<arbitrary>], iteration_bounds = array<i64: 2, 1>, scalar_prefetch = 0 : i64, scratch_operands = 2 : i64, tpu.core_type = #tpu.core_type<tc>, window_params = [{transform_indices = @transform_0, window_bounds = array<i64: 1, 18, 18, 64>}, {transform_indices = @transform_1, window_bounds = array<i64: 1, 18, 18, 64>}, {transform_indices = @transform_2, window_bounds = array<i64: 1, 18, 18, 1>}, {transform_indices = @transform_3, window_bounds = array<i64: 1, 256, 1>}, {pipeline_mode = #tpu.pipeline_mode<synchronous>, transform_indices = @transform_4, window_bounds = array<i64: 9, 64, 64>}, {pipeline_mode = #tpu.pipeline_mode<synchronous>, transform_indices = @transform_5, window_bounds = array<i64: 1, 64>}, {pipeline_mode = #tpu.pipeline_mode<synchronous>, transform_indices = @transform_6, window_bounds = array<i64: 1, 64>}, {transform_indices = @transform_7, window_bounds = array<i64: 1, 64, 64>}]} {
    %c0_i32 = arith.constant 0 : i32
    %0 = arith.cmpi eq, %arg1, %c0_i32 : i32
    %1 = arith.extui %0 : i1 to i32
    %c0_i32_0 = arith.constant 0 : i32
    %2 = arith.cmpi ne, %1, %c0_i32_0 : i32
    scf.if %2 {
      %cst_61 = arith.constant 0.000000e+00 : f32
      %116 = vector.broadcast %cst_61 : f32 to vector<64x64xf32>
      %c0_62 = arith.constant 0 : index
      %c0_63 = arith.constant 0 : index
      %117 = vector.load %arg10[%c0_62, %c0_63] : memref<64x64xf32, #tpu.memory_space<vmem>>, vector<64x64xf32>
      tpu.vector_store %arg10[%c0_62, %c0_63], %116 {strides = array<i32>} : memref<64x64xf32, #tpu.memory_space<vmem>>, vector<64x64xf32>,
      %cst_64 = arith.constant 0.000000e+00 : f32
      %118 = vector.broadcast %cst_64 : f32 to vector<1x64xf32>
      %c0_65 = arith.constant 0 : index
      %c0_66 = arith.constant 0 : index
      %119 = vector.load %arg11[%c0_65, %c0_66] : memref<1x64xf32, #tpu.memory_space<vmem>>, vector<1x64xf32>
      tpu.vector_store %arg11[%c0_65, %c0_66], %118 {strides = array<i32>} : memref<1x64xf32, #tpu.memory_space<vmem>>, vector<1x64xf32>,
    } else {
    }
    %c0 = arith.constant 0 : index
    %c0_1 = arith.constant 0 : index
    %c0_2 = arith.constant 0 : index
    %c0_3 = arith.constant 0 : index
    %3 = vector.load %arg2[%c0, %c0_1, %c0_2, %c0_3] : memref<1x18x18x64xf32, #tpu.memory_space<vmem>>, vector<1x18x18x64xf32>
    %4 = vector.shape_cast %3 : vector<1x18x18x64xf32> to vector<18x18x64xf32>
    %cst = arith.constant 0.000000e+00 : f32
    %5 = vector.broadcast %cst : f32 to vector<256x64xf32>
    %6 = vector.extract_strided_slice %4 {offsets = [0, 0, 0], sizes = [16, 16, 64], strides = [1, 1, 1]} : vector<18x18x64xf32> to vector<16x16x64xf32>
    %7 = vector.shape_cast %6 : vector<16x16x64xf32> to vector<256x64xf32>
    %8 = arith.truncf %7 : vector<256x64xf32> to vector<256x64xbf16>
    %c0_4 = arith.constant 0 : index
    %c0_5 = arith.constant 0 : index
    %c0_6 = arith.constant 0 : index
    %9 = vector.load %arg6[%c0_4, %c0_5, %c0_6] : memref<9x64x64xf32, #tpu.memory_space<vmem>>, vector<1x64x64xf32>
    %10 = vector.shape_cast %9 : vector<1x64x64xf32> to vector<64x64xf32>
    %11 = arith.truncf %10 : vector<64x64xf32> to vector<64x64xbf16>
    %cst_7 = arith.constant dense<0.000000e+00> : vector<256x64xf32>
    %12 = tpu.matmul %8, %11, %cst_7 {dimension_numbers = #tpu.dot_dimension_numbers<[1], [0], [0], [1], [0, 0, 1, 1], [], []>} : vector<256x64xbf16>, vector<64x64xbf16>, vector<256x64xf32> -> vector<256x64xf32>
    %13 = arith.addf %5, %12 : vector<256x64xf32>
    %14 = vector.extract_strided_slice %4 {offsets = [0, 1, 0], sizes = [16, 16, 64], strides = [1, 1, 1]} : vector<18x18x64xf32> to vector<16x16x64xf32>
    %15 = vector.shape_cast %14 : vector<16x16x64xf32> to vector<256x64xf32>
    %16 = arith.truncf %15 : vector<256x64xf32> to vector<256x64xbf16>
    %c1 = arith.constant 1 : index
    %c0_8 = arith.constant 0 : index
    %c0_9 = arith.constant 0 : index
    %17 = vector.load %arg6[%c1, %c0_8, %c0_9] : memref<9x64x64xf32, #tpu.memory_space<vmem>>, vector<1x64x64xf32>
    %18 = vector.shape_cast %17 : vector<1x64x64xf32> to vector<64x64xf32>
    %19 = arith.truncf %18 : vector<64x64xf32> to vector<64x64xbf16>
    %cst_10 = arith.constant dense<0.000000e+00> : vector<256x64xf32>
    %20 = tpu.matmul %16, %19, %cst_10 {dimension_numbers = #tpu.dot_dimension_numbers<[1], [0], [0], [1], [0, 0, 1, 1], [], []>} : vector<256x64xbf16>, vector<64x64xbf16>, vector<256x64xf32> -> vector<256x64xf32>
    %21 = arith.addf %13, %20 : vector<256x64xf32>
    %22 = vector.extract_strided_slice %4 {offsets = [0, 2, 0], sizes = [16, 16, 64], strides = [1, 1, 1]} : vector<18x18x64xf32> to vector<16x16x64xf32>
    %23 = vector.shape_cast %22 : vector<16x16x64xf32> to vector<256x64xf32>
    %24 = arith.truncf %23 : vector<256x64xf32> to vector<256x64xbf16>
    %c2 = arith.constant 2 : index
    %c0_11 = arith.constant 0 : index
    %c0_12 = arith.constant 0 : index
    %25 = vector.load %arg6[%c2, %c0_11, %c0_12] : memref<9x64x64xf32, #tpu.memory_space<vmem>>, vector<1x64x64xf32>
    %26 = vector.shape_cast %25 : vector<1x64x64xf32> to vector<64x64xf32>
    %27 = arith.truncf %26 : vector<64x64xf32> to vector<64x64xbf16>
    %cst_13 = arith.constant dense<0.000000e+00> : vector<256x64xf32>
    %28 = tpu.matmul %24, %27, %cst_13 {dimension_numbers = #tpu.dot_dimension_numbers<[1], [0], [0], [1], [0, 0, 1, 1], [], []>} : vector<256x64xbf16>, vector<64x64xbf16>, vector<256x64xf32> -> vector<256x64xf32>
    %29 = arith.addf %21, %28 : vector<256x64xf32>
    %30 = vector.extract_strided_slice %4 {offsets = [1, 0, 0], sizes = [16, 16, 64], strides = [1, 1, 1]} : vector<18x18x64xf32> to vector<16x16x64xf32>
    %31 = vector.shape_cast %30 : vector<16x16x64xf32> to vector<256x64xf32>
    %32 = arith.truncf %31 : vector<256x64xf32> to vector<256x64xbf16>
    %c3 = arith.constant 3 : index
    %c0_14 = arith.constant 0 : index
    %c0_15 = arith.constant 0 : index
    %33 = vector.load %arg6[%c3, %c0_14, %c0_15] : memref<9x64x64xf32, #tpu.memory_space<vmem>>, vector<1x64x64xf32>
    %34 = vector.shape_cast %33 : vector<1x64x64xf32> to vector<64x64xf32>
    %35 = arith.truncf %34 : vector<64x64xf32> to vector<64x64xbf16>
    %cst_16 = arith.constant dense<0.000000e+00> : vector<256x64xf32>
    %36 = tpu.matmul %32, %35, %cst_16 {dimension_numbers = #tpu.dot_dimension_numbers<[1], [0], [0], [1], [0, 0, 1, 1], [], []>} : vector<256x64xbf16>, vector<64x64xbf16>, vector<256x64xf32> -> vector<256x64xf32>
    %37 = arith.addf %29, %36 : vector<256x64xf32>
    %38 = vector.extract_strided_slice %4 {offsets = [1, 1, 0], sizes = [16, 16, 64], strides = [1, 1, 1]} : vector<18x18x64xf32> to vector<16x16x64xf32>
    %39 = vector.shape_cast %38 : vector<16x16x64xf32> to vector<256x64xf32>
    %40 = arith.truncf %39 : vector<256x64xf32> to vector<256x64xbf16>
    %c4 = arith.constant 4 : index
    %c0_17 = arith.constant 0 : index
    %c0_18 = arith.constant 0 : index
    %41 = vector.load %arg6[%c4, %c0_17, %c0_18] : memref<9x64x64xf32, #tpu.memory_space<vmem>>, vector<1x64x64xf32>
    %42 = vector.shape_cast %41 : vector<1x64x64xf32> to vector<64x64xf32>
    %43 = arith.truncf %42 : vector<64x64xf32> to vector<64x64xbf16>
    %cst_19 = arith.constant dense<0.000000e+00> : vector<256x64xf32>
    %44 = tpu.matmul %40, %43, %cst_19 {dimension_numbers = #tpu.dot_dimension_numbers<[1], [0], [0], [1], [0, 0, 1, 1], [], []>} : vector<256x64xbf16>, vector<64x64xbf16>, vector<256x64xf32> -> vector<256x64xf32>
    %45 = arith.addf %37, %44 : vector<256x64xf32>
    %46 = vector.extract_strided_slice %4 {offsets = [1, 2, 0], sizes = [16, 16, 64], strides = [1, 1, 1]} : vector<18x18x64xf32> to vector<16x16x64xf32>
    %47 = vector.shape_cast %46 : vector<16x16x64xf32> to vector<256x64xf32>
    %48 = arith.truncf %47 : vector<256x64xf32> to vector<256x64xbf16>
    %c5 = arith.constant 5 : index
    %c0_20 = arith.constant 0 : index
    %c0_21 = arith.constant 0 : index
    %49 = vector.load %arg6[%c5, %c0_20, %c0_21] : memref<9x64x64xf32, #tpu.memory_space<vmem>>, vector<1x64x64xf32>
    %50 = vector.shape_cast %49 : vector<1x64x64xf32> to vector<64x64xf32>
    %51 = arith.truncf %50 : vector<64x64xf32> to vector<64x64xbf16>
    %cst_22 = arith.constant dense<0.000000e+00> : vector<256x64xf32>
    %52 = tpu.matmul %48, %51, %cst_22 {dimension_numbers = #tpu.dot_dimension_numbers<[1], [0], [0], [1], [0, 0, 1, 1], [], []>} : vector<256x64xbf16>, vector<64x64xbf16>, vector<256x64xf32> -> vector<256x64xf32>
    %53 = arith.addf %45, %52 : vector<256x64xf32>
    %54 = vector.extract_strided_slice %4 {offsets = [2, 0, 0], sizes = [16, 16, 64], strides = [1, 1, 1]} : vector<18x18x64xf32> to vector<16x16x64xf32>
    %55 = vector.shape_cast %54 : vector<16x16x64xf32> to vector<256x64xf32>
    %56 = arith.truncf %55 : vector<256x64xf32> to vector<256x64xbf16>
    %c6 = arith.constant 6 : index
    %c0_23 = arith.constant 0 : index
    %c0_24 = arith.constant 0 : index
    %57 = vector.load %arg6[%c6, %c0_23, %c0_24] : memref<9x64x64xf32, #tpu.memory_space<vmem>>, vector<1x64x64xf32>
    %58 = vector.shape_cast %57 : vector<1x64x64xf32> to vector<64x64xf32>
    %59 = arith.truncf %58 : vector<64x64xf32> to vector<64x64xbf16>
    %cst_25 = arith.constant dense<0.000000e+00> : vector<256x64xf32>
    %60 = tpu.matmul %56, %59, %cst_25 {dimension_numbers = #tpu.dot_dimension_numbers<[1], [0], [0], [1], [0, 0, 1, 1], [], []>} : vector<256x64xbf16>, vector<64x64xbf16>, vector<256x64xf32> -> vector<256x64xf32>
    %61 = arith.addf %53, %60 : vector<256x64xf32>
    %62 = vector.extract_strided_slice %4 {offsets = [2, 1, 0], sizes = [16, 16, 64], strides = [1, 1, 1]} : vector<18x18x64xf32> to vector<16x16x64xf32>
    %63 = vector.shape_cast %62 : vector<16x16x64xf32> to vector<256x64xf32>
    %64 = arith.truncf %63 : vector<256x64xf32> to vector<256x64xbf16>
    %c7 = arith.constant 7 : index
    %c0_26 = arith.constant 0 : index
    %c0_27 = arith.constant 0 : index
    %65 = vector.load %arg6[%c7, %c0_26, %c0_27] : memref<9x64x64xf32, #tpu.memory_space<vmem>>, vector<1x64x64xf32>
    %66 = vector.shape_cast %65 : vector<1x64x64xf32> to vector<64x64xf32>
    %67 = arith.truncf %66 : vector<64x64xf32> to vector<64x64xbf16>
    %cst_28 = arith.constant dense<0.000000e+00> : vector<256x64xf32>
    %68 = tpu.matmul %64, %67, %cst_28 {dimension_numbers = #tpu.dot_dimension_numbers<[1], [0], [0], [1], [0, 0, 1, 1], [], []>} : vector<256x64xbf16>, vector<64x64xbf16>, vector<256x64xf32> -> vector<256x64xf32>
    %69 = arith.addf %61, %68 : vector<256x64xf32>
    %70 = vector.extract_strided_slice %4 {offsets = [2, 2, 0], sizes = [16, 16, 64], strides = [1, 1, 1]} : vector<18x18x64xf32> to vector<16x16x64xf32>
    %71 = vector.shape_cast %70 : vector<16x16x64xf32> to vector<256x64xf32>
    %72 = arith.truncf %71 : vector<256x64xf32> to vector<256x64xbf16>
    %c8 = arith.constant 8 : index
    %c0_29 = arith.constant 0 : index
    %c0_30 = arith.constant 0 : index
    %73 = vector.load %arg6[%c8, %c0_29, %c0_30] : memref<9x64x64xf32, #tpu.memory_space<vmem>>, vector<1x64x64xf32>
    %74 = vector.shape_cast %73 : vector<1x64x64xf32> to vector<64x64xf32>
    %75 = arith.truncf %74 : vector<64x64xf32> to vector<64x64xbf16>
    %cst_31 = arith.constant dense<0.000000e+00> : vector<256x64xf32>
    %76 = tpu.matmul %72, %75, %cst_31 {dimension_numbers = #tpu.dot_dimension_numbers<[1], [0], [0], [1], [0, 0, 1, 1], [], []>} : vector<256x64xbf16>, vector<64x64xbf16>, vector<256x64xf32> -> vector<256x64xf32>
    %77 = arith.addf %69, %76 : vector<256x64xf32>
    %c0_32 = arith.constant 0 : index
    %c0_33 = arith.constant 0 : index
    %78 = vector.load %arg7[%c0_32, %c0_33] : memref<1x64xf32, #tpu.memory_space<vmem>>, vector<1x64xf32>
    %79 = vector.broadcast %78 : vector<1x64xf32> to vector<256x64xf32>
    %80 = arith.addf %77, %79 : vector<256x64xf32>
    %cst_34 = arith.constant 0.000000e+00 : f32
    %81 = vector.broadcast %cst_34 : f32 to vector<256x64xf32>
    %82 = arith.cmpf oge, %80, %81 : vector<256x64xf32>
    %cst_35 = arith.constant 2.000000e-01 : f32
    %83 = vector.broadcast %cst_35 : f32 to vector<256x64xf32>
    %84 = arith.mulf %83, %80 : vector<256x64xf32>
    %85 = arith.select %82, %80, %84 : vector<256x64xi1>, vector<256x64xf32>
    %c0_36 = arith.constant 0 : index
    %c1_37 = arith.constant 1 : index
    %c1_38 = arith.constant 1 : index
    %c0_39 = arith.constant 0 : index
    %86 = vector.load %arg3[%c0_36, %c1_37, %c1_38, %c0_39] : memref<1x18x18x64xf32, #tpu.memory_space<vmem>>, vector<1x16x16x64xf32>
    %87 = vector.shape_cast %86 : vector<1x16x16x64xf32> to vector<16x16x64xf32>
    %88 = vector.shape_cast %87 : vector<16x16x64xf32> to vector<256x64xf32>
    %c0_40 = arith.constant 0 : index
    %c1_41 = arith.constant 1 : index
    %c1_42 = arith.constant 1 : index
    %c0_43 = arith.constant 0 : index
    %89 = vector.load %arg4[%c0_40, %c1_41, %c1_42, %c0_43] : memref<1x18x18x1xf32, #tpu.memory_space<vmem>>, vector<1x16x16x1xf32>
    %90 = vector.shape_cast %89 : vector<1x16x16x1xf32> to vector<16x16x1xf32>
    %91 = vector.shape_cast %90 : vector<16x16x1xf32> to vector<256x1xf32>
    %c0_44 = arith.constant 0 : index
    %c0_45 = arith.constant 0 : index
    %c0_46 = arith.constant 0 : index
    %92 = vector.load %arg5[%c0_44, %c0_45, %c0_46] : memref<1x256x1xf32, #tpu.memory_space<vmem>>, vector<1x256x1xf32>
    %93 = vector.shape_cast %92 : vector<1x256x1xf32> to vector<256x1xf32>
    %94 = vector.broadcast %91 : vector<256x1xf32> to vector<256x64xf32>
    %95 = arith.mulf %88, %94 : vector<256x64xf32>
    %cst_47 = arith.constant 1.000000e+00 : f32
    %96 = vector.broadcast %cst_47 : f32 to vector<256x1xf32>
    %97 = arith.subf %96, %93 : vector<256x1xf32>
    %98 = vector.broadcast %97 : vector<256x1xf32> to vector<256x64xf32>
    %99 = arith.mulf %95, %98 : vector<256x64xf32>
    %cst_48 = arith.constant 0.000000e+00 : f32
    %100 = vector.broadcast %cst_48 : f32 to vector<256x64xf32>
    %101 = arith.cmpf one, %99, %100 : vector<256x64xf32>
    %102 = arith.extui %101 : vector<256x64xi1> to vector<256x64xi32>
    %103 = arith.sitofp %102 : vector<256x64xi32> to vector<256x64xf32>
    %c0_49 = arith.constant 0 : index
    %c0_50 = arith.constant 0 : index
    %104 = vector.load %arg10[%c0_49, %c0_50] : memref<64x64xf32, #tpu.memory_space<vmem>>, vector<64x64xf32>
    %cst_51 = arith.constant dense<0.000000e+00> : vector<64x64xf32>
    %105 = tpu.matmul %85, %103, %cst_51 {dimension_numbers = #tpu.dot_dimension_numbers<[0], [0], [1], [1], [0, 1, 1, 1], [], []>} : vector<256x64xf32>, vector<256x64xf32>, vector<64x64xf32> -> vector<64x64xf32>
    %106 = arith.addf %104, %105 : vector<64x64xf32>
    %c0_52 = arith.constant 0 : index
    %c0_53 = arith.constant 0 : index
    %107 = vector.load %arg10[%c0_52, %c0_53] : memref<64x64xf32, #tpu.memory_space<vmem>>, vector<64x64xf32>
    tpu.vector_store %arg10[%c0_52, %c0_53], %106 {strides = array<i32>} : memref<64x64xf32, #tpu.memory_space<vmem>>, vector<64x64xf32>,
    %c0_54 = arith.constant 0 : index
    %c0_55 = arith.constant 0 : index
    %108 = vector.load %arg11[%c0_54, %c0_55] : memref<1x64xf32, #tpu.memory_space<vmem>>, vector<1x64xf32>
    %cst_56 = arith.constant dense<0.000000e+00> : vector<64xf32>
    %109 = vector.multi_reduction <add>, %103, %cst_56 [0] : vector<256x64xf32> to vector<64xf32>
    %110 = vector.shape_cast %109 : vector<64xf32> to vector<1x64xf32>
    %111 = arith.addf %108, %110 : vector<1x64xf32>
    %c0_57 = arith.constant 0 : index
    %c0_58 = arith.constant 0 : index
    %112 = vector.load %arg11[%c0_57, %c0_58] : memref<1x64xf32, #tpu.memory_space<vmem>>, vector<1x64xf32>
    tpu.vector_store %arg11[%c0_57, %c0_58], %111 {strides = array<i32>} : memref<1x64xf32, #tpu.memory_space<vmem>>, vector<1x64xf32>,
    %c0_i32_59 = arith.constant 0 : i32
    %113 = arith.cmpi eq, %arg1, %c0_i32_59 : i32
    %114 = arith.extui %113 : i1 to i32
    %c0_i32_60 = arith.constant 0 : i32
    %115 = arith.cmpi ne, %114, %c0_i32_60 : i32
    scf.if %115 {
      %c0_61 = arith.constant 0 : index
      %c0_62 = arith.constant 0 : index
      %116 = vector.load %arg11[%c0_61, %c0_62] : memref<1x64xf32, #tpu.memory_space<vmem>>, vector<1x64xf32>
      %cst_63 = arith.constant 0.000000e+00 : f32
      %117 = vector.broadcast %cst_63 : f32 to vector<1x64xf32>
      %118 = arith.cmpf ogt, %116, %117 : vector<1x64xf32>
      %c0_64 = arith.constant 0 : index
      %c0_65 = arith.constant 0 : index
      %119 = vector.load %arg8[%c0_64, %c0_65] : memref<1x64xf32, #tpu.memory_space<vmem>>, vector<1x64xf32>
      %cst_66 = arith.constant 0.000000e+00 : f32
      %120 = vector.broadcast %cst_66 : f32 to vector<1x64xf32>
      %121 = arith.cmpf ogt, %119, %120 : vector<1x64xf32>
      %122 = arith.andi %118, %121 : vector<1x64xi1>
      %cst_67 = arith.constant 1.000000e+00 : f32
      %123 = vector.broadcast %cst_67 : f32 to vector<1x64xf32>
      %124 = arith.maximumf %116, %123 : vector<1x64xf32>
      %cst_68 = arith.constant 1.000000e+00 : f32
      %125 = vector.broadcast %cst_68 : f32 to vector<1x64xf32>
      %126 = arith.divf %125, %124 : vector<1x64xf32>
      %c0_69 = arith.constant 0 : index
      %c0_70 = arith.constant 0 : index
      %127 = vector.load %arg10[%c0_69, %c0_70] : memref<64x64xf32, #tpu.memory_space<vmem>>, vector<64x64xf32>
      %128 = vector.broadcast %126 : vector<1x64xf32> to vector<64x64xf32>
      %129 = arith.mulf %127, %128 : vector<64x64xf32>
      %cst_71 = arith.constant 0.000000e+00 : f32
      %130 = vector.shape_cast %122 : vector<1x64xi1> to vector<1x64xi1>
      %131 = vector.broadcast %130 : vector<1x64xi1> to vector<64x64xi1>
      %132 = vector.broadcast %cst_71 : f32 to vector<64x64xf32>
      %133 = arith.select %131, %129, %132 : vector<64x64xi1>, vector<64x64xf32>
      %c0_72 = arith.constant 0 : index
      %c0_73 = arith.constant 0 : index
      %c0_74 = arith.constant 0 : index
      %134 = vector.load %arg9[%c0_72, %c0_73, %c0_74] : memref<1x64x64xf32, #tpu.memory_space<vmem>>, vector<1x64x64xf32>
      %135 = vector.shape_cast %134 : vector<1x64x64xf32> to vector<64x64xf32>
      %136 = vector.shape_cast %133 : vector<64x64xf32> to vector<1x64x64xf32>
      tpu.vector_store %arg9[%c0_72, %c0_73, %c0_74], %136 {strides = array<i32>} : memref<1x64x64xf32, #tpu.memory_space<vmem>>, vector<1x64x64xf32>,
    } else {
    }
    return
  }
  func.func @transform_0(%arg0: i32, %arg1: i32) -> (i32, i32, i32, i32) {
    %c1_i32 = arith.constant 1 : i32
    %0 = arith.muli %arg0, %c1_i32 : i32
    %1 = arith.addi %0, %arg1 : i32
    %c0_i32 = arith.constant 0 : i32
    %c0_i32_0 = arith.constant 0 : i32
    %c0_i32_1 = arith.constant 0 : i32
    %c0_i32_2 = arith.constant 0 : i32
    return %1, %c0_i32, %c0_i32_0, %c0_i32_1 : i32, i32, i32, i32
  }
  func.func @transform_1(%arg0: i32, %arg1: i32) -> (i32, i32, i32, i32) {
    %c1_i32 = arith.constant 1 : i32
    %0 = arith.muli %arg0, %c1_i32 : i32
    %1 = arith.addi %0, %arg1 : i32
    %c0_i32 = arith.constant 0 : i32
    %c0_i32_0 = arith.constant 0 : i32
    %c0_i32_1 = arith.constant 0 : i32
    %c0_i32_2 = arith.constant 0 : i32
    return %1, %c0_i32, %c0_i32_0, %c0_i32_1 : i32, i32, i32, i32
  }
  func.func @transform_2(%arg0: i32, %arg1: i32) -> (i32, i32, i32, i32) {
    %c1_i32 = arith.constant 1 : i32
    %0 = arith.muli %arg0, %c1_i32 : i32
    %1 = arith.addi %0, %arg1 : i32
    %c0_i32 = arith.constant 0 : i32
    %c0_i32_0 = arith.constant 0 : i32
    %c0_i32_1 = arith.constant 0 : i32
    %c0_i32_2 = arith.constant 0 : i32
    return %1, %c0_i32, %c0_i32_0, %c0_i32_1 : i32, i32, i32, i32
  }
  func.func @transform_3(%arg0: i32, %arg1: i32) -> (i32, i32, i32) {
    %c0_i32 = arith.constant 0 : i32
    %c0_i32_0 = arith.constant 0 : i32
    return %arg0, %arg1, %c0_i32 : i32, i32, i32
  }
  func.func @transform_4(%arg0: i32, %arg1: i32) -> (i32, i32, i32) {
    %c0_i32 = arith.constant 0 : i32
    %c0_i32_0 = arith.constant 0 : i32
    %c0_i32_1 = arith.constant 0 : i32
    %c0_i32_2 = arith.constant 0 : i32
    return %c0_i32, %c0_i32_0, %c0_i32_1 : i32, i32, i32
  }
  func.func @transform_5(%arg0: i32, %arg1: i32) -> (i32, i32) {
    %c0_i32 = arith.constant 0 : i32
    %c0_i32_0 = arith.constant 0 : i32
    %c0_i32_1 = arith.constant 0 : i32
    return %c0_i32, %c0_i32_0 : i32, i32
  }
  func.func @transform_6(%arg0: i32, %arg1: i32) -> (i32, i32) {
    %c0_i32 = arith.constant 0 : i32
    %c0_i32_0 = arith.constant 0 : i32
    %c0_i32_1 = arith.constant 0 : i32
    return %c0_i32, %c0_i32_0 : i32, i32
  }
  func.func @transform_7(%arg0: i32, %arg1: i32) -> (i32, i32, i32) {
    %c0_i32 = arith.constant 0 : i32
    %c0_i32_0 = arith.constant 0 : i32
    %c0_i32_1 = arith.constant 0 : i32
    return %arg0, %c0_i32, %c0_i32_0 : i32, i32, i32
  }
}

module attributes {stable_mosaic.version = 11 : i64} {
  func.func @_shared_conv_kernel(%arg0: i32, %arg1: i32, %arg2: memref<1x18x18x64xf32, #tpu.memory_space<vmem>>, %arg3: memref<1x18x18x1xf32, #tpu.memory_space<vmem>>, %arg4: memref<1x64x64xf32, #tpu.memory_space<vmem>>, %arg5: memref<9x64x128xf32, #tpu.memory_space<vmem>>, %arg6: memref<9x64x128xf32, #tpu.memory_space<vmem>>, %arg7: memref<1x128xf32, #tpu.memory_space<vmem>>, %arg8: memref<1x256x128xf32, #tpu.memory_space<vmem>>) attributes {dimension_semantics = [#tpu.dimension_semantics<parallel>, #tpu.dimension_semantics<parallel>], iteration_bounds = array<i64: 2, 1>, scalar_prefetch = 0 : i64, scratch_operands = 0 : i64, tpu.core_type = #tpu.core_type<tc>, window_params = [{transform_indices = @transform_0, window_bounds = array<i64: 1, 18, 18, 64>}, {transform_indices = @transform_1, window_bounds = array<i64: 1, 18, 18, 1>}, {transform_indices = @transform_2, window_bounds = array<i64: 1, 64, 64>}, {pipeline_mode = #tpu.pipeline_mode<synchronous>, transform_indices = @transform_3, window_bounds = array<i64: 9, 64, 128>}, {pipeline_mode = #tpu.pipeline_mode<synchronous>, transform_indices = @transform_4, window_bounds = array<i64: 9, 64, 128>}, {pipeline_mode = #tpu.pipeline_mode<synchronous>, transform_indices = @transform_5, window_bounds = array<i64: 1, 128>}, {transform_indices = @transform_6, window_bounds = array<i64: 1, 256, 128>}]} {
    %c0 = arith.constant 0 : index
    %c0_0 = arith.constant 0 : index
    %c0_1 = arith.constant 0 : index
    %0 = vector.load %arg4[%c0, %c0_0, %c0_1] : memref<1x64x64xf32, #tpu.memory_space<vmem>>, vector<1x64x64xf32>
    %1 = vector.shape_cast %0 : vector<1x64x64xf32> to vector<64x64xf32>
    %c0_2 = arith.constant 0 : index
    %c0_3 = arith.constant 0 : index
    %c0_4 = arith.constant 0 : index
    %c0_5 = arith.constant 0 : index
    %2 = vector.load %arg2[%c0_2, %c0_3, %c0_4, %c0_5] : memref<1x18x18x64xf32, #tpu.memory_space<vmem>>, vector<1x18x18x64xf32>
    %3 = vector.shape_cast %2 : vector<1x18x18x64xf32> to vector<18x18x64xf32>
    %c0_6 = arith.constant 0 : index
    %c0_7 = arith.constant 0 : index
    %c0_8 = arith.constant 0 : index
    %c0_9 = arith.constant 0 : index
    %4 = vector.load %arg3[%c0_6, %c0_7, %c0_8, %c0_9] : memref<1x18x18x1xf32, #tpu.memory_space<vmem>>, vector<1x18x18x1xf32>
    %5 = vector.shape_cast %4 : vector<1x18x18x1xf32> to vector<18x18x1xf32>
    %6 = vector.broadcast %5 : vector<18x18x1xf32> to vector<18x18x64xf32>
    %7 = arith.mulf %3, %6 : vector<18x18x64xf32>
    %cst = arith.constant 0.000000e+00 : f32
    %8 = vector.broadcast %cst : f32 to vector<256x128xf32>
    %9 = arith.truncf %1 : vector<64x64xf32> to vector<64x64xbf16>
    %c0_10 = arith.constant 0 : index
    %c0_11 = arith.constant 0 : index
    %c0_12 = arith.constant 0 : index
    %10 = vector.load %arg5[%c0_10, %c0_11, %c0_12] : memref<9x64x128xf32, #tpu.memory_space<vmem>>, vector<1x64x128xf32>
    %11 = vector.shape_cast %10 : vector<1x64x128xf32> to vector<64x128xf32>
    %12 = arith.truncf %11 : vector<64x128xf32> to vector<64x128xbf16>
    %cst_13 = arith.constant dense<0.000000e+00> : vector<64x128xf32>
    %13 = tpu.matmul %9, %12, %cst_13 {dimension_numbers = #tpu.dot_dimension_numbers<[0], [0], [1], [1], [0, 1, 1, 1], [], []>} : vector<64x64xbf16>, vector<64x128xbf16>, vector<64x128xf32> -> vector<64x128xf32>
    %c0_14 = arith.constant 0 : index
    %c0_15 = arith.constant 0 : index
    %c0_16 = arith.constant 0 : index
    %14 = vector.load %arg6[%c0_14, %c0_15, %c0_16] : memref<9x64x128xf32, #tpu.memory_space<vmem>>, vector<1x64x128xf32>
    %15 = vector.shape_cast %14 : vector<1x64x128xf32> to vector<64x128xf32>
    %16 = arith.addf %13, %15 : vector<64x128xf32>
    %17 = vector.extract_strided_slice %7 {offsets = [0, 0, 0], sizes = [16, 16, 64], strides = [1, 1, 1]} : vector<18x18x64xf32> to vector<16x16x64xf32>
    %18 = vector.shape_cast %17 : vector<16x16x64xf32> to vector<256x64xf32>
    %19 = arith.truncf %18 : vector<256x64xf32> to vector<256x64xbf16>
    %20 = arith.truncf %16 : vector<64x128xf32> to vector<64x128xbf16>
    %cst_17 = arith.constant dense<0.000000e+00> : vector<256x128xf32>
    %21 = tpu.matmul %19, %20, %cst_17 {dimension_numbers = #tpu.dot_dimension_numbers<[1], [0], [0], [1], [0, 0, 1, 1], [], []>} : vector<256x64xbf16>, vector<64x128xbf16>, vector<256x128xf32> -> vector<256x128xf32>
    %22 = arith.addf %8, %21 : vector<256x128xf32>
    %23 = arith.truncf %1 : vector<64x64xf32> to vector<64x64xbf16>
    %c1 = arith.constant 1 : index
    %c0_18 = arith.constant 0 : index
    %c0_19 = arith.constant 0 : index
    %24 = vector.load %arg5[%c1, %c0_18, %c0_19] : memref<9x64x128xf32, #tpu.memory_space<vmem>>, vector<1x64x128xf32>
    %25 = vector.shape_cast %24 : vector<1x64x128xf32> to vector<64x128xf32>
    %26 = arith.truncf %25 : vector<64x128xf32> to vector<64x128xbf16>
    %cst_20 = arith.constant dense<0.000000e+00> : vector<64x128xf32>
    %27 = tpu.matmul %23, %26, %cst_20 {dimension_numbers = #tpu.dot_dimension_numbers<[0], [0], [1], [1], [0, 1, 1, 1], [], []>} : vector<64x64xbf16>, vector<64x128xbf16>, vector<64x128xf32> -> vector<64x128xf32>
    %c1_21 = arith.constant 1 : index
    %c0_22 = arith.constant 0 : index
    %c0_23 = arith.constant 0 : index
    %28 = vector.load %arg6[%c1_21, %c0_22, %c0_23] : memref<9x64x128xf32, #tpu.memory_space<vmem>>, vector<1x64x128xf32>
    %29 = vector.shape_cast %28 : vector<1x64x128xf32> to vector<64x128xf32>
    %30 = arith.addf %27, %29 : vector<64x128xf32>
    %31 = vector.extract_strided_slice %7 {offsets = [0, 1, 0], sizes = [16, 16, 64], strides = [1, 1, 1]} : vector<18x18x64xf32> to vector<16x16x64xf32>
    %32 = vector.shape_cast %31 : vector<16x16x64xf32> to vector<256x64xf32>
    %33 = arith.truncf %32 : vector<256x64xf32> to vector<256x64xbf16>
    %34 = arith.truncf %30 : vector<64x128xf32> to vector<64x128xbf16>
    %cst_24 = arith.constant dense<0.000000e+00> : vector<256x128xf32>
    %35 = tpu.matmul %33, %34, %cst_24 {dimension_numbers = #tpu.dot_dimension_numbers<[1], [0], [0], [1], [0, 0, 1, 1], [], []>} : vector<256x64xbf16>, vector<64x128xbf16>, vector<256x128xf32> -> vector<256x128xf32>
    %36 = arith.addf %22, %35 : vector<256x128xf32>
    %37 = arith.truncf %1 : vector<64x64xf32> to vector<64x64xbf16>
    %c2 = arith.constant 2 : index
    %c0_25 = arith.constant 0 : index
    %c0_26 = arith.constant 0 : index
    %38 = vector.load %arg5[%c2, %c0_25, %c0_26] : memref<9x64x128xf32, #tpu.memory_space<vmem>>, vector<1x64x128xf32>
    %39 = vector.shape_cast %38 : vector<1x64x128xf32> to vector<64x128xf32>
    %40 = arith.truncf %39 : vector<64x128xf32> to vector<64x128xbf16>
    %cst_27 = arith.constant dense<0.000000e+00> : vector<64x128xf32>
    %41 = tpu.matmul %37, %40, %cst_27 {dimension_numbers = #tpu.dot_dimension_numbers<[0], [0], [1], [1], [0, 1, 1, 1], [], []>} : vector<64x64xbf16>, vector<64x128xbf16>, vector<64x128xf32> -> vector<64x128xf32>
    %c2_28 = arith.constant 2 : index
    %c0_29 = arith.constant 0 : index
    %c0_30 = arith.constant 0 : index
    %42 = vector.load %arg6[%c2_28, %c0_29, %c0_30] : memref<9x64x128xf32, #tpu.memory_space<vmem>>, vector<1x64x128xf32>
    %43 = vector.shape_cast %42 : vector<1x64x128xf32> to vector<64x128xf32>
    %44 = arith.addf %41, %43 : vector<64x128xf32>
    %45 = vector.extract_strided_slice %7 {offsets = [0, 2, 0], sizes = [16, 16, 64], strides = [1, 1, 1]} : vector<18x18x64xf32> to vector<16x16x64xf32>
    %46 = vector.shape_cast %45 : vector<16x16x64xf32> to vector<256x64xf32>
    %47 = arith.truncf %46 : vector<256x64xf32> to vector<256x64xbf16>
    %48 = arith.truncf %44 : vector<64x128xf32> to vector<64x128xbf16>
    %cst_31 = arith.constant dense<0.000000e+00> : vector<256x128xf32>
    %49 = tpu.matmul %47, %48, %cst_31 {dimension_numbers = #tpu.dot_dimension_numbers<[1], [0], [0], [1], [0, 0, 1, 1], [], []>} : vector<256x64xbf16>, vector<64x128xbf16>, vector<256x128xf32> -> vector<256x128xf32>
    %50 = arith.addf %36, %49 : vector<256x128xf32>
    %51 = arith.truncf %1 : vector<64x64xf32> to vector<64x64xbf16>
    %c3 = arith.constant 3 : index
    %c0_32 = arith.constant 0 : index
    %c0_33 = arith.constant 0 : index
    %52 = vector.load %arg5[%c3, %c0_32, %c0_33] : memref<9x64x128xf32, #tpu.memory_space<vmem>>, vector<1x64x128xf32>
    %53 = vector.shape_cast %52 : vector<1x64x128xf32> to vector<64x128xf32>
    %54 = arith.truncf %53 : vector<64x128xf32> to vector<64x128xbf16>
    %cst_34 = arith.constant dense<0.000000e+00> : vector<64x128xf32>
    %55 = tpu.matmul %51, %54, %cst_34 {dimension_numbers = #tpu.dot_dimension_numbers<[0], [0], [1], [1], [0, 1, 1, 1], [], []>} : vector<64x64xbf16>, vector<64x128xbf16>, vector<64x128xf32> -> vector<64x128xf32>
    %c3_35 = arith.constant 3 : index
    %c0_36 = arith.constant 0 : index
    %c0_37 = arith.constant 0 : index
    %56 = vector.load %arg6[%c3_35, %c0_36, %c0_37] : memref<9x64x128xf32, #tpu.memory_space<vmem>>, vector<1x64x128xf32>
    %57 = vector.shape_cast %56 : vector<1x64x128xf32> to vector<64x128xf32>
    %58 = arith.addf %55, %57 : vector<64x128xf32>
    %59 = vector.extract_strided_slice %7 {offsets = [1, 0, 0], sizes = [16, 16, 64], strides = [1, 1, 1]} : vector<18x18x64xf32> to vector<16x16x64xf32>
    %60 = vector.shape_cast %59 : vector<16x16x64xf32> to vector<256x64xf32>
    %61 = arith.truncf %60 : vector<256x64xf32> to vector<256x64xbf16>
    %62 = arith.truncf %58 : vector<64x128xf32> to vector<64x128xbf16>
    %cst_38 = arith.constant dense<0.000000e+00> : vector<256x128xf32>
    %63 = tpu.matmul %61, %62, %cst_38 {dimension_numbers = #tpu.dot_dimension_numbers<[1], [0], [0], [1], [0, 0, 1, 1], [], []>} : vector<256x64xbf16>, vector<64x128xbf16>, vector<256x128xf32> -> vector<256x128xf32>
    %64 = arith.addf %50, %63 : vector<256x128xf32>
    %65 = arith.truncf %1 : vector<64x64xf32> to vector<64x64xbf16>
    %c4 = arith.constant 4 : index
    %c0_39 = arith.constant 0 : index
    %c0_40 = arith.constant 0 : index
    %66 = vector.load %arg5[%c4, %c0_39, %c0_40] : memref<9x64x128xf32, #tpu.memory_space<vmem>>, vector<1x64x128xf32>
    %67 = vector.shape_cast %66 : vector<1x64x128xf32> to vector<64x128xf32>
    %68 = arith.truncf %67 : vector<64x128xf32> to vector<64x128xbf16>
    %cst_41 = arith.constant dense<0.000000e+00> : vector<64x128xf32>
    %69 = tpu.matmul %65, %68, %cst_41 {dimension_numbers = #tpu.dot_dimension_numbers<[0], [0], [1], [1], [0, 1, 1, 1], [], []>} : vector<64x64xbf16>, vector<64x128xbf16>, vector<64x128xf32> -> vector<64x128xf32>
    %c4_42 = arith.constant 4 : index
    %c0_43 = arith.constant 0 : index
    %c0_44 = arith.constant 0 : index
    %70 = vector.load %arg6[%c4_42, %c0_43, %c0_44] : memref<9x64x128xf32, #tpu.memory_space<vmem>>, vector<1x64x128xf32>
    %71 = vector.shape_cast %70 : vector<1x64x128xf32> to vector<64x128xf32>
    %72 = arith.addf %69, %71 : vector<64x128xf32>
    %73 = vector.extract_strided_slice %7 {offsets = [1, 1, 0], sizes = [16, 16, 64], strides = [1, 1, 1]} : vector<18x18x64xf32> to vector<16x16x64xf32>
    %74 = vector.shape_cast %73 : vector<16x16x64xf32> to vector<256x64xf32>
    %75 = arith.truncf %74 : vector<256x64xf32> to vector<256x64xbf16>
    %76 = arith.truncf %72 : vector<64x128xf32> to vector<64x128xbf16>
    %cst_45 = arith.constant dense<0.000000e+00> : vector<256x128xf32>
    %77 = tpu.matmul %75, %76, %cst_45 {dimension_numbers = #tpu.dot_dimension_numbers<[1], [0], [0], [1], [0, 0, 1, 1], [], []>} : vector<256x64xbf16>, vector<64x128xbf16>, vector<256x128xf32> -> vector<256x128xf32>
    %78 = arith.addf %64, %77 : vector<256x128xf32>
    %79 = arith.truncf %1 : vector<64x64xf32> to vector<64x64xbf16>
    %c5 = arith.constant 5 : index
    %c0_46 = arith.constant 0 : index
    %c0_47 = arith.constant 0 : index
    %80 = vector.load %arg5[%c5, %c0_46, %c0_47] : memref<9x64x128xf32, #tpu.memory_space<vmem>>, vector<1x64x128xf32>
    %81 = vector.shape_cast %80 : vector<1x64x128xf32> to vector<64x128xf32>
    %82 = arith.truncf %81 : vector<64x128xf32> to vector<64x128xbf16>
    %cst_48 = arith.constant dense<0.000000e+00> : vector<64x128xf32>
    %83 = tpu.matmul %79, %82, %cst_48 {dimension_numbers = #tpu.dot_dimension_numbers<[0], [0], [1], [1], [0, 1, 1, 1], [], []>} : vector<64x64xbf16>, vector<64x128xbf16>, vector<64x128xf32> -> vector<64x128xf32>
    %c5_49 = arith.constant 5 : index
    %c0_50 = arith.constant 0 : index
    %c0_51 = arith.constant 0 : index
    %84 = vector.load %arg6[%c5_49, %c0_50, %c0_51] : memref<9x64x128xf32, #tpu.memory_space<vmem>>, vector<1x64x128xf32>
    %85 = vector.shape_cast %84 : vector<1x64x128xf32> to vector<64x128xf32>
    %86 = arith.addf %83, %85 : vector<64x128xf32>
    %87 = vector.extract_strided_slice %7 {offsets = [1, 2, 0], sizes = [16, 16, 64], strides = [1, 1, 1]} : vector<18x18x64xf32> to vector<16x16x64xf32>
    %88 = vector.shape_cast %87 : vector<16x16x64xf32> to vector<256x64xf32>
    %89 = arith.truncf %88 : vector<256x64xf32> to vector<256x64xbf16>
    %90 = arith.truncf %86 : vector<64x128xf32> to vector<64x128xbf16>
    %cst_52 = arith.constant dense<0.000000e+00> : vector<256x128xf32>
    %91 = tpu.matmul %89, %90, %cst_52 {dimension_numbers = #tpu.dot_dimension_numbers<[1], [0], [0], [1], [0, 0, 1, 1], [], []>} : vector<256x64xbf16>, vector<64x128xbf16>, vector<256x128xf32> -> vector<256x128xf32>
    %92 = arith.addf %78, %91 : vector<256x128xf32>
    %93 = arith.truncf %1 : vector<64x64xf32> to vector<64x64xbf16>
    %c6 = arith.constant 6 : index
    %c0_53 = arith.constant 0 : index
    %c0_54 = arith.constant 0 : index
    %94 = vector.load %arg5[%c6, %c0_53, %c0_54] : memref<9x64x128xf32, #tpu.memory_space<vmem>>, vector<1x64x128xf32>
    %95 = vector.shape_cast %94 : vector<1x64x128xf32> to vector<64x128xf32>
    %96 = arith.truncf %95 : vector<64x128xf32> to vector<64x128xbf16>
    %cst_55 = arith.constant dense<0.000000e+00> : vector<64x128xf32>
    %97 = tpu.matmul %93, %96, %cst_55 {dimension_numbers = #tpu.dot_dimension_numbers<[0], [0], [1], [1], [0, 1, 1, 1], [], []>} : vector<64x64xbf16>, vector<64x128xbf16>, vector<64x128xf32> -> vector<64x128xf32>
    %c6_56 = arith.constant 6 : index
    %c0_57 = arith.constant 0 : index
    %c0_58 = arith.constant 0 : index
    %98 = vector.load %arg6[%c6_56, %c0_57, %c0_58] : memref<9x64x128xf32, #tpu.memory_space<vmem>>, vector<1x64x128xf32>
    %99 = vector.shape_cast %98 : vector<1x64x128xf32> to vector<64x128xf32>
    %100 = arith.addf %97, %99 : vector<64x128xf32>
    %101 = vector.extract_strided_slice %7 {offsets = [2, 0, 0], sizes = [16, 16, 64], strides = [1, 1, 1]} : vector<18x18x64xf32> to vector<16x16x64xf32>
    %102 = vector.shape_cast %101 : vector<16x16x64xf32> to vector<256x64xf32>
    %103 = arith.truncf %102 : vector<256x64xf32> to vector<256x64xbf16>
    %104 = arith.truncf %100 : vector<64x128xf32> to vector<64x128xbf16>
    %cst_59 = arith.constant dense<0.000000e+00> : vector<256x128xf32>
    %105 = tpu.matmul %103, %104, %cst_59 {dimension_numbers = #tpu.dot_dimension_numbers<[1], [0], [0], [1], [0, 0, 1, 1], [], []>} : vector<256x64xbf16>, vector<64x128xbf16>, vector<256x128xf32> -> vector<256x128xf32>
    %106 = arith.addf %92, %105 : vector<256x128xf32>
    %107 = arith.truncf %1 : vector<64x64xf32> to vector<64x64xbf16>
    %c7 = arith.constant 7 : index
    %c0_60 = arith.constant 0 : index
    %c0_61 = arith.constant 0 : index
    %108 = vector.load %arg5[%c7, %c0_60, %c0_61] : memref<9x64x128xf32, #tpu.memory_space<vmem>>, vector<1x64x128xf32>
    %109 = vector.shape_cast %108 : vector<1x64x128xf32> to vector<64x128xf32>
    %110 = arith.truncf %109 : vector<64x128xf32> to vector<64x128xbf16>
    %cst_62 = arith.constant dense<0.000000e+00> : vector<64x128xf32>
    %111 = tpu.matmul %107, %110, %cst_62 {dimension_numbers = #tpu.dot_dimension_numbers<[0], [0], [1], [1], [0, 1, 1, 1], [], []>} : vector<64x64xbf16>, vector<64x128xbf16>, vector<64x128xf32> -> vector<64x128xf32>
    %c7_63 = arith.constant 7 : index
    %c0_64 = arith.constant 0 : index
    %c0_65 = arith.constant 0 : index
    %112 = vector.load %arg6[%c7_63, %c0_64, %c0_65] : memref<9x64x128xf32, #tpu.memory_space<vmem>>, vector<1x64x128xf32>
    %113 = vector.shape_cast %112 : vector<1x64x128xf32> to vector<64x128xf32>
    %114 = arith.addf %111, %113 : vector<64x128xf32>
    %115 = vector.extract_strided_slice %7 {offsets = [2, 1, 0], sizes = [16, 16, 64], strides = [1, 1, 1]} : vector<18x18x64xf32> to vector<16x16x64xf32>
    %116 = vector.shape_cast %115 : vector<16x16x64xf32> to vector<256x64xf32>
    %117 = arith.truncf %116 : vector<256x64xf32> to vector<256x64xbf16>
    %118 = arith.truncf %114 : vector<64x128xf32> to vector<64x128xbf16>
    %cst_66 = arith.constant dense<0.000000e+00> : vector<256x128xf32>
    %119 = tpu.matmul %117, %118, %cst_66 {dimension_numbers = #tpu.dot_dimension_numbers<[1], [0], [0], [1], [0, 0, 1, 1], [], []>} : vector<256x64xbf16>, vector<64x128xbf16>, vector<256x128xf32> -> vector<256x128xf32>
    %120 = arith.addf %106, %119 : vector<256x128xf32>
    %121 = arith.truncf %1 : vector<64x64xf32> to vector<64x64xbf16>
    %c8 = arith.constant 8 : index
    %c0_67 = arith.constant 0 : index
    %c0_68 = arith.constant 0 : index
    %122 = vector.load %arg5[%c8, %c0_67, %c0_68] : memref<9x64x128xf32, #tpu.memory_space<vmem>>, vector<1x64x128xf32>
    %123 = vector.shape_cast %122 : vector<1x64x128xf32> to vector<64x128xf32>
    %124 = arith.truncf %123 : vector<64x128xf32> to vector<64x128xbf16>
    %cst_69 = arith.constant dense<0.000000e+00> : vector<64x128xf32>
    %125 = tpu.matmul %121, %124, %cst_69 {dimension_numbers = #tpu.dot_dimension_numbers<[0], [0], [1], [1], [0, 1, 1, 1], [], []>} : vector<64x64xbf16>, vector<64x128xbf16>, vector<64x128xf32> -> vector<64x128xf32>
    %c8_70 = arith.constant 8 : index
    %c0_71 = arith.constant 0 : index
    %c0_72 = arith.constant 0 : index
    %126 = vector.load %arg6[%c8_70, %c0_71, %c0_72] : memref<9x64x128xf32, #tpu.memory_space<vmem>>, vector<1x64x128xf32>
    %127 = vector.shape_cast %126 : vector<1x64x128xf32> to vector<64x128xf32>
    %128 = arith.addf %125, %127 : vector<64x128xf32>
    %129 = vector.extract_strided_slice %7 {offsets = [2, 2, 0], sizes = [16, 16, 64], strides = [1, 1, 1]} : vector<18x18x64xf32> to vector<16x16x64xf32>
    %130 = vector.shape_cast %129 : vector<16x16x64xf32> to vector<256x64xf32>
    %131 = arith.truncf %130 : vector<256x64xf32> to vector<256x64xbf16>
    %132 = arith.truncf %128 : vector<64x128xf32> to vector<64x128xbf16>
    %cst_73 = arith.constant dense<0.000000e+00> : vector<256x128xf32>
    %133 = tpu.matmul %131, %132, %cst_73 {dimension_numbers = #tpu.dot_dimension_numbers<[1], [0], [0], [1], [0, 0, 1, 1], [], []>} : vector<256x64xbf16>, vector<64x128xbf16>, vector<256x128xf32> -> vector<256x128xf32>
    %134 = arith.addf %120, %133 : vector<256x128xf32>
    %c0_74 = arith.constant 0 : index
    %c0_75 = arith.constant 0 : index
    %135 = vector.load %arg7[%c0_74, %c0_75] : memref<1x128xf32, #tpu.memory_space<vmem>>, vector<1x128xf32>
    %136 = vector.broadcast %135 : vector<1x128xf32> to vector<256x128xf32>
    %137 = arith.addf %134, %136 : vector<256x128xf32>
    %cst_76 = arith.constant 0.000000e+00 : f32
    %138 = vector.broadcast %cst_76 : f32 to vector<256x128xf32>
    %139 = arith.maximumf %137, %138 : vector<256x128xf32>
    %c0_77 = arith.constant 0 : index
    %c0_78 = arith.constant 0 : index
    %c0_79 = arith.constant 0 : index
    %140 = vector.load %arg8[%c0_77, %c0_78, %c0_79] : memref<1x256x128xf32, #tpu.memory_space<vmem>>, vector<1x256x128xf32>
    %141 = vector.shape_cast %140 : vector<1x256x128xf32> to vector<256x128xf32>
    %142 = vector.shape_cast %139 : vector<256x128xf32> to vector<1x256x128xf32>
    tpu.vector_store %arg8[%c0_77, %c0_78, %c0_79], %142 {strides = array<i32>} : memref<1x256x128xf32, #tpu.memory_space<vmem>>, vector<1x256x128xf32>,
    return
  }
  func.func @transform_0(%arg0: i32, %arg1: i32) -> (i32, i32, i32, i32) {
    %c1_i32 = arith.constant 1 : i32
    %0 = arith.muli %arg0, %c1_i32 : i32
    %1 = arith.addi %0, %arg1 : i32
    %c0_i32 = arith.constant 0 : i32
    %c0_i32_0 = arith.constant 0 : i32
    %c0_i32_1 = arith.constant 0 : i32
    %c0_i32_2 = arith.constant 0 : i32
    return %1, %c0_i32, %c0_i32_0, %c0_i32_1 : i32, i32, i32, i32
  }
  func.func @transform_1(%arg0: i32, %arg1: i32) -> (i32, i32, i32, i32) {
    %c1_i32 = arith.constant 1 : i32
    %0 = arith.muli %arg0, %c1_i32 : i32
    %1 = arith.addi %0, %arg1 : i32
    %c0_i32 = arith.constant 0 : i32
    %c0_i32_0 = arith.constant 0 : i32
    %c0_i32_1 = arith.constant 0 : i32
    %c0_i32_2 = arith.constant 0 : i32
    return %1, %c0_i32, %c0_i32_0, %c0_i32_1 : i32, i32, i32, i32
  }
  func.func @transform_2(%arg0: i32, %arg1: i32) -> (i32, i32, i32) {
    %c0_i32 = arith.constant 0 : i32
    %c0_i32_0 = arith.constant 0 : i32
    %c0_i32_1 = arith.constant 0 : i32
    return %arg0, %c0_i32, %c0_i32_0 : i32, i32, i32
  }
  func.func @transform_3(%arg0: i32, %arg1: i32) -> (i32, i32, i32) {
    %c0_i32 = arith.constant 0 : i32
    %c0_i32_0 = arith.constant 0 : i32
    %c0_i32_1 = arith.constant 0 : i32
    %c0_i32_2 = arith.constant 0 : i32
    return %c0_i32, %c0_i32_0, %c0_i32_1 : i32, i32, i32
  }
  func.func @transform_4(%arg0: i32, %arg1: i32) -> (i32, i32, i32) {
    %c0_i32 = arith.constant 0 : i32
    %c0_i32_0 = arith.constant 0 : i32
    %c0_i32_1 = arith.constant 0 : i32
    %c0_i32_2 = arith.constant 0 : i32
    return %c0_i32, %c0_i32_0, %c0_i32_1 : i32, i32, i32
  }
  func.func @transform_5(%arg0: i32, %arg1: i32) -> (i32, i32) {
    %c0_i32 = arith.constant 0 : i32
    %c0_i32_0 = arith.constant 0 : i32
    %c0_i32_1 = arith.constant 0 : i32
    return %c0_i32, %c0_i32_0 : i32, i32
  }
  func.func @transform_6(%arg0: i32, %arg1: i32) -> (i32, i32, i32) {
    %c0_i32 = arith.constant 0 : i32
    %c0_i32_0 = arith.constant 0 : i32
    return %arg0, %arg1, %c0_i32 : i32, i32, i32
  }
}

module attributes {stable_mosaic.version = 11 : i64} {
  func.func @_spade_tail_kernel(%arg0: i32, %arg1: memref<1x18x18x128xf32, #tpu.memory_space<vmem>>, %arg2: memref<1x18x18x64xf32, #tpu.memory_space<vmem>>, %arg3: memref<9x128x128xf32, #tpu.memory_space<vmem>>, %arg4: memref<1x128xf32, #tpu.memory_space<vmem>>, %arg5: memref<9x64x64xf32, #tpu.memory_space<vmem>>, %arg6: memref<1x64xf32, #tpu.memory_space<vmem>>, %arg7: memref<1x64x256xf32, #tpu.memory_space<vmem>>) attributes {dimension_semantics = [#tpu.dimension_semantics<parallel>], iteration_bounds = array<i64: 2>, scalar_prefetch = 0 : i64, scratch_operands = 0 : i64, tpu.core_type = #tpu.core_type<tc>, window_params = [{transform_indices = @transform_0, window_bounds = array<i64: 1, 18, 18, 128>}, {transform_indices = @transform_1, window_bounds = array<i64: 1, 18, 18, 64>}, {pipeline_mode = #tpu.pipeline_mode<synchronous>, transform_indices = @transform_2, window_bounds = array<i64: 9, 128, 128>}, {pipeline_mode = #tpu.pipeline_mode<synchronous>, transform_indices = @transform_3, window_bounds = array<i64: 1, 128>}, {pipeline_mode = #tpu.pipeline_mode<synchronous>, transform_indices = @transform_4, window_bounds = array<i64: 9, 64, 64>}, {pipeline_mode = #tpu.pipeline_mode<synchronous>, transform_indices = @transform_5, window_bounds = array<i64: 1, 64>}, {transform_indices = @transform_6, window_bounds = array<i64: 1, 64, 256>}]} {
    %c0 = arith.constant 0 : index
    %c0_0 = arith.constant 0 : index
    %c0_1 = arith.constant 0 : index
    %c0_2 = arith.constant 0 : index
    %0 = vector.load %arg1[%c0, %c0_0, %c0_1, %c0_2] : memref<1x18x18x128xf32, #tpu.memory_space<vmem>>, vector<1x18x18x128xf32>
    %1 = vector.shape_cast %0 : vector<1x18x18x128xf32> to vector<18x18x128xf32>
    %c0_3 = arith.constant 0 : index
    %c0_4 = arith.constant 0 : index
    %c0_5 = arith.constant 0 : index
    %c0_6 = arith.constant 0 : index
    %2 = vector.load %arg2[%c0_3, %c0_4, %c0_5, %c0_6] : memref<1x18x18x64xf32, #tpu.memory_space<vmem>>, vector<1x18x18x64xf32>
    %3 = vector.shape_cast %2 : vector<1x18x18x64xf32> to vector<18x18x64xf32>
    %cst = arith.constant 0.000000e+00 : f32
    %4 = vector.broadcast %cst : f32 to vector<256x128xf32>
    %cst_7 = arith.constant 0.000000e+00 : f32
    %5 = vector.broadcast %cst_7 : f32 to vector<256x64xf32>
    %6 = vector.extract_strided_slice %1 {offsets = [0, 0, 0], sizes = [16, 16, 128], strides = [1, 1, 1]} : vector<18x18x128xf32> to vector<16x16x128xf32>
    %7 = vector.shape_cast %6 : vector<16x16x128xf32> to vector<256x128xf32>
    %8 = vector.extract_strided_slice %3 {offsets = [0, 0, 0], sizes = [16, 16, 64], strides = [1, 1, 1]} : vector<18x18x64xf32> to vector<16x16x64xf32>
    %9 = vector.shape_cast %8 : vector<16x16x64xf32> to vector<256x64xf32>
    %10 = arith.truncf %7 : vector<256x128xf32> to vector<256x128xbf16>
    %c0_8 = arith.constant 0 : index
    %c0_9 = arith.constant 0 : index
    %c0_10 = arith.constant 0 : index
    %11 = vector.load %arg3[%c0_8, %c0_9, %c0_10] : memref<9x128x128xf32, #tpu.memory_space<vmem>>, vector<1x128x128xf32>
    %12 = vector.shape_cast %11 : vector<1x128x128xf32> to vector<128x128xf32>
    %13 = arith.truncf %12 : vector<128x128xf32> to vector<128x128xbf16>
    %cst_11 = arith.constant dense<0.000000e+00> : vector<256x128xf32>
    %14 = tpu.matmul %10, %13, %cst_11 {dimension_numbers = #tpu.dot_dimension_numbers<[1], [0], [0], [1], [0, 0, 1, 1], [], []>} : vector<256x128xbf16>, vector<128x128xbf16>, vector<256x128xf32> -> vector<256x128xf32>
    %15 = arith.addf %4, %14 : vector<256x128xf32>
    %16 = arith.truncf %9 : vector<256x64xf32> to vector<256x64xbf16>
    %c0_12 = arith.constant 0 : index
    %c0_13 = arith.constant 0 : index
    %c0_14 = arith.constant 0 : index
    %17 = vector.load %arg5[%c0_12, %c0_13, %c0_14] : memref<9x64x64xf32, #tpu.memory_space<vmem>>, vector<1x64x64xf32>
    %18 = vector.shape_cast %17 : vector<1x64x64xf32> to vector<64x64xf32>
    %19 = arith.truncf %18 : vector<64x64xf32> to vector<64x64xbf16>
    %cst_15 = arith.constant dense<0.000000e+00> : vector<256x64xf32>
    %20 = tpu.matmul %16, %19, %cst_15 {dimension_numbers = #tpu.dot_dimension_numbers<[1], [0], [0], [1], [0, 0, 1, 1], [], []>} : vector<256x64xbf16>, vector<64x64xbf16>, vector<256x64xf32> -> vector<256x64xf32>
    %21 = arith.addf %5, %20 : vector<256x64xf32>
    %22 = vector.extract_strided_slice %1 {offsets = [0, 1, 0], sizes = [16, 16, 128], strides = [1, 1, 1]} : vector<18x18x128xf32> to vector<16x16x128xf32>
    %23 = vector.shape_cast %22 : vector<16x16x128xf32> to vector<256x128xf32>
    %24 = vector.extract_strided_slice %3 {offsets = [0, 1, 0], sizes = [16, 16, 64], strides = [1, 1, 1]} : vector<18x18x64xf32> to vector<16x16x64xf32>
    %25 = vector.shape_cast %24 : vector<16x16x64xf32> to vector<256x64xf32>
    %26 = arith.truncf %23 : vector<256x128xf32> to vector<256x128xbf16>
    %c1 = arith.constant 1 : index
    %c0_16 = arith.constant 0 : index
    %c0_17 = arith.constant 0 : index
    %27 = vector.load %arg3[%c1, %c0_16, %c0_17] : memref<9x128x128xf32, #tpu.memory_space<vmem>>, vector<1x128x128xf32>
    %28 = vector.shape_cast %27 : vector<1x128x128xf32> to vector<128x128xf32>
    %29 = arith.truncf %28 : vector<128x128xf32> to vector<128x128xbf16>
    %cst_18 = arith.constant dense<0.000000e+00> : vector<256x128xf32>
    %30 = tpu.matmul %26, %29, %cst_18 {dimension_numbers = #tpu.dot_dimension_numbers<[1], [0], [0], [1], [0, 0, 1, 1], [], []>} : vector<256x128xbf16>, vector<128x128xbf16>, vector<256x128xf32> -> vector<256x128xf32>
    %31 = arith.addf %15, %30 : vector<256x128xf32>
    %32 = arith.truncf %25 : vector<256x64xf32> to vector<256x64xbf16>
    %c1_19 = arith.constant 1 : index
    %c0_20 = arith.constant 0 : index
    %c0_21 = arith.constant 0 : index
    %33 = vector.load %arg5[%c1_19, %c0_20, %c0_21] : memref<9x64x64xf32, #tpu.memory_space<vmem>>, vector<1x64x64xf32>
    %34 = vector.shape_cast %33 : vector<1x64x64xf32> to vector<64x64xf32>
    %35 = arith.truncf %34 : vector<64x64xf32> to vector<64x64xbf16>
    %cst_22 = arith.constant dense<0.000000e+00> : vector<256x64xf32>
    %36 = tpu.matmul %32, %35, %cst_22 {dimension_numbers = #tpu.dot_dimension_numbers<[1], [0], [0], [1], [0, 0, 1, 1], [], []>} : vector<256x64xbf16>, vector<64x64xbf16>, vector<256x64xf32> -> vector<256x64xf32>
    %37 = arith.addf %21, %36 : vector<256x64xf32>
    %38 = vector.extract_strided_slice %1 {offsets = [0, 2, 0], sizes = [16, 16, 128], strides = [1, 1, 1]} : vector<18x18x128xf32> to vector<16x16x128xf32>
    %39 = vector.shape_cast %38 : vector<16x16x128xf32> to vector<256x128xf32>
    %40 = vector.extract_strided_slice %3 {offsets = [0, 2, 0], sizes = [16, 16, 64], strides = [1, 1, 1]} : vector<18x18x64xf32> to vector<16x16x64xf32>
    %41 = vector.shape_cast %40 : vector<16x16x64xf32> to vector<256x64xf32>
    %42 = arith.truncf %39 : vector<256x128xf32> to vector<256x128xbf16>
    %c2 = arith.constant 2 : index
    %c0_23 = arith.constant 0 : index
    %c0_24 = arith.constant 0 : index
    %43 = vector.load %arg3[%c2, %c0_23, %c0_24] : memref<9x128x128xf32, #tpu.memory_space<vmem>>, vector<1x128x128xf32>
    %44 = vector.shape_cast %43 : vector<1x128x128xf32> to vector<128x128xf32>
    %45 = arith.truncf %44 : vector<128x128xf32> to vector<128x128xbf16>
    %cst_25 = arith.constant dense<0.000000e+00> : vector<256x128xf32>
    %46 = tpu.matmul %42, %45, %cst_25 {dimension_numbers = #tpu.dot_dimension_numbers<[1], [0], [0], [1], [0, 0, 1, 1], [], []>} : vector<256x128xbf16>, vector<128x128xbf16>, vector<256x128xf32> -> vector<256x128xf32>
    %47 = arith.addf %31, %46 : vector<256x128xf32>
    %48 = arith.truncf %41 : vector<256x64xf32> to vector<256x64xbf16>
    %c2_26 = arith.constant 2 : index
    %c0_27 = arith.constant 0 : index
    %c0_28 = arith.constant 0 : index
    %49 = vector.load %arg5[%c2_26, %c0_27, %c0_28] : memref<9x64x64xf32, #tpu.memory_space<vmem>>, vector<1x64x64xf32>
    %50 = vector.shape_cast %49 : vector<1x64x64xf32> to vector<64x64xf32>
    %51 = arith.truncf %50 : vector<64x64xf32> to vector<64x64xbf16>
    %cst_29 = arith.constant dense<0.000000e+00> : vector<256x64xf32>
    %52 = tpu.matmul %48, %51, %cst_29 {dimension_numbers = #tpu.dot_dimension_numbers<[1], [0], [0], [1], [0, 0, 1, 1], [], []>} : vector<256x64xbf16>, vector<64x64xbf16>, vector<256x64xf32> -> vector<256x64xf32>
    %53 = arith.addf %37, %52 : vector<256x64xf32>
    %54 = vector.extract_strided_slice %1 {offsets = [1, 0, 0], sizes = [16, 16, 128], strides = [1, 1, 1]} : vector<18x18x128xf32> to vector<16x16x128xf32>
    %55 = vector.shape_cast %54 : vector<16x16x128xf32> to vector<256x128xf32>
    %56 = vector.extract_strided_slice %3 {offsets = [1, 0, 0], sizes = [16, 16, 64], strides = [1, 1, 1]} : vector<18x18x64xf32> to vector<16x16x64xf32>
    %57 = vector.shape_cast %56 : vector<16x16x64xf32> to vector<256x64xf32>
    %58 = arith.truncf %55 : vector<256x128xf32> to vector<256x128xbf16>
    %c3 = arith.constant 3 : index
    %c0_30 = arith.constant 0 : index
    %c0_31 = arith.constant 0 : index
    %59 = vector.load %arg3[%c3, %c0_30, %c0_31] : memref<9x128x128xf32, #tpu.memory_space<vmem>>, vector<1x128x128xf32>
    %60 = vector.shape_cast %59 : vector<1x128x128xf32> to vector<128x128xf32>
    %61 = arith.truncf %60 : vector<128x128xf32> to vector<128x128xbf16>
    %cst_32 = arith.constant dense<0.000000e+00> : vector<256x128xf32>
    %62 = tpu.matmul %58, %61, %cst_32 {dimension_numbers = #tpu.dot_dimension_numbers<[1], [0], [0], [1], [0, 0, 1, 1], [], []>} : vector<256x128xbf16>, vector<128x128xbf16>, vector<256x128xf32> -> vector<256x128xf32>
    %63 = arith.addf %47, %62 : vector<256x128xf32>
    %64 = arith.truncf %57 : vector<256x64xf32> to vector<256x64xbf16>
    %c3_33 = arith.constant 3 : index
    %c0_34 = arith.constant 0 : index
    %c0_35 = arith.constant 0 : index
    %65 = vector.load %arg5[%c3_33, %c0_34, %c0_35] : memref<9x64x64xf32, #tpu.memory_space<vmem>>, vector<1x64x64xf32>
    %66 = vector.shape_cast %65 : vector<1x64x64xf32> to vector<64x64xf32>
    %67 = arith.truncf %66 : vector<64x64xf32> to vector<64x64xbf16>
    %cst_36 = arith.constant dense<0.000000e+00> : vector<256x64xf32>
    %68 = tpu.matmul %64, %67, %cst_36 {dimension_numbers = #tpu.dot_dimension_numbers<[1], [0], [0], [1], [0, 0, 1, 1], [], []>} : vector<256x64xbf16>, vector<64x64xbf16>, vector<256x64xf32> -> vector<256x64xf32>
    %69 = arith.addf %53, %68 : vector<256x64xf32>
    %70 = vector.extract_strided_slice %1 {offsets = [1, 1, 0], sizes = [16, 16, 128], strides = [1, 1, 1]} : vector<18x18x128xf32> to vector<16x16x128xf32>
    %71 = vector.shape_cast %70 : vector<16x16x128xf32> to vector<256x128xf32>
    %72 = vector.extract_strided_slice %3 {offsets = [1, 1, 0], sizes = [16, 16, 64], strides = [1, 1, 1]} : vector<18x18x64xf32> to vector<16x16x64xf32>
    %73 = vector.shape_cast %72 : vector<16x16x64xf32> to vector<256x64xf32>
    %74 = arith.truncf %71 : vector<256x128xf32> to vector<256x128xbf16>
    %c4 = arith.constant 4 : index
    %c0_37 = arith.constant 0 : index
    %c0_38 = arith.constant 0 : index
    %75 = vector.load %arg3[%c4, %c0_37, %c0_38] : memref<9x128x128xf32, #tpu.memory_space<vmem>>, vector<1x128x128xf32>
    %76 = vector.shape_cast %75 : vector<1x128x128xf32> to vector<128x128xf32>
    %77 = arith.truncf %76 : vector<128x128xf32> to vector<128x128xbf16>
    %cst_39 = arith.constant dense<0.000000e+00> : vector<256x128xf32>
    %78 = tpu.matmul %74, %77, %cst_39 {dimension_numbers = #tpu.dot_dimension_numbers<[1], [0], [0], [1], [0, 0, 1, 1], [], []>} : vector<256x128xbf16>, vector<128x128xbf16>, vector<256x128xf32> -> vector<256x128xf32>
    %79 = arith.addf %63, %78 : vector<256x128xf32>
    %80 = arith.truncf %73 : vector<256x64xf32> to vector<256x64xbf16>
    %c4_40 = arith.constant 4 : index
    %c0_41 = arith.constant 0 : index
    %c0_42 = arith.constant 0 : index
    %81 = vector.load %arg5[%c4_40, %c0_41, %c0_42] : memref<9x64x64xf32, #tpu.memory_space<vmem>>, vector<1x64x64xf32>
    %82 = vector.shape_cast %81 : vector<1x64x64xf32> to vector<64x64xf32>
    %83 = arith.truncf %82 : vector<64x64xf32> to vector<64x64xbf16>
    %cst_43 = arith.constant dense<0.000000e+00> : vector<256x64xf32>
    %84 = tpu.matmul %80, %83, %cst_43 {dimension_numbers = #tpu.dot_dimension_numbers<[1], [0], [0], [1], [0, 0, 1, 1], [], []>} : vector<256x64xbf16>, vector<64x64xbf16>, vector<256x64xf32> -> vector<256x64xf32>
    %85 = arith.addf %69, %84 : vector<256x64xf32>
    %86 = vector.extract_strided_slice %1 {offsets = [1, 2, 0], sizes = [16, 16, 128], strides = [1, 1, 1]} : vector<18x18x128xf32> to vector<16x16x128xf32>
    %87 = vector.shape_cast %86 : vector<16x16x128xf32> to vector<256x128xf32>
    %88 = vector.extract_strided_slice %3 {offsets = [1, 2, 0], sizes = [16, 16, 64], strides = [1, 1, 1]} : vector<18x18x64xf32> to vector<16x16x64xf32>
    %89 = vector.shape_cast %88 : vector<16x16x64xf32> to vector<256x64xf32>
    %90 = arith.truncf %87 : vector<256x128xf32> to vector<256x128xbf16>
    %c5 = arith.constant 5 : index
    %c0_44 = arith.constant 0 : index
    %c0_45 = arith.constant 0 : index
    %91 = vector.load %arg3[%c5, %c0_44, %c0_45] : memref<9x128x128xf32, #tpu.memory_space<vmem>>, vector<1x128x128xf32>
    %92 = vector.shape_cast %91 : vector<1x128x128xf32> to vector<128x128xf32>
    %93 = arith.truncf %92 : vector<128x128xf32> to vector<128x128xbf16>
    %cst_46 = arith.constant dense<0.000000e+00> : vector<256x128xf32>
    %94 = tpu.matmul %90, %93, %cst_46 {dimension_numbers = #tpu.dot_dimension_numbers<[1], [0], [0], [1], [0, 0, 1, 1], [], []>} : vector<256x128xbf16>, vector<128x128xbf16>, vector<256x128xf32> -> vector<256x128xf32>
    %95 = arith.addf %79, %94 : vector<256x128xf32>
    %96 = arith.truncf %89 : vector<256x64xf32> to vector<256x64xbf16>
    %c5_47 = arith.constant 5 : index
    %c0_48 = arith.constant 0 : index
    %c0_49 = arith.constant 0 : index
    %97 = vector.load %arg5[%c5_47, %c0_48, %c0_49] : memref<9x64x64xf32, #tpu.memory_space<vmem>>, vector<1x64x64xf32>
    %98 = vector.shape_cast %97 : vector<1x64x64xf32> to vector<64x64xf32>
    %99 = arith.truncf %98 : vector<64x64xf32> to vector<64x64xbf16>
    %cst_50 = arith.constant dense<0.000000e+00> : vector<256x64xf32>
    %100 = tpu.matmul %96, %99, %cst_50 {dimension_numbers = #tpu.dot_dimension_numbers<[1], [0], [0], [1], [0, 0, 1, 1], [], []>} : vector<256x64xbf16>, vector<64x64xbf16>, vector<256x64xf32> -> vector<256x64xf32>
    %101 = arith.addf %85, %100 : vector<256x64xf32>
    %102 = vector.extract_strided_slice %1 {offsets = [2, 0, 0], sizes = [16, 16, 128], strides = [1, 1, 1]} : vector<18x18x128xf32> to vector<16x16x128xf32>
    %103 = vector.shape_cast %102 : vector<16x16x128xf32> to vector<256x128xf32>
    %104 = vector.extract_strided_slice %3 {offsets = [2, 0, 0], sizes = [16, 16, 64], strides = [1, 1, 1]} : vector<18x18x64xf32> to vector<16x16x64xf32>
    %105 = vector.shape_cast %104 : vector<16x16x64xf32> to vector<256x64xf32>
    %106 = arith.truncf %103 : vector<256x128xf32> to vector<256x128xbf16>
    %c6 = arith.constant 6 : index
    %c0_51 = arith.constant 0 : index
    %c0_52 = arith.constant 0 : index
    %107 = vector.load %arg3[%c6, %c0_51, %c0_52] : memref<9x128x128xf32, #tpu.memory_space<vmem>>, vector<1x128x128xf32>
    %108 = vector.shape_cast %107 : vector<1x128x128xf32> to vector<128x128xf32>
    %109 = arith.truncf %108 : vector<128x128xf32> to vector<128x128xbf16>
    %cst_53 = arith.constant dense<0.000000e+00> : vector<256x128xf32>
    %110 = tpu.matmul %106, %109, %cst_53 {dimension_numbers = #tpu.dot_dimension_numbers<[1], [0], [0], [1], [0, 0, 1, 1], [], []>} : vector<256x128xbf16>, vector<128x128xbf16>, vector<256x128xf32> -> vector<256x128xf32>
    %111 = arith.addf %95, %110 : vector<256x128xf32>
    %112 = arith.truncf %105 : vector<256x64xf32> to vector<256x64xbf16>
    %c6_54 = arith.constant 6 : index
    %c0_55 = arith.constant 0 : index
    %c0_56 = arith.constant 0 : index
    %113 = vector.load %arg5[%c6_54, %c0_55, %c0_56] : memref<9x64x64xf32, #tpu.memory_space<vmem>>, vector<1x64x64xf32>
    %114 = vector.shape_cast %113 : vector<1x64x64xf32> to vector<64x64xf32>
    %115 = arith.truncf %114 : vector<64x64xf32> to vector<64x64xbf16>
    %cst_57 = arith.constant dense<0.000000e+00> : vector<256x64xf32>
    %116 = tpu.matmul %112, %115, %cst_57 {dimension_numbers = #tpu.dot_dimension_numbers<[1], [0], [0], [1], [0, 0, 1, 1], [], []>} : vector<256x64xbf16>, vector<64x64xbf16>, vector<256x64xf32> -> vector<256x64xf32>
    %117 = arith.addf %101, %116 : vector<256x64xf32>
    %118 = vector.extract_strided_slice %1 {offsets = [2, 1, 0], sizes = [16, 16, 128], strides = [1, 1, 1]} : vector<18x18x128xf32> to vector<16x16x128xf32>
    %119 = vector.shape_cast %118 : vector<16x16x128xf32> to vector<256x128xf32>
    %120 = vector.extract_strided_slice %3 {offsets = [2, 1, 0], sizes = [16, 16, 64], strides = [1, 1, 1]} : vector<18x18x64xf32> to vector<16x16x64xf32>
    %121 = vector.shape_cast %120 : vector<16x16x64xf32> to vector<256x64xf32>
    %122 = arith.truncf %119 : vector<256x128xf32> to vector<256x128xbf16>
    %c7 = arith.constant 7 : index
    %c0_58 = arith.constant 0 : index
    %c0_59 = arith.constant 0 : index
    %123 = vector.load %arg3[%c7, %c0_58, %c0_59] : memref<9x128x128xf32, #tpu.memory_space<vmem>>, vector<1x128x128xf32>
    %124 = vector.shape_cast %123 : vector<1x128x128xf32> to vector<128x128xf32>
    %125 = arith.truncf %124 : vector<128x128xf32> to vector<128x128xbf16>
    %cst_60 = arith.constant dense<0.000000e+00> : vector<256x128xf32>
    %126 = tpu.matmul %122, %125, %cst_60 {dimension_numbers = #tpu.dot_dimension_numbers<[1], [0], [0], [1], [0, 0, 1, 1], [], []>} : vector<256x128xbf16>, vector<128x128xbf16>, vector<256x128xf32> -> vector<256x128xf32>
    %127 = arith.addf %111, %126 : vector<256x128xf32>
    %128 = arith.truncf %121 : vector<256x64xf32> to vector<256x64xbf16>
    %c7_61 = arith.constant 7 : index
    %c0_62 = arith.constant 0 : index
    %c0_63 = arith.constant 0 : index
    %129 = vector.load %arg5[%c7_61, %c0_62, %c0_63] : memref<9x64x64xf32, #tpu.memory_space<vmem>>, vector<1x64x64xf32>
    %130 = vector.shape_cast %129 : vector<1x64x64xf32> to vector<64x64xf32>
    %131 = arith.truncf %130 : vector<64x64xf32> to vector<64x64xbf16>
    %cst_64 = arith.constant dense<0.000000e+00> : vector<256x64xf32>
    %132 = tpu.matmul %128, %131, %cst_64 {dimension_numbers = #tpu.dot_dimension_numbers<[1], [0], [0], [1], [0, 0, 1, 1], [], []>} : vector<256x64xbf16>, vector<64x64xbf16>, vector<256x64xf32> -> vector<256x64xf32>
    %133 = arith.addf %117, %132 : vector<256x64xf32>
    %134 = vector.extract_strided_slice %1 {offsets = [2, 2, 0], sizes = [16, 16, 128], strides = [1, 1, 1]} : vector<18x18x128xf32> to vector<16x16x128xf32>
    %135 = vector.shape_cast %134 : vector<16x16x128xf32> to vector<256x128xf32>
    %136 = vector.extract_strided_slice %3 {offsets = [2, 2, 0], sizes = [16, 16, 64], strides = [1, 1, 1]} : vector<18x18x64xf32> to vector<16x16x64xf32>
    %137 = vector.shape_cast %136 : vector<16x16x64xf32> to vector<256x64xf32>
    %138 = arith.truncf %135 : vector<256x128xf32> to vector<256x128xbf16>
    %c8 = arith.constant 8 : index
    %c0_65 = arith.constant 0 : index
    %c0_66 = arith.constant 0 : index
    %139 = vector.load %arg3[%c8, %c0_65, %c0_66] : memref<9x128x128xf32, #tpu.memory_space<vmem>>, vector<1x128x128xf32>
    %140 = vector.shape_cast %139 : vector<1x128x128xf32> to vector<128x128xf32>
    %141 = arith.truncf %140 : vector<128x128xf32> to vector<128x128xbf16>
    %cst_67 = arith.constant dense<0.000000e+00> : vector<256x128xf32>
    %142 = tpu.matmul %138, %141, %cst_67 {dimension_numbers = #tpu.dot_dimension_numbers<[1], [0], [0], [1], [0, 0, 1, 1], [], []>} : vector<256x128xbf16>, vector<128x128xbf16>, vector<256x128xf32> -> vector<256x128xf32>
    %143 = arith.addf %127, %142 : vector<256x128xf32>
    %144 = arith.truncf %137 : vector<256x64xf32> to vector<256x64xbf16>
    %c8_68 = arith.constant 8 : index
    %c0_69 = arith.constant 0 : index
    %c0_70 = arith.constant 0 : index
    %145 = vector.load %arg5[%c8_68, %c0_69, %c0_70] : memref<9x64x64xf32, #tpu.memory_space<vmem>>, vector<1x64x64xf32>
    %146 = vector.shape_cast %145 : vector<1x64x64xf32> to vector<64x64xf32>
    %147 = arith.truncf %146 : vector<64x64xf32> to vector<64x64xbf16>
    %cst_71 = arith.constant dense<0.000000e+00> : vector<256x64xf32>
    %148 = tpu.matmul %144, %147, %cst_71 {dimension_numbers = #tpu.dot_dimension_numbers<[1], [0], [0], [1], [0, 0, 1, 1], [], []>} : vector<256x64xbf16>, vector<64x64xbf16>, vector<256x64xf32> -> vector<256x64xf32>
    %149 = arith.addf %133, %148 : vector<256x64xf32>
    %c0_72 = arith.constant 0 : index
    %c0_73 = arith.constant 0 : index
    %150 = vector.load %arg4[%c0_72, %c0_73] : memref<1x128xf32, #tpu.memory_space<vmem>>, vector<1x128xf32>
    %151 = vector.broadcast %150 : vector<1x128xf32> to vector<256x128xf32>
    %152 = arith.addf %143, %151 : vector<256x128xf32>
    %c0_74 = arith.constant 0 : index
    %c0_75 = arith.constant 0 : index
    %153 = vector.load %arg6[%c0_74, %c0_75] : memref<1x64xf32, #tpu.memory_space<vmem>>, vector<1x64xf32>
    %154 = vector.broadcast %153 : vector<1x64xf32> to vector<256x64xf32>
    %155 = arith.addf %149, %154 : vector<256x64xf32>
    %cst_76 = arith.constant dense<0.000000e+00> : vector<64xf32>
    %156 = vector.multi_reduction <add>, %155, %cst_76 [0] : vector<256x64xf32> to vector<64xf32>
    %157 = vector.shape_cast %156 : vector<64xf32> to vector<1x64xf32>
    %cst_77 = arith.constant 2.560000e+02 : f32
    %158 = vector.broadcast %cst_77 : f32 to vector<1x64xf32>
    %159 = arith.divf %157, %158 : vector<1x64xf32>
    %160 = vector.broadcast %159 : vector<1x64xf32> to vector<256x64xf32>
    %161 = arith.subf %155, %160 : vector<256x64xf32>
    %162 = arith.mulf %161, %161 : vector<256x64xf32>
    %cst_78 = arith.constant dense<0.000000e+00> : vector<64xf32>
    %163 = vector.multi_reduction <add>, %162, %cst_78 [0] : vector<256x64xf32> to vector<64xf32>
    %164 = vector.shape_cast %163 : vector<64xf32> to vector<1x64xf32>
    %cst_79 = arith.constant 2.560000e+02 : f32
    %165 = vector.broadcast %cst_79 : f32 to vector<1x64xf32>
    %166 = arith.divf %164, %165 : vector<1x64xf32>
    %167 = vector.broadcast %159 : vector<1x64xf32> to vector<256x64xf32>
    %168 = arith.subf %155, %167 : vector<256x64xf32>
    %cst_80 = arith.constant 9.99999974E-6 : f32
    %169 = vector.broadcast %cst_80 : f32 to vector<1x64xf32>
    %170 = arith.addf %166, %169 : vector<1x64xf32>
    %171 = math.rsqrt %170 : vector<1x64xf32>
    %172 = vector.broadcast %171 : vector<1x64xf32> to vector<256x64xf32>
    %173 = arith.mulf %168, %172 : vector<256x64xf32>
    %174 = vector.extract_strided_slice %152 {offsets = [0, 0], sizes = [256, 64], strides = [1, 1]} : vector<256x128xf32> to vector<256x64xf32>
    %cst_81 = arith.constant 1.000000e+00 : f32
    %175 = vector.broadcast %cst_81 : f32 to vector<256x64xf32>
    %176 = arith.addf %175, %174 : vector<256x64xf32>
    %177 = arith.mulf %173, %176 : vector<256x64xf32>
    %178 = vector.extract_strided_slice %152 {offsets = [0, 64], sizes = [256, 64], strides = [1, 1]} : vector<256x128xf32> to vector<256x64xf32>
    %179 = arith.addf %177, %178 : vector<256x64xf32>
    %cst_82 = arith.constant 0.000000e+00 : f32
    %180 = vector.broadcast %cst_82 : f32 to vector<256x64xf32>
    %181 = arith.cmpf oge, %179, %180 : vector<256x64xf32>
    %cst_83 = arith.constant 2.000000e-01 : f32
    %182 = vector.broadcast %cst_83 : f32 to vector<256x64xf32>
    %183 = arith.mulf %182, %179 : vector<256x64xf32>
    %184 = arith.select %181, %179, %183 : vector<256x64xi1>, vector<256x64xf32>
    %185 = tpu.transpose %184, [1, 0] : vector<256x64xf32> -> vector<64x256xf32>
    %c0_84 = arith.constant 0 : index
    %c0_85 = arith.constant 0 : index
    %c0_86 = arith.constant 0 : index
    %186 = vector.load %arg7[%c0_84, %c0_85, %c0_86] : memref<1x64x256xf32, #tpu.memory_space<vmem>>, vector<1x64x256xf32>
    %187 = vector.shape_cast %186 : vector<1x64x256xf32> to vector<64x256xf32>
    %188 = vector.shape_cast %185 : vector<64x256xf32> to vector<1x64x256xf32>
    tpu.vector_store %arg7[%c0_84, %c0_85, %c0_86], %188 {strides = array<i32>} : memref<1x64x256xf32, #tpu.memory_space<vmem>>, vector<1x64x256xf32>,
    return
  }
  func.func @transform_0(%arg0: i32) -> (i32, i32, i32, i32) {
    %c0_i32 = arith.constant 0 : i32
    %c0_i32_0 = arith.constant 0 : i32
    %c0_i32_1 = arith.constant 0 : i32
    %c0_i32_2 = arith.constant 0 : i32
    return %arg0, %c0_i32, %c0_i32_0, %c0_i32_1 : i32, i32, i32, i32
  }
  func.func @transform_1(%arg0: i32) -> (i32, i32, i32, i32) {
    %c0_i32 = arith.constant 0 : i32
    %c0_i32_0 = arith.constant 0 : i32
    %c0_i32_1 = arith.constant 0 : i32
    %c0_i32_2 = arith.constant 0 : i32
    return %arg0, %c0_i32, %c0_i32_0, %c0_i32_1 : i32, i32, i32, i32
  }
  func.func @transform_2(%arg0: i32) -> (i32, i32, i32) {
    %c0_i32 = arith.constant 0 : i32
    %c0_i32_0 = arith.constant 0 : i32
    %c0_i32_1 = arith.constant 0 : i32
    %c0_i32_2 = arith.constant 0 : i32
    return %c0_i32, %c0_i32_0, %c0_i32_1 : i32, i32, i32
  }
  func.func @transform_3(%arg0: i32) -> (i32, i32) {
    %c0_i32 = arith.constant 0 : i32
    %c0_i32_0 = arith.constant 0 : i32
    %c0_i32_1 = arith.constant 0 : i32
    return %c0_i32, %c0_i32_0 : i32, i32
  }
  func.func @transform_4(%arg0: i32) -> (i32, i32, i32) {
    %c0_i32 = arith.constant 0 : i32
    %c0_i32_0 = arith.constant 0 : i32
    %c0_i32_1 = arith.constant 0 : i32
    %c0_i32_2 = arith.constant 0 : i32
    return %c0_i32, %c0_i32_0, %c0_i32_1 : i32, i32, i32
  }
  func.func @transform_5(%arg0: i32) -> (i32, i32) {
    %c0_i32 = arith.constant 0 : i32
    %c0_i32_0 = arith.constant 0 : i32
    %c0_i32_1 = arith.constant 0 : i32
    return %c0_i32, %c0_i32_0 : i32, i32
  }
  func.func @transform_6(%arg0: i32) -> (i32, i32, i32) {
    %c0_i32 = arith.constant 0 : i32
    %c0_i32_0 = arith.constant 0 : i32
    %c0_i32_1 = arith.constant 0 : i32
    return %arg0, %c0_i32, %c0_i32_0 : i32, i32, i32
  }
}

</mosaic_0001>

<bundles_post_ra>
// kernel: style_propagate_forward.4
= control target key start
LH: loop header
LB: loop body
LE: loop exit
PB: predicated region body
PF: predicated region fallthrough
CT: control target
= control target key end

     0   :  { %s5457_s21 = smov 0   ;;  %s5459_s22 = smov 0   ;;  %s7057_s0 = inlined_call_operand.vmem [shape: f32[2,18,18,64], index: 0, kind: input, shape index: {}]   ;;  %s7058_s1 = inlined_call_operand.vmem [shape: f32[2,18,18,1], index: 1, kind: input, shape index: {}]   ;;  %s7059_s2 = inlined_call_operand.vmem [shape: f32[2,64,64], index: 2, kind: input, shape index: {}]   ;;  %s7060_s3 = inlined_call_operand.vmem [shape: f32[9,64,128], index: 3, kind: input, shape index: {}]   ;;  %s7061_s4 = inlined_call_operand.vmem [shape: f32[9,64,128], index: 4, kind: input, shape index: {}]   ;;  %s7062_s5 = inlined_call_operand.vmem [shape: f32[1,128], index: 5, kind: input, shape index: {}]   ;;  %s7063_s6 = inlined_call_operand.vmem [shape: f32[2,256,128], index: 6, kind: output, shape index: {}]  }
   0x1   :  { %s5461_s23 = smov 0  }
   0x2 LB: > { %s28_s24 = sadd.s32 1, %s5415_s22  ;;  %p4029_p0 = scmp.ge.s32.totalorder %s5419_s23, 1  ;;  %s5419_s23 = sphi %s5461_s23, %s16_s23   ;;  %s5415_s22 = sphi %s5459_s22, %s7327_s22   ;;  %s5411_s21 = sphi %s5457_s21, %s7326_s21  }
   0x3   : > { %p30_p1 = scmp.ge.s32.totalorder %s28_s24, 2  ;;  %p254_p2 = scmp.lt.s32.totalorder %s5419_s23, 3 }
   0x5   : > { %s7329_s24 = smov (%p30_p1, %s28_s24), 0  ;;  %p255_p3 = pnand %p4029_p0, %p254_p2 }
   0x7   : > { %258 = sbr.rel (%p255_p3) target bundleno = 1835 (0x72b), region = 44 }
   0xe   : > { %p301_p4 = scmp.lt.s32.totalorder %s5411_s21, 1  ;;  %v774_v0 = vld [vmem:[%s7060_s3] sm:$0xff]  ;;  %v775_v1 = vld [vmem:[%s7060_s3 + $0x8] sm:$0xff]  ;;  %v5421_v3 = vmov 0   ;;  %v776_v6 = vld [vmem:[%s7060_s3 + $0x10] sm:$0xff]  ;;  %vm810_vm0 = vcmask 523264  }
   0xf   : > { %v4040_v2 = vld [vmem:[%s7060_s3 + $0x40] sm:$0xff]  ;;  %5395 = vset.pattern.permute.xlu1 %v5421_v3  ;;  %v782_v4 = vpack.c.bf16 %v775_v1, %v774_v0  ;;  %v4041_v5 = vld [vmem:[%s7060_s3 + $0x48] sm:$0xff]  ;;  %v777_v7 = vld [vmem:[%s7060_s3 + $0x18] sm:$0xff]  ;;  %vm1043_vm1 = vcmask 1046528   ;;  %vm1681_vm2 = vcmask 1045504  }
  0x10   : > { %s7331_s21 = smov (!%p301_p4, %s5411_s21), 1  ;;  %v917_v8 = vpack.c.bf16 %v4041_v5, %v4040_v2  ;;  %v783_v9 = vpack.c.bf16 %v777_v7, %v776_v6  ;;  %v4042_v10 = vld [vmem:[%s7060_s3 + $0x50] sm:$0xff]  ;;  %v4043_v11 = vld [vmem:[%s7060_s3 + $0x58] sm:$0xff]  ;;  %v778_v13 = vld [vmem:[%s7060_s3 + $0x20] sm:$0xff] }
  0x11   : > { %4601 = vmatprep.subr.bf16.mxu0 %v782_v4  ;;  %v918_v12 = vpack.c.bf16 %v4043_v11, %v4042_v10  ;;  %v779_v14 = vld [vmem:[%s7060_s3 + $0x28] sm:$0xff]  ;;  %s4347_s25 = sshll.u32 %s7331_s21, 6  ;;  %v4044_v15 = vld [vmem:[%s7060_s3 + $0x60] sm:$0xff]  ;;  %s5369_s9 = smul.u32 432, %s7331_s21  ;;  %v780_v24 = vld [vmem:[%s7060_s3 + $0x30] sm:$0xff] }
  0x12   : > { %4617 = vmatprep.subr.bf16.mxu1 %v917_v8  ;;  %4602 = vmatpush3.bf16.msra.mxu0 %v782_v4  ;;  %v4045_v16 = vld [vmem:[%s7060_s3 + $0x68] sm:$0xff]  ;;  %s5518_s8 = scalar_lea.vmem %s7059_s2, %s4347_s25  ;;  %v784_v20 = vpack.c.bf16 %v779_v14, %v778_v13  ;;  %v781_v25 = vld [vmem:[%s7060_s3 + $0x38] sm:$0xff]  ;;  %v4046_v26 = vld [vmem:[%s7060_s3 + $0x70] sm:$0xff]  ;;  %s4348_s26 = sshll.u32 %s7331_s21, 8 }
  0x13   : > { %4618 = vmatpush3.bf16.msra.mxu1 %v917_v8  ;;  %4603 = vmatprep.subr.bf16.mxu0 %v783_v9  ;;  %v330_v17 = vld [vmem:[%s5518_s8] sm:$0xff]  ;;  %v331_v18 = vld [vmem:[%s5518_s8 + $0x8] sm:$0xff]  ;;  %v332_v19 = vld [vmem:[%s5518_s8 + $0x10] sm:$0xff]  ;;  %v919_v23 = vpack.c.bf16 %v4045_v16, %v4044_v15  ;;  %s5536_s16 = scalar_lea.vmem %s7058_s1, %s5369_s9  ;;  %v785_v32 = vpack.c.bf16 %v781_v25, %v780_v24  ;;  %s5632_s27 = scalar_lea.vmem %s7057_s0, %s5369_s9 }
  0x14   : > { %4619 = vmatprep.subr.bf16.mxu1 %v918_v12  ;;  %v770_v21 = vpack.c.bf16 %v331_v18, %v330_v17  ;;  %v333_v22 = vld [vmem:[%s5518_s8 + $0x18] sm:$0xff]  ;;  %v392_v29 = vld [vmem:[%s5536_s16] sm:$0xff]  ;;  %v335_v31 = vld [vmem:[%s5518_s8 + $0x28] sm:$0xff]  ;;  %s6954_s29 = scalar_lea.vmem %s7063_s6, %s4348_s26 }
  0x15   : > { %v4047_v27 = vld [vmem:[%s7060_s3 + $0x78] sm:$0xff]  ;;  %v771_v28 = vpack.c.bf16 %v333_v22, %v332_v19  ;;  %v334_v30 = vld [vmem:[%s5518_s8 + $0x20] sm:$0xff]  ;;  %448 = vperm.xlu1 %5395, %v392_v29   ;;  %v393_v33 = vld [vmem:[%s5536_s16 + $0x8] sm:$0xff] }
  0x16   : > { %4604 = vmatpush3.bf16.msra.mxu0 %v783_v9  ;;  %794 = vxpose.xlu0.c.b16.start [1/4] (short) (narrow) %v770_v21, 64  ;;  %v920_v34 = vpack.c.bf16 %v4047_v27, %v4046_v26  ;;  %v772_v35 = vpack.c.bf16 %v335_v31, %v334_v30  ;;  %v336_v36 = vld [vmem:[%s5518_s8 + $0x30] sm:$0xff]  ;;  %v337_v37 = vld [vmem:[%s5518_s8 + $0x38] sm:$0xff]  ;;  %v397_v41 = vld [vmem:[%s5536_s16 + $0x28] sm:$0x3] }
  0x17   : > { %4620 = vmatpush3.bf16.msra.mxu1 %v918_v12  ;;  %4605 = vmatprep.subr.bf16.mxu0 %v784_v20  ;;  %v394_v38 = vld [vmem:[%s5536_s16 + $0x10] sm:$0x3]  ;;  %v773_v39 = vpack.c.bf16 %v337_v37, %v336_v36  ;;  %v395_v40 = vld [vmem:[%s5536_s16 + $0x18] sm:$0xff]  ;;  %v396_v43 = vld [vmem:[%s5536_s16 + $0x20] sm:$0xff] }
  0x18   : > { %4621 = vmatprep.subr.bf16.mxu1 %v919_v23  ;;  %v398_v42 = vld [vmem:[%s5536_s16 + $0x30] sm:$0xff]  ;;  %v399_v44 = vld [vmem:[%s5536_s16 + $0x38] sm:$0xff]  ;;  %v400_v45 = vld [vmem:[%s5536_s16 + $0x40] sm:$0x3] }
  0x19   : > { %453 = vperm.xlu1 %5395, %v393_v33   ;;  %v401_v46 = vld [vmem:[%s5536_s16 + $0x48] sm:$0xff]  ;;  %v402_v47 = vld [vmem:[%s5536_s16 + $0x50] sm:$0xff]  ;;  %v403_v48 = vld [vmem:[%s5536_s16 + $0x58] sm:$0x3] }
  0x1a   : > { %4606 = vmatpush3.bf16.msra.mxu0 %v784_v20  ;;  %795 = vxpose.xlu0.c.b16.cont [2/4] (short) (narrow) %v771_v28, 64  ;;  %v404_v49 = vld [vmem:[%s5536_s16 + $0x60] sm:$0xff]  ;;  %v405_v50 = vld [vmem:[%s5536_s16 + $0x68] sm:$0xff]  ;;  %v406_v51 = vld [vmem:[%s5536_s16 + $0x70] sm:$0x3] }
  0x1b   : > { %4622 = vmatpush3.bf16.msra.mxu1 %v919_v23  ;;  %4607 = vmatprep.subr.bf16.mxu0 %v785_v32  ;;  %v407_v52 = vld [vmem:[%s5536_s16 + $0x78] sm:$0xff]  ;;  %v408_v53 = vld [vmem:[%s5536_s16 + $0x80] sm:$0xff]  ;;  %v409_v54 = vld [vmem:[%s5536_s16 + $0x88] sm:$0x3] }
  0x1c   : > { %4623 = vmatprep.subr.bf16.mxu1 %v920_v34  ;;  %v410_v55 = vld [vmem:[%s5536_s16 + $0x90] sm:$0xff]  ;;  %v411_v56 = vld [vmem:[%s5536_s16 + $0x98] sm:$0xff]  ;;  %v412_v57 = vld [vmem:[%s5536_s16 + $0xa0] sm:$0x3] }
  0x1d   : > { %458 = vperm.xlu1 %5395, %v394_v38   ;;  %v413_v58 = vld [vmem:[%s5536_s16 + $0xa8] sm:$0xff]  ;;  %v414_v59 = vld [vmem:[%s5536_s16 + $0xb0] sm:$0xff]  ;;  %v415_v60 = vld [vmem:[%s5536_s16 + $0xb8] sm:$0x3] }
  0x1e   : > { %4608 = vmatpush3.bf16.msra.mxu0 %v785_v32  ;;  %796 = vxpose.xlu0.c.b16.cont [3/4] (short) (narrow) %v772_v35, 64  ;;  %v416_v61 = vld [vmem:[%s5536_s16 + $0xc0] sm:$0xff]  ;;  %v417_v62 = vld [vmem:[%s5536_s16 + $0xc8] sm:$0xff]  ;;  %v418_v63 = vld [vmem:[%s5536_s16 + $0xd0] sm:$0x3] }
  0x1f   : > { %4624 = vmatpush3.bf16.msra.mxu1 %v920_v34  ;;  %v419_v0 = vld [vmem:[%s5536_s16 + $0xd8] sm:$0xff]  ;;  %v420_v1 = vld [vmem:[%s5536_s16 + $0xe0] sm:$0xff]  ;;  %v421_v2 = vld [vmem:[%s5536_s16 + $0xe8] sm:$0x3] }
  0x20   : > { %v423_v4 = vld [vmem:[%s5536_s16 + $0xf8] sm:$0xff]  ;;  %v424_v5 = vld [vmem:[%s5536_s16 + $0x100] sm:$0x3]  ;;  %v425_v6 = vld [vmem:[%s5536_s16 + $0x108] sm:$0xff] }
  0x21   : > { %463 = vperm.xlu1 %5395, %v395_v40   ;;  %v426_v7 = vld [vmem:[%s5536_s16 + $0x110] sm:$0xff]  ;;  %v427_v8 = vld [vmem:[%s5536_s16 + $0x118] sm:$0x3]  ;;  %v428_v9 = vld [vmem:[%s5536_s16 + $0x120] sm:$0xff] }
  0x22   : > { %797 = vxpose.xlu0.c.b16.end [4/4] (short) (narrow) %v773_v39, 64  ;;  %v429_v10 = vld [vmem:[%s5536_s16 + $0x128] sm:$0xff]  ;;  %v430_v11 = vld [vmem:[%s5536_s16 + $0x130] sm:$0x3]  ;;  %v431_v12 = vld [vmem:[%s5536_s16 + $0x138] sm:$0xff] }
  0x23   : > { %v432_v13 = vld [vmem:[%s5536_s16 + $0x140] sm:$0xff]  ;;  %v433_v14 = vld [vmem:[%s5536_s16 + $0x148] sm:$0x3]  ;;  %v434_v15 = vld [vmem:[%s5536_s16 + $0x150] sm:$0xff] }
  0x24   : > { %v435_v16 = vld [vmem:[%s5536_s16 + $0x158] sm:$0xff]  ;;  %v436_v17 = vld [vmem:[%s5536_s16 + $0x160] sm:$0x3]  ;;  %v437_v18 = vld [vmem:[%s5536_s16 + $0x168] sm:$0xff] }
  0x25   : > { %473 = vperm.xlu1 %5395, %v397_v41   ;;  %v438_v19 = vld [vmem:[%s5536_s16 + $0x170] sm:$0xff]  ;;  %v439_v21 = vld [vmem:[%s5536_s16 + $0x178] sm:$0x3]  ;;  %v440_v22 = vld [vmem:[%s5536_s16 + $0x180] sm:$0xff] }
  0x26   : > { %v441_v24 = vld [vmem:[%s5536_s16 + $0x188] sm:$0xff]  ;;  %v442_v25 = vld [vmem:[%s5536_s16 + $0x190] sm:$0x3]  ;;  %v443_v27 = vld [vmem:[%s5536_s16 + $0x198] sm:$0xff] }
  0x27   : > { %v444_v28 = vld [vmem:[%s5536_s16 + $0x1a0] sm:$0xff]  ;;  %v445_v30 = vld [vmem:[%s5536_s16 + $0x1a8] sm:$0x3]  ;;  %v340_v37 = vld [vmem:[%s5632_s27 + $0x10] sm:$0x3] }
  0x28   : > { %v338_v32 = vld [vmem:[%s5632_s27] sm:$0xff]  ;;  %v339_v33 = vld [vmem:[%s5632_s27 + $0x8] sm:$0xff] }
  0x29   : > { %478 = vperm.xlu1 %5395, %v398_v42  }
  0x2b   : > { %5396 = vset.pattern.permute.xlu0 %v5421_v3  ;;  %v422_v3 = vld [vmem:[%s5536_s16 + $0xf0] sm:$0xff] }
  0x2c   : > { %468 = vperm.xlu0 %5396, %v396_v43  }
  0x2d   : > { %483 = vperm.xlu1 %5395, %v399_v44  }
  0x30   : > { %488 = vperm.xlu0 %5396, %v400_v45  }
  0x31   : > { %493 = vperm.xlu1 %5395, %v401_v46  }
  0x34   : > { %498 = vperm.xlu0 %5396, %v402_v47  }
  0x35   : > { %503 = vperm.xlu1 %5395, %v403_v48  }
  0x38   : > { %508 = vperm.xlu0 %5396, %v404_v49  }
  0x39   : > { %513 = vperm.xlu1 %5395, %v405_v50   ;;  %v341_v50 = vld [vmem:[%s5632_s27 + $0x18] sm:$0xff] }
  0x3c   : > { %518 = vperm.xlu0 %5396, %v406_v51  }
  0x3d   : > { %523 = vperm.xlu1 %5395, %v407_v52   ;;  %v343_v52 = vld [vmem:[%s5632_s27 + $0x28] sm:$0x3] }
  0x40   : > { %528 = vperm.xlu0 %5396, %v408_v53  }
  0x41   : > { %533 = vperm.xlu1 %5395, %v409_v54  }
  0x44   : > { %538 = vperm.xlu0 %5396, %v410_v55  }
  0x45   : > { %543 = vperm.xlu1 %5395, %v411_v56   ;;  %v342_v56 = vld [vmem:[%s5632_s27 + $0x20] sm:$0xff] }
  0x48   : > { %548 = vperm.xlu0 %5396, %v412_v57  }
  0x49   : > { %553 = vperm.xlu1 %5395, %v413_v58   ;;  %v344_v58 = vld [vmem:[%s5632_s27 + $0x30] sm:$0xff] }
  0x4c   : > { %558 = vperm.xlu0 %5396, %v414_v59  }
  0x4d   : > { %563 = vperm.xlu1 %5395, %v415_v60  }
  0x50   : > { %568 = vperm.xlu0 %5396, %v416_v61  }
  0x51   : > { %573 = vperm.xlu1 %5395, %v417_v62  }
  0x54   : > { %578 = vperm.xlu0 %5396, %v418_v63  }
  0x55   : > { %583 = vperm.xlu1 %5395, %v419_v0  }
  0x58   : > { %588 = vperm.xlu0 %5396, %v420_v1   ;;  %v345_v1 = vld [vmem:[%s5632_s27 + $0x38] sm:$0xff] }
  0x59   : > { %593 = vperm.xlu1 %5395, %v421_v2  }
  0x5c   : > { %598 = vperm.xlu0 %5396, %v422_v3  }
  0x5d   : > { %603 = vperm.xlu1 %5395, %v423_v4  }
  0x60   : > { %608 = vperm.xlu0 %5396, %v424_v5  }
  0x61   : > { %613 = vperm.xlu1 %5395, %v425_v6  }
  0x64   : > { %618 = vperm.xlu0 %5396, %v426_v7  }
  0x65   : > { %623 = vperm.xlu1 %5395, %v427_v8  }
  0x68   : > { %628 = vperm.xlu0 %5396, %v428_v9   ;;  %v346_v9 = vld [vmem:[%s5632_s27 + $0x40] sm:$0x3] }
  0x69   : > { %633 = vperm.xlu1 %5395, %v429_v10  }
  0x6c   : > { %638 = vperm.xlu0 %5396, %v430_v11  }
  0x6d   : > { %643 = vperm.xlu1 %5395, %v431_v12  }
  0x70   : > { %648 = vperm.xlu0 %5396, %v432_v13  }
  0x71   : > { %653 = vperm.xlu1 %5395, %v433_v14   ;;  %v347_v14 = vld [vmem:[%s5632_s27 + $0x48] sm:$0xff] }
  0x74   : > { %658 = vperm.xlu0 %5396, %v434_v15  }
  0x75   : > { %663 = vperm.xlu1 %5395, %v435_v16  }
  0x78   : > { %668 = vperm.xlu0 %5396, %v436_v17  }
  0x79   : > { %673 = vperm.xlu1 %5395, %v437_v18   ;;  %v348_v18 = vld [vmem:[%s5632_s27 + $0x50] sm:$0xff] }
  0x7c   : > { %v5596_v20 = vpop.trf.xlu0  ;;  %678 = vperm.xlu0 %5396, %v438_v19  }
  0x7d   : > { %7133 = vst [vmem:[#allocation2_spill] sm:$0xff] %v5596_v20  ;;  %4609 = vmatprep.mubr.msk.bf16.mxu0 %vm810_vm0, %v5596_v20  ;;  %4625 = vmatprep.mubr.msk.bf16.mxu1 %vm810_vm0, %v5596_v20 }
  0x7e   : > { %683 = vperm.xlu1 %5395, %v439_v21  }
  0x80   : > { %v5604_v23 = vpop.trf.xlu0  ;;  %688 = vperm.xlu0 %5396, %v440_v22  }
  0x81   : > { %7134 = vst [vmem:[#allocation3_spill] sm:$0xff] %v5604_v23  ;;  %4610 = vmatmul.mubr.msk.bf16.vlgmr.msra.gmra.mrb[0].mxu0 %vm810_vm0, %v5604_v23  ;;  %4626 = vmatmul.mubr.msk.bf16.vlgmr.msra.gmra.mrb[0].mxu1 %vm810_vm0, %v5604_v23 }
  0x82   : > { %693 = vperm.xlu1 %5395, %v441_v24  }
  0x84   : > { %v5612_v26 = vpop.trf.xlu0  ;;  %698 = vperm.xlu0 %5396, %v442_v25  }
  0x85   : > { %7135 = vst [vmem:[#allocation4_spill] sm:$0xff] %v5612_v26  ;;  %4613 = vmatprep.mubr.msk.bf16.mxu0 %vm810_vm0, %v5612_v26  ;;  %4629 = vmatprep.mubr.msk.bf16.mxu1 %vm810_vm0, %v5612_v26  ;;  %v380_v26 = vld [vmem:[%s5632_s27 + $0x150] sm:$0xff] }
  0x86   : > { %703 = vperm.xlu1 %5395, %v443_v27  }
  0x88   : > { %v5620_v29 = vpop.trf.xlu0  ;;  %708 = vperm.xlu0 %5396, %v444_v28  }
  0x89   : > { %7136 = vst [vmem:[#allocation5_spill] sm:$0xff] %v5620_v29  ;;  %4614 = vmatmul.mubr.msk.bf16.gmra.mrb[4].mxu0 %vm810_vm0, %v5620_v29  ;;  %4630 = vmatmul.mubr.msk.bf16.gmra.mrb[4].mxu1 %vm810_vm0, %v5620_v29  ;;  %v378_v29 = vld [vmem:[%s5632_s27 + $0x140] sm:$0xff] }
  0x8a   : > { %713 = vperm.xlu1 %5395, %v445_v30   ;;  %v349_v30 = vld [vmem:[%s5632_s27 + $0x58] sm:$0x3] }
  0x94   : > { %v449_v31 = vpop.permute.xlu1 %448 }
  0x95   : > { %v5636_v34 = vmul.f32 %v449_v31, %v338_v32  ;;  %v350_v31 = vld [vmem:[%s5632_s27 + $0x60] sm:$0xff] }
  0x97   : > { %7137 = vst [vmem:[#allocation6_spill] sm:$0xff] %v5636_v34  ;;  %v1044_v38 = vrot.slane %v5636_v34, 1  ;;  %v1682_v32 = vrot.slane %v5636_v34, 2 }
  0x98   : > { %v454_v35 = vpop.permute.xlu1 %453 }
  0x99   : > { %v5638_v36 = vmul.f32 %v454_v35, %v339_v33 }
  0x9b   : > { %7138 = vst [vmem:[#allocation7_spill] sm:$0xff] %v5638_v36  ;;  %v1045_v40 = vrot.slane %v5638_v36, 1  ;;  %v1683_v42 = vrot.slane %v5638_v36, 2 }
  0x9c   : > { %v459_v41 = vpop.permute.xlu1 %458 }
  0x9d   : > { %v718_v43 = vmul.f32 %v459_v41, %v340_v37  ;;  %v1046_v46 = vsel %vm1043_vm1, %v1044_v38, %v1045_v40 }
  0x9f   : > { %v1047_v44 = vrot.slane %v718_v43, 1  ;;  %v1685_v45 = vrot.slane %v718_v43, 2 }
  0xa0   : > { %v464_v47 = vpop.permute.xlu1 %463 }
  0xa1   : > { %v1048_v48 = vsel %vm1043_vm1, %v1045_v40, %v1047_v44  ;;  %v5651_v49 = vsel %vm1681_vm2, %v1683_v42, %v1685_v45  ;;  %v719_v54 = vmul.f32 %v464_v47, %v341_v50 }
  0xa2   : > { %7139 = vst [vmem:[#allocation8_spill] sm:$0xff] %v5651_v49  ;;  %v1156_v51 = vpack.c.bf16 %v1048_v48, %v1046_v46  ;;  %v351_v46 = vld [vmem:[%s5632_s27 + $0x68] sm:$0xff]  ;;  %v352_v48 = vld [vmem:[%s5632_s27 + $0x70] sm:$0x3] }
  0xa3   : > { %v1049_v59 = vrot.slane %v719_v54, 1  ;;  %v1687_v61 = vrot.slane %v719_v54, 2 }
  0xa4   : > { %v474_v53 = vpop.permute.xlu1 %473  ;;  %4641 = vmatprep.mubr.msk.bf16.mxu1 %vm810_vm0, %v1156_v51  ;;  %v5711_v51 = vsel %vm1681_vm2, %v1682_v32, %v1683_v42 }
  0xa5   : > { %v721_v55 = vmul.f32 %v474_v53, %v343_v52  ;;  %7144 = vst [vmem:[#allocation13_spill] sm:$0xff] %v5711_v51 }
  0xa7   : > { %v1052_v62 = vrot.slane %v721_v55, 1  ;;  %v1690_v63 = vrot.slane %v721_v55, 2 }
  0xa8   : > { %v479_v57 = vpop.permute.xlu1 %478 }
  0xa9   : > { %v5659_v2 = vmul.f32 %v479_v57, %v344_v58  ;;  %v353_v58 = vld [vmem:[%s5632_s27 + $0x78] sm:$0xff] }
  0xab   : > { %v469_v60 = vpop.permute.xlu0 %468  ;;  %v1692_v43 = vrot.slane %v5659_v2, 2 }
  0xac   : > { %v720_v0 = vmul.f32 %v469_v60, %v342_v56  ;;  %v484_v6 = vpop.permute.xlu1 %483 }
  0xad   : > { %v5663_v7 = vmul.f32 %v484_v6, %v345_v1 }
  0xae   : > { %v5661_v3 = vpack.c.bf16 %v720_v0, %v719_v54  ;;  %v1050_v4 = vrot.slane %v720_v0, 1  ;;  %v1688_v5 = vrot.slane %v720_v0, 2 }
  0xaf   : > { %v489_v8 = vpop.permute.xlu0 %488  ;;  %v5679_v17 = vpack.c.bf16 %v5663_v7, %v5659_v2  ;;  %v1693_v19 = vrot.slane %v5663_v7, 2 }
  0xb0   : > { %7140 = vst [vmem:[#allocation9_spill] sm:$0xff] %v5661_v3  ;;  %v1051_v10 = vsel %vm1043_vm1, %v1049_v59, %v1050_v4  ;;  %v1053_v11 = vsel %vm1043_vm1, %v1050_v4, %v1052_v62  ;;  %v1689_v12 = vsel %vm1681_vm2, %v1687_v61, %v1688_v5  ;;  %v1691_v13 = vsel %vm1681_vm2, %v1688_v5, %v1690_v63  ;;  %v494_v22 = vpop.permute.xlu1 %493  ;;  %v354_v62 = vld [vmem:[%s5632_s27 + $0x80] sm:$0xff] }
  0xb1   : > { %4793 = vmatprep.mubr.msk.bf16.mxu0 %vm810_vm0, %v5661_v3  ;;  %v5673_v15 = vpack.c.bf16 %v1053_v11, %v1051_v10  ;;  %v5675_v16 = vpack.c.bf16 %v1691_v13, %v1689_v12  ;;  %7142 = vst [vmem:[#allocation11_spill] sm:$0xff] %v5679_v17  ;;  %v5683_v21 = vmul.f32 %v489_v8, %v346_v9  ;;  %v355_v11 = vld [vmem:[%s5632_s27 + $0x88] sm:$0x3]  ;;  %v356_v13 = vld [vmem:[%s5632_s27 + $0x90] sm:$0xff]  ;;  %v390_v17 = vld [vmem:[%s5632_s27 + $0x1a0] sm:$0xff] }
  0xb2   : > { %v5685_v24 = vmul.f32 %v494_v22, %v347_v14  ;;  %v1694_v59 = vsel %vm1681_vm2, %v1692_v43, %v1693_v19 }
  0xb3   : > { %7141 = vst [vmem:[#allocation10_spill] sm:$0xff] %v5675_v16  ;;  %v499_v25 = vpop.permute.xlu0 %498  ;;  %v1695_v27 = vrot.slane %v5683_v21, 2 }
  0xb4   : > { %v5688_v28 = vmul.f32 %v499_v25, %v348_v18  ;;  %v504_v37 = vpop.permute.xlu1 %503  ;;  %v1697_v44 = vrot.slane %v5685_v24, 2 }
  0xb5   : > { %v1696_v33 = vsel %vm1681_vm2, %v1693_v19, %v1695_v27  ;;  %v5699_v40 = vmul.f32 %v504_v37, %v349_v30  ;;  %v358_v37 = vld [vmem:[%s5632_s27 + $0xa0] sm:$0x3] }
  0xb6   : > { %v5696_v35 = vpack.c.bf16 %v5688_v28, %v5685_v24  ;;  %v1698_v38 = vrot.slane %v5688_v28, 2  ;;  %v5730_v63 = vpack.c.bf16 %v1696_v33, %v1694_v59 }
  0xb7   : > { %v509_v41 = vpop.permute.xlu0 %508  ;;  %v1700_v47 = vrot.slane %v5699_v40, 2 }
  0xb8   : > { %7143 = vst [vmem:[#allocation12_spill] sm:$0xff] %v5696_v35  ;;  %v5703_v45 = vmul.f32 %v509_v41, %v350_v31  ;;  %v514_v50 = vpop.permute.xlu1 %513  ;;  %v1699_v42 = vsel %vm1681_vm2, %v1697_v44, %v1698_v38  ;;  %7146 = vst [vmem:[#allocation15_spill] sm:$0xff] %v5730_v63  ;;  %v357_v31 = vld [vmem:[%s5632_s27 + $0x98] sm:$0xff] }
  0xb9   : > { %v1701_v52 = vsel %vm1681_vm2, %v1698_v38, %v1700_v47  ;;  %v5715_v54 = vmul.f32 %v514_v50, %v351_v46 }
  0xba   : > { %v1702_v53 = vrot.slane %v5703_v45, 2  ;;  %v5733_v4 = vpack.c.bf16 %v1701_v52, %v1699_v42 }
  0xbb   : > { %v519_v55 = vpop.permute.xlu0 %518  ;;  %v5726_v60 = vpack.c.bf16 %v5715_v54, %v5703_v45  ;;  %v1703_v61 = vrot.slane %v5715_v54, 2 }
  0xbc   : > { %v5719_v57 = vmul.f32 %v519_v55, %v352_v48  ;;  %v524_v1 = vpop.permute.xlu1 %523  ;;  %7147 = vst [vmem:[#allocation16_spill] sm:$0xff] %v5733_v4  ;;  %v359_v48 = vld [vmem:[%s5632_s27 + $0xa8] sm:$0xff]  ;;  %v360_v55 = vld [vmem:[%s5632_s27 + $0xb0] sm:$0xff] }
  0xbd   : > { %7145 = vst [vmem:[#allocation14_spill] sm:$0xff] %v5726_v60  ;;  %v5735_v5 = vmul.f32 %v524_v1, %v353_v58  ;;  %v1704_v8 = vsel %vm1681_vm2, %v1702_v53, %v1703_v61 }
  0xbe   : > { %v1705_v0 = vrot.slane %v5719_v57, 2 }
  0xbf   : > { %v529_v6 = vpop.permute.xlu0 %528  ;;  %v1707_v12 = vrot.slane %v5735_v5, 2 }
  0xc0   : > { %v1706_v9 = vsel %vm1681_vm2, %v1703_v61, %v1705_v0  ;;  %v5739_v10 = vmul.f32 %v529_v6, %v354_v62  ;;  %v534_v22 = vpop.permute.xlu1 %533  ;;  %v361_v6 = vld [vmem:[%s5632_s27 + $0xb8] sm:$0x3] }
  0xc1   : > { %v5744_v14 = vpack.c.bf16 %v1706_v9, %v1704_v8  ;;  %v5751_v25 = vmul.f32 %v534_v22, %v355_v11  ;;  %v362_v9 = vld [vmem:[%s5632_s27 + $0xc0] sm:$0xff] }
  0xc2   : > { %v5748_v18 = vpack.c.bf16 %v5739_v10, %v5735_v5  ;;  %v1708_v19 = vrot.slane %v5739_v10, 2 }
  0xc3   : > { %7148 = vst [vmem:[#allocation17_spill] sm:$0xff] %v5744_v14  ;;  %v539_v27 = vpop.permute.xlu0 %538  ;;  %v1710_v33 = vrot.slane %v5751_v25, 2 }
  0xc4   : > { %7149 = vst [vmem:[#allocation18_spill] sm:$0xff] %v5748_v18  ;;  %v5753_v30 = vmul.f32 %v539_v27, %v356_v13  ;;  %v1709_v32 = vsel %vm1681_vm2, %v1707_v12, %v1708_v19  ;;  %v544_v38 = vpop.permute.xlu1 %543 }
  0xc5   : > { %v1711_v41 = vsel %vm1681_vm2, %v1708_v19, %v1710_v33  ;;  %v5761_v44 = vmul.f32 %v544_v38, %v357_v31  ;;  %v364_v38 = vld [vmem:[%s5632_s27 + $0xd0] sm:$0x3] }
  0xc6   : > { %v1712_v43 = vrot.slane %v5753_v30, 2  ;;  %v5766_v50 = vpack.c.bf16 %v1711_v41, %v1709_v32  ;;  %v363_v32 = vld [vmem:[%s5632_s27 + $0xc8] sm:$0xff] }
  0xc7   : > { %v549_v46 = vpop.permute.xlu0 %548  ;;  %v5770_v52 = vpack.c.bf16 %v5761_v44, %v5753_v30  ;;  %v1713_v53 = vrot.slane %v5761_v44, 2 }
  0xc8   : > { %v5763_v47 = vmul.f32 %v549_v46, %v358_v37  ;;  %7150 = vst [vmem:[#allocation19_spill] sm:$0xff] %v5766_v50  ;;  %v554_v59 = vpop.permute.xlu1 %553  ;;  %v374_v50 = vld [vmem:[%s5632_s27 + $0x120] sm:$0xff] }
  0xc9   : > { %7151 = vst [vmem:[#allocation20_spill] sm:$0xff] %v5770_v52  ;;  %v5775_v42 = vmul.f32 %v554_v59, %v359_v48  ;;  %v1714_v62 = vsel %vm1681_vm2, %v1712_v43, %v1713_v53 }
  0xca   : > { %v1715_v58 = vrot.slane %v5763_v47, 2 }
  0xcb   : > { %v559_v61 = vpop.permute.xlu0 %558  ;;  %v1717_v8 = vrot.slane %v5775_v42, 2 }
  0xcc   : > { %v1716_v0 = vsel %vm1681_vm2, %v1713_v53, %v1715_v58  ;;  %v5779_v1 = vmul.f32 %v559_v61, %v360_v55  ;;  %v564_v19 = vpop.permute.xlu1 %563  ;;  %v365_v58 = vld [vmem:[%s5632_s27 + $0xd8] sm:$0xff] }
  0xcd   : > { %v5784_v11 = vpack.c.bf16 %v1716_v0, %v1714_v62  ;;  %v5791_v22 = vmul.f32 %v564_v19, %v361_v6  ;;  %v366_v0 = vld [vmem:[%s5632_s27 + $0xe0] sm:$0xff] }
  0xce   : > { %v5788_v12 = vpack.c.bf16 %v5779_v1, %v5775_v42  ;;  %v1718_v13 = vrot.slane %v5779_v1, 2 }
  0xcf   : > { %7152 = vst [vmem:[#allocation21_spill] sm:$0xff] %v5784_v11  ;;  %v569_v27 = vpop.permute.xlu0 %568  ;;  %v1720_v37 = vrot.slane %v5791_v22, 2  ;;  %v372_v11 = vld [vmem:[%s5632_s27 + $0x110] sm:$0xff] }
  0xd0   : > { %7153 = vst [vmem:[#allocation22_spill] sm:$0xff] %v5788_v12  ;;  %v5793_v31 = vmul.f32 %v569_v27, %v362_v9  ;;  %v1719_v33 = vsel %vm1681_vm2, %v1717_v8, %v1718_v13  ;;  %v574_v41 = vpop.permute.xlu1 %573 }
  0xd1   : > { %v1721_v43 = vsel %vm1681_vm2, %v1718_v13, %v1720_v37  ;;  %v5801_v48 = vmul.f32 %v574_v41, %v363_v32 }
  0xd2   : > { %v1722_v46 = vrot.slane %v5793_v31, 2  ;;  %v5806_v59 = vpack.c.bf16 %v1721_v43, %v1719_v33  ;;  %v367_v33 = vld [vmem:[%s5632_s27 + $0xe8] sm:$0x3] }
  0xd3   : > { %v579_v53 = vpop.permute.xlu0 %578  ;;  %v5810_v61 = vpack.c.bf16 %v5801_v48, %v5793_v31  ;;  %v1723_v62 = vrot.slane %v5801_v48, 2 }
  0xd4   : > { %v5803_v55 = vmul.f32 %v579_v53, %v364_v38  ;;  %7154 = vst [vmem:[#allocation23_spill] sm:$0xff] %v5806_v59  ;;  %v584_v8 = vpop.permute.xlu1 %583  ;;  %v368_v38 = vld [vmem:[%s5632_s27 + $0xf0] sm:$0xff] }
  0xd5   : > { %7155 = vst [vmem:[#allocation24_spill] sm:$0xff] %v5810_v61  ;;  %v5815_v9 = vmul.f32 %v584_v8, %v365_v58  ;;  %v1724_v19 = vsel %vm1681_vm2, %v1722_v46, %v1723_v62 }
  0xd6   : > { %v1725_v6 = vrot.slane %v5803_v55, 2 }
  0xd7   : > { %v589_v13 = vpop.permute.xlu0 %588  ;;  %v1727_v37 = vrot.slane %v5815_v9, 2 }
  0xd8   : > { %v1726_v27 = vsel %vm1681_vm2, %v1723_v62, %v1725_v6  ;;  %v5819_v32 = vmul.f32 %v589_v13, %v366_v0  ;;  %v594_v58 = vpop.permute.xlu1 %593  ;;  %v369_v0 = vld [vmem:[%s5632_s27 + $0xf8] sm:$0xff] }
  0xd9   : > { %v5824_v41 = vpack.c.bf16 %v1726_v27, %v1724_v19  ;;  %v5831_v46 = vmul.f32 %v594_v58, %v367_v33  ;;  %v370_v19 = vld [vmem:[%s5632_s27 + $0x100] sm:$0x3] }
  0xda   : > { %v5828_v43 = vpack.c.bf16 %v5819_v32, %v5815_v9  ;;  %v1728_v53 = vrot.slane %v5819_v32, 2 }
  0xdb   : > { %7156 = vst [vmem:[#allocation25_spill] sm:$0xff] %v5824_v41  ;;  %v599_v8 = vpop.permute.xlu0 %598  ;;  %v1730_v13 = vrot.slane %v5831_v46, 2 }
  0xdc   : > { %7157 = vst [vmem:[#allocation26_spill] sm:$0xff] %v5828_v43  ;;  %v5833_v62 = vmul.f32 %v599_v8, %v368_v38  ;;  %v1729_v6 = vsel %vm1681_vm2, %v1727_v37, %v1728_v53  ;;  %v604_v27 = vpop.permute.xlu1 %603  ;;  %v371_v38 = vld [vmem:[%s5632_s27 + $0x108] sm:$0xff]  ;;  %v384_v43 = vld [vmem:[%s5632_s27 + $0x170] sm:$0xff] }
  0xdd   : > { %v1731_v56 = vsel %vm1681_vm2, %v1728_v53, %v1730_v13  ;;  %v5841_v41 = vmul.f32 %v604_v27, %v369_v0 }
  0xde   : > { %v1732_v39 = vrot.slane %v5833_v62, 2  ;;  %v5846_v8 = vpack.c.bf16 %v1731_v56, %v1729_v6 }
  0xdf   : > { %v609_v33 = vpop.permute.xlu0 %608  ;;  %v5850_v37 = vpack.c.bf16 %v5841_v41, %v5833_v62  ;;  %v1733_v59 = vrot.slane %v5841_v41, 2 }
  0xe0   : > { %v5843_v58 = vmul.f32 %v609_v33, %v370_v19  ;;  %7158 = vst [vmem:[#allocation27_spill] sm:$0xff] %v5846_v8  ;;  %v614_v13 = vpop.permute.xlu1 %613  ;;  %v373_v33 = vld [vmem:[%s5632_s27 + $0x118] sm:$0x3] }
  0xe1   : > { %7159 = vst [vmem:[#allocation28_spill] sm:$0xff] %v5850_v37  ;;  %v5855_v0 = vmul.f32 %v614_v13, %v371_v38  ;;  %v1734_v19 = vsel %vm1681_vm2, %v1732_v39, %v1733_v59 }
  0xe2   : > { %v1735_v53 = vrot.slane %v5843_v58, 2 }
  0xe3   : > { %v619_v27 = vpop.permute.xlu0 %618  ;;  %v1737_v8 = vrot.slane %v5855_v0, 2 }
  0xe4   : > { %v1736_v56 = vsel %vm1681_vm2, %v1733_v59, %v1735_v53  ;;  %v5859_v6 = vmul.f32 %v619_v27, %v372_v11  ;;  %v624_v13 = vpop.permute.xlu1 %623  ;;  %v375_v59 = vld [vmem:[%s5632_s27 + $0x128] sm:$0xff] }
  0xe5   : > { %v5864_v14 = vpack.c.bf16 %v1736_v56, %v1734_v19  ;;  %v5871_v39 = vmul.f32 %v624_v13, %v373_v33  ;;  %v376_v19 = vld [vmem:[%s5632_s27 + $0x130] sm:$0x3] }
  0xe6   : > { %v5868_v4 = vpack.c.bf16 %v5859_v6, %v5855_v0  ;;  %v1738_v38 = vrot.slane %v5859_v6, 2 }
  0xe7   : > { %7160 = vst [vmem:[#allocation29_spill] sm:$0xff] %v5864_v14  ;;  %v629_v63 = vpop.permute.xlu0 %628  ;;  %v1740_v27 = vrot.slane %v5871_v39, 2 }
  0xe8   : > { %7161 = vst [vmem:[#allocation30_spill] sm:$0xff] %v5868_v4  ;;  %v5873_v11 = vmul.f32 %v629_v63, %v374_v50  ;;  %v1739_v53 = vsel %vm1681_vm2, %v1737_v8, %v1738_v38  ;;  %v634_v56 = vpop.permute.xlu1 %633  ;;  %v377_v63 = vld [vmem:[%s5632_s27 + $0x138] sm:$0xff] }
  0xe9   : > { %v1741_v14 = vsel %vm1681_vm2, %v1738_v38, %v1740_v27  ;;  %v5881_v51 = vmul.f32 %v634_v56, %v375_v59 }
  0xea   : > { %7162 = vst [vmem:[#allocation31_spill] sm:$0xff] %v5873_v11  ;;  %v1742_v16 = vrot.slane %v5873_v11, 2  ;;  %v5886_v50 = vpack.c.bf16 %v1741_v14, %v1739_v53 }
  0xeb   : > { %7163 = vst [vmem:[#allocation32_spill] sm:$0xff] %v5881_v51  ;;  %v639_v33 = vpop.permute.xlu0 %638  ;;  %v5890_v8 = vpack.c.bf16 %v5881_v51, %v5873_v11  ;;  %v1743_v49 = vrot.slane %v5881_v51, 2  ;;  %v1054_v51 = vrot.slane %v5659_v2, 1  ;;  %v1055_v11 = vrot.slane %v5663_v7, 1 }
  0xec   : > { %v5883_v13 = vmul.f32 %v639_v33, %v376_v19  ;;  %7165 = vst [vmem:[#allocation34_spill] sm:$0xff] %v5886_v50  ;;  %v644_v27 = vpop.permute.xlu1 %643  ;;  %v379_v33 = vld [vmem:[%s5632_s27 + $0x148] sm:$0x3]  ;;  %v1064_v7 = vrot.slane %v5703_v45, 1 }
  0xed   : > { %7166 = vst [vmem:[#allocation35_spill] sm:$0xff] %v5890_v8  ;;  %v5895_v59 = vmul.f32 %v644_v27, %v377_v63  ;;  %v1744_v19 = vsel %vm1681_vm2, %v1742_v16, %v1743_v49 }
  0xee   : > { %7164 = vst [vmem:[#allocation33_spill] sm:$0xff] %v5883_v13  ;;  %v1745_v38 = vrot.slane %v5883_v13, 2 }
  0xef   : > { %7167 = vst [vmem:[#allocation36_spill] sm:$0xff] %v5895_v59  ;;  %v649_v56 = vpop.permute.xlu0 %648  ;;  %v1747_v50 = vrot.slane %v5895_v59, 2 }
  0xf0   : > { %v1746_v14 = vsel %vm1681_vm2, %v1743_v49, %v1745_v38  ;;  %v5899_v53 = vmul.f32 %v649_v56, %v378_v29  ;;  %v654_v27 = vpop.permute.xlu1 %653  ;;  %v381_v49 = vld [vmem:[%s5632_s27 + $0x158] sm:$0xff] }
  0xf1   : > { %v5904_v23 = vpack.c.bf16 %v1746_v14, %v1744_v19  ;;  %v5911_v16 = vmul.f32 %v654_v27, %v379_v33  ;;  %v382_v19 = vld [vmem:[%s5632_s27 + $0x160] sm:$0x3] }
  0xf2   : > { %7168 = vst [vmem:[#allocation37_spill] sm:$0xff] %v5899_v53  ;;  %v5908_v20 = vpack.c.bf16 %v5899_v53, %v5895_v59  ;;  %v1748_v63 = vrot.slane %v5899_v53, 2  ;;  %v792_v53 = vld [vmem:[%s7061_s4 + $0x30] sm:$0xff] }
  0xf3   : > { %7169 = vst [vmem:[#allocation38_spill] sm:$0xff] %v5904_v23  ;;  %7171 = vst [vmem:[#allocation40_spill] sm:$0xff] %v5911_v16  ;;  %v659_v8 = vpop.permute.xlu0 %658  ;;  %v1750_v56 = vrot.slane %v5911_v16, 2 }
  0xf4   : > { %7170 = vst [vmem:[#allocation39_spill] sm:$0xff] %v5908_v20  ;;  %v5913_v29 = vmul.f32 %v659_v8, %v380_v26  ;;  %v1749_v38 = vsel %vm1681_vm2, %v1747_v50, %v1748_v63  ;;  %v664_v14 = vpop.permute.xlu1 %663  ;;  %v383_v26 = vld [vmem:[%s5632_s27 + $0x168] sm:$0xff] }
  0xf5   : > { %v1751_v23 = vsel %vm1681_vm2, %v1748_v63, %v1750_v56  ;;  %v5921_v4 = vmul.f32 %v664_v14, %v381_v49 }
  0xf6   : > { %7172 = vst [vmem:[#allocation41_spill] sm:$0xff] %v5913_v29  ;;  %v1752_v20 = vrot.slane %v5913_v29, 2  ;;  %v5926_v8 = vpack.c.bf16 %v1751_v23, %v1749_v38 }
  0xf7   : > { %7173 = vst [vmem:[#allocation42_spill] sm:$0xff] %v5921_v4  ;;  %v669_v33 = vpop.permute.xlu0 %668  ;;  %v5930_v50 = vpack.c.bf16 %v5921_v4, %v5913_v29  ;;  %v1753_v37 = vrot.slane %v5921_v4, 2 }
  0xf8   : > { %v5923_v27 = vmul.f32 %v669_v33, %v382_v19  ;;  %7175 = vst [vmem:[#allocation44_spill] sm:$0xff] %v5926_v8  ;;  %v674_v56 = vpop.permute.xlu1 %673  ;;  %v385_v33 = vld [vmem:[%s5632_s27 + $0x178] sm:$0x3] }
  0xf9   : > { %7176 = vst [vmem:[#allocation45_spill] sm:$0xff] %v5930_v50  ;;  %v5935_v49 = vmul.f32 %v674_v56, %v383_v26  ;;  %v1754_v19 = vsel %vm1681_vm2, %v1752_v20, %v1753_v37  ;;  %v386_v50 = vld [vmem:[%s5632_s27 + $0x180] sm:$0xff] }
  0xfa   : > { %7174 = vst [vmem:[#allocation43_spill] sm:$0xff] %v5923_v27  ;;  %v1755_v63 = vrot.slane %v5923_v27, 2 }
  0xfb   : > { %7177 = vst [vmem:[#allocation46_spill] sm:$0xff] %v5935_v49  ;;  %v679_v14 = vpop.permute.xlu0 %678  ;;  %v1757_v8 = vrot.slane %v5935_v49, 2 }
  0xfc   : > { %v1756_v23 = vsel %vm1681_vm2, %v1753_v37, %v1755_v63  ;;  %v5939_v38 = vmul.f32 %v679_v14, %v384_v43  ;;  %v387_v43 = vld [vmem:[%s5632_s27 + $0x188] sm:$0xff] }
  0xfd   : > { %v5944_v61 = vpack.c.bf16 %v1756_v23, %v1754_v19  ;;  %v684_v56 = vpop.permute.xlu1 %683  ;;  %v388_v19 = vld [vmem:[%s5632_s27 + $0x190] sm:$0x3] }
  0xfe   : > { %7178 = vst [vmem:[#allocation47_spill] sm:$0xff] %v5939_v38  ;;  %v5948_v12 = vpack.c.bf16 %v5939_v38, %v5935_v49  ;;  %v1758_v26 = vrot.slane %v5939_v38, 2  ;;  %v5951_v20 = vmul.f32 %v684_v56, %v385_v33 }
  0xff   : > { %7179 = vst [vmem:[#allocation48_spill] sm:$0xff] %v5944_v61  ;;  %v689_v52 = vpop.permute.xlu0 %688 }
 0x100   : > { %7180 = vst [vmem:[#allocation49_spill] sm:$0xff] %v5948_v12  ;;  %7181 = vst [vmem:[#allocation50_spill] sm:$0xff] %v5951_v20  ;;  %v5953_v37 = vmul.f32 %v689_v52, %v386_v50  ;;  %v1759_v63 = vsel %vm1681_vm2, %v1757_v8, %v1758_v26  ;;  %v1760_v14 = vrot.slane %v5951_v20, 2  ;;  %v389_v52 = vld [vmem:[%s5632_s27 + $0x198] sm:$0xff] }
 0x101   : > { %v694_v23 = vpop.permute.xlu1 %693 }
 0x102   : > { %7182 = vst [vmem:[#allocation51_spill] sm:$0xff] %v5953_v37  ;;  %v1761_v61 = vsel %vm1681_vm2, %v1758_v26, %v1760_v14  ;;  %v2433_v12 = vrot.slane %v5953_v37, 1  ;;  %v2728_v18 = vrot.slane %v5953_v37, 2  ;;  %v5962_v60 = vmul.f32 %v694_v23, %v387_v43 }
 0x103   : > { %v699_v33 = vpop.permute.xlu0 %698  ;;  %v5965_v50 = vpack.c.bf16 %v1761_v61, %v1759_v63 }
 0x104   : > { %7183 = vst [vmem:[#allocation52_spill] sm:$0xff] %v5962_v60  ;;  %v766_v56 = vmul.f32 %v699_v33, %v388_v19  ;;  %v2434_v8 = vrot.slane %v5962_v60, 1  ;;  %v2729_v35 = vrot.slane %v5962_v60, 2  ;;  %v391_v33 = vld [vmem:[%s5632_s27 + $0x1a8] sm:$0x3] }
 0x105   : > { %7184 = vst [vmem:[#allocation53_spill] sm:$0xff] %v5965_v50  ;;  %v704_v26 = vpop.permute.xlu1 %703 }
 0x106   : > { %v2436_v3 = vrot.slane %v766_v56, 1  ;;  %v2731_v34 = vrot.slane %v766_v56, 2  ;;  %v5970_v14 = vmul.f32 %v704_v26, %v389_v52  ;;  %v2435_v43 = vsel %vm1043_vm1, %v2433_v12, %v2434_v8 }
 0x107   : > { %v709_v36 = vpop.permute.xlu0 %708  ;;  %v2730_v23 = vsel %vm1681_vm2, %v2728_v18, %v2729_v35 }
 0x108   : > { %7185 = vst [vmem:[#allocation54_spill] sm:$0xff] %v5970_v14  ;;  %v2437_v19 = vsel %vm1043_vm1, %v2434_v8, %v2436_v3  ;;  %v2732_v61 = vsel %vm1681_vm2, %v2729_v35, %v2731_v34  ;;  %v5976_v63 = vmul.f32 %v709_v36, %v390_v17  ;;  %v3609_v60 = vrot.slane %v5970_v14, 2  ;;  %v788_v17 = vld [vmem:[%s7061_s4 + $0x10] sm:$0xff] }
 0x109   : > { %v5980_v37 = vpack.c.bf16 %v2437_v19, %v2435_v43  ;;  %v5982_v56 = vpack.c.bf16 %v2732_v61, %v2730_v23  ;;  %v714_v26 = vpop.permute.xlu1 %713  ;;  %v4050_v35 = vld [vmem:[%s7061_s4 + $0x50] sm:$0xff]  ;;  %v789_v43 = vld [vmem:[%s7061_s4 + $0x18] sm:$0xff] }
 0x10a   : > { %7186 = vst [vmem:[#allocation55_spill] sm:$0xff] %v5976_v63  ;;  %v3610_v52 = vrot.slane %v5976_v63, 2  ;;  %v5985_v50 = vmul.f32 %v714_v26, %v391_v33  ;;  %v4051_v23 = vld [vmem:[%s7061_s4 + $0x58] sm:$0xff]  ;;  %v4048_v33 = vld [vmem:[%s7061_s4 + $0x40] sm:$0xff]  ;;  %v4049_v26 = vld [vmem:[%s7061_s4 + $0x48] sm:$0xff] }
 0x10b   : > { %7187 = vst [vmem:[#allocation56_spill] sm:$0xff] %v5980_v37  ;;  %7188 = vst [vmem:[#allocation57_spill] sm:$0xff] %v5982_v56 }
 0x10c   : > { %7189 = vst [vmem:[#allocation58_spill] sm:$0xff] %v5985_v50  ;;  %v5988_v18 = vsel %vm1681_vm2, %v3609_v60, %v3610_v52  ;;  %v3612_v3 = vrot.slane %v5985_v50, 2  ;;  %v786_v60 = vld [vmem:[%s7061_s4] sm:$0xff] }
 0x10d   : > { %7190 = vst [vmem:[#allocation59_spill] sm:$0xff] %v5988_v18 }
 0x10e   : > { %v5992_v34 = vsel %vm1681_vm2, %v3610_v52, %v3612_v3  ;;  %v787_v52 = vld [vmem:[%s7061_s4 + $0x8] sm:$0xff] }
 0x10f   : > { %7191 = vst [vmem:[#allocation60_spill] sm:$0xff] %v5992_v34 }
 0x154   : > { %v4611_v12 = vpop.f32.mrb[0].mxu0  ;;  %v4627_v8 = vpop.f32.mrb[0].mxu1 }
 0x155   : > { %v857_v19 = vpop.f32.mrb[1].mxu0  ;;  %v964_v61 = vpop.f32.mrb[1].mxu1  ;;  %v866_v18 = vadd.f32 %v4611_v12, %v788_v17  ;;  %v973_v34 = vadd.f32 %v4627_v8, %v4050_v35  ;;  %v4054_v17 = vld [vmem:[%s7061_s4 + $0x70] sm:$0xff] }
 0x156   : > { %v4612_v3 = vpop.f32.mrb[2].mxu0  ;;  %v4628_v36 = vpop.f32.mrb[2].mxu1  ;;  %v858_v37 = vadd.f32 %v857_v19, %v786_v60  ;;  %v965_v20 = vadd.f32 %v4048_v33, %v964_v61 }
 0x157   : > { %v869_v50 = vadd.f32 %v4612_v3, %v789_v43  ;;  %v976_v63 = vadd.f32 %v4628_v36, %v4051_v23  ;;  %v860_v14 = vpop.f32.mrb[3].mxu0  ;;  %v967_v56 = vpop.f32.mrb[3].mxu1 }
 0x158   : > { %v861_v38 = vadd.f32 %v860_v14, %v787_v52  ;;  %v968_v49 = vadd.f32 %v4049_v26, %v967_v56  ;;  %v790_v14 = vld [vmem:[%s7061_s4 + $0x20] sm:$0xff]  ;;  %v4053_v56 = vld [vmem:[%s7061_s4 + $0x68] sm:$0xff] }
 0x159   : > { %v905_v27 = vpack.c.bf16 %v869_v50, %v866_v18  ;;  %v1173_v4 = vpack.c.bf16 %v976_v63, %v973_v34  ;;  %v4052_v50 = vld [vmem:[%s7061_s4 + $0x60] sm:$0xff]  ;;  %v791_v63 = vld [vmem:[%s7061_s4 + $0x28] sm:$0xff] }
 0x15a   : > { %v904_v29 = vpack.c.bf16 %v861_v38, %v858_v37  ;;  %v1172_v16 = vpack.c.bf16 %v968_v49, %v965_v20  ;;  %v793_v38 = vld [vmem:[%s7061_s4 + $0x38] sm:$0xff] }
 0x15b   : > { %v4055_v49 = vld [vmem:[%s7061_s4 + $0x78] sm:$0xff] }
 0x15c   : > { %v4615_v35 = vpop.f32.mrb[4].mxu0  ;;  %v4631_v36 = vpop.f32.mrb[4].mxu1  ;;  %4633 = vmatprep.subr.bf16.mxu1 %v1172_v16 }
 0x15d   : > { %v873_v20 = vpop.f32.mrb[5].mxu0  ;;  %v980_v37 = vpop.f32.mrb[5].mxu1  ;;  %4634 = vmatpush3.bf16.msra.mxu1 %v1172_v16  ;;  %v882_v12 = vadd.f32 %v4615_v35, %v792_v53  ;;  %v989_v8 = vadd.f32 %v4631_v36, %v4054_v17  ;;  %v1057_v53 = vrot.slane %v5683_v21, 1  ;;  %v1056_v35 = vsel %vm1043_vm1, %v1054_v51, %v1055_v11 }
 0x15e   : > { %v4616_v18 = vpop.f32.mrb[6].mxu0  ;;  %v4632_v34 = vpop.f32.mrb[6].mxu1  ;;  %4635 = vmatprep.subr.bf16.mxu1 %v1173_v4  ;;  %v874_v61 = vadd.f32 %v873_v20, %v790_v14  ;;  %v981_v33 = vadd.f32 %v4052_v50, %v980_v37  ;;  %v1059_v36 = vrot.slane %v5685_v24, 1  ;;  %v1062_v14 = vrot.slane %v5699_v40, 1 }
 0x15f   : > { %v885_v60 = vadd.f32 %v4616_v18, %v793_v38  ;;  %v992_v43 = vadd.f32 %v4632_v34, %v4055_v49  ;;  %v876_v23 = vpop.f32.mrb[7].mxu0  ;;  %v983_v19 = vpop.f32.mrb[7].mxu1  ;;  %v1058_v17 = vsel %vm1043_vm1, %v1055_v11, %v1057_v53  ;;  %v1065_v21 = vrot.slane %v5715_v54, 1  ;;  %v4092_v38 = vld [vmem:[%s7060_s3 + $0x80] sm:$0xff]  ;;  %v4093_v49 = vld [vmem:[%s7060_s3 + $0x88] sm:$0xff]  ;;  %v7193_v53 = vld [vmem:[#allocation32_spill] sm:$0xff] }
 0x160   : > { %v877_v16 = vadd.f32 %v876_v23, %v791_v63  ;;  %v984_v52 = vadd.f32 %v4053_v56, %v983_v19  ;;  %v6052_v2 = vpack.c.bf16 %v1058_v17, %v1056_v35  ;;  %v1069_v54 = vrot.slane %v5735_v5, 1  ;;  %v7194_v35 = vld [vmem:[#allocation33_spill] sm:$0xff] }
 0x161   : > { %v907_v26 = vpack.c.bf16 %v885_v60, %v882_v12  ;;  %v1175_v3 = vpack.c.bf16 %v992_v43, %v989_v8  ;;  %4636 = vmatpush3.bf16.msra.mxu1 %v1173_v4  ;;  %v1060_v4 = vrot.slane %v5688_v28, 1  ;;  %v1066_v45 = vsel %vm1043_vm1, %v1064_v7, %v1065_v21  ;;  %v7195_v7 = vld [vmem:[#allocation36_spill] sm:$0xff] }
 0x162   : > { %v906_v59 = vpack.c.bf16 %v877_v16, %v874_v61  ;;  %v1174_v13 = vpack.c.bf16 %v984_v52, %v981_v33  ;;  %v1072_v11 = vrot.slane %v5751_v25, 1  ;;  %v1075_v20 = vrot.slane %v5761_v44, 1 }
 0x163   : > { %v1063_v24 = vsel %vm1043_vm1, %v1060_v4, %v1062_v14  ;;  %v1061_v28 = vsel %vm1043_vm1, %v1059_v36, %v1060_v4  ;;  %v1077_v5 = vrot.slane %v5763_v47, 1  ;;  %v1079_v50 = vrot.slane %v5775_v42, 1 }
 0x164   : > { %4637 = vmatprep.subr.bf16.mxu1 %v1174_v13  ;;  %v6065_v51 = vpack.c.bf16 %v1063_v24, %v1061_v28  ;;  %v1082_v63 = vrot.slane %v5791_v22, 1  ;;  %v1084_v18 = vrot.slane %v5793_v31, 1  ;;  %v1085_v34 = vrot.slane %v5801_v48, 1  ;;  %v7197_v28 = vld [vmem:[#allocation40_spill] sm:$0xff] }
 0x165   : > { %4638 = vmatpush3.bf16.msra.mxu1 %v1174_v13  ;;  %v1067_v13 = vrot.slane %v5719_v57, 1  ;;  %v1070_v57 = vrot.slane %v5739_v10, 1  ;;  %v6085_v10 = vpack.c.bf16 %v4093_v49, %v4092_v38  ;;  %v1087_v12 = vrot.slane %v5803_v55, 1  ;;  %v7201_v49 = vld [vmem:[#allocation43_spill] sm:$0xff] }
 0x166   : > { %4639 = vmatprep.subr.bf16.mxu1 %v1175_v3  ;;  %v1086_v8 = vsel %vm1043_vm1, %v1084_v18, %v1085_v34  ;;  %v1089_v31 = vrot.slane %v5815_v9, 1  ;;  %v1090_v48 = vrot.slane %v5819_v32, 1  ;;  %v1092_v55 = vrot.slane %v5831_v46, 1  ;;  %v7205_v18 = vld [vmem:[#allocation50_spill] sm:$0xff] }
 0x167   : > { %v1068_v40 = vsel %vm1043_vm1, %v1065_v21, %v1067_v13  ;;  %v1073_v25 = vsel %vm1043_vm1, %v1070_v57, %v1072_v11  ;;  %v1071_v37 = vsel %vm1043_vm1, %v1069_v54, %v1070_v57  ;;  %v1088_v22 = vsel %vm1043_vm1, %v1085_v34, %v1087_v12  ;;  %v7196_v13 = vld [vmem:[#allocation37_spill] sm:$0xff]  ;;  %v7200_v11 = vld [vmem:[#allocation42_spill] sm:$0xff] }
 0x168   : > { %v6091_v47 = vpack.c.bf16 %v1073_v25, %v1071_v37  ;;  %v6115_v43 = vpack.c.bf16 %v1088_v22, %v1086_v8  ;;  %v1094_v23 = vrot.slane %v5833_v62, 1  ;;  %v1095_v19 = vrot.slane %v5841_v41, 1  ;;  %v7199_v54 = vld [vmem:[#allocation41_spill] sm:$0xff]  ;;  %v7207_v8 = vld [vmem:[#allocation7_spill] sm:$0xff] }
 0x169   : > { %4640 = vmatpush3.bf16.msra.mxu1 %v1175_v3  ;;  %v1097_v61 = vrot.slane %v5843_v58, 1  ;;  %v1093_v9 = vsel %vm1043_vm1, %v1090_v48, %v1092_v55  ;;  %v1091_v32 = vsel %vm1043_vm1, %v1089_v31, %v1090_v48  ;;  %v1099_v41 = vrot.slane %v5855_v0, 1  ;;  %v7208_v31 = vld [vmem:[#allocation6_spill] sm:$0xff]  ;;  %v4094_v55 = vld [vmem:[%s7060_s3 + $0x90] sm:$0xff] }
 0x16a   : > { %4673 = vmatprep.subr.bf16.mxu1 %v904_v29  ;;  %v1096_v33 = vsel %vm1043_vm1, %v1094_v23, %v1095_v19  ;;  %v6128_v16 = vpack.c.bf16 %v1093_v9, %v1091_v32  ;;  %v1100_v62 = vrot.slane %v5859_v6, 1  ;;  %v1102_v58 = vrot.slane %v5871_v39, 1  ;;  %v4095_v23 = vld [vmem:[%s7060_s3 + $0x98] sm:$0xff]  ;;  %v4097_v9 = vld [vmem:[%s7060_s3 + $0xa8] sm:$0xff] }
 0x16b   : > { %v1098_v46 = vsel %vm1043_vm1, %v1095_v19, %v1097_v61  ;;  %v1105_v17 = vrot.slane %v7193_v53, 1  ;;  %v1107_v36 = vrot.slane %v7194_v35, 1  ;;  %v1109_v21 = vrot.slane %v7195_v7, 1  ;;  %v4096_v61 = vld [vmem:[%s7060_s3 + $0xa0] sm:$0xff]  ;;  %v7210_v32 = vld [vmem:[#allocation9_spill] sm:$0xff]  ;;  %v7215_v53 = vld [vmem:[#allocation20_spill] sm:$0xff] }
 0x16c   : > { %4642 = vmatmul.mubr.msk.bf16.vlgmr.msra.gmra.mrb[8].mxu1 %vm810_vm0, %v5673_v15  ;;  %v6133_v52 = vpack.c.bf16 %v1098_v46, %v1096_v33  ;;  %v1103_v0 = vsel %vm1043_vm1, %v1100_v62, %v1102_v58  ;;  %v1101_v6 = vsel %vm1043_vm1, %v1099_v41, %v1100_v62  ;;  %v1110_v24 = vrot.slane %v7196_v13, 1  ;;  %v7211_v46 = vld [vmem:[#allocation11_spill] sm:$0xff]  ;;  %v4098_v41 = vld [vmem:[%s7060_s3 + $0xb0] sm:$0xff]  ;;  %v4099_v62 = vld [vmem:[%s7060_s3 + $0xb8] sm:$0xff] }
 0x16d   : > { %4645 = vmatprep.mubr.msk.bf16.mxu1 %vm810_vm0, %v6052_v2  ;;  %4674 = vmatpush3.bf16.msra.mxu1 %v904_v29  ;;  %v6070_v29 = vpack.c.bf16 %v1068_v40, %v1066_v45  ;;  %v1108_v39 = vsel %vm1043_vm1, %v1105_v17, %v1107_v36  ;;  %v6146_v14 = vpack.c.bf16 %v1103_v0, %v1101_v6  ;;  %v1112_v40 = vrot.slane %v7197_v28, 1  ;;  %v7217_v35 = vld [vmem:[#allocation24_spill] sm:$0xff]  ;;  %v7218_v36 = vld [vmem:[#allocation26_spill] sm:$0xff]  ;;  %v7223_v7 = vld [vmem:[#allocation45_spill] sm:$0xff] }
 0x16e   : > { %4675 = vmatprep.subr.bf16.mxu1 %v905_v27  ;;  %v1114_v57 = vrot.slane %v7199_v54, 1  ;;  %v1115_v38 = vrot.slane %v7200_v11, 1  ;;  %v1122_v34 = vrot.slane %v7205_v18, 1  ;;  %v7209_v48 = vpack.c.bf16 %v7207_v8, %v7208_v31  ;;  %v7219_v0 = vld [vmem:[#allocation28_spill] sm:$0xff]  ;;  %v7220_v6 = vld [vmem:[#allocation30_spill] sm:$0xff]  ;;  %v4107_v31 = vld [vmem:[%s7061_s4 + $0xb8] sm:$0xff] }
 0x16f   : > { %v1604_v19 = vpack.c.bf16 %v4095_v23, %v4094_v55  ;;  %v1605_v33 = vpack.c.bf16 %v4097_v9, %v4096_v61  ;;  %v1606_v58 = vpack.c.bf16 %v4099_v62, %v4098_v41  ;;  %v7225_v13 = vld [vmem:[#allocation2_spill] sm:$0xff]  ;;  %v7227_v28 = vld [vmem:[#allocation4_spill] sm:$0xff]  ;;  %v4105_v23 = vld [vmem:[%s7061_s4 + $0xa8] sm:$0xff] }
 0x170   : > { %v1116_v37 = vsel %vm1043_vm1, %v1114_v57, %v1115_v38  ;;  %v7229_v54 = vld [vmem:[#allocation8_spill] sm:$0xff]  ;;  %v7230_v57 = vld [vmem:[#allocation13_spill] sm:$0xff]  ;;  %v4104_v55 = vld [vmem:[%s7061_s4 + $0xa0] sm:$0xff] }
 0x171   : > { %4676 = vmatpush3.bf16.msra.mxu1 %v905_v27  ;;  %v1074_v27 = vrot.slane %v5753_v30, 1  ;;  %v1078_v30 = vsel %vm1043_vm1, %v1075_v20, %v1077_v5  ;;  %v1111_v5 = vsel %vm1043_vm1, %v1109_v21, %v1110_v24  ;;  %v7224_v21 = vld [vmem:[#allocation49_spill] sm:$0xff]  ;;  %v7231_v11 = vpack.c.bf16 %v7229_v54, %v7230_v57  ;;  %v4128_v54 = vld [vmem:[%s7060_s3 + $0xc0] sm:$0xff]  ;;  %v4129_v57 = vld [vmem:[%s7060_s3 + $0xc8] sm:$0xff] }
 0x172   : > { %4677 = vmatprep.subr.bf16.mxu1 %v906_v59 }
 0x173   : > { %v1076_v44 = vsel %vm1043_vm1, %v1074_v27, %v1075_v20  ;;  %v1117_v27 = vrot.slane %v7201_v49, 1  ;;  %v1113_v20 = vsel %vm1043_vm1, %v1110_v24, %v1112_v40  ;;  %v7226_v24 = vld [vmem:[#allocation3_spill] sm:$0xff]  ;;  %v7228_v40 = vld [vmem:[#allocation5_spill] sm:$0xff] }
 0x174   : > { %4646 = vmatmul.mubr.msk.bf16.gmra.mrb[12].mxu1 %vm810_vm0, %v6065_v51  ;;  %v6097_v56 = vpack.c.bf16 %v1078_v30, %v1076_v44  ;;  %v6164_v30 = vpack.c.bf16 %v1113_v20, %v1111_v5  ;;  %v7203_v44 = vld [vmem:[#allocation46_spill] sm:$0xff] }
 0x175   : > { %4649 = vmatprep.mubr.msk.bf16.mxu1 %vm810_vm0, %v6070_v29  ;;  %4678 = vmatpush3.bf16.msra.mxu1 %v906_v59  ;;  %v1080_v59 = vrot.slane %v5779_v1, 1  ;;  %v1118_v25 = vsel %vm1043_vm1, %v1115_v38, %v1117_v27  ;;  %v4102_v38 = vld [vmem:[%s7061_s4 + $0x90] sm:$0xff]  ;;  %v4103_v27 = vld [vmem:[%s7061_s4 + $0x98] sm:$0xff]  ;;  %v4100_v5 = vld [vmem:[%s7061_s4 + $0x80] sm:$0xff] }
 0x176   : > { %4679 = vmatprep.subr.bf16.mxu1 %v907_v26  ;;  %7202 = vst [vmem:[#allocation32_spill] sm:$0xff] %v6164_v30  ;;  %v6169_v12 = vpack.c.bf16 %v1118_v25, %v1116_v37  ;;  %v4101_v25 = vld [vmem:[%s7061_s4 + $0x88] sm:$0xff] }
 0x177   : > { %v1083_v42 = vsel %vm1043_vm1, %v1080_v59, %v1082_v63  ;;  %v1081_v1 = vsel %vm1043_vm1, %v1079_v50, %v1080_v59  ;;  %v1119_v50 = vrot.slane %v7203_v44, 1  ;;  %v7204_v59 = vld [vmem:[#allocation47_spill] sm:$0xff] }
 0x178   : > { %v6110_v60 = vpack.c.bf16 %v1083_v42, %v1081_v1  ;;  %v1120_v63 = vrot.slane %v7204_v59, 1  ;;  %7206 = vst [vmem:[#allocation33_spill] sm:$0xff] %v6169_v12 }
 0x179   : > { %4680 = vmatpush3.bf16.msra.mxu1 %v907_v26  ;;  %v7192_v26 = vld [vmem:[#allocation31_spill] sm:$0xff] }
 0x17a   : > { %4713 = vmatprep.subr.bf16.mxu1 %v6085_v10  ;;  %v1104_v3 = vrot.slane %v7192_v26, 1  ;;  %v1123_v42 = vsel %vm1043_vm1, %v1120_v63, %v1122_v34  ;;  %v1121_v1 = vsel %vm1043_vm1, %v1119_v50, %v1120_v63  ;;  %v7212_v26 = vld [vmem:[#allocation12_spill] sm:$0xff] }
 0x17b   : > { %v6177_v22 = vpack.c.bf16 %v1123_v42, %v1121_v1  ;;  %v4106_v1 = vld [vmem:[%s7061_s4 + $0xb0] sm:$0xff] }
 0x17c   : > { %4650 = vmatmul.mubr.msk.bf16.gmra.mrb[16].mxu1 %vm810_vm0, %v6091_v47  ;;  %v1106_v4 = vsel %vm1043_vm1, %v1104_v3, %v1105_v17  ;;  %v7213_v3 = vld [vmem:[#allocation14_spill] sm:$0xff] }
 0x17d   : > { %4653 = vmatprep.mubr.msk.bf16.mxu1 %vm810_vm0, %v6097_v56  ;;  %v6151_v45 = vpack.c.bf16 %v1108_v39, %v1106_v4  ;;  %v7216_v17 = vld [vmem:[#allocation22_spill] sm:$0xff]  ;;  %v7221_v39 = vld [vmem:[#allocation35_spill] sm:$0xff] }
 0x17e   : > { %v7222_v4 = vld [vmem:[#allocation39_spill] sm:$0xff] }
 0x17f   : > { %7198 = vst [vmem:[#allocation31_spill] sm:$0xff] %v6151_v45 }
 0x184   : > { %4654 = vmatmul.mubr.msk.bf16.gmra.mrb[20].mxu1 %vm810_vm0, %v6110_v60 }
 0x185   : > { %4657 = vmatprep.mubr.msk.bf16.mxu1 %vm810_vm0, %v6115_v43 }
 0x18c   : > { %4658 = vmatmul.mubr.msk.bf16.gmra.mrb[24].mxu1 %vm810_vm0, %v6128_v16 }
 0x18d   : > { %4661 = vmatprep.mubr.msk.bf16.mxu1 %vm810_vm0, %v6133_v52 }
 0x194   : > { %4662 = vmatmul.mubr.msk.bf16.gmra.mrb[28].mxu1 %vm810_vm0, %v6146_v14 }
 0x195   : > { %4665 = vmatprep.mubr.msk.bf16.mxu1 %vm810_vm0, %v6151_v45 }
 0x19c   : > { %4666 = vmatmul.mubr.msk.bf16.gmra.mrb[32].mxu1 %vm810_vm0, %v6164_v30 }
 0x19d   : > { %4669 = vmatprep.mubr.msk.bf16.mxu1 %vm810_vm0, %v6169_v12 }
 0x1a4   : > { %4670 = vmatmul.mubr.msk.bf16.gmra.mrb[36].mxu1 %vm810_vm0, %v6177_v22 }
 0x1a5   : > { %4681 = vmatprep.mubr.msk.bf16.mxu1 %vm810_vm0, %v7209_v48 }
 0x1ac   : > { %4682 = vmatmul.mubr.msk.bf16.vlgmr.msra.gmra.mrb[8].mxu1 %vm810_vm0, %v7210_v32 }
 0x1ad   : > { %4685 = vmatprep.mubr.msk.bf16.mxu1 %vm810_vm0, %v7211_v46  ;;  %4714 = vmatpush3.bf16.msra.mxu1 %v6085_v10  ;;  %v7214_v10 = vld [vmem:[#allocation18_spill] sm:$0xff] }
 0x1ae   : > { %4715 = vmatprep.subr.bf16.mxu1 %v1604_v19 }
 0x1b1   : > { %4716 = vmatpush3.bf16.msra.mxu1 %v1604_v19 }
 0x1b2   : > { %4717 = vmatprep.subr.bf16.mxu1 %v1605_v33 }
 0x1b4   : > { %4686 = vmatmul.mubr.msk.bf16.gmra.mrb[12].mxu1 %vm810_vm0, %v7212_v26 }
 0x1b5   : > { %4689 = vmatprep.mubr.msk.bf16.mxu1 %vm810_vm0, %v7213_v3  ;;  %4718 = vmatpush3.bf16.msra.mxu1 %v1605_v33 }
 0x1b6   : > { %4719 = vmatprep.subr.bf16.mxu1 %v1606_v58 }
 0x1b9   : > { %4720 = vmatpush3.bf16.msra.mxu1 %v1606_v58 }
 0x1bc   : > { %4690 = vmatmul.mubr.msk.bf16.gmra.mrb[16].mxu1 %vm810_vm0, %v7214_v10 }
 0x1bd   : > { %4693 = vmatprep.mubr.msk.bf16.mxu1 %vm810_vm0, %v7215_v53 }
 0x1c4   : > { %4694 = vmatmul.mubr.msk.bf16.gmra.mrb[20].mxu1 %vm810_vm0, %v7216_v17 }
 0x1c5   : > { %4697 = vmatprep.mubr.msk.bf16.mxu1 %vm810_vm0, %v7217_v35 }
 0x1cc   : > { %4698 = vmatmul.mubr.msk.bf16.gmra.mrb[24].mxu1 %vm810_vm0, %v7218_v36 }
 0x1cd   : > { %4701 = vmatprep.mubr.msk.bf16.mxu1 %vm810_vm0, %v7219_v0 }
 0x1d4   : > { %4702 = vmatmul.mubr.msk.bf16.gmra.mrb[28].mxu1 %vm810_vm0, %v7220_v6 }
 0x1d5   : > { %4705 = vmatprep.mubr.msk.bf16.mxu1 %vm810_vm0, %v7221_v39 }
 0x1dc   : > { %4706 = vmatmul.mubr.msk.bf16.gmra.mrb[32].mxu1 %vm810_vm0, %v7222_v4 }
 0x1dd   : > { %4709 = vmatprep.mubr.msk.bf16.mxu1 %vm810_vm0, %v7223_v7 }
 0x1e4   : > { %4710 = vmatmul.mubr.msk.bf16.gmra.mrb[36].mxu1 %vm810_vm0, %v7224_v21 }
 0x1e5   : > { %4721 = vmatprep.mubr.msk.bf16.mxu1 %vm810_vm0, %v7225_v13 }
 0x1ec   : > { %4722 = vmatmul.mubr.msk.bf16.vlgmr.msra.gmra.mrb[40].mxu1 %vm810_vm0, %v7226_v24 }
 0x1ed   : > { %4725 = vmatprep.mubr.msk.bf16.mxu1 %vm810_vm0, %v7227_v28 }
 0x1f4   : > { %4726 = vmatmul.mubr.msk.bf16.gmra.mrb[44].mxu1 %vm810_vm0, %v7228_v40 }
 0x1f5   : > { %4737 = vmatprep.mubr.msk.bf16.mxu1 %vm810_vm0, %v7231_v11  ;;  %v2064_v11 = vpack.c.bf16 %v4129_v57, %v4128_v54 }
 0x2bf   : > { %v4723_v49 = vpop.f32.mrb[40].mxu1 }
 0x2c0   : > { %v1650_v20 = vpop.f32.mrb[41].mxu1  ;;  %v1659_v44 = vadd.f32 %v4723_v49, %v4102_v38  ;;  %v4130_v38 = vld [vmem:[%s7060_s3 + $0xd0] sm:$0xff]  ;;  %v4131_v49 = vld [vmem:[%s7060_s3 + $0xd8] sm:$0xff] }
 0x2c1   : > { %v4724_v37 = vpop.f32.mrb[42].mxu1  ;;  %v1651_v63 = vadd.f32 %v4100_v5, %v1650_v20  ;;  %v4132_v20 = vld [vmem:[%s7060_s3 + $0xe0] sm:$0xff]  ;;  %v4133_v5 = vld [vmem:[%s7060_s3 + $0xe8] sm:$0xff] }
 0x2c2   : > { %v1662_v50 = vadd.f32 %v4724_v37, %v4103_v27  ;;  %v1653_v59 = vpop.f32.mrb[43].mxu1  ;;  %v2065_v27 = vpack.c.bf16 %v4131_v49, %v4130_v38  ;;  %v7233_v37 = vld [vmem:[#allocation15_spill] sm:$0xff] }
 0x2c3   : > { %v1654_v18 = vadd.f32 %v4101_v25, %v1653_v59  ;;  %v7232_v25 = vld [vmem:[#allocation10_spill] sm:$0xff]  ;;  %v4135_v59 = vld [vmem:[%s7060_s3 + $0xf8] sm:$0xff] }
 0x2c4   : > { %v1811_v34 = vpack.c.bf16 %v1662_v50, %v1659_v44  ;;  %v2066_v44 = vpack.c.bf16 %v4133_v5, %v4132_v20  ;;  %v4134_v50 = vld [vmem:[%s7060_s3 + $0xf0] sm:$0xff] }
 0x2c5   : > { %v1810_v42 = vpack.c.bf16 %v1654_v18, %v1651_v63  ;;  %v2067_v63 = vpack.c.bf16 %v4135_v59, %v4134_v50  ;;  %v7234_v18 = vld [vmem:[#allocation16_spill] sm:$0xff]  ;;  %v4139_v59 = vld [vmem:[%s7061_s4 + $0xd8] sm:$0xff] }
 0x2c7   : > { %v4727_v8 = vpop.f32.mrb[44].mxu1  ;;  %4729 = vmatprep.subr.bf16.mxu1 %v1810_v42 }
 0x2c8   : > { %v1666_v48 = vpop.f32.mrb[45].mxu1  ;;  %4730 = vmatpush3.bf16.msra.mxu1 %v1810_v42  ;;  %v1675_v61 = vadd.f32 %v4727_v8, %v4106_v1  ;;  %v7236_v42 = vld [vmem:[#allocation19_spill] sm:$0xff]  ;;  %v7237_v1 = vld [vmem:[#allocation21_spill] sm:$0xff] }
 0x2c9   : > { %v4728_v19 = vpop.f32.mrb[46].mxu1  ;;  %4731 = vmatprep.subr.bf16.mxu1 %v1811_v34  ;;  %v1667_v33 = vadd.f32 %v4104_v55, %v1666_v48  ;;  %v7238_v8 = vld [vmem:[#allocation23_spill] sm:$0xff]  ;;  %v7241_v55 = vld [vmem:[#allocation29_spill] sm:$0xff] }
 0x2ca   : > { %v1678_v9 = vadd.f32 %v4728_v19, %v4107_v31  ;;  %v1669_v32 = vpop.f32.mrb[47].mxu1  ;;  %v7239_v31 = vld [vmem:[#allocation25_spill] sm:$0xff]  ;;  %v7240_v48 = vld [vmem:[#allocation27_spill] sm:$0xff]  ;;  %v7243_v19 = vld [vmem:[#allocation38_spill] sm:$0xff] }
 0x2cb   : > { %v1670_v41 = vadd.f32 %v4105_v23, %v1669_v32  ;;  %v7242_v23 = vld [vmem:[#allocation34_spill] sm:$0xff]  ;;  %v7246_v32 = vld [vmem:[#allocation53_spill] sm:$0xff] }
 0x2cc   : > { %v1813_v62 = vpack.c.bf16 %v1678_v9, %v1675_v61  ;;  %4732 = vmatpush3.bf16.msra.mxu1 %v1811_v34  ;;  %v7235_v34 = vld [vmem:[#allocation17_spill] sm:$0xff]  ;;  %v7244_v61 = vld [vmem:[#allocation44_spill] sm:$0xff] }
 0x2cd   : > { %v1812_v58 = vpack.c.bf16 %v1670_v41, %v1667_v33  ;;  %v7245_v9 = vld [vmem:[#allocation48_spill] sm:$0xff] }
 0x2cf   : > { %4733 = vmatprep.subr.bf16.mxu1 %v1812_v58 }
 0x2d0   : > { %4734 = vmatpush3.bf16.msra.mxu1 %v1812_v58 }
 0x2d1   : > { %4735 = vmatprep.subr.bf16.mxu1 %v1813_v62 }
 0x2d4   : > { %4736 = vmatpush3.bf16.msra.mxu1 %v1813_v62 }
 0x2d5   : > { %4769 = vmatprep.subr.bf16.mxu1 %v2064_v11 }
 0x2d7   : > { %4738 = vmatmul.mubr.msk.bf16.vlgmr.msra.gmra.mrb[8].mxu1 %vm810_vm0, %v7232_v25 }
 0x2d8   : > { %4741 = vmatprep.mubr.msk.bf16.mxu1 %vm810_vm0, %v7233_v37  ;;  %4770 = vmatpush3.bf16.msra.mxu1 %v2064_v11 }
 0x2d9   : > { %4771 = vmatprep.subr.bf16.mxu1 %v2065_v27 }
 0x2dc   : > { %4772 = vmatpush3.bf16.msra.mxu1 %v2065_v27 }
 0x2dd   : > { %4773 = vmatprep.subr.bf16.mxu1 %v2066_v44 }
 0x2df   : > { %4742 = vmatmul.mubr.msk.bf16.gmra.mrb[12].mxu1 %vm810_vm0, %v7234_v18 }
 0x2e0   : > { %4745 = vmatprep.mubr.msk.bf16.mxu1 %vm810_vm0, %v7235_v34  ;;  %4774 = vmatpush3.bf16.msra.mxu1 %v2066_v44  ;;  %v4138_v44 = vld [vmem:[%s7061_s4 + $0xd0] sm:$0xff] }
 0x2e1   : > { %4775 = vmatprep.subr.bf16.mxu1 %v2067_v63 }
 0x2e4   : > { %4776 = vmatpush3.bf16.msra.mxu1 %v2067_v63 }
 0x2e7   : > { %4746 = vmatmul.mubr.msk.bf16.gmra.mrb[16].mxu1 %vm810_vm0, %v7236_v42 }
 0x2e8   : > { %4749 = vmatprep.mubr.msk.bf16.mxu1 %vm810_vm0, %v7237_v1 }
 0x2ef   : > { %4750 = vmatmul.mubr.msk.bf16.gmra.mrb[20].mxu1 %vm810_vm0, %v7238_v8 }
 0x2f0   : > { %4753 = vmatprep.mubr.msk.bf16.mxu1 %vm810_vm0, %v7239_v31 }
 0x2f7   : > { %4754 = vmatmul.mubr.msk.bf16.gmra.mrb[24].mxu1 %vm810_vm0, %v7240_v48 }
 0x2f8   : > { %4757 = vmatprep.mubr.msk.bf16.mxu1 %vm810_vm0, %v7241_v55 }
 0x2ff   : > { %4758 = vmatmul.mubr.msk.bf16.gmra.mrb[28].mxu1 %vm810_vm0, %v7242_v23 }
 0x300   : > { %4761 = vmatprep.mubr.msk.bf16.mxu1 %vm810_vm0, %v7243_v19 }
 0x307   : > { %4762 = vmatmul.mubr.msk.bf16.gmra.mrb[32].mxu1 %vm810_vm0, %v7244_v61 }
 0x308   : > { %4765 = vmatprep.mubr.msk.bf16.mxu1 %vm810_vm0, %v7245_v9 }
 0x30f   : > { %4766 = vmatmul.mubr.msk.bf16.gmra.mrb[36].mxu1 %vm810_vm0, %v7246_v32 }
 0x310   : > { %4777 = vmatprep.mubr.msk.bf16.mxu1 %vm810_vm0, %v7225_v13 }
 0x317   : > { %4778 = vmatmul.mubr.msk.bf16.vlgmr.msra.gmra.mrb[48].mxu1 %vm810_vm0, %v7226_v24 }
 0x318   : > { %4781 = vmatprep.mubr.msk.bf16.mxu1 %vm810_vm0, %v7227_v28 }
 0x31f   : > { %4782 = vmatmul.mubr.msk.bf16.gmra.mrb[52].mxu1 %vm810_vm0, %v7228_v40 }
 0x320   : > { %4805 = vmatprep.mubr.msk.bf16.mxu1 %vm810_vm0, %v7216_v17  ;;  %v4143_v17 = vld [vmem:[%s7061_s4 + $0xf8] sm:$0xff] }
 0x3aa   : > { %v6334_v33 = vpop.f32.mrb[8].mxu1 }
 0x3ab   : > { %7247 = vst [vmem:[#allocation36_spill] sm:$0xff] %v6334_v33  ;;  %v6336_v41 = vpop.f32.mrb[9].mxu1 }
 0x3ac   : > { %7248 = vst [vmem:[#allocation37_spill] sm:$0xff] %v6336_v41  ;;  %v6338_v62 = vpop.f32.mrb[10].mxu1  ;;  %v4142_v41 = vld [vmem:[%s7061_s4 + $0xf0] sm:$0xff] }
 0x3ad   : > { %7249 = vst [vmem:[#allocation40_spill] sm:$0xff] %v6338_v62  ;;  %v6340_v58 = vpop.f32.mrb[11].mxu1 }
 0x3ae   : > { %7250 = vst [vmem:[#allocation41_spill] sm:$0xff] %v6340_v58 }
 0x3b2   : > { %v6342_v54 = vpop.f32.mrb[12].mxu1 }
 0x3b3   : > { %7251 = vst [vmem:[#allocation42_spill] sm:$0xff] %v6342_v54  ;;  %v6344_v57 = vpop.f32.mrb[13].mxu1 }
 0x3b4   : > { %7252 = vst [vmem:[#allocation43_spill] sm:$0xff] %v6344_v57  ;;  %v6346_v11 = vpop.f32.mrb[14].mxu1 }
 0x3b5   : > { %7253 = vst [vmem:[#allocation46_spill] sm:$0xff] %v6346_v11  ;;  %v6348_v38 = vpop.f32.mrb[15].mxu1 }
 0x3b6   : > { %7254 = vst [vmem:[#allocation47_spill] sm:$0xff] %v6348_v38 }
 0x3ba   : > { %v6350_v49 = vpop.f32.mrb[16].mxu1 }
 0x3bb   : > { %7255 = vst [vmem:[#allocation50_spill] sm:$0xff] %v6350_v49  ;;  %v6352_v27 = vpop.f32.mrb[17].mxu1  ;;  %v4136_v49 = vld [vmem:[%s7061_s4 + $0xc0] sm:$0xff] }
 0x3bc   : > { %7256 = vst [vmem:[#allocation7_spill] sm:$0xff] %v6352_v27  ;;  %v6354_v20 = vpop.f32.mrb[18].mxu1 }
 0x3bd   : > { %7257 = vst [vmem:[#allocation6_spill] sm:$0xff] %v6354_v20  ;;  %v6356_v5 = vpop.f32.mrb[19].mxu1  ;;  %v4137_v20 = vld [vmem:[%s7061_s4 + $0xc8] sm:$0xff] }
 0x3be   : > { %7258 = vst [vmem:[#allocation9_spill] sm:$0xff] %v6356_v5 }
 0x3ea   : > { %v4779_v50 = vpop.f32.mrb[48].mxu1 }
 0x3eb   : > { %v2111_v63 = vpop.f32.mrb[49].mxu1  ;;  %v2120_v5 = vadd.f32 %v4779_v50, %v4138_v44 }
 0x3ec   : > { %v4780_v27 = vpop.f32.mrb[50].mxu1  ;;  %v2112_v57 = vadd.f32 %v4136_v49, %v2111_v63  ;;  %v4169_v63 = vld [vmem:[%s7060_s3 + $0x128] sm:$0xff] }
 0x3ed   : > { %v2123_v38 = vadd.f32 %v4780_v27, %v4139_v59  ;;  %v2114_v11 = vpop.f32.mrb[51].mxu1  ;;  %v4140_v27 = vld [vmem:[%s7061_s4 + $0xe0] sm:$0xff]  ;;  %v4165_v59 = vld [vmem:[%s7060_s3 + $0x108] sm:$0xff] }
 0x3ee   : > { %v2115_v54 = vadd.f32 %v4137_v20, %v2114_v11 }
 0x3ef   : > { %v2144_v58 = vpack.c.bf16 %v2123_v38, %v2120_v5 }
 0x3f0   : > { %v2143_v62 = vpack.c.bf16 %v2115_v54, %v2112_v57  ;;  %v4141_v54 = vld [vmem:[%s7061_s4 + $0xe8] sm:$0xff] }
 0x3f2   : > { %v4783_v33 = vpop.f32.mrb[52].mxu1  ;;  %4785 = vmatprep.subr.bf16.mxu0 %v2143_v62  ;;  %5105 = vmatprep.subr.bf16.mxu1 %v2143_v62 }
 0x3f3   : > { %v2127_v32 = vpop.f32.mrb[53].mxu1  ;;  %4786 = vmatpush3.bf16.msra.mxu0 %v2143_v62  ;;  %5109 = vmatpush3.bf16.msra.mxu1 %v2143_v62  ;;  %v2136_v11 = vadd.f32 %v4783_v33, %v4142_v41  ;;  %v4164_v62 = vld [vmem:[%s7060_s3 + $0x100] sm:$0xff]  ;;  %v4167_v33 = vld [vmem:[%s7060_s3 + $0x118] sm:$0xff] }
 0x3f4   : > { %v4784_v57 = vpop.f32.mrb[54].mxu1  ;;  %4787 = vmatprep.subr.bf16.mxu0 %v2144_v58  ;;  %5106 = vmatprep.subr.bf16.mxu1 %v2144_v58  ;;  %v2128_v20 = vadd.f32 %v4140_v27, %v2127_v32  ;;  %v4166_v32 = vld [vmem:[%s7060_s3 + $0x110] sm:$0xff] }
 0x3f5   : > { %v2139_v38 = vadd.f32 %v4784_v57, %v4143_v17  ;;  %v2130_v49 = vpop.f32.mrb[55].mxu1  ;;  %v2352_v17 = vpack.c.bf16 %v4165_v59, %v4164_v62  ;;  %v2353_v41 = vpack.c.bf16 %v4167_v33, %v4166_v32  ;;  %v4171_v57 = vld [vmem:[%s7060_s3 + $0x138] sm:$0xff]  ;;  %v4205_v32 = vld [vmem:[%s7060_s3 + $0x168] sm:$0xff] }
 0x3f6   : > { %v2131_v5 = vadd.f32 %v4141_v54, %v2130_v49  ;;  %v4170_v54 = vld [vmem:[%s7060_s3 + $0x130] sm:$0xff]  ;;  %v4201_v49 = vld [vmem:[%s7060_s3 + $0x148] sm:$0xff]  ;;  %v4203_v62 = vld [vmem:[%s7060_s3 + $0x158] sm:$0xff] }
 0x3f7   : > { %v2146_v44 = vpack.c.bf16 %v2139_v38, %v2136_v11  ;;  %4788 = vmatpush3.bf16.msra.mxu0 %v2144_v58  ;;  %5110 = vmatpush3.bf16.msra.mxu1 %v2144_v58  ;;  %v4168_v58 = vld [vmem:[%s7060_s3 + $0x120] sm:$0xff]  ;;  %v2355_v11 = vpack.c.bf16 %v4171_v57, %v4170_v54  ;;  %v4237_v54 = vld [vmem:[%s7060_s3 + $0x188] sm:$0xff] }
 0x3f8   : > { %v2145_v50 = vpack.c.bf16 %v2131_v5, %v2128_v20  ;;  %v2354_v27 = vpack.c.bf16 %v4169_v63, %v4168_v58  ;;  %v4200_v38 = vld [vmem:[%s7060_s3 + $0x140] sm:$0xff]  ;;  %v7259_v5 = vld [vmem:[#allocation51_spill] sm:$0xff]  ;;  %v4207_v58 = vld [vmem:[%s7060_s3 + $0x178] sm:$0xff] }
 0x3f9   : > { %v2650_v20 = vpack.c.bf16 %v4201_v49, %v4200_v38  ;;  %v4239_v38 = vld [vmem:[%s7060_s3 + $0x198] sm:$0xff] }
 0x3fa   : > { %4789 = vmatprep.subr.bf16.mxu0 %v2145_v50  ;;  %5107 = vmatprep.subr.bf16.mxu1 %v2145_v50 }
 0x3fb   : > { %4790 = vmatpush3.bf16.msra.mxu0 %v2145_v50  ;;  %5111 = vmatpush3.bf16.msra.mxu1 %v2145_v50 }
 0x3fc   : > { %4791 = vmatprep.subr.bf16.mxu0 %v2146_v44  ;;  %5108 = vmatprep.subr.bf16.mxu1 %v2146_v44 }
 0x3ff   : > { %4792 = vmatpush3.bf16.msra.mxu0 %v2146_v44  ;;  %5112 = vmatpush3.bf16.msra.mxu1 %v2146_v44  ;;  %v7260_v44 = vld [vmem:[#allocation52_spill] sm:$0xff] }
 0x400   : > { %4825 = vmatprep.subr.bf16.mxu1 %v2352_v17  ;;  %v6442_v50 = vpack.c.bf16 %v7260_v44, %v7259_v5  ;;  %v4241_v5 = vld [vmem:[%s7060_s3 + $0x1a8] sm:$0xff] }
 0x402   : > { %4794 = vmatmul.mubr.msk.bf16.vlgmr.msra.gmra.mrb[8].mxu0 %vm810_vm0, %v7211_v46  ;;  %4806 = vmatmul.mubr.msk.bf16.vlgmr.msra.gmra.mrb[20].mxu1 %vm810_vm0, %v7217_v35 }
 0x403   : > { %4797 = vmatprep.mubr.msk.bf16.mxu0 %vm810_vm0, %v7212_v26  ;;  %4809 = vmatprep.mubr.msk.bf16.mxu1 %vm810_vm0, %v7218_v36 }
 0x404   : > { %4826 = vmatpush3.bf16.msra.mxu1 %v2352_v17  ;;  %v4204_v17 = vld [vmem:[%s7060_s3 + $0x160] sm:$0xff] }
 0x405   : > { %4827 = vmatprep.subr.bf16.mxu1 %v2353_v41  ;;  %v2652_v33 = vpack.c.bf16 %v4205_v32, %v4204_v17  ;;  %v4272_v17 = vld [vmem:[%s7060_s3 + $0x1c0] sm:$0xff]  ;;  %v4273_v32 = vld [vmem:[%s7060_s3 + $0x1c8] sm:$0xff] }
 0x408   : > { %4828 = vmatpush3.bf16.msra.mxu1 %v2353_v41  ;;  %v4206_v41 = vld [vmem:[%s7060_s3 + $0x170] sm:$0xff] }
 0x409   : > { %4829 = vmatprep.subr.bf16.mxu1 %v2354_v27  ;;  %v2653_v63 = vpack.c.bf16 %v4207_v58, %v4206_v41  ;;  %v4274_v41 = vld [vmem:[%s7060_s3 + $0x1d0] sm:$0xff]  ;;  %v4275_v58 = vld [vmem:[%s7060_s3 + $0x1d8] sm:$0xff] }
 0x40a   : > { %4798 = vmatmul.mubr.msk.bf16.gmra.mrb[12].mxu0 %vm810_vm0, %v7213_v3  ;;  %4810 = vmatmul.mubr.msk.bf16.gmra.mrb[24].mxu1 %vm810_vm0, %v7219_v0 }
 0x40b   : > { %4801 = vmatprep.mubr.msk.bf16.mxu0 %vm810_vm0, %v7214_v10  ;;  %4813 = vmatprep.mubr.msk.bf16.mxu1 %vm810_vm0, %v7220_v6 }
 0x40c   : > { %4830 = vmatpush3.bf16.msra.mxu1 %v2354_v27  ;;  %v4236_v27 = vld [vmem:[%s7060_s3 + $0x180] sm:$0xff] }
 0x40d   : > { %4831 = vmatprep.subr.bf16.mxu1 %v2355_v11  ;;  %v2945_v57 = vpack.c.bf16 %v4237_v54, %v4236_v27  ;;  %v4276_v27 = vld [vmem:[%s7060_s3 + $0x1e0] sm:$0xff]  ;;  %v4277_v54 = vld [vmem:[%s7060_s3 + $0x1e8] sm:$0xff] }
 0x410   : > { %4832 = vmatpush3.bf16.msra.mxu1 %v2355_v11  ;;  %v4238_v11 = vld [vmem:[%s7060_s3 + $0x190] sm:$0xff] }
 0x411   : > { %4881 = vmatprep.subr.bf16.mxu1 %v2650_v20  ;;  %v2946_v49 = vpack.c.bf16 %v4239_v38, %v4238_v11  ;;  %v4278_v11 = vld [vmem:[%s7060_s3 + $0x1f0] sm:$0xff]  ;;  %v4279_v38 = vld [vmem:[%s7060_s3 + $0x1f8] sm:$0xff] }
 0x412   : > { %4802 = vmatmul.mubr.msk.bf16.gmra.mrb[16].mxu0 %vm810_vm0, %v7215_v53  ;;  %4814 = vmatmul.mubr.msk.bf16.gmra.mrb[28].mxu1 %vm810_vm0, %v7221_v39 }
 0x413   : > { %4817 = vmatprep.mubr.msk.bf16.mxu1 %vm810_vm0, %v7222_v4  ;;  %4849 = vmatprep.mubr.msk.bf16.mxu0 %vm810_vm0, %v5673_v15  ;;  %v4202_v15 = vld [vmem:[%s7060_s3 + $0x150] sm:$0xff] }
 0x414   : > { %v2651_v59 = vpack.c.bf16 %v4203_v62, %v4202_v15  ;;  %v4242_v15 = vld [vmem:[%s7060_s3 + $0x1b0] sm:$0xff]  ;;  %v4243_v62 = vld [vmem:[%s7060_s3 + $0x1b8] sm:$0xff] }
 0x41a   : > { %4818 = vmatmul.mubr.msk.bf16.gmra.mrb[32].mxu1 %vm810_vm0, %v7223_v7 }
 0x41b   : > { %4821 = vmatprep.mubr.msk.bf16.mxu1 %vm810_vm0, %v7224_v21 }
 0x422   : > { %4822 = vmatmul.mubr.msk.bf16.gmra.mrb[36].mxu1 %vm810_vm0, %v6442_v50 }
 0x423   : > { %4833 = vmatprep.mubr.msk.bf16.mxu1 %vm810_vm0, %v7225_v13 }
 0x42a   : > { %4834 = vmatmul.mubr.msk.bf16.vlgmr.msra.gmra.mrb[56].mxu1 %vm810_vm0, %v7226_v24 }
 0x42b   : > { %4837 = vmatprep.mubr.msk.bf16.mxu1 %vm810_vm0, %v7227_v28  ;;  %4882 = vmatpush3.bf16.msra.mxu1 %v2650_v20  ;;  %v4240_v20 = vld [vmem:[%s7060_s3 + $0x1a0] sm:$0xff] }
 0x42c   : > { %4883 = vmatprep.subr.bf16.mxu1 %v2651_v59  ;;  %v2947_v44 = vpack.c.bf16 %v4241_v5, %v4240_v20  ;;  %v4308_v20 = vld [vmem:[%s7060_s3 + $0x200] sm:$0xff]  ;;  %v4309_v5 = vld [vmem:[%s7060_s3 + $0x208] sm:$0xff] }
 0x42f   : > { %4884 = vmatpush3.bf16.msra.mxu1 %v2651_v59  ;;  %v2948_v59 = vpack.c.bf16 %v4243_v62, %v4242_v15  ;;  %v4310_v15 = vld [vmem:[%s7060_s3 + $0x210] sm:$0xff]  ;;  %v4311_v62 = vld [vmem:[%s7060_s3 + $0x218] sm:$0xff] }
 0x430   : > { %4885 = vmatprep.subr.bf16.mxu1 %v2652_v33 }
 0x432   : > { %4838 = vmatmul.mubr.msk.bf16.gmra.mrb[60].mxu1 %vm810_vm0, %v7228_v40 }
 0x433   : > { %4886 = vmatpush3.bf16.msra.mxu1 %v2652_v33  ;;  %4889 = vmatprep.mubr.msk.bf16.mxu1 %vm810_vm0, %v7225_v13  ;;  %v3233_v33 = vpack.c.bf16 %v4273_v32, %v4272_v17  ;;  %v4312_v17 = vld [vmem:[%s7060_s3 + $0x220] sm:$0xff]  ;;  %v4313_v32 = vld [vmem:[%s7060_s3 + $0x228] sm:$0xff] }
 0x434   : > { %4887 = vmatprep.subr.bf16.mxu1 %v2653_v63 }
 0x437   : > { %4888 = vmatpush3.bf16.msra.mxu1 %v2653_v63  ;;  %v3234_v63 = vpack.c.bf16 %v4275_v58, %v4274_v41  ;;  %v4314_v41 = vld [vmem:[%s7060_s3 + $0x230] sm:$0xff]  ;;  %v4315_v58 = vld [vmem:[%s7060_s3 + $0x238] sm:$0xff] }
 0x438   : > { %4937 = vmatprep.subr.bf16.mxu1 %v2945_v57 }
 0x43a   : > { %4890 = vmatmul.mubr.msk.bf16.vlgmr.msra.gmra.mrb[64].mxu1 %vm810_vm0, %v7226_v24 }
 0x43b   : > { %4893 = vmatprep.mubr.msk.bf16.mxu1 %vm810_vm0, %v7227_v28  ;;  %4938 = vmatpush3.bf16.msra.mxu1 %v2945_v57  ;;  %v3235_v57 = vpack.c.bf16 %v4277_v54, %v4276_v27 }
 0x43c   : > { %4939 = vmatprep.subr.bf16.mxu1 %v2946_v49 }
 0x43f   : > { %4940 = vmatpush3.bf16.msra.mxu1 %v2946_v49  ;;  %v3236_v49 = vpack.c.bf16 %v4279_v38, %v4278_v11 }
 0x440   : > { %4941 = vmatprep.subr.bf16.mxu1 %v2947_v44 }
 0x442   : > { %4894 = vmatmul.mubr.msk.bf16.gmra.mrb[68].mxu1 %vm810_vm0, %v7228_v40 }
 0x443   : > { %4942 = vmatpush3.bf16.msra.mxu1 %v2947_v44  ;;  %4945 = vmatprep.mubr.msk.bf16.mxu1 %vm810_vm0, %v7225_v13  ;;  %v3531_v44 = vpack.c.bf16 %v4309_v5, %v4308_v20 }
 0x444   : > { %4943 = vmatprep.subr.bf16.mxu1 %v2948_v59 }
 0x447   : > { %4944 = vmatpush3.bf16.msra.mxu1 %v2948_v59  ;;  %v3532_v59 = vpack.c.bf16 %v4311_v62, %v4310_v15 }
 0x448   : > { %4993 = vmatprep.subr.bf16.mxu1 %v3233_v33 }
 0x44a   : > { %4946 = vmatmul.mubr.msk.bf16.vlgmr.msra.gmra.mrb[72].mxu1 %vm810_vm0, %v7226_v24 }
 0x44b   : > { %4949 = vmatprep.mubr.msk.bf16.mxu1 %vm810_vm0, %v7227_v28  ;;  %4994 = vmatpush3.bf16.msra.mxu1 %v3233_v33  ;;  %v3533_v33 = vpack.c.bf16 %v4313_v32, %v4312_v17 }
 0x44c   : > { %4995 = vmatprep.subr.bf16.mxu1 %v3234_v63 }
 0x44f   : > { %4996 = vmatpush3.bf16.msra.mxu1 %v3234_v63  ;;  %v3534_v63 = vpack.c.bf16 %v4315_v58, %v4314_v41  ;;  %v4174_v58 = vld [vmem:[%s7061_s4 + $0x110] sm:$0xff] }
 0x450   : > { %4997 = vmatprep.subr.bf16.mxu1 %v3235_v57 }
 0x452   : > { %4950 = vmatmul.mubr.msk.bf16.gmra.mrb[76].mxu1 %vm810_vm0, %v7228_v40 }
 0x453   : > { %4998 = vmatpush3.bf16.msra.mxu1 %v3235_v57  ;;  %5001 = vmatprep.mubr.msk.bf16.mxu1 %vm810_vm0, %v7225_v13 }
 0x454   : > { %4999 = vmatprep.subr.bf16.mxu1 %v3236_v49 }
 0x457   : > { %5000 = vmatpush3.bf16.msra.mxu1 %v3236_v49 }
 0x458   : > { %5049 = vmatprep.subr.bf16.mxu1 %v3531_v44 }
 0x45a   : > { %5002 = vmatmul.mubr.msk.bf16.vlgmr.msra.gmra.mrb[80].mxu1 %vm810_vm0, %v7226_v24 }
 0x45b   : > { %5005 = vmatprep.mubr.msk.bf16.mxu1 %vm810_vm0, %v7227_v28  ;;  %5050 = vmatpush3.bf16.msra.mxu1 %v3531_v44 }
 0x45c   : > { %5051 = vmatprep.subr.bf16.mxu1 %v3532_v59 }
 0x45f   : > { %5052 = vmatpush3.bf16.msra.mxu1 %v3532_v59 }
 0x460   : > { %5053 = vmatprep.subr.bf16.mxu1 %v3533_v33 }
 0x462   : > { %5006 = vmatmul.mubr.msk.bf16.gmra.mrb[84].mxu1 %vm810_vm0, %v7228_v40 }
 0x463   : > { %5054 = vmatpush3.bf16.msra.mxu1 %v3533_v33  ;;  %5057 = vmatprep.mubr.msk.bf16.mxu1 %vm810_vm0, %v7225_v13 }
 0x464   : > { %5055 = vmatprep.subr.bf16.mxu1 %v3534_v63 }
 0x467   : > { %5056 = vmatpush3.bf16.msra.mxu1 %v3534_v63 }
 0x46a   : > { %5058 = vmatmul.mubr.msk.bf16.vlgmr.msra.gmra.mrb[88].mxu1 %vm810_vm0, %v7226_v24 }
 0x46b   : > { %5061 = vmatprep.mubr.msk.bf16.mxu1 %vm810_vm0, %v7227_v28 }
 0x472   : > { %5062 = vmatmul.mubr.msk.bf16.gmra.mrb[92].mxu1 %vm810_vm0, %v7228_v40 }
 0x4d5   : > { %v6576_v27 = vpop.f32.mrb[20].mxu1 }
 0x4d6   : > { %7261 = vst [vmem:[#allocation11_spill] sm:$0xff] %v6576_v27  ;;  %v6578_v54 = vpop.f32.mrb[21].mxu1 }
 0x4d7   : > { %7262 = vst [vmem:[#allocation12_spill] sm:$0xff] %v6578_v54  ;;  %v6580_v57 = vpop.f32.mrb[22].mxu1  ;;  %v4318_v54 = vld [vmem:[%s7061_s4 + $0x210] sm:$0xff] }
 0x4d8   : > { %7263 = vst [vmem:[#allocation14_spill] sm:$0xff] %v6580_v57  ;;  %v6582_v11 = vpop.f32.mrb[23].mxu1 }
 0x4d9   : > { %7264 = vst [vmem:[#allocation18_spill] sm:$0xff] %v6582_v11 }
 0x4dd   : > { %v6584_v13 = vpop.f32.mrb[24].mxu1 }
 0x4de   : > { %7265 = vst [vmem:[#allocation20_spill] sm:$0xff] %v6584_v13  ;;  %v6586_v38 = vpop.f32.mrb[25].mxu1 }
 0x4df   : > { %7266 = vst [vmem:[#allocation24_spill] sm:$0xff] %v6586_v38  ;;  %v6588_v49 = vpop.f32.mrb[26].mxu1  ;;  %v4179_v38 = vld [vmem:[%s7061_s4 + $0x138] sm:$0xff] }
 0x4e0   : > { %7267 = vst [vmem:[#allocation26_spill] sm:$0xff] %v6588_v49  ;;  %v6590_v24 = vpop.f32.mrb[27].mxu1 }
 0x4e1   : > { %7268 = vst [vmem:[#allocation28_spill] sm:$0xff] %v6590_v24  ;;  %v4178_v24 = vld [vmem:[%s7061_s4 + $0x130] sm:$0xff] }
 0x4e5   : > { %v6592_v28 = vpop.f32.mrb[28].mxu1 }
 0x4e6   : > { %7269 = vst [vmem:[#allocation30_spill] sm:$0xff] %v6592_v28  ;;  %v6594_v20 = vpop.f32.mrb[29].mxu1 }
 0x4e7   : > { %7270 = vst [vmem:[#allocation35_spill] sm:$0xff] %v6594_v20  ;;  %v6596_v40 = vpop.f32.mrb[30].mxu1 }
 0x4e8   : > { %7271 = vst [vmem:[#allocation39_spill] sm:$0xff] %v6596_v40  ;;  %v6598_v5 = vpop.f32.mrb[31].mxu1 }
 0x4e9   : > { %7272 = vst [vmem:[#allocation45_spill] sm:$0xff] %v6598_v5 }
 0x4ed   : > { %v6600_v44 = vpop.f32.mrb[32].mxu1 }
 0x4ee   : > { %7273 = vst [vmem:[#allocation49_spill] sm:$0xff] %v6600_v44  ;;  %v6602_v15 = vpop.f32.mrb[33].mxu1 }
 0x4ef   : > { %7274 = vst [vmem:[#allocation2_spill] sm:$0xff] %v6602_v15  ;;  %v6604_v62 = vpop.f32.mrb[34].mxu1  ;;  %v4175_v15 = vld [vmem:[%s7061_s4 + $0x118] sm:$0xff] }
 0x4f0   : > { %7275 = vst [vmem:[#allocation3_spill] sm:$0xff] %v6604_v62  ;;  %v6606_v59 = vpop.f32.mrb[35].mxu1 }
 0x4f1   : > { %7276 = vst [vmem:[#allocation4_spill] sm:$0xff] %v6606_v59 }
 0x4f5   : > { %v6608_v17 = vpop.f32.mrb[36].mxu1 }
 0x4f6   : > { %7277 = vst [vmem:[#allocation5_spill] sm:$0xff] %v6608_v17  ;;  %v6610_v32 = vpop.f32.mrb[37].mxu1  ;;  %v4172_v17 = vld [vmem:[%s7061_s4 + $0x100] sm:$0xff] }
 0x4f7   : > { %7278 = vst [vmem:[#allocation8_spill] sm:$0xff] %v6610_v32  ;;  %v6612_v33 = vpop.f32.mrb[38].mxu1 }
 0x4f8   : > { %7279 = vst [vmem:[#allocation13_spill] sm:$0xff] %v6612_v33  ;;  %v6614_v41 = vpop.f32.mrb[39].mxu1  ;;  %v4173_v33 = vld [vmem:[%s7061_s4 + $0x108] sm:$0xff] }
 0x4f9   : > { %7280 = vst [vmem:[#allocation10_spill] sm:$0xff] %v6614_v41 }
 0x4fd   : > { %v4835_v63 = vpop.f32.mrb[56].mxu1 }
 0x4fe   : > { %v2399_v62 = vpop.f32.mrb[57].mxu1  ;;  %v2408_v41 = vadd.f32 %v4835_v63, %v4174_v58  ;;  %v4210_v58 = vld [vmem:[%s7061_s4 + $0x150] sm:$0xff]  ;;  %v4211_v63 = vld [vmem:[%s7061_s4 + $0x158] sm:$0xff] }
 0x4ff   : > { %v4836_v32 = vpop.f32.mrb[58].mxu1  ;;  %v2400_v5 = vadd.f32 %v4172_v17, %v2399_v62 }
 0x500   : > { %v2411_v59 = vadd.f32 %v4836_v32, %v4175_v15  ;;  %v2402_v44 = vpop.f32.mrb[59].mxu1  ;;  %v4176_v15 = vld [vmem:[%s7061_s4 + $0x120] sm:$0xff] }
 0x501   : > { %v2403_v40 = vadd.f32 %v4173_v33, %v2402_v44 }
 0x502   : > { %v2442_v20 = vpack.c.bf16 %v2411_v59, %v2408_v41 }
 0x503   : > { %v2441_v28 = vpack.c.bf16 %v2403_v40, %v2400_v5  ;;  %v4177_v40 = vld [vmem:[%s7061_s4 + $0x128] sm:$0xff] }
 0x505   : > { %v4839_v49 = vpop.f32.mrb[60].mxu1  ;;  %4841 = vmatprep.subr.bf16.mxu0 %v2441_v28 }
 0x506   : > { %v2415_v13 = vpop.f32.mrb[61].mxu1  ;;  %4842 = vmatpush3.bf16.msra.mxu0 %v2441_v28  ;;  %v2424_v44 = vadd.f32 %v4839_v49, %v4178_v24 }
 0x507   : > { %v4840_v5 = vpop.f32.mrb[62].mxu1  ;;  %4843 = vmatprep.subr.bf16.mxu0 %v2442_v20  ;;  %v2416_v17 = vadd.f32 %v4176_v15, %v2415_v13  ;;  %v4208_v13 = vld [vmem:[%s7061_s4 + $0x140] sm:$0xff] }
 0x508   : > { %v2427_v62 = vadd.f32 %v4840_v5, %v4179_v38  ;;  %v2418_v59 = vpop.f32.mrb[63].mxu1  ;;  %v4209_v38 = vld [vmem:[%s7061_s4 + $0x148] sm:$0xff] }
 0x509   : > { %v2419_v32 = vadd.f32 %v4177_v40, %v2418_v59  ;;  %v4214_v59 = vld [vmem:[%s7061_s4 + $0x170] sm:$0xff] }
 0x50a   : > { %v2444_v33 = vpack.c.bf16 %v2427_v62, %v2424_v44  ;;  %4844 = vmatpush3.bf16.msra.mxu0 %v2442_v20 }
 0x50b   : > { %v2443_v41 = vpack.c.bf16 %v2419_v32, %v2416_v17  ;;  %v4215_v32 = vld [vmem:[%s7061_s4 + $0x178] sm:$0xff] }
 0x50d   : > { %4845 = vmatprep.subr.bf16.mxu0 %v2443_v41  ;;  %v4891_v28 = vpop.f32.mrb[64].mxu1 }
 0x50e   : > { %4846 = vmatpush3.bf16.msra.mxu0 %v2443_v41  ;;  %v2697_v11 = vpop.f32.mrb[65].mxu1  ;;  %v2706_v24 = vadd.f32 %v4891_v28, %v4210_v58  ;;  %v4213_v41 = vld [vmem:[%s7061_s4 + $0x168] sm:$0xff] }
 0x50f   : > { %4847 = vmatprep.subr.bf16.mxu0 %v2444_v33  ;;  %v4892_v49 = vpop.f32.mrb[66].mxu1  ;;  %v2698_v40 = vadd.f32 %v4208_v13, %v2697_v11 }
 0x510   : > { %v2709_v20 = vadd.f32 %v4892_v49, %v4211_v63  ;;  %v2700_v15 = vpop.f32.mrb[67].mxu1 }
 0x511   : > { %v2701_v5 = vadd.f32 %v4209_v38, %v2700_v15  ;;  %v4246_v15 = vld [vmem:[%s7061_s4 + $0x190] sm:$0xff] }
 0x512   : > { %v2737_v44 = vpack.c.bf16 %v2709_v20, %v2706_v24  ;;  %4848 = vmatpush3.bf16.msra.mxu0 %v2444_v33  ;;  %v4212_v33 = vld [vmem:[%s7061_s4 + $0x160] sm:$0xff] }
 0x513   : > { %v2736_v62 = vpack.c.bf16 %v2701_v5, %v2698_v40  ;;  %v4247_v5 = vld [vmem:[%s7061_s4 + $0x198] sm:$0xff] }
 0x515   : > { %4850 = vmatmul.mubr.msk.bf16.vlgmr.msra.gmra.mrb[8].mxu0 %vm810_vm0, %v6052_v2  ;;  %v4895_v17 = vpop.f32.mrb[68].mxu1  ;;  %4897 = vmatprep.subr.bf16.mxu0 %v2736_v62 }
 0x516   : > { %4853 = vmatprep.mubr.msk.bf16.mxu0 %vm810_vm0, %v6065_v51  ;;  %v2713_v11 = vpop.f32.mrb[69].mxu1  ;;  %4898 = vmatpush3.bf16.msra.mxu0 %v2736_v62  ;;  %v2722_v28 = vadd.f32 %v4895_v17, %v4214_v59  ;;  %v4245_v59 = vld [vmem:[%s7061_s4 + $0x188] sm:$0xff] }
 0x517   : > { %v4896_v58 = vpop.f32.mrb[70].mxu1  ;;  %4899 = vmatprep.subr.bf16.mxu0 %v2737_v44  ;;  %v2714_v38 = vadd.f32 %v4212_v33, %v2713_v11 }
 0x518   : > { %v2725_v63 = vadd.f32 %v4896_v58, %v4215_v32  ;;  %v2716_v13 = vpop.f32.mrb[71].mxu1 }
 0x519   : > { %v2717_v49 = vadd.f32 %v4213_v41, %v2716_v13  ;;  %v4250_v13 = vld [vmem:[%s7061_s4 + $0x1b0] sm:$0xff] }
 0x51a   : > { %v2739_v24 = vpack.c.bf16 %v2725_v63, %v2722_v28  ;;  %4900 = vmatpush3.bf16.msra.mxu0 %v2737_v44  ;;  %v4244_v44 = vld [vmem:[%s7061_s4 + $0x180] sm:$0xff] }
 0x51b   : > { %v2738_v20 = vpack.c.bf16 %v2717_v49, %v2714_v38  ;;  %v4251_v49 = vld [vmem:[%s7061_s4 + $0x1b8] sm:$0xff] }
 0x51d   : > { %4854 = vmatmul.mubr.msk.bf16.gmra.mrb[12].mxu0 %vm810_vm0, %v6070_v29  ;;  %4901 = vmatprep.subr.bf16.mxu0 %v2738_v20  ;;  %v4947_v40 = vpop.f32.mrb[72].mxu1 }
 0x51e   : > { %4857 = vmatprep.mubr.msk.bf16.mxu0 %vm810_vm0, %v6091_v47  ;;  %4902 = vmatpush3.bf16.msra.mxu0 %v2738_v20  ;;  %v2992_v62 = vpop.f32.mrb[73].mxu1  ;;  %v3001_v32 = vadd.f32 %v4947_v40, %v4246_v15  ;;  %v4248_v20 = vld [vmem:[%s7061_s4 + $0x1a0] sm:$0xff]  ;;  %v4249_v15 = vld [vmem:[%s7061_s4 + $0x1a8] sm:$0xff] }
 0x51f   : > { %4903 = vmatprep.subr.bf16.mxu0 %v2739_v24  ;;  %v4948_v17 = vpop.f32.mrb[74].mxu1  ;;  %v2993_v41 = vadd.f32 %v4244_v44, %v2992_v62 }
 0x520   : > { %v3004_v11 = vadd.f32 %v4948_v17, %v4247_v5  ;;  %v2995_v33 = vpop.f32.mrb[75].mxu1 }
 0x521   : > { %v2996_v58 = vadd.f32 %v4245_v59, %v2995_v33  ;;  %v4282_v33 = vld [vmem:[%s7061_s4 + $0x1d0] sm:$0xff] }
 0x522   : > { %v6684_v28 = vpack.c.bf16 %v3004_v11, %v3001_v32  ;;  %4904 = vmatpush3.bf16.msra.mxu0 %v2739_v24 }
 0x523   : > { %v6686_v63 = vpack.c.bf16 %v2996_v58, %v2993_v41  ;;  %v4283_v58 = vld [vmem:[%s7061_s4 + $0x1d8] sm:$0xff] }
 0x525   : > { %4858 = vmatmul.mubr.msk.bf16.gmra.mrb[16].mxu0 %vm810_vm0, %v6097_v56  ;;  %v4951_v38 = vpop.f32.mrb[76].mxu1  ;;  %4953 = vmatprep.subr.bf16.mxu0 %v6686_v63 }
 0x526   : > { %4861 = vmatprep.mubr.msk.bf16.mxu0 %vm810_vm0, %v6110_v60  ;;  %v3008_v24 = vpop.f32.mrb[77].mxu1  ;;  %v3017_v5 = vadd.f32 %v4951_v38, %v4250_v13  ;;  %v4280_v38 = vld [vmem:[%s7061_s4 + $0x1c0] sm:$0xff] }
 0x527   : > { %v4952_v40 = vpop.f32.mrb[78].mxu1  ;;  %v3009_v59 = vadd.f32 %v4248_v20, %v3008_v24 }
 0x528   : > { %v3020_v62 = vadd.f32 %v4952_v40, %v4251_v49  ;;  %v3011_v44 = vpop.f32.mrb[79].mxu1  ;;  %v4281_v49 = vld [vmem:[%s7061_s4 + $0x1c8] sm:$0xff] }
 0x529   : > { %v3012_v17 = vadd.f32 %v4249_v15, %v3011_v44 }
 0x52a   : > { %v6705_v32 = vpack.c.bf16 %v3020_v62, %v3017_v5 }
 0x52b   : > { %v6707_v11 = vpack.c.bf16 %v3012_v17, %v3009_v59  ;;  %v4286_v17 = vld [vmem:[%s7061_s4 + $0x1f0] sm:$0xff] }
 0x52d   : > { %4862 = vmatmul.mubr.msk.bf16.gmra.mrb[20].mxu0 %vm810_vm0, %v6115_v43  ;;  %v5003_v41 = vpop.f32.mrb[80].mxu1 }
 0x52e   : > { %4865 = vmatprep.mubr.msk.bf16.mxu0 %vm810_vm0, %v6128_v16  ;;  %v3280_v13 = vpop.f32.mrb[81].mxu1  ;;  %v3289_v20 = vadd.f32 %v5003_v41, %v4282_v33  ;;  %v4287_v33 = vld [vmem:[%s7061_s4 + $0x1f8] sm:$0xff] }
 0x52f   : > { %v5004_v24 = vpop.f32.mrb[82].mxu1  ;;  %v3281_v5 = vadd.f32 %v4280_v38, %v3280_v13  ;;  %v4285_v13 = vld [vmem:[%s7061_s4 + $0x1e8] sm:$0xff] }
 0x530   : > { %v3292_v15 = vadd.f32 %v5004_v24, %v4283_v58  ;;  %v3283_v40 = vpop.f32.mrb[83].mxu1  ;;  %v4284_v58 = vld [vmem:[%s7061_s4 + $0x1e0] sm:$0xff] }
 0x531   : > { %v3284_v62 = vadd.f32 %v4281_v49, %v3283_v40 }
 0x532   : > { %v6725_v44 = vpack.c.bf16 %v3292_v15, %v3289_v20 }
 0x533   : > { %v6727_v59 = vpack.c.bf16 %v3284_v62, %v3281_v5 }
 0x535   : > { %4866 = vmatmul.mubr.msk.bf16.gmra.mrb[24].mxu0 %vm810_vm0, %v6133_v52  ;;  %v5007_v57 = vpop.f32.mrb[84].mxu1 }
 0x536   : > { %4869 = vmatprep.mubr.msk.bf16.mxu0 %vm810_vm0, %v6146_v14  ;;  %v3296_v41 = vpop.f32.mrb[85].mxu1  ;;  %v3305_v49 = vadd.f32 %v5007_v57, %v4286_v17  ;;  %v4319_v57 = vld [vmem:[%s7061_s4 + $0x218] sm:$0xff] }
 0x537   : > { %v5008_v38 = vpop.f32.mrb[86].mxu1  ;;  %v3297_v15 = vadd.f32 %v4284_v58, %v3296_v41  ;;  %v4317_v41 = vld [vmem:[%s7061_s4 + $0x208] sm:$0xff] }
 0x538   : > { %v3308_v24 = vadd.f32 %v5008_v38, %v4287_v33  ;;  %v3299_v20 = vpop.f32.mrb[87].mxu1  ;;  %v4316_v33 = vld [vmem:[%s7061_s4 + $0x200] sm:$0xff] }
 0x539   : > { %v3300_v40 = vadd.f32 %v4285_v13, %v3299_v20 }
 0x53a   : > { %v6745_v5 = vpack.c.bf16 %v3308_v24, %v3305_v49 }
 0x53b   : > { %v6747_v62 = vpack.c.bf16 %v3300_v40, %v3297_v15 }
 0x53d   : > { %4870 = vmatmul.mubr.msk.bf16.gmra.mrb[28].mxu0 %vm810_vm0, %v6151_v45  ;;  %v5059_v27 = vpop.f32.mrb[88].mxu1 }
 0x53e   : > { %4873 = vmatprep.mubr.msk.bf16.mxu0 %vm810_vm0, %v6164_v30  ;;  %v3578_v17 = vpop.f32.mrb[89].mxu1  ;;  %v3587_v13 = vadd.f32 %v5059_v27, %v4318_v54  ;;  %v4322_v30 = vld [vmem:[%s7061_s4 + $0x230] sm:$0xff]  ;;  %v4323_v27 = vld [vmem:[%s7061_s4 + $0x238] sm:$0xff] }
 0x53f   : > { %v5060_v58 = vpop.f32.mrb[90].mxu1  ;;  %v3579_v24 = vadd.f32 %v4316_v33, %v3578_v17  ;;  %v4321_v17 = vld [vmem:[%s7061_s4 + $0x228] sm:$0xff] }
 0x540   : > { %v3590_v38 = vadd.f32 %v5060_v58, %v4319_v57  ;;  %v3581_v49 = vpop.f32.mrb[91].mxu1  ;;  %v4320_v57 = vld [vmem:[%s7061_s4 + $0x220] sm:$0xff] }
 0x541   : > { %v3582_v20 = vadd.f32 %v4317_v41, %v3581_v49 }
 0x542   : > { %v6765_v15 = vpack.c.bf16 %v3590_v38, %v3587_v13 }
 0x543   : > { %v6767_v40 = vpack.c.bf16 %v3582_v20, %v3579_v24 }
 0x545   : > { %4874 = vmatmul.mubr.msk.bf16.gmra.mrb[32].mxu0 %vm810_vm0, %v6169_v12  ;;  %v5063_v45 = vpop.f32.mrb[92].mxu1  ;;  %v7281_v12 = vld [vmem:[#allocation56_spill] sm:$0xff] }
 0x546   : > { %4877 = vmatprep.mubr.msk.bf16.mxu0 %vm810_vm0, %v6177_v22  ;;  %v3594_v54 = vpop.f32.mrb[93].mxu1  ;;  %v3603_v41 = vadd.f32 %v5063_v45, %v4322_v30  ;;  %v7282_v45 = vld [vmem:[#allocation53_spill] sm:$0xff] }
 0x547   : > { %v5064_v33 = vpop.f32.mrb[94].mxu1  ;;  %v3595_v38 = vadd.f32 %v4320_v57, %v3594_v54  ;;  %v7283_v30 = vld [vmem:[#allocation57_spill] sm:$0xff] }
 0x548   : > { %v3606_v58 = vadd.f32 %v5064_v33, %v4323_v27  ;;  %v3597_v13 = vpop.f32.mrb[95].mxu1  ;;  %v7301_v27 = vld [vmem:[#allocation47_spill] sm:$0xff] }
 0x549   : > { %v3598_v49 = vadd.f32 %v4321_v17, %v3597_v13 }
 0x54a   : > { %v3620_v24 = vpack.c.bf16 %v3606_v58, %v3603_v41 }
 0x54b   : > { %v3619_v20 = vpack.c.bf16 %v3598_v49, %v3595_v38  ;;  %v7302_v49 = vld [vmem:[#allocation50_spill] sm:$0xff] }
 0x54d   : > { %4878 = vmatmul.mubr.msk.bf16.gmra.mrb[36].mxu0 %vm810_vm0, %v7281_v12 }
 0x54e   : > { %4905 = vmatprep.mubr.msk.bf16.mxu0 %vm810_vm0, %v7232_v25 }
 0x555   : > { %4906 = vmatmul.mubr.msk.bf16.vlgmr.msra.gmra.mrb[8].mxu0 %vm810_vm0, %v7233_v37 }
 0x556   : > { %4954 = vmatpush3.bf16.msra.mxu0 %v6686_v63  ;;  %4909 = vmatprep.mubr.msk.bf16.mxu0 %vm810_vm0, %v7234_v18 }
 0x557   : > { %4955 = vmatprep.subr.bf16.mxu0 %v6684_v28 }
 0x55a   : > { %4956 = vmatpush3.bf16.msra.mxu0 %v6684_v28 }
 0x55b   : > { %4957 = vmatprep.subr.bf16.mxu0 %v6707_v11 }
 0x55d   : > { %4910 = vmatmul.mubr.msk.bf16.gmra.mrb[12].mxu0 %vm810_vm0, %v7235_v34 }
 0x55e   : > { %4958 = vmatpush3.bf16.msra.mxu0 %v6707_v11  ;;  %4913 = vmatprep.mubr.msk.bf16.mxu0 %vm810_vm0, %v7236_v42 }
 0x55f   : > { %4959 = vmatprep.subr.bf16.mxu0 %v6705_v32 }
 0x562   : > { %4960 = vmatpush3.bf16.msra.mxu0 %v6705_v32  ;;  %v7299_v32 = vld [vmem:[#allocation43_spill] sm:$0xff] }
 0x563   : > { %5009 = vmatprep.subr.bf16.mxu0 %v6727_v59 }
 0x565   : > { %4914 = vmatmul.mubr.msk.bf16.gmra.mrb[16].mxu0 %vm810_vm0, %v7237_v1 }
 0x566   : > { %4917 = vmatprep.mubr.msk.bf16.mxu0 %vm810_vm0, %v7238_v8 }
 0x56d   : > { %4918 = vmatmul.mubr.msk.bf16.gmra.mrb[20].mxu0 %vm810_vm0, %v7239_v31 }
 0x56e   : > { %4921 = vmatprep.mubr.msk.bf16.mxu0 %vm810_vm0, %v7240_v48 }
 0x575   : > { %4922 = vmatmul.mubr.msk.bf16.gmra.mrb[24].mxu0 %vm810_vm0, %v7241_v55 }
 0x576   : > { %4925 = vmatprep.mubr.msk.bf16.mxu0 %vm810_vm0, %v7242_v23 }
 0x57d   : > { %4926 = vmatmul.mubr.msk.bf16.gmra.mrb[28].mxu0 %vm810_vm0, %v7243_v19 }
 0x57e   : > { %4929 = vmatprep.mubr.msk.bf16.mxu0 %vm810_vm0, %v7244_v61 }
 0x585   : > { %4930 = vmatmul.mubr.msk.bf16.gmra.mrb[32].mxu0 %vm810_vm0, %v7245_v9 }
 0x586   : > { %4933 = vmatprep.mubr.msk.bf16.mxu0 %vm810_vm0, %v7282_v45 }
 0x58d   : > { %4934 = vmatmul.mubr.msk.bf16.gmra.mrb[36].mxu0 %vm810_vm0, %v7283_v30 }
 0x58e   : > { %4961 = vmatprep.mubr.msk.bf16.mxu0 %vm810_vm0, %v7211_v46  ;;  %v7284_v46 = vld [vmem:[#allocation22_spill] sm:$0xff] }
 0x595   : > { %4962 = vmatmul.mubr.msk.bf16.vlgmr.msra.gmra.mrb[8].mxu0 %vm810_vm0, %v7212_v26  ;;  %v7285_v26 = vld [vmem:[#allocation54_spill] sm:$0xff] }
 0x596   : > { %5010 = vmatpush3.bf16.msra.mxu0 %v6727_v59  ;;  %4965 = vmatprep.mubr.msk.bf16.mxu0 %vm810_vm0, %v7213_v3  ;;  %v7286_v3 = vld [vmem:[#allocation55_spill] sm:$0xff] }
 0x597   : > { %5011 = vmatprep.subr.bf16.mxu0 %v6725_v44 }
 0x59a   : > { %5012 = vmatpush3.bf16.msra.mxu0 %v6725_v44 }
 0x59b   : > { %5013 = vmatprep.subr.bf16.mxu0 %v6747_v62 }
 0x59d   : > { %4966 = vmatmul.mubr.msk.bf16.gmra.mrb[12].mxu0 %vm810_vm0, %v7214_v10  ;;  %v3023_v10 = vpack.c.bf16 %v7286_v3, %v7285_v26 }
 0x59e   : > { %5014 = vmatpush3.bf16.msra.mxu0 %v6747_v62  ;;  %4969 = vmatprep.mubr.msk.bf16.mxu0 %vm810_vm0, %v7215_v53 }
 0x59f   : > { %5015 = vmatprep.subr.bf16.mxu0 %v6745_v5 }
 0x5a2   : > { %5016 = vmatpush3.bf16.msra.mxu0 %v6745_v5  ;;  %v7300_v5 = vld [vmem:[#allocation46_spill] sm:$0xff] }
 0x5a3   : > { %5065 = vmatprep.subr.bf16.mxu0 %v6767_v40 }
 0x5a5   : > { %4970 = vmatmul.mubr.msk.bf16.gmra.mrb[16].mxu0 %vm810_vm0, %v7284_v46 }
 0x5a6   : > { %4973 = vmatprep.mubr.msk.bf16.mxu0 %vm810_vm0, %v7217_v35 }
 0x5ad   : > { %4974 = vmatmul.mubr.msk.bf16.gmra.mrb[20].mxu0 %vm810_vm0, %v7218_v36  ;;  %v6944_v36 = vld [vmem:[%s7062_s5] ss:$0 sm:$0xff] }
 0x5ae   : > { %4977 = vmatprep.mubr.msk.bf16.mxu0 %vm810_vm0, %v7219_v0  ;;  %v7294_v0 = vld [vmem:[#allocation36_spill] sm:$0xff] }
 0x5b5   : > { %4978 = vmatmul.mubr.msk.bf16.gmra.mrb[24].mxu0 %vm810_vm0, %v7220_v6 }
 0x5b6   : > { %4981 = vmatprep.mubr.msk.bf16.mxu0 %vm810_vm0, %v7221_v39 }
 0x5bd   : > { %4982 = vmatmul.mubr.msk.bf16.gmra.mrb[28].mxu0 %vm810_vm0, %v7222_v4  ;;  %v7295_v4 = vld [vmem:[#allocation37_spill] sm:$0xff] }
 0x5be   : > { %4985 = vmatprep.mubr.msk.bf16.mxu0 %vm810_vm0, %v7223_v7 }
 0x5c5   : > { %4986 = vmatmul.mubr.msk.bf16.gmra.mrb[32].mxu0 %vm810_vm0, %v7224_v21 }
 0x5c6   : > { %4989 = vmatprep.mubr.msk.bf16.mxu0 %vm810_vm0, %v6442_v50  ;;  %v7298_v50 = vld [vmem:[#allocation42_spill] sm:$0xff] }
 0x5cd   : > { %4990 = vmatmul.mubr.msk.bf16.gmra.mrb[36].mxu0 %vm810_vm0, %v3023_v10 }
 0x5ce   : > { %5017 = vmatprep.mubr.msk.bf16.mxu0 %vm810_vm0, %v6052_v2  ;;  %v7287_v2 = vld [vmem:[#allocation31_spill] sm:$0xff] }
 0x5d5   : > { %5018 = vmatmul.mubr.msk.bf16.vlgmr.msra.gmra.mrb[8].mxu0 %vm810_vm0, %v6065_v51  ;;  %v7288_v51 = vld [vmem:[#allocation32_spill] sm:$0xff] }
 0x5d6   : > { %5066 = vmatpush3.bf16.msra.mxu0 %v6767_v40  ;;  %5021 = vmatprep.mubr.msk.bf16.mxu0 %vm810_vm0, %v6070_v29  ;;  %v7289_v29 = vld [vmem:[#allocation33_spill] sm:$0xff] }
 0x5d7   : > { %5067 = vmatprep.subr.bf16.mxu0 %v6765_v15 }
 0x5da   : > { %5068 = vmatpush3.bf16.msra.mxu0 %v6765_v15 }
 0x5db   : > { %5069 = vmatprep.subr.bf16.mxu0 %v3619_v20 }
 0x5dd   : > { %5022 = vmatmul.mubr.msk.bf16.gmra.mrb[12].mxu0 %vm810_vm0, %v6091_v47  ;;  %v3314_v47 = vrot.slane %v7285_v26, 1 }
 0x5de   : > { %5070 = vmatpush3.bf16.msra.mxu0 %v3619_v20  ;;  %5025 = vmatprep.mubr.msk.bf16.mxu0 %vm810_vm0, %v6097_v56  ;;  %v3315_v56 = vrot.slane %v7286_v3, 1  ;;  %v7304_v3 = vld [vmem:[#allocation6_spill] sm:$0xff] }
 0x5df   : > { %5071 = vmatprep.subr.bf16.mxu0 %v3620_v24 }
 0x5e2   : > { %5072 = vmatpush3.bf16.msra.mxu0 %v3620_v24 }
 0x5e5   : > { %5026 = vmatmul.mubr.msk.bf16.gmra.mrb[16].mxu0 %vm810_vm0, %v6110_v60  ;;  %v7290_v60 = vld [vmem:[#allocation58_spill] sm:$0xff] }
 0x5e6   : > { %5029 = vmatprep.mubr.msk.bf16.mxu0 %vm810_vm0, %v6115_v43  ;;  %v3317_v43 = vrot.slane %v7290_v60, 1 }
 0x5ed   : > { %5030 = vmatmul.mubr.msk.bf16.gmra.mrb[20].mxu0 %vm810_vm0, %v6128_v16  ;;  %v3318_v16 = vsel %vm1043_vm1, %v3315_v56, %v3317_v43 }
 0x5ee   : > { %5033 = vmatprep.mubr.msk.bf16.mxu0 %vm810_vm0, %v6133_v52  ;;  %v3316_v52 = vsel %vm1043_vm1, %v3314_v47, %v3315_v56 }
 0x5f5   : > { %5034 = vmatmul.mubr.msk.bf16.gmra.mrb[24].mxu0 %vm810_vm0, %v6146_v14  ;;  %v3321_v14 = vpack.c.bf16 %v3318_v16, %v3316_v52 }
 0x5f6   : > { %5037 = vmatprep.mubr.msk.bf16.mxu0 %vm810_vm0, %v7287_v2 }
 0x5fd   : > { %5038 = vmatmul.mubr.msk.bf16.gmra.mrb[28].mxu0 %vm810_vm0, %v7288_v51 }
 0x5fe   : > { %5041 = vmatprep.mubr.msk.bf16.mxu0 %vm810_vm0, %v7289_v29  ;;  %v7305_v29 = vld [vmem:[#allocation9_spill] sm:$0xff] }
 0x605   : > { %5042 = vmatmul.mubr.msk.bf16.gmra.mrb[32].mxu0 %vm810_vm0, %v6177_v22  ;;  %v7292_v22 = vld [vmem:[#allocation59_spill] sm:$0xff] }
 0x606   : > { %5045 = vmatprep.mubr.msk.bf16.mxu0 %vm810_vm0, %v7281_v12  ;;  %v7291_v12 = vld [vmem:[#allocation60_spill] sm:$0xff] }
 0x607   : > { %v7293_v53 = vpack.c.bf16 %v7291_v12, %v7292_v22  ;;  %v7306_v22 = vld [vmem:[#allocation11_spill] sm:$0xff] }
 0x60d   : > { %5046 = vmatmul.mubr.msk.bf16.gmra.mrb[36].mxu0 %vm810_vm0, %v3321_v14 }
 0x60e   : > { %5073 = vmatprep.mubr.msk.bf16.mxu0 %vm810_vm0, %v7233_v37  ;;  %v7296_v37 = vld [vmem:[#allocation40_spill] sm:$0xff] }
 0x615   : > { %5074 = vmatmul.mubr.msk.bf16.vlgmr.msra.gmra.mrb[8].mxu0 %vm810_vm0, %v7234_v18 }
 0x616   : > { %5077 = vmatprep.mubr.msk.bf16.mxu0 %vm810_vm0, %v7235_v34 }
 0x61d   : > { %5078 = vmatmul.mubr.msk.bf16.gmra.mrb[12].mxu0 %vm810_vm0, %v7236_v42 }
 0x61e   : > { %5081 = vmatprep.mubr.msk.bf16.mxu0 %vm810_vm0, %v7237_v1  ;;  %v7297_v1 = vld [vmem:[#allocation41_spill] sm:$0xff] }
 0x625   : > { %5082 = vmatmul.mubr.msk.bf16.gmra.mrb[16].mxu0 %vm810_vm0, %v7238_v8 }
 0x626   : > { %5085 = vmatprep.mubr.msk.bf16.mxu0 %vm810_vm0, %v7239_v31 }
 0x62d   : > { %5086 = vmatmul.mubr.msk.bf16.gmra.mrb[20].mxu0 %vm810_vm0, %v7240_v48 }
 0x62e   : > { %5089 = vmatprep.mubr.msk.bf16.mxu0 %vm810_vm0, %v7241_v55 }
 0x635   : > { %5090 = vmatmul.mubr.msk.bf16.gmra.mrb[24].mxu0 %vm810_vm0, %v7242_v23 }
 0x636   : > { %5093 = vmatprep.mubr.msk.bf16.mxu0 %vm810_vm0, %v7243_v19 }
 0x63d   : > { %5094 = vmatmul.mubr.msk.bf16.gmra.mrb[28].mxu0 %vm810_vm0, %v7244_v61 }
 0x63e   : > { %5097 = vmatprep.mubr.msk.bf16.mxu0 %vm810_vm0, %v7245_v9 }
 0x645   : > { %5098 = vmatmul.mubr.msk.bf16.gmra.mrb[32].mxu0 %vm810_vm0, %v7282_v45  ;;  %v7303_v45 = vld [vmem:[#allocation7_spill] sm:$0xff] }
 0x646   : > { %5101 = vmatprep.mubr.msk.bf16.mxu0 %vm810_vm0, %v7283_v30 }
 0x64d   : > { %5102 = vmatmul.mubr.msk.bf16.gmra.mrb[36].mxu0 %vm810_vm0, %v7293_v53 }
 0x6e8   : > { %v5075_v35 = vpop.f32.mrb[8].mxu0 }
 0x6e9   : > { %v5113_v6 = vadd.f32 %v5075_v35, %v7294_v0  ;;  %v3658_v39 = vpop.f32.mrb[9].mxu0  ;;  %v7307_v0 = vld [vmem:[#allocation12_spill] sm:$0xff] }
 0x6ea   : > { %v5114_v7 = vadd.f32 %v3658_v39, %v7295_v4  ;;  %v5076_v21 = vpop.f32.mrb[10].mxu0 }
 0x6eb   : > { %v3826_v25 = vadd.f32 %v5113_v6, %v6944_v36  ;;  %v5115_v18 = vadd.f32 %v5076_v21, %v7296_v37  ;;  %v3661_v34 = vpop.f32.mrb[11].mxu0 }
 0x6ec   : > { %v3824_v42 = vadd.f32 %v5114_v7, %v6944_v36  ;;  %v5116_v8 = vadd.f32 %v3661_v34, %v7297_v1  ;;  %v7308_v7 = vld [vmem:[#allocation14_spill] sm:$0xff] }
 0x6ed   : > { %v3858_v31 = vmax.f32 %v3826_v25, 0.0  ;;  %v3827_v48 = vadd.f32 %v5115_v18, %v6944_v36  ;;  %v7309_v18 = vld [vmem:[#allocation18_spill] sm:$0xff] }
 0x6ee   : > { %v3856_v55 = vmax.f32 %v3824_v42, 0.0  ;;  %v3825_v23 = vadd.f32 %v5116_v8, %v6944_v36 }
 0x6ef   : > { %3890 = vst [vmem:[%s6954_s29 + $0x10] sm:$0xff] %v3858_v31  ;;  %v3859_v19 = vmax.f32 %v3827_v48, 0.0 }
 0x6f0   : > { %3888 = vst [vmem:[%s6954_s29] sm:$0xff] %v3856_v55  ;;  %v3857_v61 = vmax.f32 %v3825_v23, 0.0  ;;  %v5079_v9 = vpop.f32.mrb[12].mxu0 }
 0x6f1   : > { %3891 = vst [vmem:[%s6954_s29 + $0x18] sm:$0xff] %v3859_v19  ;;  %v5117_v28 = vadd.f32 %v5079_v9, %v7298_v50  ;;  %v3674_v63 = vpop.f32.mrb[13].mxu0  ;;  %v7310_v19 = vld [vmem:[#allocation20_spill] sm:$0xff] }
 0x6f2   : > { %3889 = vst [vmem:[%s6954_s29 + $0x8] sm:$0xff] %v3857_v61  ;;  %v5118_v11 = vadd.f32 %v3674_v63, %v7299_v32  ;;  %v5080_v44 = vpop.f32.mrb[14].mxu0  ;;  %v7311_v50 = vld [vmem:[#allocation24_spill] sm:$0xff] }
 0x6f3   : > { %v3830_v59 = vadd.f32 %v5117_v28, %v6944_v36  ;;  %v5119_v62 = vadd.f32 %v5080_v44, %v7300_v5  ;;  %v3677_v15 = vpop.f32.mrb[15].mxu0 }
 0x6f4   : > { %v3828_v40 = vadd.f32 %v5118_v11, %v6944_v36  ;;  %v5120_v54 = vadd.f32 %v3677_v15, %v7301_v27  ;;  %v7312_v11 = vld [vmem:[#allocation26_spill] sm:$0xff] }
 0x6f5   : > { %v3862_v57 = vmax.f32 %v3830_v59, 0.0  ;;  %v3831_v17 = vadd.f32 %v5119_v62, %v6944_v36  ;;  %v7313_v62 = vld [vmem:[#allocation28_spill] sm:$0xff] }
 0x6f6   : > { %v3860_v33 = vmax.f32 %v3828_v40, 0.0  ;;  %v3829_v41 = vadd.f32 %v5120_v54, %v6944_v36 }
 0x6f7   : > { %3894 = vst [vmem:[%s6954_s29 + $0x30] sm:$0xff] %v3862_v57  ;;  %v3863_v58 = vmax.f32 %v3831_v17, 0.0 }
 0x6f8   : > { %3892 = vst [vmem:[%s6954_s29 + $0x20] sm:$0xff] %v3860_v33  ;;  %v3861_v13 = vmax.f32 %v3829_v41, 0.0  ;;  %v5083_v38 = vpop.f32.mrb[16].mxu0 }
 0x6f9   : > { %3895 = vst [vmem:[%s6954_s29 + $0x38] sm:$0xff] %v3863_v58  ;;  %v5121_v24 = vadd.f32 %v5083_v38, %v7302_v49  ;;  %v3690_v20 = vpop.f32.mrb[17].mxu0  ;;  %v7314_v58 = vld [vmem:[#allocation30_spill] sm:$0xff]  ;;  %v7315_v49 = vld [vmem:[#allocation35_spill] sm:$0xff] }
 0x6fa   : > { %3893 = vst [vmem:[%s6954_s29 + $0x28] sm:$0xff] %v3861_v13  ;;  %v5122_v30 = vadd.f32 %v3690_v20, %v7303_v45  ;;  %v5084_v46 = vpop.f32.mrb[18].mxu0 }
 0x6fb   : > { %v3834_v26 = vadd.f32 %v5121_v24, %v6944_v36  ;;  %v5123_v10 = vadd.f32 %v5084_v46, %v7304_v3  ;;  %v3693_v2 = vpop.f32.mrb[19].mxu0 }
 0x6fc   : > { %v3832_v51 = vadd.f32 %v5122_v30, %v6944_v36  ;;  %v5124_v47 = vadd.f32 %v3693_v2, %v7305_v29  ;;  %v7316_v30 = vld [vmem:[#allocation39_spill] sm:$0xff] }
 0x6fd   : > { %v3866_v56 = vmax.f32 %v3834_v26, 0.0  ;;  %v3835_v60 = vadd.f32 %v5123_v10, %v6944_v36  ;;  %v7317_v10 = vld [vmem:[#allocation45_spill] sm:$0xff] }
 0x6fe   : > { %v3864_v43 = vmax.f32 %v3832_v51, 0.0  ;;  %v3833_v16 = vadd.f32 %v5124_v47, %v6944_v36 }
 0x6ff   : > { %3898 = vst [vmem:[%s6954_s29 + $0x50] sm:$0xff] %v3866_v56  ;;  %v3867_v52 = vmax.f32 %v3835_v60, 0.0 }
 0x700   : > { %3896 = vst [vmem:[%s6954_s29 + $0x40] sm:$0xff] %v3864_v43  ;;  %v3865_v14 = vmax.f32 %v3833_v16, 0.0  ;;  %v5087_v12 = vpop.f32.mrb[20].mxu0 }
 0x701   : > { %3899 = vst [vmem:[%s6954_s29 + $0x58] sm:$0xff] %v3867_v52  ;;  %v5125_v53 = vadd.f32 %v5087_v12, %v7306_v22  ;;  %v3706_v35 = vpop.f32.mrb[21].mxu0  ;;  %v7318_v52 = vld [vmem:[#allocation49_spill] sm:$0xff]  ;;  %v7319_v22 = vld [vmem:[#allocation2_spill] sm:$0xff] }
 0x702   : > { %3897 = vst [vmem:[%s6954_s29 + $0x48] sm:$0xff] %v3865_v14  ;;  %v5126_v6 = vadd.f32 %v3706_v35, %v7307_v0  ;;  %v5088_v39 = vpop.f32.mrb[22].mxu0 }
 0x703   : > { %v3838_v4 = vadd.f32 %v5125_v53, %v6944_v36  ;;  %v5127_v21 = vadd.f32 %v5088_v39, %v7308_v7  ;;  %v3709_v25 = vpop.f32.mrb[23].mxu0 }
 0x704   : > { %v3836_v37 = vadd.f32 %v5126_v6, %v6944_v36  ;;  %v5128_v34 = vadd.f32 %v3709_v25, %v7309_v18  ;;  %v7320_v6 = vld [vmem:[#allocation3_spill] sm:$0xff] }
 0x705   : > { %v3870_v42 = vmax.f32 %v3838_v4, 0.0  ;;  %v3839_v1 = vadd.f32 %v5127_v21, %v6944_v36  ;;  %v7321_v21 = vld [vmem:[#allocation4_spill] sm:$0xff] }
 0x706   : > { %v3868_v8 = vmax.f32 %v3836_v37, 0.0  ;;  %v3837_v31 = vadd.f32 %v5128_v34, %v6944_v36 }
 0x707   : > { %3902 = vst [vmem:[%s6954_s29 + $0x70] sm:$0xff] %v3870_v42  ;;  %v3871_v48 = vmax.f32 %v3839_v1, 0.0 }
 0x708   : > { %3900 = vst [vmem:[%s6954_s29 + $0x60] sm:$0xff] %v3868_v8  ;;  %v3869_v55 = vmax.f32 %v3837_v31, 0.0  ;;  %v5091_v23 = vpop.f32.mrb[24].mxu0 }
 0x709   : > { %3903 = vst [vmem:[%s6954_s29 + $0x78] sm:$0xff] %v3871_v48  ;;  %v5129_v61 = vadd.f32 %v5091_v23, %v7310_v19  ;;  %v3722_v9 = vpop.f32.mrb[25].mxu0  ;;  %v7322_v48 = vld [vmem:[#allocation5_spill] sm:$0xff]  ;;  %v7323_v19 = vld [vmem:[#allocation8_spill] sm:$0xff] }
 0x70a   : > { %3901 = vst [vmem:[%s6954_s29 + $0x68] sm:$0xff] %v3869_v55  ;;  %v5130_v28 = vadd.f32 %v3722_v9, %v7311_v50  ;;  %v5092_v63 = vpop.f32.mrb[26].mxu0 }
 0x70b   : > { %v3842_v32 = vadd.f32 %v5129_v61, %v6944_v36  ;;  %v5131_v44 = vadd.f32 %v5092_v63, %v7312_v11  ;;  %v3725_v59 = vpop.f32.mrb[27].mxu0 }
 0x70c   : > { %v3840_v5 = vadd.f32 %v5130_v28, %v6944_v36  ;;  %v5132_v15 = vadd.f32 %v3725_v59, %v7313_v62  ;;  %v7324_v28 = vld [vmem:[#allocation13_spill] sm:$0xff] }
 0x70d   : > { %v3874_v40 = vmax.f32 %v3842_v32, 0.0  ;;  %v3843_v27 = vadd.f32 %v5131_v44, %v6944_v36  ;;  %v7325_v44 = vld [vmem:[#allocation10_spill] sm:$0xff] }
 0x70e   : > { %v3872_v54 = vmax.f32 %v3840_v5, 0.0  ;;  %v3841_v57 = vadd.f32 %v5132_v15, %v6944_v36 }
 0x70f   : > { %3906 = vst [vmem:[%s6954_s29 + $0x90] sm:$0xff] %v3874_v40  ;;  %v3875_v17 = vmax.f32 %v3843_v27, 0.0 }
 0x710   : > { %3904 = vst [vmem:[%s6954_s29 + $0x80] sm:$0xff] %v3872_v54  ;;  %v3873_v33 = vmax.f32 %v3841_v57, 0.0  ;;  %v5095_v41 = vpop.f32.mrb[28].mxu0 }
 0x711   : > { %3907 = vst [vmem:[%s6954_s29 + $0x98] sm:$0xff] %v3875_v17  ;;  %v5133_v13 = vadd.f32 %v5095_v41, %v7314_v58  ;;  %v3738_v38 = vpop.f32.mrb[29].mxu0 }
 0x712   : > { %3905 = vst [vmem:[%s6954_s29 + $0x88] sm:$0xff] %v3873_v33  ;;  %v5134_v24 = vadd.f32 %v3738_v38, %v7315_v49  ;;  %v5096_v20 = vpop.f32.mrb[30].mxu0 }
 0x713   : > { %v3846_v45 = vadd.f32 %v5133_v13, %v6944_v36  ;;  %v5135_v46 = vadd.f32 %v5096_v20, %v7316_v30  ;;  %v3741_v26 = vpop.f32.mrb[31].mxu0 }
 0x714   : > { %v3844_v3 = vadd.f32 %v5134_v24, %v6944_v36  ;;  %v5136_v2 = vadd.f32 %v3741_v26, %v7317_v10 }
 0x715   : > { %v3878_v51 = vmax.f32 %v3846_v45, 0.0  ;;  %v3847_v29 = vadd.f32 %v5135_v46, %v6944_v36 }
 0x716   : > { %v3876_v47 = vmax.f32 %v3844_v3, 0.0  ;;  %v3845_v56 = vadd.f32 %v5136_v2, %v6944_v36 }
 0x717   : > { %3910 = vst [vmem:[%s6954_s29 + $0xb0] sm:$0xff] %v3878_v51  ;;  %v3879_v60 = vmax.f32 %v3847_v29, 0.0 }
 0x718   : > { %3908 = vst [vmem:[%s6954_s29 + $0xa0] sm:$0xff] %v3876_v47  ;;  %v3877_v43 = vmax.f32 %v3845_v56, 0.0  ;;  %v5099_v16 = vpop.f32.mrb[32].mxu0 }
 0x719   : > { %3911 = vst [vmem:[%s6954_s29 + $0xb8] sm:$0xff] %v3879_v60  ;;  %v5137_v14 = vadd.f32 %v5099_v16, %v7318_v52  ;;  %v3754_v12 = vpop.f32.mrb[33].mxu0 }
 0x71a   : > { %3909 = vst [vmem:[%s6954_s29 + $0xa8] sm:$0xff] %v3877_v43  ;;  %v5138_v53 = vadd.f32 %v3754_v12, %v7319_v22  ;;  %v5100_v35 = vpop.f32.mrb[34].mxu0 }
 0x71b   : > { %v3850_v0 = vadd.f32 %v5137_v14, %v6944_v36  ;;  %v5139_v39 = vadd.f32 %v5100_v35, %v7320_v6  ;;  %v3757_v4 = vpop.f32.mrb[35].mxu0 }
 0x71c   : > { %v3848_v7 = vadd.f32 %v5138_v53, %v6944_v36  ;;  %v5140_v25 = vadd.f32 %v3757_v4, %v7321_v21 }
 0x71d   : > { %v3882_v37 = vmax.f32 %v3850_v0, 0.0  ;;  %v3851_v18 = vadd.f32 %v5139_v39, %v6944_v36 }
 0x71e   : > { %v3880_v34 = vmax.f32 %v3848_v7, 0.0  ;;  %v3849_v42 = vadd.f32 %v5140_v25, %v6944_v36 }
 0x71f   : > { %3914 = vst [vmem:[%s6954_s29 + $0xd0] sm:$0xff] %v3882_v37  ;;  %v3883_v1 = vmax.f32 %v3851_v18, 0.0 }
 0x720   : > { %3912 = vst [vmem:[%s6954_s29 + $0xc0] sm:$0xff] %v3880_v34  ;;  %v3881_v8 = vmax.f32 %v3849_v42, 0.0  ;;  %v5103_v31 = vpop.f32.mrb[36].mxu0 }
 0x721   : > { %3915 = vst [vmem:[%s6954_s29 + $0xd8] sm:$0xff] %v3883_v1  ;;  %v5141_v55 = vadd.f32 %v5103_v31, %v7322_v48  ;;  %v3770_v23 = vpop.f32.mrb[37].mxu0 }
 0x722   : > { %3913 = vst [vmem:[%s6954_s29 + $0xc8] sm:$0xff] %v3881_v8  ;;  %v5142_v61 = vadd.f32 %v3770_v23, %v7323_v19  ;;  %v5104_v9 = vpop.f32.mrb[38].mxu0 }
 0x723   : > { %v3854_v50 = vadd.f32 %v5141_v55, %v6944_v36  ;;  %v5143_v63 = vadd.f32 %v5104_v9, %v7324_v28  ;;  %v3773_v32 = vpop.f32.mrb[39].mxu0 }
 0x724   : > { %v3852_v11 = vadd.f32 %v5142_v61, %v6944_v36  ;;  %v5144_v59 = vadd.f32 %v3773_v32, %v7325_v44 }
 0x725   : > { %v3886_v5 = vmax.f32 %v3854_v50, 0.0  ;;  %v3855_v62 = vadd.f32 %v5143_v63, %v6944_v36 }
 0x726   : > { %v3884_v15 = vmax.f32 %v3852_v11, 0.0  ;;  %v3853_v40 = vadd.f32 %v5144_v59, %v6944_v36 }
 0x727   : > { %3918 = vst [vmem:[%s6954_s29 + $0xf0] sm:$0xff] %v3886_v5  ;;  %v3887_v27 = vmax.f32 %v3855_v62, 0.0 }
 0x728   : > { %3916 = vst [vmem:[%s6954_s29 + $0xe0] sm:$0xff] %v3884_v15  ;;  %v3885_v54 = vmax.f32 %v3853_v40, 0.0 }
 0x729   : > { %3919 = vst [vmem:[%s6954_s29 + $0xf8] sm:$0xff] %v3887_v27 }
 0x72a   : > { %3917 = vst [vmem:[%s6954_s29 + $0xe8] sm:$0xff] %v3885_v54 }
 0x72b PF: > { %s16_s23 = sadd.s32 1, %s5419_s23   ;;  %s7326_s21 = smov %s5415_s22 }
 0x72c   : > { %p13_p5 = scmp.ge.s32.totalorder %s16_s23, 4   ;;  %s7327_s22 = smov %s7329_s24 }
 0x72e   :  { %15 = sbr.rel (!%p13_p5) target bundleno = 2 (0x2), region = 96 }

// kernel: style_propagate_forward.3
= control target key start
LH: loop header
LB: loop body
LE: loop exit
PB: predicated region body
PF: predicated region fallthrough
CT: control target
= control target key end

     0   :  { %s5351_s24 = smov 0   ;;  %s5353_s25 = smov 0   ;;  %s7097_s0 = inlined_call_operand.vmem [shape: f32[2,18,18,64], index: 0, kind: input, shape index: {}]   ;;  %s7098_s1 = inlined_call_operand.vmem [shape: f32[2,18,18,64], index: 1, kind: input, shape index: {}]   ;;  %s7099_s2 = inlined_call_operand.vmem [shape: f32[2,18,18,1], index: 2, kind: input, shape index: {}]   ;;  %s7100_s3 = inlined_call_operand.vmem [shape: f32[2,256,1], index: 3, kind: input, shape index: {}]   ;;  %s7101_s4 = inlined_call_operand.vmem [shape: f32[9,64,64], index: 4, kind: input, shape index: {}]   ;;  %s7102_s5 = inlined_call_operand.vmem [shape: f32[1,64], index: 5, kind: input, shape index: {}]   ;;  %s7103_s6 = inlined_call_operand.vmem [shape: f32[1,64], index: 6, kind: input, shape index: {}]   ;;  %s7104_s7 = inlined_call_operand.vmem [shape: f32[2,64,64], index: 7, kind: output, shape index: {}]  }
   0x1   :  { %s5355_s26 = smov 0  }
   0x2 LB: > { %s29_s27 = sadd.s32 1, %s5302_s25  ;;  %p3947_p0 = scmp.ge.s32.totalorder %s5306_s26, 1  ;;  %s5306_s26 = sphi %s5355_s26, %s17_s26   ;;  %s5302_s25 = sphi %s5353_s25, %s7227_s25   ;;  %s5298_s24 = sphi %s5351_s24, %s7226_s24  }
   0x3   : > { %p31_p1 = scmp.ge.s32.totalorder %s29_s27, 2  ;;  %p298_p2 = scmp.lt.s32.totalorder %s5306_s26, 3 }
   0x5   : > { %s7229_s27 = smov (%p31_p1, %s29_s27), 0  ;;  %p299_p3 = pnand %p3947_p0, %p298_p2 }
   0x7   : > { %302 = sbr.rel (%p299_p3) target bundleno = 933 (0x3a5), region = 48 }
   0xe   : > { %v3955_v0 = vld [vmem:[%s7101_s4 + $0x40] sm:$0xff]  ;;  %v3956_v1 = vld [vmem:[%s7101_s4 + $0x48] sm:$0xff]  ;;  %p353_p4 = scmp.lt.s32.totalorder %s5298_s24, 1  ;;  %v3957_v5 = vld [vmem:[%s7101_s4 + $0x50] sm:$0xff]  ;;  %vm534_vm0 = vcmask 1046528   ;;  %vm393_vm1 = vcmask 523264  }
   0xf   : > { %v4043_v2 = vld [vmem:[%s7101_s4 + $0x100] sm:$0xff]  ;;  %v672_v3 = vpack.c.bf16 %v3956_v1, %v3955_v0  ;;  %v4044_v4 = vld [vmem:[%s7101_s4 + $0x108] sm:$0xff]  ;;  %v3958_v6 = vld [vmem:[%s7101_s4 + $0x58] sm:$0xff]  ;;  %vm1095_vm2 = vcmask 1045504  }
  0x10   : > { %v1708_v7 = vpack.c.bf16 %v4044_v4, %v4043_v2  ;;  %v673_v8 = vpack.c.bf16 %v3958_v6, %v3957_v5  ;;  %v4045_v9 = vld [vmem:[%s7101_s4 + $0x110] sm:$0xff]  ;;  %v4046_v10 = vld [vmem:[%s7101_s4 + $0x118] sm:$0xff]  ;;  %v3959_v11 = vld [vmem:[%s7101_s4 + $0x60] sm:$0xff]  ;;  %s7231_s24 = smov (!%p353_p4, %s5298_s24), 1 }
  0x11   : > { %4532 = vmatprep.subr.bf16.mxu1 %v672_v3  ;;  %v1709_v12 = vpack.c.bf16 %v4046_v10, %v4045_v9  ;;  %v3960_v13 = vld [vmem:[%s7101_s4 + $0x68] sm:$0xff]  ;;  %v4047_v14 = vld [vmem:[%s7101_s4 + $0x120] sm:$0xff]  ;;  %s5408_s10 = smul.u32 432, %s7231_s24  ;;  %v3961_v17 = vld [vmem:[%s7101_s4 + $0x70] sm:$0xff]  ;;  %s4294_s20 = sshll.u32 %s7231_s24, 8 }
  0x12   : > { %v4048_v15 = vld [vmem:[%s7101_s4 + $0x128] sm:$0xff]  ;;  %4692 = vmatprep.subr.bf16.mxu0 %v1708_v7  ;;  %4533 = vmatpush3.bf16.msra.mxu1 %v672_v3  ;;  %v674_v16 = vpack.c.bf16 %v3960_v13, %v3959_v11  ;;  %v3962_v19 = vld [vmem:[%s7101_s4 + $0x78] sm:$0xff]  ;;  %v4049_v20 = vld [vmem:[%s7101_s4 + $0x130] sm:$0xff]  ;;  %s6109_s9 = scalar_lea.vmem %s7100_s3, %s4294_s20 }
  0x13   : > { %4693 = vmatpush3.bf16.msra.mxu0 %v1708_v7  ;;  %4534 = vmatprep.subr.bf16.mxu1 %v673_v8  ;;  %v1710_v18 = vpack.c.bf16 %v4048_v15, %v4047_v14  ;;  %v4050_v21 = vld [vmem:[%s7101_s4 + $0x138] sm:$0xff]  ;;  %s5426_s21 = scalar_lea.vmem %s7097_s0, %s5408_s10  ;;  %v675_v30 = vpack.c.bf16 %v3962_v19, %v3961_v17  ;;  %v4067_v42 = vld [vmem:[%s7101_s4 + $0x140] sm:$0xff]  ;;  %v4068_v44 = vld [vmem:[%s7101_s4 + $0x148] sm:$0xff]  ;;  %s6075_s11 = scalar_lea.vmem %s7099_s2, %s5408_s10 }
  0x14   : > { %4694 = vmatprep.subr.bf16.mxu0 %v1709_v12  ;;  %v5429_v22 = vld [vmem:[%s5426_s21] sm:$0xff]  ;;  %v5432_v23 = vld [vmem:[%s5426_s21 + $0x8] sm:$0xff]  ;;  %v5435_v24 = vld [vmem:[%s5426_s21 + $0x10] sm:$0x3]  ;;  %v1711_v31 = vpack.c.bf16 %v4050_v21, %v4049_v20  ;;  %v1925_v59 = vpack.c.bf16 %v4068_v44, %v4067_v42  ;;  %s6428_s8 = scalar_lea.vmem %s7098_s1, %s5408_s10 }
  0x15   : > { %v535_v25 = vrot.slane %v5429_v22, 1  ;;  %v536_v26 = vrot.slane %v5432_v23, 1  ;;  %v538_v27 = vrot.slane %v5435_v24, 1  ;;  %v5441_v28 = vld [vmem:[%s5426_s21 + $0x18] sm:$0xff]  ;;  %v5444_v29 = vld [vmem:[%s5426_s21 + $0x20] sm:$0xff]  ;;  %v5455_v35 = vld [vmem:[%s5426_s21 + $0x30] sm:$0xff] }
  0x16   : > { %4535 = vmatpush3.bf16.msra.mxu1 %v673_v8  ;;  %7145 = vst [vmem:[#allocation4_spill] sm:$0xff] %v5444_v29  ;;  %v5447_v32 = vld [vmem:[%s5426_s21 + $0x28] sm:$0x3]  ;;  %v5451_v33 = vpack.c.bf16 %v5444_v29, %v5441_v28  ;;  %v540_v34 = vrot.slane %v5441_v28, 1  ;;  %v541_v38 = vrot.slane %v5444_v29, 1  ;;  %v5462_v40 = vld [vmem:[%s5426_s21 + $0x38] sm:$0xff] }
  0x17   : > { %4695 = vmatpush3.bf16.msra.mxu0 %v1709_v12  ;;  %4536 = vmatprep.subr.bf16.mxu1 %v674_v16  ;;  %7146 = vst [vmem:[#allocation5_spill] sm:$0xff] %v5447_v32  ;;  %v537_v36 = vsel %vm534_vm0, %v535_v25, %v536_v26  ;;  %v539_v37 = vsel %vm534_vm0, %v536_v26, %v538_v27  ;;  %v543_v39 = vrot.slane %v5447_v32, 1  ;;  %v5465_v41 = vld [vmem:[%s5426_s21 + $0x40] sm:$0x3]  ;;  %v5474_v45 = vld [vmem:[%s5426_s21 + $0x48] sm:$0xff]  ;;  %v5477_v46 = vld [vmem:[%s5426_s21 + $0x50] sm:$0xff] }
  0x18   : > { %7147 = vst [vmem:[#allocation6_spill] sm:$0xff] %v5451_v33  ;;  %4696 = vmatprep.subr.bf16.mxu0 %v1710_v18  ;;  %v647_v43 = vpack.c.bf16 %v539_v37, %v537_v36  ;;  %v542_v47 = vsel %vm534_vm0, %v540_v34, %v541_v38  ;;  %v545_v49 = vrot.slane %v5455_v35, 1  ;;  %v546_v50 = vrot.slane %v5462_v40, 1  ;;  %v5484_v51 = vld [vmem:[%s5426_s21 + $0x58] sm:$0x3]  ;;  %v5487_v52 = vld [vmem:[%s5426_s21 + $0x60] sm:$0xff] }
  0x19   : > { %v544_v48 = vsel %vm534_vm0, %v541_v38, %v543_v39  ;;  %v5490_v53 = vld [vmem:[%s5426_s21 + $0x68] sm:$0xff]  ;;  %v548_v55 = vrot.slane %v5465_v41, 1  ;;  %v5494_v56 = vld [vmem:[%s5426_s21 + $0x70] sm:$0x3]  ;;  %v5497_v57 = vld [vmem:[%s5426_s21 + $0x78] sm:$0xff]  ;;  %v550_v60 = vrot.slane %v5474_v45, 1 }
  0x1a   : > { %4537 = vmatpush3.bf16.msra.mxu1 %v674_v16  ;;  %v648_v54 = vpack.c.bf16 %v544_v48, %v542_v47  ;;  %4540 = vmatprep.mubr.msk.bf16.mxu1 %vm393_vm1, %v647_v43  ;;  %v547_v58 = vsel %vm534_vm0, %v545_v49, %v546_v50  ;;  %v551_v61 = vrot.slane %v5477_v46, 1  ;;  %v5504_v62 = vld [vmem:[%s5426_s21 + $0x80] sm:$0xff]  ;;  %v5507_v63 = vld [vmem:[%s5426_s21 + $0x88] sm:$0x3]  ;;  %v4069_v0 = vld [vmem:[%s7101_s4 + $0x150] sm:$0xff]  ;;  %v553_v2 = vrot.slane %v5484_v51, 1 }
  0x1b   : > { %4697 = vmatpush3.bf16.msra.mxu0 %v1710_v18  ;;  %4538 = vmatprep.subr.bf16.mxu1 %v675_v30  ;;  %v549_v1 = vsel %vm534_vm0, %v546_v50, %v548_v55  ;;  %v555_v3 = vrot.slane %v5487_v52, 1  ;;  %v556_v4 = vrot.slane %v5490_v53, 1  ;;  %v5518_v5 = vld [vmem:[%s5426_s21 + $0x90] sm:$0xff]  ;;  %v5521_v6 = vld [vmem:[%s5426_s21 + $0x98] sm:$0xff]  ;;  %v558_v10 = vrot.slane %v5494_v56, 1  ;;  %v5538_v16 = vld [vmem:[%s5426_s21 + $0xa8] sm:$0xff] }
  0x1c   : > { %4698 = vmatprep.subr.bf16.mxu0 %v1711_v31  ;;  %4700 = vmatprep.mubr.msk.bf16.mxu0 %vm393_vm1, %v648_v54  ;;  %v4070_v7 = vld [vmem:[%s7101_s4 + $0x158] sm:$0xff]  ;;  %v5526_v8 = vpack.c.bf16 %v549_v1, %v547_v58  ;;  %v552_v9 = vsel %vm534_vm0, %v550_v60, %v551_v61  ;;  %v560_v11 = vrot.slane %v5497_v57, 1  ;;  %v5532_v12 = vld [vmem:[%s5426_s21 + $0xa0] sm:$0x3]  ;;  %v554_v13 = vsel %vm534_vm0, %v551_v61, %v553_v2  ;;  %v5541_v17 = vld [vmem:[%s5426_s21 + $0xb0] sm:$0xff] }
  0x1d   : > { %v561_v14 = vrot.slane %v5504_v62, 1  ;;  %v563_v15 = vrot.slane %v5507_v63, 1  ;;  %v5543_v18 = vpack.c.bf16 %v554_v13, %v552_v9  ;;  %v565_v19 = vrot.slane %v5518_v5, 1  ;;  %v5548_v25 = vld [vmem:[%s5426_s21 + $0xb8] sm:$0x3]  ;;  %v5563_v38 = vld [vmem:[%s5426_s21 + $0xc0] sm:$0xff] }
  0x1e   : > { %4539 = vmatpush3.bf16.msra.mxu1 %v675_v30  ;;  %7148 = vst [vmem:[#allocation7_spill] sm:$0xff] %v5526_v8  ;;  %v566_v20 = vrot.slane %v5521_v6, 1  ;;  %v1926_v21 = vpack.c.bf16 %v4070_v7, %v4069_v0  ;;  %v557_v26 = vsel %vm534_vm0, %v555_v3, %v556_v4  ;;  %v559_v27 = vsel %vm534_vm0, %v556_v4, %v558_v10  ;;  %v5566_v39 = vld [vmem:[%s5426_s21 + $0xc8] sm:$0xff]  ;;  %v5569_v42 = vld [vmem:[%s5426_s21 + $0xd0] sm:$0x3]  ;;  %v5577_v48 = vld [vmem:[%s5426_s21 + $0xd8] sm:$0xff] }
  0x1f   : > { %4699 = vmatpush3.bf16.msra.mxu0 %v1711_v31  ;;  %7149 = vst [vmem:[#allocation8_spill] sm:$0xff] %v5543_v18  ;;  %v568_v30 = vrot.slane %v5532_v12, 1  ;;  %v562_v31 = vsel %vm534_vm0, %v560_v11, %v561_v14  ;;  %v564_v34 = vsel %vm534_vm0, %v561_v14, %v563_v15  ;;  %v570_v36 = vrot.slane %v5538_v16, 1  ;;  %v5580_v49 = vld [vmem:[%s5426_s21 + $0xe0] sm:$0xff]  ;;  %v5583_v50 = vld [vmem:[%s5426_s21 + $0xe8] sm:$0x3] }
  0x20   : > { %4732 = vmatprep.subr.bf16.mxu0 %v1925_v59  ;;  %v571_v37 = vrot.slane %v5541_v17, 1  ;;  %v567_v43 = vsel %vm534_vm0, %v565_v19, %v566_v20  ;;  %v573_v47 = vrot.slane %v5548_v25, 1  ;;  %v5594_v60 = vld [vmem:[%s5426_s21 + $0xf8] sm:$0xff]  ;;  %v5597_v61 = vld [vmem:[%s5426_s21 + $0x100] sm:$0x3]  ;;  %v5601_v2 = vpack.c.bf16 %v559_v27, %v557_v26  ;;  %v4072_v4 = vld [vmem:[%s7101_s4 + $0x168] sm:$0xff] }
  0x21   : > { %4541 = vmatmul.mubr.msk.bf16.vlgmr.msra.gmra.mrb[0].mxu1 %vm393_vm1, %v648_v54  ;;  %v569_v44 = vsel %vm534_vm0, %v566_v20, %v568_v30  ;;  %v4071_v54 = vld [vmem:[%s7101_s4 + $0x160] sm:$0xff]  ;;  %7150 = vst [vmem:[#allocation9_spill] sm:$0xff] %v5594_v60  ;;  %7151 = vst [vmem:[#allocation10_spill] sm:$0xff] %v5597_v61  ;;  %v5603_v3 = vpack.c.bf16 %v564_v34, %v562_v31  ;;  %v5609_v7 = vld [vmem:[%s5426_s21 + $0x108] sm:$0xff]  ;;  %v575_v13 = vrot.slane %v5563_v38, 1  ;;  %v576_v14 = vrot.slane %v5566_v39, 1 }
  0x22   : > { %4701 = vmatmul.mubr.msk.bf16.vlgmr.msra.gmra.mrb[0].mxu0 %vm393_vm1, %v5526_v8  ;;  %4544 = vmatprep.mubr.msk.bf16.mxu1 %vm393_vm1, %v5526_v8  ;;  %7152 = vst [vmem:[#allocation11_spill] sm:$0xff] %v5601_v2  ;;  %7153 = vst [vmem:[#allocation12_spill] sm:$0xff] %v5609_v7  ;;  %v5612_v9 = vld [vmem:[%s5426_s21 + $0x110] sm:$0xff]  ;;  %v5614_v10 = vpack.c.bf16 %v569_v44, %v567_v43  ;;  %v572_v11 = vsel %vm534_vm0, %v570_v36, %v571_v37  ;;  %v5620_v15 = vld [vmem:[%s5426_s21 + $0x118] sm:$0x3]  ;;  %v578_v27 = vrot.slane %v5569_v42, 1 }
  0x23   : > { %4733 = vmatpush3.bf16.msra.mxu0 %v1925_v59  ;;  %4704 = vmatprep.mubr.msk.bf16.mxu0 %vm393_vm1, %v5543_v18  ;;  %v5591_v59 = vld [vmem:[%s5426_s21 + $0xf0] sm:$0xff]  ;;  %7154 = vst [vmem:[#allocation13_spill] sm:$0xff] %v5612_v9  ;;  %7155 = vst [vmem:[#allocation14_spill] sm:$0xff] %v5620_v15  ;;  %v5623_v19 = vld [vmem:[%s5426_s21 + $0x120] sm:$0xff]  ;;  %v574_v26 = vsel %vm534_vm0, %v571_v37, %v573_v47  ;;  %v580_v30 = vrot.slane %v5577_v48, 1  ;;  %v581_v31 = vrot.slane %v5580_v49, 1 }
  0x24   : > { %4734 = vmatprep.subr.bf16.mxu0 %v1926_v21  ;;  %7156 = vst [vmem:[#allocation15_spill] sm:$0xff] %v5623_v19  ;;  %v5626_v20 = vld [vmem:[%s5426_s21 + $0x128] sm:$0xff]  ;;  %v5633_v34 = vld [vmem:[%s5426_s21 + $0x130] sm:$0x3]  ;;  %v5636_v36 = vld [vmem:[%s5426_s21 + $0x138] sm:$0xff]  ;;  %v583_v43 = vrot.slane %v5583_v50, 1  ;;  %v1927_v58 = vpack.c.bf16 %v4072_v4, %v4071_v54 }
  0x25   : > { %7157 = vst [vmem:[#allocation16_spill] sm:$0xff] %v5626_v20  ;;  %7158 = vst [vmem:[#allocation17_spill] sm:$0xff] %v5633_v34  ;;  %v585_v44 = vrot.slane %v5591_v59, 1  ;;  %v586_v55 = vrot.slane %v5594_v60, 1  ;;  %v5645_v37 = vld [vmem:[%s5426_s21 + $0x148] sm:$0x3] }
  0x26   : > { %7159 = vst [vmem:[#allocation18_spill] sm:$0xff] %v5636_v36  ;;  %7161 = vst [vmem:[#allocation20_spill] sm:$0xff] %v5645_v37  ;;  %v588_v47 = vrot.slane %v5597_v61, 1  ;;  %v590_v0 = vrot.slane %v5609_v7, 1  ;;  %v591_v1 = vrot.slane %v5612_v9, 1  ;;  %v593_v8 = vrot.slane %v5620_v15, 1 }
  0x27   : > { %4735 = vmatpush3.bf16.msra.mxu0 %v1926_v21  ;;  %v5642_v21 = vld [vmem:[%s5426_s21 + $0x140] sm:$0xff]  ;;  %v475_v4 = vld [vmem:[%s7101_s4 + $0x8] sm:$0xff]  ;;  %v596_v33 = vrot.slane %v5626_v20, 1  ;;  %v598_v32 = vrot.slane %v5633_v34, 1  ;;  %v600_v29 = vrot.slane %v5636_v36, 1  ;;  %v5669_v15 = vpack.c.bf16 %v574_v26, %v572_v11  ;;  %v4073_v34 = vld [vmem:[%s7101_s4 + $0x170] sm:$0xff] }
  0x28   : > { %7160 = vst [vmem:[#allocation19_spill] sm:$0xff] %v5642_v21  ;;  %v474_v54 = vld [vmem:[%s7101_s4] sm:$0xff]  ;;  %v577_v9 = vsel %vm534_vm0, %v575_v13, %v576_v14  ;;  %4736 = vmatprep.subr.bf16.mxu0 %v1927_v58  ;;  %v601_v7 = vrot.slane %v5642_v21, 1  ;;  %v4074_v36 = vld [vmem:[%s7101_s4 + $0x178] sm:$0xff]  ;;  %v579_v11 = vsel %vm534_vm0, %v576_v14, %v578_v27  ;;  %v582_v13 = vsel %vm534_vm0, %v580_v30, %v581_v31  ;;  %v476_v20 = vld [vmem:[%s7101_s4 + $0x10] sm:$0xff] }
  0x29   : > { %4545 = vmatmul.mubr.msk.bf16.gmra.mrb[4].mxu1 %vm393_vm1, %v5543_v18  ;;  %v595_v18 = vrot.slane %v5623_v19, 1  ;;  %v5675_v19 = vld [vmem:[%s5426_s21 + $0x150] sm:$0xff]  ;;  %v584_v26 = vsel %vm534_vm0, %v581_v31, %v583_v43  ;;  %v482_v21 = vpack.c.bf16 %v475_v4, %v474_v54  ;;  %v477_v61 = vld [vmem:[%s7101_s4 + $0x18] sm:$0xff]  ;;  %v587_v60 = vsel %vm534_vm0, %v585_v44, %v586_v55  ;;  %v5721_v44 = vld [vmem:[%s5426_s21 + $0x168] sm:$0xff] }
  0x2a   : > { %4705 = vmatmul.mubr.msk.bf16.gmra.mrb[4].mxu0 %vm393_vm1, %v5601_v2  ;;  %4548 = vmatprep.mubr.msk.bf16.mxu1 %vm393_vm1, %v5601_v2  ;;  %v603_v2 = vrot.slane %v5645_v37, 1  ;;  %v5687_v37 = vld [vmem:[%s5426_s21 + $0x158] sm:$0xff]  ;;  %v589_v14 = vsel %vm534_vm0, %v586_v55, %v588_v47  ;;  %v592_v27 = vsel %vm534_vm0, %v590_v0, %v591_v1  ;;  %v594_v30 = vsel %vm534_vm0, %v591_v1, %v593_v8  ;;  %v478_v55 = vld [vmem:[%s7101_s4 + $0x20] sm:$0xff]  ;;  %v479_v8 = vld [vmem:[%s7101_s4 + $0x28] sm:$0xff] }
  0x2b   : > { %4708 = vmatprep.mubr.msk.bf16.mxu0 %vm393_vm1, %v5603_v3  ;;  %4737 = vmatpush3.bf16.msra.mxu0 %v1927_v58  ;;  %v5700_v58 = vld [vmem:[%s5426_s21 + $0x160] sm:$0x3]  ;;  %v597_v31 = vsel %vm534_vm0, %v595_v18, %v596_v33  ;;  %v599_v43 = vsel %vm534_vm0, %v596_v33, %v598_v32  ;;  %v602_v54 = vsel %vm534_vm0, %v600_v29, %v601_v7  ;;  %v605_v18 = vrot.slane %v5675_v19, 1  ;;  %v5724_v47 = vld [vmem:[%s5426_s21 + $0x170] sm:$0xff] }
  0x2c   : > { %4572 = vmatprep.subr.bf16.mxu1 %v482_v21  ;;  %v1928_v4 = vpack.c.bf16 %v4074_v36, %v4073_v34  ;;  %v604_v0 = vsel %vm534_vm0, %v601_v7, %v603_v2  ;;  %v606_v32 = vrot.slane %v5687_v37, 1  ;;  %v483_v29 = vpack.c.bf16 %v477_v61, %v476_v20  ;;  %v5727_v2 = vld [vmem:[%s5426_s21 + $0x178] sm:$0x3]  ;;  %v480_v20 = vld [vmem:[%s7101_s4 + $0x30] sm:$0xff] }
  0x2d   : > { %4573 = vmatpush3.bf16.msra.mxu1 %v482_v21  ;;  %v1109_v33 = vrot.slane %v5465_v41, 2  ;;  %v5715_v1 = vpack.c.bf16 %v579_v11, %v577_v9  ;;  %v5717_v34 = vpack.c.bf16 %v584_v26, %v582_v13  ;;  %v608_v36 = vrot.slane %v5700_v58, 1  ;;  %v481_v13 = vld [vmem:[%s7101_s4 + $0x38] sm:$0xff] }
  0x2e   : > { %4738 = vmatprep.subr.bf16.mxu0 %v1928_v4  ;;  %v5732_v61 = vpack.c.bf16 %v589_v14, %v587_v60  ;;  %v5734_v41 = vpack.c.bf16 %v594_v30, %v592_v27  ;;  %v484_v9 = vpack.c.bf16 %v479_v8, %v478_v55  ;;  %v5744_v11 = vpack.c.bf16 %v599_v43, %v597_v31  ;;  %v4091_v14 = vld [vmem:[%s7101_s4 + $0x180] sm:$0xff]  ;;  %v4092_v27 = vld [vmem:[%s7101_s4 + $0x188] sm:$0xff] }
  0x2f   : > { %4739 = vmatpush3.bf16.msra.mxu0 %v1928_v4  ;;  %v5746_v60 = vpack.c.bf16 %v604_v0, %v602_v54  ;;  %v5762_v30 = vsel %vm534_vm0, %v605_v18, %v606_v32  ;;  %4574 = vmatprep.subr.bf16.mxu1 %v483_v29  ;;  %v611_v43 = vrot.slane %v5724_v47, 1  ;;  %v5768_v4 = vsel %vm534_vm0, %v606_v32, %v608_v36 }
  0x30   : > { %7162 = vst [vmem:[#allocation21_spill] sm:$0xff] %v5732_v61  ;;  %7163 = vst [vmem:[#allocation22_spill] sm:$0xff] %v5734_v41  ;;  %v7165_v55 = vrot.slane %v5462_v40, 2  ;;  %v7166_v8 = vrot.slane %v5455_v35, 2  ;;  %v1111_v21 = vrot.slane %v5474_v45, 2  ;;  %v485_v7 = vpack.c.bf16 %v481_v13, %v480_v20 }
  0x31   : > { %4549 = vmatmul.mubr.msk.bf16.gmra.mrb[8].mxu1 %vm393_vm1, %v5603_v3  ;;  %7164 = vst [vmem:[#allocation23_spill] sm:$0xff] %v5744_v11  ;;  %v5781_v32 = vpack.c.bf16 %v4092_v27, %v4091_v14  ;;  %v1112_v36 = vrot.slane %v5477_v46, 2  ;;  %v1117_v20 = vrot.slane %v5490_v53, 2  ;;  %v1119_v13 = vrot.slane %v5494_v56, 2 }
  0x32   : > { %4709 = vmatmul.mubr.msk.bf16.gmra.mrb[8].mxu0 %vm393_vm1, %v5614_v10  ;;  %4552 = vmatprep.mubr.msk.bf16.mxu1 %vm393_vm1, %v5614_v10  ;;  %v1108_v0 = vsel %vm1095_vm2, %v7166_v8, %v7165_v55  ;;  %v7167_v18 = vmov %v7165_v55  ;;  %v1114_v55 = vrot.slane %v5484_v51, 2  ;;  %v1116_v8 = vrot.slane %v5487_v52, 2 }
  0x33   : > { %4712 = vmatprep.mubr.msk.bf16.mxu0 %vm393_vm1, %v5669_v15  ;;  %4575 = vmatpush3.bf16.msra.mxu1 %v483_v29  ;;  %v1110_v26 = vsel %vm1095_vm2, %v7167_v18, %v1109_v33  ;;  %v5785_v29 = vpack.c.bf16 %v5462_v40, %v5455_v35  ;;  %v5791_v33 = vpack.c.bf16 %v5477_v46, %v5474_v45  ;;  %v1121_v40 = vrot.slane %v5497_v57, 2 }
  0x34   : > { %4576 = vmatprep.subr.bf16.mxu1 %v484_v9  ;;  %v5779_v54 = vpack.c.bf16 %v1110_v26, %v1108_v0  ;;  %4772 = vmatprep.subr.bf16.mxu0 %v5781_v32  ;;  %v5799_v35 = vpack.c.bf16 %v5490_v53, %v5487_v52  ;;  %v5803_v26 = vld [vmem:[%s5426_s21 + $0x180] sm:$0xff]  ;;  %v1113_v45 = vsel %vm1095_vm2, %v1111_v21, %v1112_v36  ;;  %v1122_v51 = vrot.slane %v5504_v62, 2 }
  0x35   : > { %v1115_v46 = vsel %vm1095_vm2, %v1112_v36, %v1114_v55  ;;  %v1124_v14 = vrot.slane %v5507_v63, 2  ;;  %v1118_v52 = vsel %vm1095_vm2, %v1116_v8, %v1117_v20  ;;  %v1120_v53 = vsel %vm1095_vm2, %v1117_v20, %v1119_v13 }
  0x36   : > { %v5811_v56 = vpack.c.bf16 %v1115_v46, %v1113_v45  ;;  %v5820_v21 = vpack.c.bf16 %v1120_v53, %v1118_v52  ;;  %v1123_v63 = vsel %vm1095_vm2, %v1121_v40, %v1122_v51  ;;  %v1127_v0 = vrot.slane %v5521_v6, 2 }
  0x37   : > { %4577 = vmatpush3.bf16.msra.mxu1 %v484_v9  ;;  %v1126_v9 = vrot.slane %v5518_v5, 2  ;;  %v1125_v27 = vsel %vm1095_vm2, %v1122_v51, %v1124_v14  ;;  %v5832_v55 = vpack.c.bf16 %v5504_v62, %v5497_v57  ;;  %v1129_v8 = vrot.slane %v5532_v12, 2 }
  0x38   : > { %4578 = vmatprep.subr.bf16.mxu1 %v485_v7  ;;  %v5828_v36 = vpack.c.bf16 %v1125_v27, %v1123_v63  ;;  %v5838_v13 = vpack.c.bf16 %v5521_v6, %v5518_v5  ;;  %v1131_v40 = vrot.slane %v5538_v16, 2  ;;  %v1132_v45 = vrot.slane %v5541_v17, 2 }
  0x39   : > { %4553 = vmatmul.mubr.msk.bf16.gmra.mrb[12].mxu1 %vm393_vm1, %v5669_v15  ;;  %v1128_v20 = vsel %vm1095_vm2, %v1126_v9, %v1127_v0  ;;  %v1130_v46 = vsel %vm1095_vm2, %v1127_v0, %v1129_v8  ;;  %v1134_v51 = vrot.slane %v5548_v25, 2  ;;  %v5846_v57 = vpack.c.bf16 %v5541_v17, %v5538_v16  ;;  %v7168_v8 = vld [vmem:[#allocation9_spill] sm:$0xff] }
  0x3a   : > { %4713 = vmatmul.mubr.msk.bf16.gmra.mrb[12].mxu0 %vm393_vm1, %v5715_v1  ;;  %4556 = vmatprep.mubr.msk.bf16.mxu1 %vm393_vm1, %v5715_v1  ;;  %v1136_v62 = vrot.slane %v5563_v38, 2  ;;  %v5849_v12 = vpack.c.bf16 %v1130_v46, %v1128_v20  ;;  %v1137_v5 = vrot.slane %v5566_v39, 2  ;;  %v1139_v6 = vrot.slane %v5569_v42, 2  ;;  %v7170_v46 = vld [vmem:[#allocation12_spill] sm:$0xff] }
  0x3b   : > { %4716 = vmatprep.mubr.msk.bf16.mxu0 %vm393_vm1, %v5717_v34  ;;  %4579 = vmatpush3.bf16.msra.mxu1 %v485_v7  ;;  %v1133_v7 = vsel %vm1095_vm2, %v1131_v40, %v1132_v45  ;;  %v1135_v14 = vsel %vm1095_vm2, %v1132_v45, %v1134_v51  ;;  %v5857_v52 = vpack.c.bf16 %v5566_v39, %v5563_v38  ;;  %v1141_v25 = vrot.slane %v5577_v48, 2  ;;  %v7169_v40 = vld [vmem:[#allocation10_spill] sm:$0xff] }
  0x3c   : > { %v1142_v16 = vrot.slane %v5580_v49, 2  ;;  %v5861_v17 = vpack.c.bf16 %v1135_v14, %v1133_v7  ;;  %v1138_v53 = vsel %vm1095_vm2, %v1136_v62, %v1137_v5  ;;  %v1140_v9 = vsel %vm1095_vm2, %v1137_v5, %v1139_v6  ;;  %v7171_v62 = vld [vmem:[#allocation13_spill] sm:$0xff]  ;;  %v7172_v5 = vld [vmem:[#allocation14_spill] sm:$0xff] }
  0x3d   : > { %v1144_v63 = vrot.slane %v5583_v50, 2  ;;  %v5868_v42 = vpack.c.bf16 %v1140_v9, %v1138_v53  ;;  %v5873_v39 = vpack.c.bf16 %v5580_v49, %v5577_v48  ;;  %v1146_v27 = vrot.slane %v5591_v59, 2  ;;  %v7174_v9 = vld [vmem:[#allocation16_spill] sm:$0xff] }
  0x3e   : > { %v1143_v38 = vsel %vm1095_vm2, %v1141_v25, %v1142_v16  ;;  %v5882_v50 = vpack.c.bf16 %v5768_v4, %v5762_v30  ;;  %v1147_v20 = vrot.slane %v7168_v8, 2  ;;  %v1149_v45 = vrot.slane %v7169_v40, 2 }
  0x3f   : > { %v1145_v0 = vsel %vm1095_vm2, %v1142_v16, %v1144_v63  ;;  %v5893_v49 = vpack.c.bf16 %v7168_v8, %v5591_v59  ;;  %v1151_v51 = vrot.slane %v7170_v46, 2  ;;  %v1152_v30 = vrot.slane %v7171_v62, 2  ;;  %v7173_v59 = vld [vmem:[#allocation15_spill] sm:$0xff]  ;;  %v7175_v8 = vld [vmem:[#allocation17_spill] sm:$0xff] }
  0x40   : > { %v5889_v48 = vpack.c.bf16 %v1145_v0, %v1143_v38  ;;  %v1148_v4 = vsel %vm1095_vm2, %v1146_v27, %v1147_v20  ;;  %v1150_v7 = vsel %vm1095_vm2, %v1147_v20, %v1149_v45  ;;  %v1154_v6 = vrot.slane %v7172_v5, 2  ;;  %v3995_v38 = vld [vmem:[%s7101_s4 + $0x80] sm:$0xff]  ;;  %v3996_v27 = vld [vmem:[%s7101_s4 + $0x88] sm:$0xff]  ;;  %v7176_v45 = vld [vmem:[#allocation18_spill] sm:$0xff] }
  0x41   : > { %4557 = vmatmul.mubr.msk.bf16.gmra.mrb[16].mxu1 %vm393_vm1, %v5717_v34  ;;  %v5902_v14 = vpack.c.bf16 %v7171_v62, %v7170_v46  ;;  %v5904_v25 = vpack.c.bf16 %v1150_v7, %v1148_v4  ;;  %v1153_v16 = vsel %vm1095_vm2, %v1151_v51, %v1152_v30  ;;  %v1156_v53 = vrot.slane %v7173_v59, 2  ;;  %v7177_v4 = vld [vmem:[#allocation19_spill] sm:$0xff]  ;;  %v7178_v5 = vld [vmem:[#allocation20_spill] sm:$0xff] }
  0x42   : > { %4717 = vmatmul.mubr.msk.bf16.gmra.mrb[16].mxu0 %vm393_vm1, %v5732_v61  ;;  %4560 = vmatprep.mubr.msk.bf16.mxu1 %vm393_vm1, %v5732_v61  ;;  %v1157_v63 = vrot.slane %v7174_v9, 2  ;;  %v1155_v0 = vsel %vm1095_vm2, %v1152_v30, %v1154_v6  ;;  %v1159_v20 = vrot.slane %v7175_v8, 2  ;;  %v5919_v40 = vpack.c.bf16 %v7174_v9, %v7173_v59 }
  0x43   : > { %4720 = vmatprep.mubr.msk.bf16.mxu0 %vm393_vm1, %v5734_v41  ;;  %v1161_v46 = vrot.slane %v7176_v45, 2  ;;  %v5922_v51 = vpack.c.bf16 %v1155_v0, %v1153_v16  ;;  %v1162_v7 = vrot.slane %v7177_v4, 2  ;;  %v1164_v18 = vrot.slane %v7178_v5, 2  ;;  %v453_v16 = vld [vmem:[%s5426_s21 + $0x188] sm:$0xff] }
  0x44   : > { %v1158_v62 = vsel %vm1095_vm2, %v1156_v53, %v1157_v63  ;;  %v1160_v31 = vsel %vm1095_vm2, %v1157_v63, %v1159_v20  ;;  %v5930_v30 = vpack.c.bf16 %v7177_v4, %v7176_v45  ;;  %v5932_v6 = vpack.c.bf16 %v3996_v27, %v3995_v38 }
  0x45   : > { %v1166_v59 = vrot.slane %v5675_v19, 2  ;;  %v5938_v9 = vpack.c.bf16 %v1160_v31, %v1158_v62  ;;  %v1163_v53 = vsel %vm1095_vm2, %v1161_v46, %v1162_v7  ;;  %v1165_v0 = vsel %vm1095_vm2, %v1162_v7, %v1164_v18 }
  0x46   : > { %v1167_v63 = vrot.slane %v5687_v37, 2  ;;  %v7179_v38 = vrot.slane %v5721_v44, 1  ;;  %v7180_v27 = vrot.slane %v5727_v2, 1  ;;  %v5957_v8 = vpack.c.bf16 %v1165_v0, %v1163_v53  ;;  %4612 = vmatprep.subr.bf16.mxu1 %v5932_v6 }
  0x47   : > { %v1169_v20 = vrot.slane %v5700_v58, 2  ;;  %v5966_v46 = vpack.c.bf16 %v5687_v37, %v5675_v19  ;;  %v1171_v62 = vrot.slane %v5721_v44, 2  ;;  %v1172_v4 = vrot.slane %v5724_v47, 2 }
  0x48   : > { %v612_v31 = vsel %vm534_vm0, %v7179_v38, %v611_v43  ;;  %v614_v18 = vsel %vm534_vm0, %v611_v43, %v7180_v27  ;;  %v1168_v45 = vsel %vm1095_vm2, %v1166_v59, %v1167_v63  ;;  %v454_v43 = vld [vmem:[%s5426_s21 + $0x190] sm:$0x3]  ;;  %v1692_v7 = vrot.slane %v453_v16, 1 }
  0x49   : > { %4561 = vmatmul.mubr.msk.bf16.gmra.mrb[20].mxu1 %vm393_vm1, %v5734_v41  ;;  %v1170_v5 = vsel %vm1095_vm2, %v1167_v63, %v1169_v20  ;;  %v1174_v58 = vrot.slane %v5727_v2, 2  ;;  %v5975_v53 = vpack.c.bf16 %v5724_v47, %v5721_v44  ;;  %v1173_v59 = vsel %vm1095_vm2, %v1171_v62, %v1172_v4 }
  0x4a   : > { %4721 = vmatmul.mubr.msk.bf16.gmra.mrb[20].mxu0 %vm393_vm1, %v5744_v11  ;;  %4564 = vmatprep.mubr.msk.bf16.mxu1 %vm393_vm1, %v5744_v11  ;;  %v5977_v0 = vpack.c.bf16 %v1170_v5, %v1168_v45  ;;  %v1908_v19 = vrot.slane %v5803_v26, 2  ;;  %v1909_v37 = vrot.slane %v453_v16, 2  ;;  %v5981_v38 = vpack.c.bf16 %v614_v18, %v612_v31 }
  0x4b   : > { %4724 = vmatprep.mubr.msk.bf16.mxu0 %vm393_vm1, %v5746_v60  ;;  %v1175_v27 = vsel %vm1095_vm2, %v1172_v4, %v1174_v58  ;;  %v1911_v11 = vrot.slane %v454_v43, 2  ;;  %v7181_v63 = vrot.slane %v5432_v23, 2  ;;  %v7182_v2 = vrot.slane %v5429_v22, 2  ;;  %v7185_v4 = vld [vmem:[#allocation4_spill] sm:$0xff]  ;;  %v7186_v58 = vld [vmem:[#allocation5_spill] sm:$0xff] }
  0x4c   : > { %v1694_v44 = vrot.slane %v454_v43, 1  ;;  %v5991_v47 = vpack.c.bf16 %v1175_v27, %v1173_v59  ;;  %v1910_v45 = vsel %vm1095_vm2, %v1908_v19, %v1909_v37  ;;  %v7183_v62 = vrot.slane %v5435_v24, 2 }
  0x4d   : > { %v5989_v20 = vsel %vm1095_vm2, %v7182_v2, %v7181_v63  ;;  %v7184_v31 = vmov %v7181_v63  ;;  %v1102_v5 = vrot.slane %v7185_v4, 2  ;;  %v1104_v41 = vrot.slane %v7186_v58, 2  ;;  %v3999_v4 = vld [vmem:[%s7101_s4 + $0xa0] sm:$0xff] }
  0x4e   : > { %v5999_v18 = vsel %vm1095_vm2, %v7184_v31, %v7183_v62  ;;  %v1912_v61 = vsel %vm1095_vm2, %v1909_v37, %v1911_v11  ;;  %v6015_v24 = vpack.c.bf16 %v453_v16, %v5803_v26  ;;  %v7187_v11 = vrot.slane %v5803_v26, 1  ;;  %v3997_v16 = vld [vmem:[%s7101_s4 + $0x90] sm:$0xff]  ;;  %v4096_v62 = vld [vmem:[%s7101_s4 + $0x1a8] sm:$0xff]  ;;  %v4212_v58 = vld [vmem:[%s6075_s11 + $0xd9] sm:$0xff] }
  0x4f   : > { %v1208_v43 = vpack.c.bf16 %v5999_v18, %v5989_v20  ;;  %v6008_v59 = vpack.c.bf16 %v1912_v61, %v1910_v45  ;;  %v1695_v37 = vsel %vm534_vm0, %v1692_v7, %v1694_v44  ;;  %v7188_v61 = vrot.slane %v5441_v28, 2  ;;  %v4093_v28 = vld [vmem:[%s7101_s4 + $0x190] sm:$0xff]  ;;  %v4095_v44 = vld [vmem:[%s7101_s4 + $0x1a0] sm:$0xff]  ;;  %v4022_v18 = vld [vmem:[%s7101_s4 + $0xd8] sm:$0xff] }
  0x50   : > { %v1693_v19 = vsel %vm534_vm0, %v7187_v11, %v1692_v7  ;;  %v1105_v63 = vsel %vm1095_vm2, %v1102_v5, %v1104_v41  ;;  %v7189_v26 = vpack.c.bf16 %v5432_v23, %v5429_v22  ;;  %v4094_v41 = vld [vmem:[%s7101_s4 + $0x198] sm:$0xff]  ;;  %v2137_v11 = vpack.c.bf16 %v4096_v62, %v4095_v44  ;;  %v4213_v44 = vld [vmem:[%s6075_s11 + $0xe1] sm:$0xff]  ;;  %v4021_v20 = vld [vmem:[%s7101_s4 + $0xd0] sm:$0xff] }
  0x51   : > { %4565 = vmatmul.mubr.msk.bf16.gmra.mrb[24].mxu1 %vm393_vm1, %v5746_v60  ;;  %v1103_v27 = vsel %vm1095_vm2, %v7188_v61, %v1102_v5  ;;  %v6027_v2 = vpack.c.bf16 %v1695_v37, %v1693_v19  ;;  %v3998_v22 = vld [vmem:[%s7101_s4 + $0x98] sm:$0xff]  ;;  %v2136_v23 = vpack.c.bf16 %v4094_v41, %v4093_v28  ;;  %v4000_v5 = vld [vmem:[%s7101_s4 + $0xa8] sm:$0xff]  ;;  %v4097_v37 = vld [vmem:[%s7101_s4 + $0x1b0] sm:$0xff] }
  0x52   : > { %4725 = vmatmul.mubr.msk.bf16.gmra.mrb[24].mxu0 %vm393_vm1, %v5882_v50  ;;  %4568 = vmatprep.mubr.msk.bf16.mxu1 %vm393_vm1, %v5882_v50  ;;  %v6029_v45 = vpack.c.bf16 %v1105_v63, %v1103_v27  ;;  %v7190_v7 = vld [vmem:[#allocation6_spill] sm:$0xff]  ;;  %v1234_v31 = vpack.c.bf16 %v3998_v22, %v3997_v16  ;;  %v4196_v19 = vld [vmem:[%s6075_s11 + $0x19] sm:$0xff]  ;;  %v5308_v27 = vmov 0   ;;  %v4116_v16 = vld [vmem:[%s7101_s4 + $0x1c8] sm:$0xff] }
  0x53   : > { %4728 = vmatprep.mubr.msk.bf16.mxu0 %vm393_vm1, %v5981_v38  ;;  %v4098_v61 = vld [vmem:[%s7101_s4 + $0x1b8] sm:$0xff]  ;;  %5208 = vset.pattern.permute.xlu0 %v5308_v27  ;;  %v4001_v63 = vld [vmem:[%s7101_s4 + $0xb0] sm:$0xff]  ;;  %v4115_v41 = vld [vmem:[%s7101_s4 + $0x1c0] sm:$0xff] }
  0x54   : > { %3087 = vperm.xlu0 %5208, %v4212_v58   ;;  %5209 = vset.pattern.permute.xlu1 %v5308_v27  ;;  %v4019_v22 = vld [vmem:[%s7101_s4 + $0xc0] sm:$0xff]  ;;  %v2990_v58 = vld [vmem:[%s6109_s9 + $0x88] sm:$0xff] }
  0x55   : > { %3007 = vperm.xlu1 %5209, %v4196_v19   ;;  %v4197_v62 = vld [vmem:[%s6075_s11 + $0x21] sm:$0xff] }
  0x58   : > { %3092 = vperm.xlu0 %5208, %v4213_v44  }
  0x59   : > { %4569 = vmatmul.mubr.msk.bf16.gmra.mrb[28].mxu1 %vm393_vm1, %v5981_v38  ;;  %3012 = vperm.xlu1 %5209, %v4197_v62   ;;  %v2975_v62 = vld [vmem:[%s6109_s9 + $0x10] sm:$0xff] }
  0x5a   : > { %4729 = vmatmul.mubr.msk.bf16.gmra.mrb[28].mxu0 %vm393_vm1, %v6027_v2  ;;  %4580 = vmatprep.mubr.msk.bf16.mxu1 %vm393_vm1, %v7189_v26  ;;  %v2138_v26 = vpack.c.bf16 %v4098_v61, %v4097_v37  ;;  %v2973_v37 = vld [vmem:[%s6109_s9] sm:$0xff]  ;;  %v2974_v61 = vld [vmem:[%s6109_s9 + $0x8] sm:$0xff] }
  0x5b   : > { %4740 = vmatprep.mubr.msk.bf16.mxu0 %vm393_vm1, %v6029_v45 }
  0x61   : > { %4581 = vmatmul.mubr.msk.bf16.vlgmr.msra.gmra.mrb[0].mxu1 %vm393_vm1, %v7190_v7 }
  0x62   : > { %4741 = vmatmul.mubr.msk.bf16.vlgmr.msra.gmra.mrb[0].mxu0 %vm393_vm1, %v5779_v54  ;;  %4584 = vmatprep.mubr.msk.bf16.mxu1 %vm393_vm1, %v5785_v29 }
  0x63   : > { %4773 = vmatpush3.bf16.msra.mxu0 %v5781_v32  ;;  %4744 = vmatprep.mubr.msk.bf16.mxu0 %vm393_vm1, %v5811_v56  ;;  %v1235_v32 = vpack.c.bf16 %v4000_v5, %v3999_v4  ;;  %v2989_v4 = vld [vmem:[%s6109_s9 + $0x80] sm:$0xff] }
  0x64   : > { %4774 = vmatprep.subr.bf16.mxu0 %v2136_v23  ;;  %4613 = vmatpush3.bf16.msra.mxu1 %v5932_v6  ;;  %v4002_v6 = vld [vmem:[%s7101_s4 + $0xb8] sm:$0xff]  ;;  %v3213_v19 = vsub.f32 1.0, %v2989_v4 }
  0x65   : > { %4614 = vmatprep.subr.bf16.mxu1 %v1234_v31  ;;  %v1236_v28 = vpack.c.bf16 %v4002_v6, %v4001_v63  ;;  %v3198_v63 = vsub.f32 1.0, %v2974_v61  ;;  %v4214_v6 = vld [vmem:[%s6075_s11 + $0xf1] sm:$0xff]  ;;  %v4200_v61 = vld [vmem:[%s6075_s11 + $0x49] sm:$0xff] }
  0x66   : > { %3311 = vperm.xlu0 %5208, %v3213_v19   ;;  %v2976_v4 = vld [vmem:[%s6109_s9 + $0x18] sm:$0xff] }
  0x67   : > { %4775 = vmatpush3.bf16.msra.mxu0 %v2136_v23  ;;  %v4020_v23 = vld [vmem:[%s7101_s4 + $0xc8] sm:$0xff]  ;;  %v3200_v19 = vsub.f32 1.0, %v2976_v4 }
  0x68   : > { %4776 = vmatprep.subr.bf16.mxu0 %v2137_v11  ;;  %4615 = vmatpush3.bf16.msra.mxu1 %v1234_v31  ;;  %v6125_v31 = vpack.c.bf16 %v4116_v16, %v4115_v41  ;;  %v6128_v5 = vpack.c.bf16 %v4020_v23, %v4019_v22  ;;  %v2991_v41 = vld [vmem:[%s6109_s9 + $0x90] sm:$0xff]  ;;  %v4199_v16 = vld [vmem:[%s6075_s11 + $0x39] sm:$0xff]  ;;  %v4202_v4 = vld [vmem:[%s6075_s11 + $0x61] sm:$0xff] }
  0x69   : > { %4585 = vmatmul.mubr.msk.bf16.gmra.mrb[4].mxu1 %vm393_vm1, %v5791_v33  ;;  %4616 = vmatprep.subr.bf16.mxu1 %v1235_v32  ;;  %v2992_v22 = vld [vmem:[%s6109_s9 + $0x98] sm:$0xff]  ;;  %v3215_v23 = vsub.f32 1.0, %v2991_v41  ;;  %v2977_v41 = vld [vmem:[%s6109_s9 + $0x20] sm:$0xff] }
  0x6a   : > { %4745 = vmatmul.mubr.msk.bf16.gmra.mrb[4].mxu0 %vm393_vm1, %v5820_v21  ;;  %4588 = vmatprep.mubr.msk.bf16.mxu1 %vm393_vm1, %v5799_v35  ;;  %v3216_v44 = vsub.f32 1.0, %v2992_v22  ;;  %v3201_v22 = vsub.f32 1.0, %v2977_v41 }
  0x6b   : > { %4748 = vmatprep.mubr.msk.bf16.mxu0 %vm393_vm1, %v5828_v36  ;;  %4777 = vmatpush3.bf16.msra.mxu0 %v2137_v11  ;;  %v3214_v11 = vsub.f32 1.0, %v2990_v58  ;;  %v3199_v58 = vsub.f32 1.0, %v2975_v62  ;;  %v4219_v62 = vld [vmem:[%s6075_s11 + $0x129] sm:$0xff] }
  0x6c   : > { %4778 = vmatprep.subr.bf16.mxu0 %v2138_v26  ;;  %4617 = vmatpush3.bf16.msra.mxu1 %v1235_v32  ;;  %v3197_v32 = vsub.f32 1.0, %v2973_v37  ;;  %v4217_v37 = vld [vmem:[%s6075_s11 + $0x111] sm:$0xff] }
  0x6d   : > { %4618 = vmatprep.subr.bf16.mxu1 %v1236_v28  ;;  %3316 = vperm.xlu1 %5209, %v3214_v11   ;;  %v4216_v11 = vld [vmem:[%s6075_s11 + $0x109] sm:$0xff] }
  0x6e   : > { %3231 = vperm.xlu0 %5208, %v3197_v32   ;;  %v2993_v32 = vld [vmem:[%s6109_s9 + $0xa0] sm:$0xff] }
  0x6f   : > { %4779 = vmatpush3.bf16.msra.mxu0 %v2138_v26  ;;  %v4215_v26 = vld [vmem:[%s6075_s11 + $0xf9] sm:$0xff] }
  0x70   : > { %4619 = vmatpush3.bf16.msra.mxu1 %v1236_v28  ;;  %4812 = vmatprep.subr.bf16.mxu0 %v6125_v31  ;;  %v4198_v28 = vld [vmem:[%s6075_s11 + $0x31] sm:$0xff] }
  0x71   : > { %4589 = vmatmul.mubr.msk.bf16.gmra.mrb[8].mxu1 %vm393_vm1, %v5832_v55  ;;  %4652 = vmatprep.subr.bf16.mxu1 %v6128_v5 }
  0x72   : > { %4749 = vmatmul.mubr.msk.bf16.gmra.mrb[8].mxu0 %vm393_vm1, %v5849_v12  ;;  %4592 = vmatprep.mubr.msk.bf16.mxu1 %vm393_vm1, %v5838_v13 }
  0x73   : > { %4752 = vmatprep.mubr.msk.bf16.mxu0 %vm393_vm1, %v5861_v17  ;;  %3236 = vperm.xlu1 %5209, %v3198_v63   ;;  %v4201_v63 = vld [vmem:[%s6075_s11 + $0x51] sm:$0xff] }
  0x74   : > { %3097 = vperm.xlu0 %5208, %v4214_v6   ;;  %v2994_v6 = vld [vmem:[%s6109_s9 + $0xa8] sm:$0xff] }
  0x77   : > { %3102 = vperm.xlu1 %5209, %v4215_v26   ;;  %v3217_v26 = vsub.f32 1.0, %v2993_v32  ;;  %v4119_v32 = vld [vmem:[%s7101_s4 + $0x1e0] sm:$0xff] }
  0x78   : > { %3017 = vperm.xlu0 %5208, %v4198_v28   ;;  %v3218_v28 = vsub.f32 1.0, %v2994_v6  ;;  %v1489_v6 = vpack.c.bf16 %v4022_v18, %v4021_v20  ;;  %v4140_v20 = vld [vmem:[%s7101_s4 + $0x208] sm:$0xff] }
  0x79   : > { %4593 = vmatmul.mubr.msk.bf16.gmra.mrb[12].mxu1 %vm393_vm1, %v5846_v57 }
  0x7a   : > { %4753 = vmatmul.mubr.msk.bf16.gmra.mrb[12].mxu0 %vm393_vm1, %v5868_v42  ;;  %4596 = vmatprep.mubr.msk.bf16.mxu1 %vm393_vm1, %v5857_v52 }
  0x7b   : > { %4756 = vmatprep.mubr.msk.bf16.mxu0 %vm393_vm1, %v5889_v48  ;;  %3022 = vperm.xlu1 %5209, %v4199_v16   ;;  %v2978_v16 = vld [vmem:[%s6109_s9 + $0x28] sm:$0xff] }
  0x7c   : > { %3321 = vperm.xlu0 %5208, %v3215_v23   ;;  %v3202_v23 = vsub.f32 1.0, %v2978_v16 }
  0x7f   : > { %3326 = vperm.xlu1 %5209, %v3216_v44   ;;  %v4218_v44 = vld [vmem:[%s6075_s11 + $0x121] sm:$0xff] }
  0x80   : > { %3241 = vperm.xlu0 %5208, %v3199_v58   ;;  %v4117_v58 = vld [vmem:[%s7101_s4 + $0x1d0] sm:$0xff] }
  0x81   : > { %4597 = vmatmul.mubr.msk.bf16.gmra.mrb[16].mxu1 %vm393_vm1, %v5873_v39 }
  0x82   : > { %4757 = vmatmul.mubr.msk.bf16.gmra.mrb[16].mxu0 %vm393_vm1, %v5904_v25  ;;  %4600 = vmatprep.mubr.msk.bf16.mxu1 %vm393_vm1, %v5893_v49 }
  0x83   : > { %4760 = vmatprep.mubr.msk.bf16.mxu0 %vm393_vm1, %v5922_v51  ;;  %3246 = vperm.xlu1 %5209, %v3200_v19   ;;  %v4118_v19 = vld [vmem:[%s7101_s4 + $0x1d8] sm:$0xff] }
  0x84   : > { %3107 = vperm.xlu0 %5208, %v4216_v11   ;;  %v4203_v11 = vld [vmem:[%s6075_s11 + $0x69] sm:$0xff] }
  0x87   : > { %3112 = vperm.xlu1 %5209, %v4217_v37   ;;  %v2996_v37 = vld [vmem:[%s6109_s9 + $0xb8] sm:$0xff] }
  0x88   : > { %3027 = vperm.xlu0 %5208, %v4200_v61   ;;  %v2356_v61 = vpack.c.bf16 %v4118_v19, %v4117_v58  ;;  %v3220_v41 = vsub.f32 1.0, %v2996_v37 }
  0x89   : > { %4601 = vmatmul.mubr.msk.bf16.gmra.mrb[20].mxu1 %vm393_vm1, %v5902_v14 }
  0x8a   : > { %4761 = vmatmul.mubr.msk.bf16.gmra.mrb[20].mxu0 %vm393_vm1, %v5938_v9  ;;  %4604 = vmatprep.mubr.msk.bf16.mxu1 %vm393_vm1, %v5919_v40 }
  0x8b   : > { %4764 = vmatprep.mubr.msk.bf16.mxu0 %vm393_vm1, %v5957_v8  ;;  %3032 = vperm.xlu1 %5209, %v4201_v63   ;;  %v4120_v63 = vld [vmem:[%s7101_s4 + $0x1e8] sm:$0xff] }
  0x8c   : > { %3331 = vperm.xlu0 %5208, %v3217_v26   ;;  %v2357_v16 = vpack.c.bf16 %v4120_v63, %v4119_v32  ;;  %v4221_v32 = vld [vmem:[%s6075_s11 + $0x141] sm:$0xff]  ;;  %v4204_v63 = vld [vmem:[%s6075_s11 + $0x79] sm:$0xff] }
  0x8f   : > { %3336 = vperm.xlu1 %5209, %v3218_v28   ;;  %v4024_v28 = vld [vmem:[%s7101_s4 + $0xe8] sm:$0xff] }
  0x90   : > { %3251 = vperm.xlu0 %5208, %v3201_v22   ;;  %v4121_v22 = vld [vmem:[%s7101_s4 + $0x1f0] sm:$0xff] }
  0x91   : > { %4605 = vmatmul.mubr.msk.bf16.gmra.mrb[24].mxu1 %vm393_vm1, %v5930_v30 }
  0x92   : > { %4765 = vmatmul.mubr.msk.bf16.gmra.mrb[24].mxu0 %vm393_vm1, %v5977_v0  ;;  %4608 = vmatprep.mubr.msk.bf16.mxu1 %vm393_vm1, %v5966_v46 }
  0x93   : > { %4768 = vmatprep.mubr.msk.bf16.mxu0 %vm393_vm1, %v5991_v47  ;;  %3256 = vperm.xlu1 %5209, %v3202_v23   ;;  %v4122_v23 = vld [vmem:[%s7101_s4 + $0x1f8] sm:$0xff] }
  0x94   : > { %3117 = vperm.xlu0 %5208, %v4218_v44   ;;  %v2358_v58 = vpack.c.bf16 %v4122_v23, %v4121_v22  ;;  %v2982_v22 = vld [vmem:[%s6109_s9 + $0x48] sm:$0xff] }
  0x97   : > { %3122 = vperm.xlu1 %5209, %v4219_v62   ;;  %v4026_v62 = vld [vmem:[%s7101_s4 + $0xf8] sm:$0xff] }
  0x98   : > { %3037 = vperm.xlu0 %5208, %v4202_v4   ;;  %v2980_v4 = vld [vmem:[%s6109_s9 + $0x38] sm:$0xff] }
  0x99   : > { %4609 = vmatmul.mubr.msk.bf16.gmra.mrb[28].mxu1 %vm393_vm1, %v5975_v53 }
  0x9a   : > { %4769 = vmatmul.mubr.msk.bf16.gmra.mrb[28].mxu0 %vm393_vm1, %v6008_v59  ;;  %4620 = vmatprep.mubr.msk.bf16.mxu1 %vm393_vm1, %v1208_v43  ;;  %v2995_v43 = vld [vmem:[%s6109_s9 + $0xb0] sm:$0xff] }
  0x9b   : > { %4780 = vmatprep.mubr.msk.bf16.mxu0 %vm393_vm1, %v5785_v29  ;;  %3042 = vperm.xlu1 %5209, %v4203_v11   ;;  %v3219_v26 = vsub.f32 1.0, %v2995_v43  ;;  %v4139_v11 = vld [vmem:[%s7101_s4 + $0x200] sm:$0xff]  ;;  %v3204_v43 = vsub.f32 1.0, %v2980_v4  ;;  %v2999_v4 = vld [vmem:[%s6109_s9 + $0xd0] sm:$0xff] }
  0x9c   : > { %v6269_v37 = vpack.c.bf16 %v4140_v20, %v4139_v11  ;;  %v3223_v11 = vsub.f32 1.0, %v2999_v4  ;;  %v2983_v20 = vld [vmem:[%s6109_s9 + $0x50] sm:$0xff] }
  0x9d   : > { %3341 = vperm.xlu0 %5208, %v3219_v26   ;;  %v4205_v26 = vld [vmem:[%s6075_s11 + $0x81] sm:$0xff] }
  0x9f   : > { %3346 = vperm.xlu1 %5209, %v3220_v41   ;;  %v2981_v41 = vld [vmem:[%s6109_s9 + $0x40] sm:$0xff] }
  0xa0   : > { %v3205_v23 = vsub.f32 1.0, %v2981_v41  ;;  %v4225_v41 = vld [vmem:[%s6075_s11 + $0x171] sm:$0xff] }
  0xa1   : > { %4621 = vmatmul.mubr.msk.bf16.vlgmr.msra.gmra.mrb[0].mxu1 %vm393_vm1, %v6029_v45  ;;  %v4023_v45 = vld [vmem:[%s7101_s4 + $0xe0] sm:$0xff] }
  0xa2   : > { %4781 = vmatmul.mubr.msk.bf16.vlgmr.msra.gmra.mrb[0].mxu0 %vm393_vm1, %v5791_v33  ;;  %4624 = vmatprep.mubr.msk.bf16.mxu1 %vm393_vm1, %v5779_v54  ;;  %v1490_v44 = vpack.c.bf16 %v4024_v28, %v4023_v45  ;;  %v2998_v45 = vld [vmem:[%s6109_s9 + $0xc8] sm:$0xff] }
  0xa3   : > { %4813 = vmatpush3.bf16.msra.mxu0 %v6125_v31  ;;  %4784 = vmatprep.mubr.msk.bf16.mxu0 %vm393_vm1, %v5799_v35  ;;  %v4025_v31 = vld [vmem:[%s7101_s4 + $0xf0] sm:$0xff] }
  0xa4   : > { %4814 = vmatprep.subr.bf16.mxu0 %v2356_v61  ;;  %4653 = vmatpush3.bf16.msra.mxu1 %v6128_v5  ;;  %v2979_v5 = vld [vmem:[%s6109_s9 + $0x30] sm:$0xff]  ;;  %v1491_v19 = vpack.c.bf16 %v4026_v62, %v4025_v31  ;;  %v4223_v62 = vld [vmem:[%s6075_s11 + $0x159] sm:$0xff] }
  0xa5   : > { %4654 = vmatprep.subr.bf16.mxu1 %v1489_v6  ;;  %v3203_v18 = vsub.f32 1.0, %v2979_v5  ;;  %3266 = vperm.xlu1 %5209, %v3204_v43   ;;  %v4222_v31 = vld [vmem:[%s6075_s11 + $0x151] sm:$0xff] }
  0xa6   : > { %v4206_v5 = vld [vmem:[%s6075_s11 + $0x91] sm:$0xff] }
  0xa7   : > { %4815 = vmatpush3.bf16.msra.mxu0 %v2356_v61  ;;  %3261 = vperm.xlu0 %5208, %v3203_v18   ;;  %v4220_v61 = vld [vmem:[%s6075_s11 + $0x139] sm:$0xff] }
  0xa8   : > { %4816 = vmatprep.subr.bf16.mxu0 %v2357_v16  ;;  %4655 = vmatpush3.bf16.msra.mxu1 %v1489_v6  ;;  %v2997_v6 = vld [vmem:[%s6109_s9 + $0xc0] sm:$0xff]  ;;  %v2984_v43 = vld [vmem:[%s6109_s9 + $0x58] sm:$0xff] }
  0xa9   : > { %4625 = vmatmul.mubr.msk.bf16.gmra.mrb[4].mxu1 %vm393_vm1, %v5811_v56  ;;  %4656 = vmatprep.subr.bf16.mxu1 %v1490_v44  ;;  %v3221_v28 = vsub.f32 1.0, %v2997_v6  ;;  %v6324_v6 = vld [vmem:[%s5426_s21 + $0x1a0] sm:$0xff] }
  0xaa   : > { %4785 = vmatmul.mubr.msk.bf16.gmra.mrb[4].mxu0 %vm393_vm1, %v5832_v55  ;;  %4628 = vmatprep.mubr.msk.bf16.mxu1 %vm393_vm1, %v5820_v21 }
  0xab   : > { %4788 = vmatprep.mubr.msk.bf16.mxu0 %vm393_vm1, %v5838_v13  ;;  %4817 = vmatpush3.bf16.msra.mxu0 %v2357_v16  ;;  %v3222_v16 = vsub.f32 1.0, %v2998_v45 }
  0xac   : > { %4818 = vmatprep.subr.bf16.mxu0 %v2358_v58  ;;  %4657 = vmatpush3.bf16.msra.mxu1 %v1490_v44  ;;  %v3206_v44 = vsub.f32 1.0, %v2982_v22  ;;  %v4208_v22 = vld [vmem:[%s6075_s11 + $0xa9] sm:$0xff] }
  0xad   : > { %4658 = vmatprep.subr.bf16.mxu1 %v1491_v19  ;;  %3127 = vperm.xlu0 %5208, %v4220_v61   ;;  %v3207_v61 = vsub.f32 1.0, %v2983_v20 }
  0xae   : > { %3132 = vperm.xlu1 %5209, %v4221_v32   ;;  %v3208_v32 = vsub.f32 1.0, %v2984_v43  ;;  %v2986_v43 = vld [vmem:[%s6109_s9 + $0x68] sm:$0xff] }
  0xaf   : > { %4819 = vmatpush3.bf16.msra.mxu0 %v2358_v58  ;;  %v4207_v58 = vld [vmem:[%s6075_s11 + $0x99] sm:$0xff] }
  0xb0   : > { %4659 = vmatpush3.bf16.msra.mxu1 %v1491_v19  ;;  %4852 = vmatprep.subr.bf16.mxu0 %v6269_v37  ;;  %v3000_v19 = vld [vmem:[%s6109_s9 + $0xd8] sm:$0xff] }
  0xb1   : > { %4629 = vmatmul.mubr.msk.bf16.gmra.mrb[8].mxu1 %vm393_vm1, %v5828_v36  ;;  %3047 = vperm.xlu0 %5208, %v4204_v63   ;;  %v3224_v18 = vsub.f32 1.0, %v3000_v19  ;;  %v6321_v63 = vld [vmem:[%s5426_s21 + $0x198] sm:$0xff] }
  0xb2   : > { %4789 = vmatmul.mubr.msk.bf16.gmra.mrb[8].mxu0 %vm393_vm1, %v5846_v57  ;;  %4632 = vmatprep.mubr.msk.bf16.mxu1 %vm393_vm1, %v5849_v12  ;;  %v2555_v45 = vrot.slane %v6321_v63, 2  ;;  %v2125_v19 = vpack.c.bf16 %v6324_v6, %v6321_v63 }
  0xb3   : > { %4792 = vmatprep.mubr.msk.bf16.mxu0 %vm393_vm1, %v5857_v52  ;;  %3052 = vperm.xlu1 %5209, %v4205_v26   ;;  %v4224_v26 = vld [vmem:[%s6075_s11 + $0x169] sm:$0xff] }
  0xb5   : > { %3351 = vperm.xlu0 %5208, %v3221_v28   ;;  %v2556_v28 = vrot.slane %v6324_v6, 2 }
  0xb7   : > { %3356 = vperm.xlu1 %5209, %v3222_v16   ;;  %v6337_v16 = vld [vmem:[%s5426_s21 + $0x1a8] sm:$0x3]  ;;  %s4295_s21 = sshll.u32 %s7231_s24, 6 }
  0xb8   : > { %s7039_s16 = scalar_lea.vmem %s7104_s7, %s4295_s21 }
  0xb9   : > { %4633 = vmatmul.mubr.msk.bf16.gmra.mrb[12].mxu1 %vm393_vm1, %v5861_v17  ;;  %3271 = vperm.xlu0 %5208, %v3205_v23   ;;  %v3001_v23 = vld [vmem:[%s6109_s9 + $0xe0] sm:$0xff] }
  0xba   : > { %4793 = vmatmul.mubr.msk.bf16.gmra.mrb[12].mxu0 %vm393_vm1, %v5873_v39  ;;  %4636 = vmatprep.mubr.msk.bf16.mxu1 %vm393_vm1, %v5868_v42  ;;  %v3225_v4 = vsub.f32 1.0, %v3001_v23  ;;  %v4143_v23 = vld [vmem:[%s7101_s4 + $0x220] sm:$0xff] }
  0xbb   : > { %4796 = vmatprep.mubr.msk.bf16.mxu0 %vm393_vm1, %v5893_v49  ;;  %3276 = vperm.xlu1 %5209, %v3206_v44   ;;  %v6344_v44 = vsel %vm1095_vm2, %v2555_v45, %v2556_v28  ;;  %v5309_v45 = vmov 0.0  }
  0xbc   : > { %394 = vst.msk [vmem:[#allocation2] sm:$0xff] %vm393_vm1, %v5309_v45  ;;  %395 = vst.msk [vmem:[#allocation2 + $0x8] sm:$0xff] %vm393_vm1, %v5309_v45 }
  0xbd   : > { %3137 = vperm.xlu0 %5208, %v4222_v31   ;;  %v2558_v31 = vrot.slane %v6337_v16, 2  ;;  %396 = vst.msk [vmem:[#allocation2 + $0x10] sm:$0xff] %vm393_vm1, %v5309_v45  ;;  %397 = vst.msk [vmem:[#allocation2 + $0x18] sm:$0xff] %vm393_vm1, %v5309_v45 }
  0xbe   : > { %398 = vst.msk [vmem:[#allocation2 + $0x20] sm:$0xff] %vm393_vm1, %v5309_v45  ;;  %399 = vst.msk [vmem:[#allocation2 + $0x28] sm:$0xff] %vm393_vm1, %v5309_v45 }
  0xbf   : > { %3142 = vperm.xlu1 %5209, %v4223_v62   ;;  %v4209_v62 = vld [vmem:[%s6075_s11 + $0xb1] sm:$0xff]  ;;  %400 = vst.msk [vmem:[#allocation2 + $0x30] sm:$0xff] %vm393_vm1, %v5309_v45  ;;  %401 = vst.msk [vmem:[#allocation2 + $0x38] sm:$0xff] %vm393_vm1, %v5309_v45 }
  0xc1   : > { %4637 = vmatmul.mubr.msk.bf16.gmra.mrb[16].mxu1 %vm393_vm1, %v5889_v48  ;;  %3057 = vperm.xlu0 %5208, %v4206_v5   ;;  %v3002_v5 = vld [vmem:[%s6109_s9 + $0xe8] sm:$0xff] }
  0xc2   : > { %4797 = vmatmul.mubr.msk.bf16.gmra.mrb[16].mxu0 %vm393_vm1, %v5902_v14  ;;  %4640 = vmatprep.mubr.msk.bf16.mxu1 %vm393_vm1, %v5904_v25 }
  0xc3   : > { %4800 = vmatprep.mubr.msk.bf16.mxu0 %vm393_vm1, %v5919_v40  ;;  %3062 = vperm.xlu1 %5209, %v4207_v58   ;;  %v6350_v58 = vsel %vm1095_vm2, %v2556_v28, %v2558_v31  ;;  %v4142_v28 = vld [vmem:[%s7101_s4 + $0x218] sm:$0xff]  ;;  %v4144_v31 = vld [vmem:[%s7101_s4 + $0x228] sm:$0xff] }
  0xc4   : > { %v2562_v20 = vpack.c.bf16 %v6350_v58, %v6344_v44 }
  0xc5   : > { %3361 = vperm.xlu0 %5208, %v3223_v11   ;;  %v2985_v11 = vld [vmem:[%s6109_s9 + $0x60] sm:$0xff] }
  0xc7   : > { %3366 = vperm.xlu1 %5209, %v3224_v18   ;;  %v3226_v18 = vsub.f32 1.0, %v3002_v5  ;;  %v7192_v5 = vld [vmem:[#allocation8_spill] sm:$0xff] }
  0xc9   : > { %4641 = vmatmul.mubr.msk.bf16.gmra.mrb[20].mxu1 %vm393_vm1, %v5922_v51  ;;  %3281 = vperm.xlu0 %5208, %v3207_v61   ;;  %v3209_v61 = vsub.f32 1.0, %v2985_v11  ;;  %v2574_v11 = vpack.c.bf16 %v4144_v31, %v4143_v23  ;;  %v2988_v31 = vld [vmem:[%s6109_s9 + $0x78] sm:$0xff] }
  0xca   : > { %4801 = vmatmul.mubr.msk.bf16.gmra.mrb[20].mxu0 %vm393_vm1, %v5930_v30  ;;  %4644 = vmatprep.mubr.msk.bf16.mxu1 %vm393_vm1, %v5938_v9 }
  0xcb   : > { %4804 = vmatprep.mubr.msk.bf16.mxu0 %vm393_vm1, %v5966_v46  ;;  %3286 = vperm.xlu1 %5209, %v3208_v32   ;;  %v7191_v32 = vld [vmem:[#allocation7_spill] sm:$0xff] }
  0xcd   : > { %3147 = vperm.xlu0 %5208, %v4224_v26   ;;  %v3210_v26 = vsub.f32 1.0, %v2986_v43  ;;  %v4146_v43 = vld [vmem:[%s7101_s4 + $0x238] sm:$0xff] }
  0xcf   : > { %3152 = vperm.xlu1 %5209, %v4225_v41   ;;  %v4226_v41 = vld [vmem:[%s6075_s11 + $0x181] sm:$0xff] }
  0xd1   : > { %4645 = vmatmul.mubr.msk.bf16.gmra.mrb[24].mxu1 %vm393_vm1, %v5957_v8  ;;  %3067 = vperm.xlu0 %5208, %v4208_v22  }
  0xd2   : > { %4805 = vmatmul.mubr.msk.bf16.gmra.mrb[24].mxu0 %vm393_vm1, %v5975_v53  ;;  %4648 = vmatprep.mubr.msk.bf16.mxu1 %vm393_vm1, %v5977_v0 }
  0xd3   : > { %4808 = vmatprep.mubr.msk.bf16.mxu0 %vm393_vm1, %v6015_v24  ;;  %3072 = vperm.xlu1 %5209, %v4209_v62   ;;  %v4227_v62 = vld [vmem:[%s6075_s11 + $0x189] sm:$0xff] }
  0xd5   : > { %3371 = vperm.xlu0 %5208, %v3225_v4   ;;  %v3003_v4 = vld [vmem:[%s6109_s9 + $0xf0] sm:$0xff] }
  0xd7   : > { %3376 = vperm.xlu1 %5209, %v3226_v18   ;;  %v4145_v18 = vld [vmem:[%s7101_s4 + $0x230] sm:$0xff] }
  0xd9   : > { %4649 = vmatmul.mubr.msk.bf16.gmra.mrb[28].mxu1 %vm393_vm1, %v5991_v47  ;;  %3291 = vperm.xlu0 %5208, %v3209_v61   ;;  %v3227_v61 = vsub.f32 1.0, %v3003_v4  ;;  %v4165_v4 = vld [vmem:[%s6428_s8 + $0x21] sm:$0xff] }
  0xda   : > { %4809 = vmatmul.mubr.msk.bf16.gmra.mrb[28].mxu0 %vm393_vm1, %v2125_v19  ;;  %4660 = vmatprep.mubr.msk.bf16.mxu1 %vm393_vm1, %v7190_v7  ;;  %v4141_v7 = vld [vmem:[%s7101_s4 + $0x210] sm:$0xff]  ;;  %v7193_v19 = vld [vmem:[#allocation11_spill] sm:$0xff] }
  0xdb   : > { %4820 = vmatprep.mubr.msk.bf16.mxu0 %vm393_vm1, %v7191_v32  ;;  %3296 = vperm.xlu1 %5209, %v3210_v26   ;;  %v2573_v22 = vpack.c.bf16 %v4142_v28, %v4141_v7  ;;  %v3004_v32 = vld [vmem:[%s6109_s9 + $0xf8] sm:$0xff]  ;;  %v3088_v26 = vpop.permute.xlu0 %3087  ;;  %v3008_v7 = vpop.permute.xlu1 %3007  ;;  %v2575_v28 = vpack.c.bf16 %v4146_v43, %v4145_v18 }
  0xdd   : > { %3157 = vperm.xlu0 %5208, %v4226_v41   ;;  %v3228_v41 = vsub.f32 1.0, %v3004_v32 }
  0xdf   : > { %3162 = vperm.xlu1 %5209, %v4227_v62   ;;  %v3013_v62 = vpop.permute.xlu1 %3012 }
  0xe1   : > { %4661 = vmatmul.mubr.msk.bf16.vlgmr.msra.gmra.mrb[0].mxu1 %vm393_vm1, %v5785_v29  ;;  %v4210_v29 = vld [vmem:[%s6075_s11 + $0xc1] sm:$0xff] }
  0xe2   : > { %4821 = vmatmul.mubr.msk.bf16.vlgmr.msra.gmra.mrb[0].mxu0 %vm393_vm1, %v7192_v5  ;;  %4664 = vmatprep.mubr.msk.bf16.mxu1 %vm393_vm1, %v5791_v33  ;;  %v4211_v33 = vld [vmem:[%s6075_s11 + $0xc9] sm:$0xff]  ;;  %v4164_v5 = vld [vmem:[%s6428_s8 + $0x19] sm:$0xff] }
  0xe3   : > { %4853 = vmatpush3.bf16.msra.mxu0 %v6269_v37  ;;  %4824 = vmatprep.mubr.msk.bf16.mxu0 %vm393_vm1, %v7193_v19  ;;  %v2987_v37 = vld [vmem:[%s6109_s9 + $0x70] sm:$0xff] }
  0xe4   : > { %4854 = vmatprep.subr.bf16.mxu0 %v2573_v22  ;;  %3077 = vperm.xlu0 %5208, %v4210_v29   ;;  %v3211_v23 = vsub.f32 1.0, %v2987_v37 }
  0xe5   : > { %3082 = vperm.xlu1 %5209, %v4211_v33   ;;  %v3166_v33 = vmul.f32 %v4165_v4, %v3013_v62 }
  0xe7   : > { %4855 = vmatpush3.bf16.msra.mxu0 %v2573_v22  ;;  %v3093_v22 = vpop.permute.xlu0 %3092 }
  0xe8   : > { %4856 = vmatprep.subr.bf16.mxu0 %v2574_v11  ;;  %3381 = vperm.xlu0 %5208, %v3227_v61  }
  0xe9   : > { %4665 = vmatmul.mubr.msk.bf16.gmra.mrb[4].mxu1 %vm393_vm1, %v5799_v35  ;;  %3386 = vperm.xlu1 %5209, %v3228_v41   ;;  %v3212_v35 = vsub.f32 1.0, %v2988_v31 }
  0xea   : > { %4825 = vmatmul.mubr.msk.bf16.gmra.mrb[4].mxu0 %vm393_vm1, %v5603_v3  ;;  %4668 = vmatprep.mubr.msk.bf16.mxu1 %vm393_vm1, %v5832_v55  ;;  %v4180_v3 = vld [vmem:[%s6428_s8 + $0xd9] sm:$0xff]  ;;  %v4181_v55 = vld [vmem:[%s6428_s8 + $0xe1] sm:$0xff] }
  0xeb   : > { %4828 = vmatprep.mubr.msk.bf16.mxu0 %vm393_vm1, %v5614_v10  ;;  %4857 = vmatpush3.bf16.msra.mxu0 %v2574_v11  ;;  %v3181_v10 = vmul.f32 %v4180_v3, %v3088_v26  ;;  %v3182_v29 = vmul.f32 %v4181_v55, %v3093_v22  ;;  %v3312_v19 = vpop.permute.xlu0 %3311  ;;  %v3165_v11 = vmul.f32 %v4164_v5, %v3008_v7  ;;  %v7196_v7 = vld [vmem:[#allocation21_spill] sm:$0xff]  ;;  %v4167_v5 = vld [vmem:[%s6428_s8 + $0x39] sm:$0xff] }
  0xec   : > { %4858 = vmatprep.subr.bf16.mxu0 %v2575_v28  ;;  %3301 = vperm.xlu0 %5208, %v3211_v23   ;;  %v3317_v43 = vpop.permute.xlu1 %3316  ;;  %v4182_v23 = vld [vmem:[%s6428_s8 + $0xf1] sm:$0xff] }
  0xed   : > { %3306 = vperm.xlu1 %5209, %v3212_v35   ;;  %v6442_v18 = vmul.f32 %v3312_v19, %v3181_v10  ;;  %v6444_v61 = vmul.f32 %v3317_v43, %v3182_v29  ;;  %v4183_v35 = vld [vmem:[%s6428_s8 + $0xf9] sm:$0xff]  ;;  %v4166_v10 = vld [vmem:[%s6428_s8 + $0x31] sm:$0xff] }
  0xee   : > { %v7199_v29 = vld [vmem:[#allocation22_spill] sm:$0xff]  ;;  %v7200_v19 = vld [vmem:[#allocation23_spill] sm:$0xff] }
  0xef   : > { %4859 = vmatpush3.bf16.msra.mxu0 %v2575_v28  ;;  %vm3437_vm3 = vcmp.ne.f32.partialorder %v6442_v18, 0.0  ;;  %vm3438_vm4 = vcmp.ne.f32.partialorder %v6444_v61, 0.0 }
  0xf0   : > { %vm6452_vm5 = vmpackc.low %vm3438_vm4, %vm3437_vm3  ;;  %v4244_v41 = vsel %vm3437_vm3, 1.0, %v5309_v45 }
  0xf1   : > { %4669 = vmatmul.mubr.msk.bf16.gmra.mrb[8].mxu1 %vm393_vm1, %v5838_v13  ;;  %v3232_v13 = vpop.permute.xlu0 %3231  ;;  %v3742_v61 = vsel %vm393_vm1, %v4244_v41, 0.0 }
  0xf2   : > { %4829 = vmatmul.mubr.msk.bf16.gmra.mrb[8].mxu0 %vm393_vm1, %v5669_v15  ;;  %4672 = vmatprep.mubr.msk.bf16.mxu1 %vm393_vm1, %v5846_v57  ;;  %v3237_v57 = vpop.permute.xlu1 %3236 }
  0xf3   : > { %4832 = vmatprep.mubr.msk.bf16.mxu0 %vm393_vm1, %v5715_v1  ;;  %v3389_v1 = vmul.f32 %v3232_v13, %v3165_v11  ;;  %v3390_v32 = vmul.f32 %v3237_v57, %v3166_v33 }
  0xf5   : > { %vm3421_vm6 = vcmp.ne.f32.partialorder %v3389_v1, 0.0  ;;  %vm3422_vm7 = vcmp.ne.f32.partialorder %v3390_v32, 0.0  ;;  %v3098_v26 = vpop.permute.xlu0 %3097 }
  0xf6   : > { %v4228_v37 = vsel %vm3421_vm6, 1.0, %v5309_v45  ;;  %vm6467_vm8 = vmpackc.low %vm3422_vm7, %vm3421_vm6  ;;  %v3183_v22 = vmul.f32 %v4182_v23, %v3098_v26  ;;  %v4185_v23 = vld [vmem:[%s6428_s8 + $0x111] sm:$0xff] }
  0xf7   : > { %v3711_v28 = vsel %vm393_vm1, %v4228_v37, 0.0 }
  0xf9   : > { %4673 = vmatmul.mubr.msk.bf16.gmra.mrb[12].mxu1 %vm393_vm1, %v5857_v52  ;;  %v4229_v52 = vsel %vm3422_vm7, 1.0, %v5309_v45  ;;  %v3018_v3 = vpop.permute.xlu0 %3017 }
  0xfa   : > { %4833 = vmatmul.mubr.msk.bf16.gmra.mrb[12].mxu0 %vm393_vm1, %v5717_v34  ;;  %4676 = vmatprep.mubr.msk.bf16.mxu1 %vm393_vm1, %v5873_v39  ;;  %v3103_v34 = vpop.permute.xlu1 %3102  ;;  %v3712_v39 = vsel %vm393_vm1, %v4229_v52, 0.0  ;;  %v3167_v11 = vmul.f32 %v4166_v10, %v3018_v3 }
  0xfb   : > { %4836 = vmatprep.mubr.msk.bf16.mxu0 %vm393_vm1, %v7196_v7  ;;  %v3713_v31 = vadd.f32 %v3712_v39, %v3711_v28  ;;  %v3184_v62 = vmul.f32 %v4183_v35, %v3103_v34  ;;  %v4184_v39 = vld [vmem:[%s6428_s8 + $0x109] sm:$0xff] }
  0xfd   : > { %v3322_v4 = vpop.permute.xlu0 %3321 }
  0xfe   : > { %v3023_v55 = vpop.permute.xlu1 %3022  ;;  %v6484_v43 = vmul.f32 %v3322_v4, %v3183_v22  ;;  %v2339_v22 = vrot.slane %v6324_v6, 1 }
  0xff   : > { %v3168_v13 = vmul.f32 %v4167_v5, %v3023_v55  ;;  %v2341_v55 = vrot.slane %v6337_v16, 1 }
 0x100   : > { %vm3439_vm9 = vcmp.ne.f32.partialorder %v6484_v43, 0.0 }
 0x101   : > { %4677 = vmatmul.mubr.msk.bf16.gmra.mrb[16].mxu1 %vm393_vm1, %v5893_v49  ;;  %v3242_v49 = vpop.permute.xlu0 %3241  ;;  %v2342_v6 = vsel %vm534_vm0, %v2339_v22, %v2341_v55 }
 0x102   : > { %4837 = vmatmul.mubr.msk.bf16.gmra.mrb[16].mxu0 %vm393_vm1, %v7199_v29  ;;  %4680 = vmatprep.mubr.msk.bf16.mxu1 %vm393_vm1, %v5902_v14  ;;  %v3327_v33 = vpop.permute.xlu1 %3326  ;;  %v3391_v57 = vmul.f32 %v3242_v49, %v3167_v11  ;;  %v4168_v29 = vld [vmem:[%s6428_s8 + $0x49] sm:$0xff] }
 0x103   : > { %4840 = vmatprep.mubr.msk.bf16.mxu0 %vm393_vm1, %v7200_v19  ;;  %v6486_v1 = vmul.f32 %v3327_v33, %v3184_v62 }
 0x104   : > { %vm3423_vm12 = vcmp.ne.f32.partialorder %v3391_v57, 0.0 }
 0x105   : > { %vm3440_vm10 = vcmp.ne.f32.partialorder %v6486_v1, 0.0  ;;  %v4230_v26 = vsel %vm3423_vm12, 1.0, %v5309_v45  ;;  %v3108_v7 = vpop.permute.xlu0 %3107 }
 0x106   : > { %vm6494_vm11 = vmpackc.low %vm3440_vm10, %vm3439_vm9  ;;  %v3247_v32 = vpop.permute.xlu1 %3246  ;;  %v3714_v28 = vsel %vm393_vm1, %v4230_v26, 0.0  ;;  %v3185_v62 = vmul.f32 %v4184_v39, %v3108_v7 }
 0x107   : > { %v3392_v37 = vmul.f32 %v3247_v32, %v3168_v13  ;;  %v3715_v34 = vadd.f32 %v3714_v28, %v3713_v31  ;;  %v4169_v31 = vld [vmem:[%s6428_s8 + $0x51] sm:$0xff] }
 0x109   : > { %4681 = vmatmul.mubr.msk.bf16.gmra.mrb[20].mxu1 %vm393_vm1, %v5919_v40  ;;  %vm3424_vm13 = vcmp.ne.f32.partialorder %v3392_v37, 0.0  ;;  %v3028_v3 = vpop.permute.xlu0 %3027  ;;  %v4246_v40 = vsel %vm3439_vm9, 1.0, %v5309_v45 }
 0x10a   : > { %4841 = vmatmul.mubr.msk.bf16.gmra.mrb[20].mxu0 %vm393_vm1, %v5746_v60  ;;  %4684 = vmatprep.mubr.msk.bf16.mxu1 %vm393_vm1, %v5930_v30  ;;  %v4231_v52 = vsel %vm3424_vm13, 1.0, %v5309_v45  ;;  %vm6509_vm14 = vmpackc.low %vm3424_vm13, %vm3423_vm12  ;;  %v3113_v60 = vpop.permute.xlu1 %3112  ;;  %v3169_v16 = vmul.f32 %v4168_v29, %v3028_v3  ;;  %v4188_v29 = vld [vmem:[%s6428_s8 + $0x139] sm:$0xff]  ;;  %v3746_v1 = vsel %vm393_vm1, %v4246_v40, 0.0 }
 0x10b   : > { %4844 = vmatprep.mubr.msk.bf16.mxu0 %vm393_vm1, %v5882_v50  ;;  %v3716_v30 = vsel %vm393_vm1, %v4231_v52, 0.0  ;;  %v2338_v50 = vrot.slane %v6321_v63, 1  ;;  %v3186_v5 = vmul.f32 %v4185_v23, %v3113_v60  ;;  %v4187_v23 = vld [vmem:[%s6428_s8 + $0x129] sm:$0xff] }
 0x10c   : > { %v3717_v35 = vadd.f32 %v3716_v30, %v3715_v34  ;;  %v4186_v30 = vld [vmem:[%s6428_s8 + $0x121] sm:$0xff] }
 0x10d   : > { %v3332_v4 = vpop.permute.xlu0 %3331  ;;  %v2340_v63 = vsel %vm534_vm0, %v2338_v50, %v2339_v22 }
 0x10e   : > { %v3033_v10 = vpop.permute.xlu1 %3032  ;;  %v6531_v19 = vmul.f32 %v3332_v4, %v3185_v62  ;;  %v2345_v13 = vpack.c.bf16 %v2342_v6, %v2340_v63  ;;  %v4189_v4 = vld [vmem:[%s6428_s8 + $0x141] sm:$0xff] }
 0x110   : > { %vm7137_vm15 = vcmp.ne.f32.partialorder %v6531_v19, 0.0  ;;  %vm7215_vm9 = vcmp.ne.f32.partialorder %v6531_v19, 0.0 }
 0x111   : > { %4685 = vmatmul.mubr.msk.bf16.gmra.mrb[24].mxu1 %vm393_vm1, %v5966_v46  ;;  %v3170_v46 = vmul.f32 %v4169_v31, %v3033_v10  ;;  %v4248_v28 = vsel %vm7215_vm9, 1.0, %v5309_v45 }
 0x112   : > { %4845 = vmatmul.mubr.msk.bf16.gmra.mrb[24].mxu0 %vm393_vm1, %v5981_v38  ;;  %4688 = vmatprep.mubr.msk.bf16.mxu1 %vm393_vm1, %v5975_v53  ;;  %v3337_v11 = vpop.permute.xlu1 %3336  ;;  %v3252_v53 = vpop.permute.xlu0 %3251 }
 0x113   : > { %4848 = vmatprep.mubr.msk.bf16.mxu0 %vm393_vm1, %v6027_v2  ;;  %v6533_v33 = vmul.f32 %v3337_v11, %v3186_v5  ;;  %v3393_v2 = vmul.f32 %v3252_v53, %v3169_v16 }
 0x115   : > { %vm7134_vm2 = vcmp.ne.f32.partialorder %v6533_v33, 0.0  ;;  %vm3425_vm0 = vcmp.ne.f32.partialorder %v3393_v2, 0.0 }
 0x116   : > { %vm6541_vm6 = vmpackc.low %vm7134_vm2, %vm7137_vm15  ;;  %v3257_v49 = vpop.permute.xlu1 %3256  ;;  %v4232_v32 = vsel %vm3425_vm0, 1.0, %v5309_v45  ;;  %v3118_v37 = vpop.permute.xlu0 %3117 }
 0x117   : > { %v3394_v57 = vmul.f32 %v3257_v49, %v3170_v46  ;;  %v3718_v26 = vsel %vm393_vm1, %v4232_v32, 0.0  ;;  %v3187_v50 = vmul.f32 %v4186_v30, %v3118_v37  ;;  %v4171_v49 = vld [vmem:[%s6428_s8 + $0x69] sm:$0xff]  ;;  %v4173_v30 = vld [vmem:[%s6428_s8 + $0x81] sm:$0xff] }
 0x118   : > { %v3719_v52 = vadd.f32 %v3718_v26, %v3717_v35 }
 0x119   : > { %4689 = vmatmul.mubr.msk.bf16.gmra.mrb[28].mxu1 %vm393_vm1, %v6015_v24  ;;  %vm3426_vm7 = vcmp.ne.f32.partialorder %v3394_v57, 0.0 }
 0x11a   : > { %4849 = vmatmul.mubr.msk.bf16.gmra.mrb[28].mxu0 %vm393_vm1, %v2345_v13  ;;  %v4233_v7 = vsel %vm3426_vm7, 1.0, %v5309_v45  ;;  %vm6553_vm12 = vmpackc.low %vm3426_vm7, %vm3425_vm0  ;;  %v3123_v24 = vpop.permute.xlu1 %3122  ;;  %v3038_v39 = vpop.permute.xlu0 %3037  ;;  %v4170_v13 = vld [vmem:[%s6428_s8 + $0x61] sm:$0xff] }
 0x11b   : > { %4860 = vmatprep.mubr.msk.bf16.mxu0 %vm393_vm1, %v5779_v54  ;;  %v3720_v60 = vsel %vm393_vm1, %v4233_v7, 0.0  ;;  %v3188_v54 = vmul.f32 %v4187_v23, %v3123_v24  ;;  %v4172_v7 = vld [vmem:[%s6428_s8 + $0x79] sm:$0xff] }
 0x11c   : > { %v6558_v34 = vadd.f32 %v3720_v60, %v3719_v52 }
 0x11e   : > { %v3043_v3 = vpop.permute.xlu1 %3042  ;;  %v3342_v22 = vpop.permute.xlu0 %3341 }
 0x11f   : > { %v6566_v35 = vmul.f32 %v3342_v22, %v3187_v50  ;;  %v3172_v37 = vmul.f32 %v4171_v49, %v3043_v3  ;;  %v4177_v49 = vld [vmem:[%s6428_s8 + $0xb1] sm:$0xff] }
 0x121   : > { %vm7133_vm13 = vcmp.ne.f32.partialorder %v6566_v35, 0.0 }
 0x122   : > { %4861 = vmatmul.mubr.msk.bf16.vlgmr.msra.gmra.mrb[0].mxu0 %vm393_vm1, %v5811_v56  ;;  %v3347_v55 = vpop.permute.xlu1 %3346 }
 0x123   : > { %4864 = vmatprep.mubr.msk.bf16.mxu0 %vm393_vm1, %v5820_v21  ;;  %v6568_v62 = vmul.f32 %v3347_v55, %v3188_v54  ;;  %v4174_v54 = vld [vmem:[%s6428_s8 + $0x91] sm:$0xff] }
 0x125   : > { %vm7132_vm0 = vcmp.ne.f32.partialorder %v6568_v62, 0.0 }
 0x126   : > { %vm6576_vm7 = vmpackc.low %vm7132_vm0, %vm7133_vm13  ;;  %v3262_v21 = vpop.permute.xlu0 %3261  ;;  %v3267_v10 = vpop.permute.xlu1 %3266 }
 0x127   : > { %v6624_v60 = vmul.f32 %v3267_v10, %v3172_v37 }
 0x12a   : > { %4865 = vmatmul.mubr.msk.bf16.gmra.mrb[4].mxu0 %vm393_vm1, %v5828_v36 }
 0x12b   : > { %4868 = vmatprep.mubr.msk.bf16.mxu0 %vm393_vm1, %v5849_v12 }
 0x12c   : > { %v3128_v5 = vpop.permute.xlu0 %3127 }
 0x12d   : > { %v3133_v31 = vpop.permute.xlu1 %3132  ;;  %v3189_v6 = vmul.f32 %v4188_v29, %v3128_v5  ;;  %v4175_v29 = vld [vmem:[%s6428_s8 + $0x99] sm:$0xff] }
 0x12e   : > { %v3190_v36 = vmul.f32 %v4189_v4, %v3133_v31 }
 0x130   : > { %v3048_v63 = vpop.permute.xlu0 %3047 }
 0x132   : > { %4869 = vmatmul.mubr.msk.bf16.gmra.mrb[8].mxu0 %vm393_vm1, %v5861_v17  ;;  %v3053_v16 = vpop.permute.xlu1 %3052 }
 0x133   : > { %4872 = vmatprep.mubr.msk.bf16.mxu0 %vm393_vm1, %v5868_v42  ;;  %v3174_v3 = vmul.f32 %v4173_v30, %v3053_v16 }
 0x134   : > { %v3352_v11 = vpop.permute.xlu0 %3351 }
 0x135   : > { %v6590_v12 = vmul.f32 %v3352_v11, %v3189_v6 }
 0x136   : > { %v3357_v46 = vpop.permute.xlu1 %3356 }
 0x137   : > { %v6596_v17 = vmul.f32 %v3357_v46, %v3190_v36  ;;  %vm7136_vm0 = vcmp.ne.f32.partialorder %v6590_v12, 0.0  ;;  %v4176_v36 = vld [vmem:[%s6428_s8 + $0xa9] sm:$0xff] }
 0x138   : > { %v3272_v42 = vpop.permute.xlu0 %3271 }
 0x139   : > { %vm7135_vm13 = vcmp.ne.f32.partialorder %v6596_v17, 0.0 }
 0x13a   : > { %4873 = vmatmul.mubr.msk.bf16.gmra.mrb[12].mxu0 %vm393_vm1, %v5889_v48  ;;  %vm6605_vm2 = vmpackc.low %vm7135_vm13, %vm7136_vm0  ;;  %v3277_v48 = vpop.permute.xlu1 %3276  ;;  %vm7138_vm0 = vcmp.ne.f32.partialorder %v6624_v60, 0.0 }
 0x13b   : > { %4876 = vmatprep.mubr.msk.bf16.mxu0 %vm393_vm1, %v5904_v25  ;;  %v3171_v25 = vmul.f32 %v4170_v13, %v3038_v39  ;;  %v4235_v55 = vsel %vm7138_vm0, 1.0, %v5309_v45 }
 0x13c   : > { %v6609_v2 = vpop.permute.xlu0 %3137  ;;  %v3724_v4 = vsel %vm393_vm1, %v4235_v55, 0.0 }
 0x13d   : > { %v6618_v26 = vmul.f32 %v3262_v21, %v3171_v25  ;;  %v6647_v21 = vmul.f32 %v3277_v48, %v3174_v3 }
 0x13e   : > { %v6614_v57 = vpop.permute.xlu1 %3142 }
 0x13f   : > { %vm7141_vm13 = vcmp.ne.f32.partialorder %v6618_v26, 0.0  ;;  %vm7140_vm0 = vcmp.ne.f32.partialorder %v6647_v21, 0.0  ;;  %vm7213_vm3 = vcmp.ne.f32.partialorder %v6618_v26, 0.0 }
 0x140   : > { %v3058_v32 = vpop.permute.xlu0 %3057 }
 0x141   : > { %v3175_v10 = vmul.f32 %v4174_v54, %v3058_v32 }
 0x142   : > { %4877 = vmatmul.mubr.msk.bf16.gmra.mrb[16].mxu0 %vm393_vm1, %v5922_v51  ;;  %v3063_v24 = vpop.permute.xlu1 %3062  ;;  %v3173_v51 = vmul.f32 %v4172_v7, %v3048_v63 }
 0x143   : > { %4880 = vmatprep.mubr.msk.bf16.mxu0 %vm393_vm1, %v5938_v9  ;;  %v4234_v9 = vsel %vm7141_vm13, 1.0, %v5309_v45  ;;  %v3176_v16 = vmul.f32 %v4175_v29, %v3063_v24  ;;  %vm7144_vm13 = vcmask 516096   ;;  %v4178_v29 = vld [vmem:[%s6428_s8 + $0xc1] sm:$0xff] }
 0x144   : > { %v6621_v52 = vpop.permute.xlu0 %3361  ;;  %v6637_v50 = vmul.f32 %v3272_v42, %v3173_v51  ;;  %403 = vst.msk [vmem:[#allocation3] sm:$0x1] %vm7144_vm13, %v5309_v45 }
 0x146   : > { %v6629_v39 = vpop.permute.xlu1 %3366  ;;  %vm7139_vm15 = vcmp.ne.f32.partialorder %v6637_v50, 0.0 }
 0x147   : > { %v4236_v63 = vsel %vm7139_vm15, 1.0, %v5309_v45 }
 0x148   : > { %v3282_v23 = vpop.permute.xlu0 %3281  ;;  %v3726_v46 = vsel %vm393_vm1, %v4236_v63, 0.0 }
 0x14a   : > { %4881 = vmatmul.mubr.msk.bf16.gmra.mrb[20].mxu0 %vm393_vm1, %v5957_v8  ;;  %v3287_v22 = vpop.permute.xlu1 %3286  ;;  %v3722_v8 = vsel %vm393_vm1, %v4234_v9, 0.0 }
 0x14b   : > { %4884 = vmatprep.mubr.msk.bf16.mxu0 %vm393_vm1, %v5977_v0  ;;  %v3723_v5 = vadd.f32 %v3722_v8, %v6558_v34  ;;  %v6672_v13 = vmul.f32 %v3287_v22, %v3176_v16  ;;  %v3710_v40 = vld [vmem:[#allocation3] sm:$0x1] }
 0x14c   : > { %v6644_v0 = vpop.permute.xlu0 %3147 }
 0x14d   : > { %v3725_v34 = vadd.f32 %v3724_v4, %v3723_v5 }
 0x14e   : > { %v6653_v31 = vpop.permute.xlu1 %3152 }
 0x14f   : > { %v3727_v25 = vadd.f32 %v3726_v46, %v3725_v34 }
 0x150   : > { %v3068_v6 = vpop.permute.xlu0 %3067 }
 0x151   : > { %v3177_v48 = vmul.f32 %v4176_v36, %v3068_v6  ;;  %v4179_v36 = vld [vmem:[%s6428_s8 + $0xc9] sm:$0xff] }
 0x152   : > { %4885 = vmatmul.mubr.msk.bf16.gmra.mrb[24].mxu0 %vm393_vm1, %v5991_v47  ;;  %v6662_v47 = vmul.f32 %v3282_v23, %v3175_v10  ;;  %v3073_v11 = vpop.permute.xlu1 %3072 }
 0x153   : > { %4888 = vmatprep.mubr.msk.bf16.mxu0 %vm393_vm1, %v6008_v59  ;;  %v4237_v59 = vsel %vm7140_vm0, 1.0, %v5309_v45  ;;  %vm7143_vm0 = vcmp.ne.f32.partialorder %v6672_v13, 0.0  ;;  %v3178_v51 = vmul.f32 %v4177_v49, %v3073_v11 }
 0x154   : > { %v6669_v42 = vpop.permute.xlu0 %3371  ;;  %vm7142_vm15 = vcmp.ne.f32.partialorder %v6662_v47, 0.0  ;;  %v3728_v37 = vsel %vm393_vm1, %v4237_v59, 0.0 }
 0x155   : > { %v4238_v7 = vsel %vm7142_vm15, 1.0, %v5309_v45  ;;  %v3729_v9 = vadd.f32 %v3728_v37, %v3727_v25  ;;  %v5310_v37 = vmov 1.0|1.0  }
 0x156   : > { %v6679_v32 = vpop.permute.xlu1 %3376  ;;  %v3730_v58 = vsel %vm393_vm1, %v4238_v7, 0.0  ;;  %4893 = vmatprep.subr.msk.bf16.mxu1 %vm6452_vm5, %v5310_v37 }
 0x157   : > { %v3731_v54 = vadd.f32 %v3730_v58, %v3729_v9  ;;  %4895 = vmatpush3.bf16.msk.msra.mxu1 %vm6467_vm8, %v5310_v37  ;;  %v4245_v58 = vsel %vm3438_vm4, 1.0, %v5309_v45  ;;  %vm7214_vm4 = vcmp.ne.f32.partialorder %v6624_v60, 0.0 }
 0x158   : > { %v3292_v24 = vpop.permute.xlu0 %3291  ;;  %4897 = vmatprep.subr.msk.bf16.mxu1 %vm6494_vm11, %v5310_v37  ;;  %vm4906_vm8 = vmpackc.low %vm7214_vm4, %vm7213_vm3  ;;  %vm7219_vm4 = vcmp.ne.f32.partialorder %v6566_v35, 0.0 }
 0x159   : > { %v6686_v30 = vmul.f32 %v3292_v24, %v3177_v48  ;;  %v4190_v24 = vld [vmem:[%s6428_s8 + $0x151] sm:$0xff] }
 0x15a   : > { %4889 = vmatmul.mubr.msk.bf16.gmra.mrb[28].mxu0 %vm393_vm1, %v2562_v20  ;;  %v3297_v44 = vpop.permute.xlu1 %3296  ;;  %v4239_v20 = vsel %vm7143_vm0, 1.0, %v5309_v45  ;;  %v3191_v14 = vmul.f32 %v4190_v24, %v6609_v2  ;;  %v4193_v2 = vld [vmem:[%s6428_s8 + $0x171] sm:$0xff] }
 0x15b   : > { %vm3433_vm15 = vcmp.ne.f32.partialorder %v6686_v30, 0.0  ;;  %v6697_v3 = vmul.f32 %v3297_v44, %v3178_v51  ;;  %v3732_v22 = vsel %vm393_vm1, %v4239_v20, 0.0  ;;  %v4191_v51 = vld [vmem:[%s6428_s8 + $0x159] sm:$0xff]  ;;  %4899 = vmatpush3.bf16.msk.msra.mxu1 %vm6509_vm14, %v5310_v37  ;;  %v3194_v43 = vmul.f32 %v4193_v2, %v6653_v31 }
 0x15c   : > { %v6692_v23 = vpop.permute.xlu0 %3157  ;;  %v4240_v55 = vsel %vm3433_vm15, 1.0, %v5309_v45  ;;  %v3733_v5 = vadd.f32 %v3732_v22, %v3731_v54  ;;  %v3192_v54 = vmul.f32 %v4191_v51, %v6614_v57  ;;  %4901 = vmatprep.subr.msk.bf16.mxu1 %vm6541_vm6, %v5310_v37  ;;  %v3415_v38 = vmul.f32 %v6621_v52, %v3191_v14  ;;  %v4194_v52 = vld [vmem:[%s6428_s8 + $0x181] sm:$0xff] }
 0x15d   : > { %vm3434_vm0 = vcmp.ne.f32.partialorder %v6697_v3, 0.0  ;;  %v3734_v4 = vsel %vm393_vm1, %v4240_v55, 0.0  ;;  %v4192_v55 = vld [vmem:[%s6428_s8 + $0x169] sm:$0xff]  ;;  %vm7217_vm6 = vcmp.ne.f32.partialorder %v6637_v50, 0.0  ;;  %v3418_v31 = vmul.f32 %v6679_v32, %v3194_v43 }
 0x15e   : > { %v6700_v8 = vpop.permute.xlu1 %3162  ;;  %v4241_v6 = vsel %vm3434_vm0, 1.0, %v5309_v45  ;;  %v3735_v11 = vadd.f32 %v3734_v4, %v3733_v5  ;;  %v3416_v4 = vmul.f32 %v6629_v39, %v3192_v54  ;;  %v4195_v39 = vld [vmem:[%s6428_s8 + $0x189] sm:$0xff]  ;;  %vm3447_vm11 = vcmp.ne.f32.partialorder %v3415_v38, 0.0 }
 0x15f   : > { %v3736_v46 = vsel %vm393_vm1, %v4241_v6, 0.0  ;;  %4903 = vmatpush3.bf16.msk.msra.mxu1 %vm6553_vm12, %v5310_v37  ;;  %vm7218_vm12 = vcmp.ne.f32.partialorder %v6647_v21, 0.0  ;;  %v3195_v19 = vmul.f32 %v4194_v52, %v6692_v23  ;;  %v4250_v50 = vsel %vm7219_vm4, 1.0, %v5309_v45 }
 0x160   : > { %v3737_v7 = vadd.f32 %v3736_v46, %v3735_v11  ;;  %4905 = vmatprep.subr.msk.bf16.mxu1 %vm6576_vm7, %v5310_v37  ;;  %vm3448_vm14 = vcmp.ne.f32.partialorder %v3416_v4, 0.0  ;;  %vm4910_vm7 = vmpackc.low %vm7218_vm12, %vm7217_vm6  ;;  %vm3450_vm12 = vcmp.ne.f32.partialorder %v3418_v31, 0.0  ;;  %v4254_v46 = vsel %vm3447_vm11, 1.0, %v5309_v45 }
 0x161   : > { %vm4912_vm3 = vmpackc.low %vm3448_vm14, %vm3447_vm11  ;;  %v4255_v30 = vsel %vm3448_vm14, 1.0, %v5309_v45  ;;  %v4257_v51 = vsel %vm3450_vm12, 1.0, %v5309_v45 }
 0x162   : > { %v3764_v24 = vsel %vm393_vm1, %v4255_v30, 0.0  ;;  %v3768_v41 = vsel %vm393_vm1, %v4257_v51, 0.0 }
 0x163   : > { %v3078_v10 = vpop.permute.xlu0 %3077  ;;  %4907 = vmatpush3.bf16.msk.msra.mxu1 %vm4906_vm8, %v5310_v37  ;;  %vm7220_vm8 = vcmp.ne.f32.partialorder %v6568_v62, 0.0 }
 0x164   : > { %v3083_v63 = vpop.permute.xlu1 %3082  ;;  %v3179_v34 = vmul.f32 %v4178_v29, %v3078_v10  ;;  %v3744_v10 = vsel %vm393_vm1, %v4245_v58, 0.0  ;;  %v4247_v29 = vsel %vm3440_vm10, 1.0, %v5309_v45  ;;  %vm7216_vm10 = vcmp.ne.f32.partialorder %v6533_v33, 0.0  ;;  %4909 = vmatprep.subr.msk.bf16.mxu1 %vm6605_vm2, %v5310_v37 }
 0x165   : > { %v3180_v48 = vmul.f32 %v4179_v36, %v3083_v63  ;;  %v3193_v63 = vmul.f32 %v4192_v55, %v6644_v0  ;;  %v3748_v0 = vsel %vm393_vm1, %v4247_v29, 0.0  ;;  %v4249_v60 = vsel %vm7216_vm10, 1.0, %v5309_v45 }
 0x166   : > { %v3750_v33 = vsel %vm393_vm1, %v4248_v28, 0.0  ;;  %v4251_v32 = vsel %vm7220_vm8, 1.0, %v5309_v45  ;;  %vm7221_vm2 = vcmp.ne.f32.partialorder %v6662_v47, 0.0  ;;  %vm7222_vm10 = vcmp.ne.f32.partialorder %v6672_v13, 0.0 }
 0x167   : > { %v6711_v16 = vpop.permute.xlu0 %3381  ;;  %v3417_v56 = vmul.f32 %v6669_v42, %v3193_v63  ;;  %v3752_v42 = vsel %vm393_vm1, %v4249_v60, 0.0  ;;  %4911 = vmatpush3.bf16.msk.msra.mxu1 %vm4910_vm7, %v5310_v37  ;;  %vm4914_vm6 = vmpackc.low %vm7222_vm10, %vm7221_vm2  ;;  %vm7223_vm7 = vcmp.ne.f32.partialorder %v6590_v12, 0.0  ;;  %v3756_v13 = vsel %vm393_vm1, %v4251_v32, 0.0 }
 0x168   : > { %v6715_v59 = vpop.permute.xlu1 %3386  ;;  %v3419_v53 = vmul.f32 %v6711_v16, %v3195_v19  ;;  %4913 = vmatprep.subr.msk.bf16.mxu1 %vm4912_vm3, %v5310_v37  ;;  %v4252_v62 = vsel %vm7223_vm7, 1.0, %v5309_v45  ;;  %vm7224_vm8 = vcmp.ne.f32.partialorder %v6596_v17, 0.0  ;;  %vm4918_vm3 = vmpackc.low %vm3434_vm0, %vm3433_vm15 }
 0x169   : > { %vm3449_vm9 = vcmp.ne.f32.partialorder %v3417_v56, 0.0  ;;  %v4253_v16 = vsel %vm7224_vm8, 1.0, %v5309_v45  ;;  %v3758_v12 = vsel %vm393_vm1, %v4252_v62, 0.0 }
 0x16a   : > { %vm4916_vm4 = vmpackc.low %vm3450_vm12, %vm3449_vm9  ;;  %vm3451_vm2 = vcmp.ne.f32.partialorder %v3419_v53, 0.0 }
 0x16b   : > { %v3302_v25 = vpop.permute.xlu0 %3301  ;;  %4915 = vmatpush3.bf16.msk.msra.mxu1 %vm4914_vm6, %v5310_v37 }
 0x16c   : > { %v6717_v49 = vmul.f32 %v3302_v25, %v3179_v34  ;;  %v3307_v9 = vpop.permute.xlu1 %3306  ;;  %v3196_v34 = vmul.f32 %v4195_v39, %v6700_v8  ;;  %v3754_v8 = vsel %vm393_vm1, %v4250_v50, 0.0  ;;  %4917 = vmatprep.subr.msk.bf16.mxu1 %vm4916_vm4, %v5310_v37  ;;  %v4256_v25 = vsel %vm3449_vm9, 1.0, %v5309_v45 }
 0x16d   : > { %v6734_v44 = vmul.f32 %v3307_v9, %v3180_v48  ;;  %v3762_v48 = vsel %vm393_vm1, %v4254_v46, 0.0  ;;  %v3766_v9 = vsel %vm393_vm1, %v4256_v25, 0.0 }
 0x16e   : > { %vm3435_vm13 = vcmp.ne.f32.partialorder %v6717_v49, 0.0  ;;  %v3420_v35 = vmul.f32 %v6715_v59, %v3196_v34  ;;  %v3760_v59 = vsel %vm393_vm1, %v4253_v16, 0.0 }
 0x16f   : > { %v4242_v15 = vsel %vm3435_vm13, 1.0, %v5309_v45  ;;  %vm3436_vm5 = vcmp.ne.f32.partialorder %v6734_v44, 0.0  ;;  %4919 = vmatpush3.bf16.msk.msra.mxu1 %vm4918_vm3, %v5310_v37 }
 0x170   : > { %v3738_v20 = vsel %vm393_vm1, %v4242_v15, 0.0  ;;  %v4243_v18 = vsel %vm3436_vm5, 1.0, %v5309_v45  ;;  %vm3452_vm10 = vcmp.ne.f32.partialorder %v3420_v35, 0.0  ;;  %vm4922_vm15 = vmpackc.low %vm3436_vm5, %vm3435_vm13  ;;  %v4258_v15 = vsel %vm3451_vm2, 1.0, %v5309_v45 }
 0x171   : > { %v3739_v22 = vadd.f32 %v3738_v20, %v3737_v7  ;;  %v3740_v57 = vsel %vm393_vm1, %v4243_v18, 0.0  ;;  %vm4920_vm7 = vmpackc.low %vm3452_vm10, %vm3451_vm2  ;;  %v4259_v58 = vsel %vm3452_vm10, 1.0, %v5309_v45  ;;  %v3770_v14 = vsel %vm393_vm1, %v4258_v15, 0.0 }
 0x172   : > { %4921 = vmatprep.subr.msk.bf16.mxu1 %vm4920_vm7, %v5310_v37  ;;  %vm7225_vm13 = vcmask 516096  }
 0x173   : > { %v3741_v5 = vadd.f32 %v3740_v57, %v3739_v22  ;;  %4923 = vmatpush3.bf16.msk.msra.mxu1 %vm4922_vm15, %v5310_v37  ;;  %v3772_v37 = vsel %vm393_vm1, %v4259_v58, 0.0 }
 0x175   : > { %v3743_v6 = vadd.f32 %v3742_v61, %v3741_v5 }
 0x177   : > { %v3745_v26 = vadd.f32 %v3744_v10, %v3743_v6 }
 0x179   : > { %v3747_v36 = vadd.f32 %v3746_v1, %v3745_v26 }
 0x17b   : > { %v3749_v21 = vadd.f32 %v3748_v0, %v3747_v36 }
 0x17d   : > { %v3751_v23 = vadd.f32 %v3750_v33, %v3749_v21 }
 0x17f   : > { %v3753_v47 = vadd.f32 %v3752_v42, %v3751_v23 }
 0x181   : > { %v3755_v11 = vadd.f32 %v3754_v8, %v3753_v47 }
 0x183   : > { %v3757_v17 = vadd.f32 %v3756_v13, %v3755_v11 }
 0x185   : > { %v3759_v3 = vadd.f32 %v3758_v12, %v3757_v17 }
 0x187   : > { %v3761_v7 = vadd.f32 %v3760_v59, %v3759_v3 }
 0x189   : > { %v3763_v49 = vadd.f32 %v3762_v48, %v3761_v7 }
 0x18b   : > { %v3765_v44 = vadd.f32 %v3764_v24, %v3763_v49 }
 0x18d   : > { %v3767_v20 = vadd.f32 %v3766_v9, %v3765_v44 }
 0x18f   : > { %v3769_v54 = vadd.f32 %v3768_v41, %v3767_v20 }
 0x191   : > { %v3771_v22 = vadd.f32 %v3770_v14, %v3769_v54 }
 0x193   : > { %v3773_v55 = vadd.f32 %v3772_v37, %v3771_v22 }
 0x195   : > { %v3774_v18 = vrot.slane %v3773_v55, 4 }
 0x197   : > { %v3775_v61 = vadd.f32 %v3774_v18, %v3773_v55 }
 0x199   : > { %v3776_v2 = vrot.slane %v3775_v61, 2 }
 0x19b   : > { %v3777_v57 = vadd.f32 %v3776_v2, %v3775_v61  ;;  %v6903_v61 = vld [vmem:[%s7102_s5] ss:$0 sm:$0xff] }
 0x19d   : > { %v3778_v10 = vrot.slane %v3777_v57, 1 }
 0x19f   : > { %v3779_v5 = vadd.f32 %v3778_v10, %v3777_v57 }
 0x1a1   : > { %v3780_v29 = vadd.f32 %v3779_v5, %v3710_v40 }
 0x1a3   : > { %3782 = vst.msk [vmem:[#allocation3] sm:$0x1] %vm7225_vm13, %v3780_v29 }
 0x1b4   : > { %v4662_v38 = vpop.f32.mrb[0].mxu1 }
 0x1b5   : > { %v1529_v45 = vpop.f32.mrb[1].mxu1 }
 0x1b6   : > { %v4663_v4 = vpop.f32.mrb[2].mxu1 }
 0x1b7   : > { %v1532_v63 = vpop.f32.mrb[3].mxu1 }
 0x1bc   : > { %v4666_v43 = vpop.f32.mrb[4].mxu1 }
 0x1bd   : > { %v1545_v6 = vpop.f32.mrb[5].mxu1 }
 0x1be   : > { %v4667_v1 = vpop.f32.mrb[6].mxu1 }
 0x1bf   : > { %v1548_v52 = vpop.f32.mrb[7].mxu1 }
 0x1c4   : > { %v4670_v39 = vpop.f32.mrb[8].mxu1 }
 0x1c5   : > { %v1561_v0 = vpop.f32.mrb[9].mxu1 }
 0x1c6   : > { %v4671_v28 = vpop.f32.mrb[10].mxu1 }
 0x1c7   : > { %v1564_v26 = vpop.f32.mrb[11].mxu1 }
 0x1cc   : > { %v4674_v60 = vpop.f32.mrb[12].mxu1 }
 0x1cd   : > { %v1577_v56 = vpop.f32.mrb[13].mxu1 }
 0x1ce   : > { %v4675_v31 = vpop.f32.mrb[14].mxu1 }
 0x1cf   : > { %v1580_v19 = vpop.f32.mrb[15].mxu1 }
 0x1d4   : > { %v6866_v34 = vpop.f32.mrb[16].mxu1 }
 0x1d5   : > { %v6868_v36 = vpop.f32.mrb[17].mxu1 }
 0x1d6   : > { %v6870_v33 = vpop.f32.mrb[18].mxu1 }
 0x1d7   : > { %v6872_v50 = vpop.f32.mrb[19].mxu1 }
 0x1dc   : > { %v6874_v21 = vpop.f32.mrb[20].mxu1 }
 0x1dd   : > { %v6876_v42 = vpop.f32.mrb[21].mxu1 }
 0x1de   : > { %v6878_v32 = vpop.f32.mrb[22].mxu1 }
 0x1df   : > { %v6880_v53 = vpop.f32.mrb[23].mxu1 }
 0x1e4   : > { %v6882_v35 = vpop.f32.mrb[24].mxu1 }
 0x1e5   : > { %v6884_v23 = vpop.f32.mrb[25].mxu1 }
 0x1e6   : > { %v6886_v8 = vpop.f32.mrb[26].mxu1 }
 0x1e7   : > { %v6888_v62 = vpop.f32.mrb[27].mxu1 }
 0x1ec   : > { %v6890_v47 = vpop.f32.mrb[28].mxu1 }
 0x1ed   : > { %v6892_v13 = vpop.f32.mrb[29].mxu1 }
 0x1ee   : > { %v6894_v16 = vpop.f32.mrb[30].mxu1 }
 0x1ef   : > { %v6896_v11 = vpop.f32.mrb[31].mxu1 }
 0x1f5   : > { %v4862_v12 = vpop.f32.mrb[0].mxu0 }
 0x1f6   : > { %v4924_v46 = vadd.f32 %v4862_v12, %v4662_v38  ;;  %v2613_v17 = vpop.f32.mrb[1].mxu0 }
 0x1f7   : > { %v4925_v59 = vadd.f32 %v2613_v17, %v1529_v45  ;;  %v4863_v30 = vpop.f32.mrb[2].mxu0 }
 0x1f8   : > { %v4926_v3 = vadd.f32 %v4863_v30, %v4663_v4  ;;  %v2616_v48 = vpop.f32.mrb[3].mxu0  ;;  %v2781_v2 = vadd.f32 %v4924_v46, %v6903_v61 }
 0x1f9   : > { %v4927_v25 = vadd.f32 %v2616_v48, %v1532_v63  ;;  %v2779_v10 = vadd.f32 %v4925_v59, %v6903_v61 }
 0x1fa   : > { %v2782_v40 = vadd.f32 %v4926_v3, %v6903_v61  ;;  %vm2813_vm0 = vcmp.ge.f32.partialorder %v2781_v2, 0.0 }
 0x1fb   : > { %v2780_v38 = vadd.f32 %v4927_v25, %v6903_v61  ;;  %vm2811_vm5 = vcmp.ge.f32.partialorder %v2779_v10, 0.0 }
 0x1fc   : > { %vm2814_vm11 = vcmp.ge.f32.partialorder %v2782_v40, 0.0 }
 0x1fd   : > { %v4866_v7 = vpop.f32.mrb[4].mxu0  ;;  %v2844_v12 = vmul.f32 0.2, %v2780_v38  ;;  %vm2812_vm14 = vcmp.ge.f32.partialorder %v2780_v38, 0.0 }
 0x1fe   : > { %v4928_v24 = vadd.f32 %v4866_v7, %v4666_v43  ;;  %v2629_v51 = vpop.f32.mrb[5].mxu0 }
 0x1ff   : > { %v4929_v49 = vadd.f32 %v2629_v51, %v1545_v6  ;;  %v4867_v9 = vpop.f32.mrb[6].mxu0 }
 0x200   : > { %v4930_v15 = vadd.f32 %v4867_v9, %v4667_v1  ;;  %v2632_v44 = vpop.f32.mrb[7].mxu0  ;;  %v2785_v45 = vadd.f32 %v4928_v24, %v6903_v61  ;;  %v6928_v24 = vsel %vm2812_vm14, %v2780_v38, %v2844_v12 }
 0x201   : > { %v4931_v41 = vadd.f32 %v2632_v44, %v1548_v52  ;;  %v2783_v4 = vadd.f32 %v4929_v49, %v6903_v61 }
 0x202   : > { %v2786_v6 = vadd.f32 %v4930_v15, %v6903_v61  ;;  %v2849_v46 = vmul.f32 0.2, %v2785_v45  ;;  %vm2817_vm9 = vcmp.ge.f32.partialorder %v2785_v45, 0.0 }
 0x203   : > { %vm2815_vm6 = vcmp.ge.f32.partialorder %v2783_v4, 0.0 }
 0x204   : > { %v2850_v17 = vmul.f32 0.2, %v2786_v6  ;;  %vm2818_vm12 = vcmp.ge.f32.partialorder %v2786_v6, 0.0  ;;  %v6930_v51 = vsel %vm2817_vm9, %v2785_v45, %v2849_v46 }
 0x205   : > { %v4870_v58 = vpop.f32.mrb[8].mxu0 }
 0x206   : > { %v4932_v20 = vadd.f32 %v4870_v58, %v4670_v39  ;;  %v2645_v14 = vpop.f32.mrb[9].mxu0  ;;  %v2845_v39 = vmul.f32 0.2, %v2781_v2  ;;  %v6935_v44 = vsel %vm2818_vm12, %v2786_v6, %v2850_v17 }
 0x207   : > { %v4933_v54 = vadd.f32 %v2645_v14, %v1561_v0  ;;  %v4871_v37 = vpop.f32.mrb[10].mxu0  ;;  %v2784_v0 = vadd.f32 %v4931_v41, %v6903_v61 }
 0x208   : > { %v4934_v22 = vadd.f32 %v4871_v37, %v4671_v28  ;;  %v2648_v55 = vpop.f32.mrb[11].mxu0  ;;  %v2789_v30 = vadd.f32 %v4932_v20, %v6903_v61 }
 0x209   : > { %v6898_v18 = vadd.f32 %v2648_v55, %v1564_v26  ;;  %v2843_v26 = vmul.f32 0.2, %v2779_v10  ;;  %v2848_v59 = vmul.f32 0.2, %v2784_v0  ;;  %vm2816_vm4 = vcmp.ge.f32.partialorder %v2784_v0, 0.0 }
 0x20a   : > { %v2787_v41 = vadd.f32 %v4933_v54, %v6903_v61  ;;  %vm2821_vm8 = vcmp.ge.f32.partialorder %v2789_v30, 0.0 }
 0x20b   : > { %v2875_v7 = vsel %vm2811_vm5, %v2779_v10, %v2843_v26  ;;  %v6940_v14 = vsel %vm2816_vm4, %v2784_v0, %v2848_v59  ;;  %v2790_v10 = vadd.f32 %v4934_v22, %v6903_v61  ;;  %v2788_v0 = vadd.f32 %v6898_v18, %v6903_v61 }
 0x20c   : > { %vm2819_vm10 = vcmp.ge.f32.partialorder %v2787_v41, 0.0 }
 0x20d   : > { %v4874_v57 = vpop.f32.mrb[12].mxu0  ;;  %vm2822_vm13 = vcmp.ge.f32.partialorder %v2790_v10, 0.0  ;;  %v2854_v18 = vmul.f32 0.2, %v2790_v10  ;;  %vm2820_vm9 = vcmp.ge.f32.partialorder %v2788_v0, 0.0 }
 0x20e   : > { %v6908_v5 = vadd.f32 %v4874_v57, %v4674_v60  ;;  %v2661_v29 = vpop.f32.mrb[13].mxu0  ;;  %v2846_v60 = vmul.f32 0.2, %v2782_v40 }
 0x20f   : > { %v6913_v63 = vadd.f32 %v2661_v29, %v1577_v56  ;;  %v4875_v43 = vpop.f32.mrb[14].mxu0  ;;  %v2847_v56 = vmul.f32 0.2, %v2783_v4 }
 0x210   : > { %v6916_v1 = vadd.f32 %v4875_v43, %v4675_v31  ;;  %v2664_v52 = vpop.f32.mrb[15].mxu0  ;;  %v6921_v31 = vsel %vm2813_vm0, %v2781_v2, %v2845_v39  ;;  %v2853_v2 = vmul.f32 0.2, %v2789_v30  ;;  %v2851_v43 = vmul.f32 0.2, %v2787_v41 }
 0x211   : > { %v6919_v28 = vadd.f32 %v2664_v52, %v1580_v19  ;;  %v6924_v19 = vsel %vm2814_vm11, %v2782_v40, %v2846_v60  ;;  %v6932_v49 = vsel %vm2815_vm6, %v2783_v4, %v2847_v56 }
 0x212   : > { %v6957_v56 = vsel %vm2821_vm8, %v2789_v30, %v2853_v2  ;;  %v6980_v2 = vsel %vm2822_vm13, %v2790_v10, %v2854_v18 }
 0x215   : > { %v4878_v3 = vpop.f32.mrb[16].mxu0 }
 0x216   : > { %v4940_v48 = vadd.f32 %v4878_v3, %v6866_v34  ;;  %v2677_v25 = vpop.f32.mrb[17].mxu0 }
 0x217   : > { %v4941_v9 = vadd.f32 %v2677_v25, %v6868_v36  ;;  %v4879_v15 = vpop.f32.mrb[18].mxu0  ;;  %v2852_v25 = vmul.f32 0.2, %v2788_v0 }
 0x218   : > { %v2797_v58 = vadd.f32 %v4940_v48, %v6903_v61  ;;  %v4942_v34 = vadd.f32 %v4879_v15, %v6870_v33  ;;  %v2680_v20 = vpop.f32.mrb[19].mxu0  ;;  %v6965_v48 = vsel %vm2819_vm10, %v2787_v41, %v2851_v43 }
 0x219   : > { %v2795_v37 = vadd.f32 %v4941_v9, %v6903_v61  ;;  %v4943_v55 = vadd.f32 %v2680_v20, %v6872_v50  ;;  %v6994_v10 = vsel %vm2820_vm9, %v2788_v0, %v2852_v25 }
 0x21a   : > { %vm2829_vm3 = vcmp.ge.f32.partialorder %v2797_v58, 0.0  ;;  %v2861_v36 = vmul.f32 0.2, %v2797_v58  ;;  %v2798_v57 = vadd.f32 %v4942_v34, %v6903_v61 }
 0x21b   : > { %vm2827_vm2 = vcmp.ge.f32.partialorder %v2795_v37, 0.0  ;;  %v2859_v54 = vmul.f32 0.2, %v2795_v37  ;;  %v2796_v40 = vadd.f32 %v4943_v55, %v6903_v61 }
 0x21c   : > { %v2893_v33 = vsel %vm2829_vm3, %v2797_v58, %v2861_v36  ;;  %vm2830_vm7 = vcmp.ge.f32.partialorder %v2798_v57, 0.0  ;;  %v2862_v29 = vmul.f32 0.2, %v2798_v57 }
 0x21d   : > { %vm2828_vm15 = vcmp.ge.f32.partialorder %v2796_v40, 0.0  ;;  %v2860_v38 = vmul.f32 0.2, %v2796_v40  ;;  %v4882_v45 = vpop.f32.mrb[20].mxu0  ;;  %v2891_v4 = vsel %vm2827_vm2, %v2795_v37, %v2859_v54  ;;  %v5214_v50 = vpack.i.bf16 %v6921_v31, %v2893_v33 }
 0x21e   : > { %v6948_v6 = vsel %vm2830_vm7, %v2798_v57, %v2862_v29  ;;  %v4944_v52 = vadd.f32 %v4882_v45, %v6874_v21  ;;  %v2693_v22 = vpop.f32.mrb[21].mxu0  ;;  %v5210_v39 = vpack.i.bf16 %v2875_v7, %v2891_v4  ;;  %v2791_v33 = vadd.f32 %v6913_v63, %v6903_v61 }
 0x21f   : > { %v2892_v26 = vsel %vm2828_vm15, %v2796_v40, %v2860_v38  ;;  %v4945_v60 = vadd.f32 %v2693_v22, %v6876_v42  ;;  %v4883_v12 = vpop.f32.mrb[22].mxu0  ;;  %v5216_v46 = vpack.i.bf16 %v6924_v19, %v6948_v6 }
 0x220   : > { %v2801_v17 = vadd.f32 %v4944_v52, %v6903_v61  ;;  %v4946_v31 = vadd.f32 %v4883_v12, %v6878_v32  ;;  %v2696_v21 = vpop.f32.mrb[23].mxu0  ;;  %5211 = vxpose.xlu0.b32.start [1/16] (narrow) %v5210_v39, 64  ;;  %v5212_v59 = vpack.i.bf16 %v6928_v24, %v2892_v26  ;;  %v2793_v24 = vadd.f32 %v6908_v5, %v6903_v61 }
 0x221   : > { %v2799_v3 = vadd.f32 %v4945_v60, %v6903_v61  ;;  %v4947_v42 = vadd.f32 %v2696_v21, %v6880_v53  ;;  %vm2823_vm8 = vcmp.ge.f32.partialorder %v2791_v33, 0.0  ;;  %v2855_v26 = vmul.f32 0.2, %v2791_v33 }
 0x222   : > { %vm2833_vm0 = vcmp.ge.f32.partialorder %v2801_v17, 0.0  ;;  %v2865_v30 = vmul.f32 0.2, %v2801_v17  ;;  %v2802_v19 = vadd.f32 %v4946_v31, %v6903_v61  ;;  %vm2825_vm6 = vcmp.ge.f32.partialorder %v2793_v24, 0.0 }
 0x223   : > { %vm2831_vm5 = vcmp.ge.f32.partialorder %v2799_v3, 0.0  ;;  %v2863_v32 = vmul.f32 0.2, %v2799_v3  ;;  %v2800_v7 = vadd.f32 %v4947_v42, %v6903_v61  ;;  %v2857_v4 = vmul.f32 0.2, %v2793_v24 }
 0x224   : > { %v6971_v9 = vsel %vm2833_vm0, %v2801_v17, %v2865_v30  ;;  %vm2834_vm11 = vcmp.ge.f32.partialorder %v2802_v19, 0.0  ;;  %v2866_v15 = vmul.f32 0.2, %v2802_v19  ;;  %5213 = vxpose.xlu0.b32.cont [2/16] (narrow) %v5212_v59, 64  ;;  %v2792_v31 = vadd.f32 %v6919_v28, %v6903_v61 }
 0x225   : > { %v2895_v53 = vsel %vm2831_vm5, %v2799_v3, %v2863_v32  ;;  %vm2832_vm14 = vcmp.ge.f32.partialorder %v2800_v7, 0.0  ;;  %v2864_v41 = vmul.f32 0.2, %v2800_v7  ;;  %v4886_v58 = vpop.f32.mrb[24].mxu0  ;;  %v5222_v34 = vpack.i.bf16 %v6930_v51, %v6971_v9 }
 0x226   : > { %v6975_v20 = vsel %vm2834_vm11, %v2802_v19, %v2866_v15  ;;  %v4948_v37 = vadd.f32 %v4886_v58, %v6882_v35  ;;  %v2709_v55 = vpop.f32.mrb[25].mxu0  ;;  %v5218_v5 = vpack.i.bf16 %v6932_v49, %v2895_v53  ;;  %v2889_v3 = vsel %vm2825_vm6, %v2793_v24, %v2857_v4 }
 0x227   : > { %v6982_v36 = vsel %vm2832_vm14, %v2800_v7, %v2864_v41  ;;  %v4949_v57 = vadd.f32 %v2709_v55, %v6884_v23  ;;  %v4887_v54 = vpop.f32.mrb[26].mxu0  ;;  %v5224_v40 = vpack.i.bf16 %v6935_v44, %v6975_v20  ;;  %v2856_v7 = vmul.f32 0.2, %v2792_v31 }
 0x228   : > { %v2805_v29 = vadd.f32 %v4948_v37, %v6903_v61  ;;  %v4950_v35 = vadd.f32 %v4887_v54, %v6886_v8  ;;  %v2712_v38 = vpop.f32.mrb[27].mxu0  ;;  %5215 = vxpose.xlu0.b32.cont [3/16] (narrow) %v5214_v50, 64  ;;  %v5220_v49 = vpack.i.bf16 %v6940_v14, %v6982_v36  ;;  %v2794_v8 = vadd.f32 %v6916_v1, %v6903_v61 }
 0x229   : > { %v2803_v23 = vadd.f32 %v4949_v57, %v6903_v61  ;;  %v4951_v45 = vadd.f32 %v2712_v38, %v6888_v62  ;;  %vm2824_vm13 = vcmp.ge.f32.partialorder %v2792_v31, 0.0 }
 0x22a   : > { %vm2837_vm12 = vcmp.ge.f32.partialorder %v2805_v29, 0.0  ;;  %v2869_v63 = vmul.f32 0.2, %v2805_v29  ;;  %v2806_v43 = vadd.f32 %v4950_v35, %v6903_v61  ;;  %vm2826_vm10 = vcmp.ge.f32.partialorder %v2794_v8, 0.0 }
 0x22b   : > { %vm2835_vm4 = vcmp.ge.f32.partialorder %v2803_v23, 0.0  ;;  %v2867_v50 = vmul.f32 0.2, %v2803_v23  ;;  %v2804_v14 = vadd.f32 %v4951_v45, %v6903_v61 }
 0x22c   : > { %v2901_v6 = vsel %vm2837_vm12, %v2805_v29, %v2869_v63  ;;  %vm2838_vm3 = vcmp.ge.f32.partialorder %v2806_v43, 0.0  ;;  %v2870_v52 = vmul.f32 0.2, %v2806_v43  ;;  %5217 = vxpose.xlu0.b32.cont [4/16] (narrow) %v5216_v46, 64 }
 0x22d   : > { %v2899_v22 = vsel %vm2835_vm4, %v2803_v23, %v2867_v50  ;;  %vm2836_vm2 = vcmp.ge.f32.partialorder %v2804_v14, 0.0  ;;  %v2868_v62 = vmul.f32 0.2, %v2804_v14  ;;  %v4890_v39 = vpop.f32.mrb[28].mxu0  ;;  %v5230_v0 = vpack.i.bf16 %v6957_v56, %v2901_v6 }
 0x22e   : > { %v2902_v60 = vsel %vm2838_vm3, %v2806_v43, %v2870_v52  ;;  %v4952_v12 = vadd.f32 %v4890_v39, %v6890_v47  ;;  %v2725_v1 = vpop.f32.mrb[29].mxu0  ;;  %v5226_v17 = vpack.i.bf16 %v6965_v48, %v2899_v22  ;;  %v2858_v48 = vmul.f32 0.2, %v2794_v8 }
 0x22f   : > { %v2900_v21 = vsel %vm2836_vm2, %v2804_v14, %v2868_v62  ;;  %v4953_v59 = vadd.f32 %v2725_v1, %v6892_v13  ;;  %v4891_v46 = vpop.f32.mrb[30].mxu0  ;;  %v5232_v18 = vpack.i.bf16 %v6980_v2, %v2902_v60  ;;  %v2887_v13 = vsel %vm2823_vm8, %v2791_v33, %v2855_v26  ;;  %v3786_v62 = vld [vmem:[#allocation3] sm:$0x1] }
 0x230   : > { %v2809_v56 = vadd.f32 %v4952_v12, %v6903_v61  ;;  %v4954_v42 = vadd.f32 %v4891_v46, %v6894_v16  ;;  %v2728_v30 = vpop.f32.mrb[31].mxu0  ;;  %5219 = vxpose.xlu0.b32.cont [5/16] (narrow) %v5218_v5, 64  ;;  %v5228_v47 = vpack.i.bf16 %v6994_v10, %v2900_v21  ;;  %v2890_v37 = vsel %vm2826_vm10, %v2794_v8, %v2858_v48  ;;  %v3517_v12 = vld [vmem:[#allocation2] sm:$0xff]  ;;  %v3518_v46 = vld [vmem:[#allocation2 + $0x8] sm:$0xff] }
 0x231   : > { %v2807_v28 = vadd.f32 %v4953_v59, %v6903_v61  ;;  %v4955_v19 = vadd.f32 %v2728_v30, %v6896_v11  ;;  %v2888_v2 = vsel %vm2824_vm13, %v2792_v31, %v2856_v7  ;;  %v3791_v39 = vmax.f32 %v3786_v62, 1.0 }
 0x232   : > { %vm2841_vm7 = vcmp.ge.f32.partialorder %v2809_v56, 0.0  ;;  %v2873_v25 = vmul.f32 0.2, %v2809_v56  ;;  %v2810_v32 = vadd.f32 %v4954_v42, %v6903_v61  ;;  %v3803_v26 = vlaneseq }
 0x233   : > { %vm2839_vm15 = vcmp.ge.f32.partialorder %v2807_v28, 0.0  ;;  %v2871_v24 = vmul.f32 0.2, %v2807_v28  ;;  %v2808_v16 = vadd.f32 %v4955_v19, %v6903_v61  ;;  %5282 = vrcp.f32 %v3791_v39 }
 0x234   : > { %v2905_v15 = vsel %vm2841_vm7, %v2809_v56, %v2873_v25  ;;  %vm2842_vm0 = vcmp.ge.f32.partialorder %v2810_v32, 0.0  ;;  %v2874_v53 = vmul.f32 0.2, %v2810_v32  ;;  %5221 = vxpose.xlu0.b32.cont [6/16] (narrow) %v5220_v49, 64  ;;  %vm3787_vm11 = vcmp.gt.f32.partialorder %v3786_v62, 0.0 }
 0x235   : > { %v2903_v41 = vsel %vm2839_vm15, %v2807_v28, %v2871_v24  ;;  %vm2840_vm5 = vcmp.ge.f32.partialorder %v2808_v16, 0.0  ;;  %v2872_v58 = vmul.f32 0.2, %v2808_v16  ;;  %v5238_v11 = vpack.i.bf16 %v2889_v3, %v2905_v15  ;;  %v3519_v28 = vld [vmem:[#allocation2 + $0x10] sm:$0xff]  ;;  %v3520_v15 = vld [vmem:[#allocation2 + $0x18] sm:$0xff] }
 0x236   : > { %v2906_v55 = vsel %vm2842_vm0, %v2810_v32, %v2874_v53  ;;  %v5234_v5 = vpack.i.bf16 %v2887_v13, %v2903_v41  ;;  %v3804_v31 = vshrl.u32 %v3803_v26, 7 }
 0x237   : > { %v2904_v36 = vsel %vm2840_vm5, %v2808_v16, %v2872_v58  ;;  %v5240_v57 = vpack.i.bf16 %v2890_v37, %v2906_v55 }
 0x238   : > { %5223 = vxpose.xlu0.b32.cont [7/16] (narrow) %v5222_v34, 64  ;;  %v5236_v61 = vpack.i.bf16 %v2888_v2, %v2904_v36  ;;  %v3805_v56 = vsub.s32 0, %v3804_v31 }
 0x23c   : > { %5225 = vxpose.xlu0.b32.cont [8/16] (narrow) %v5224_v40, 64 }
 0x23d   : > { %v5283_v48 = vpop.eup %5282 }
 0x23e   : > { %v7034_v32 = vrot.slane %v5283_v48, %v3805_v56 }
 0x240   : > { %5227 = vxpose.xlu0.b32.cont [9/16] (narrow) %v5226_v17, 64 }
 0x244   : > { %5229 = vxpose.xlu0.b32.cont [10/16] (narrow) %v5228_v47, 64 }
 0x248   : > { %5231 = vxpose.xlu0.b32.cont [11/16] (narrow) %v5230_v0, 64  ;;  %v3788_v0 = vld [vmem:[%s7103_s6] sm:$0x1] }
 0x249   : > { %vm3789_vm14 = vcmp.gt.f32.partialorder %v3788_v0, 0.0 }
 0x24a   : > { %vm3790_vm9 = vmand %vm3787_vm11, %vm3789_vm14 }
 0x24b   : > { %v3816_v42 = vsel %vm3790_vm9, 1, %v5308_v27 }
 0x24c   : > { %5233 = vxpose.xlu0.b32.cont [12/16] (narrow) %v5232_v18, 64  ;;  %v7032_v25 = vrot.slane %v3816_v42, %v3805_v56 }
 0x24e   : > { %vm3821_vm6 = vcmp.eq.s32.totalorder %v7032_v25, 1 }
 0x250   : > { %5235 = vxpose.xlu0.b32.cont [13/16] (narrow) %v5234_v5, 64  ;;  %v3521_v5 = vld [vmem:[#allocation2 + $0x20] sm:$0xff] }
 0x254   : > { %5237 = vxpose.xlu0.b32.cont [14/16] (narrow) %v5236_v61, 64 }
 0x258   : > { %5239 = vxpose.xlu0.b32.cont [15/16] (narrow) %v5238_v11, 64 }
 0x25c   : > { %5241 = vxpose.xlu0.b32.end [16/16] (narrow) %v5240_v57, 64 }
 0x2a0   : > { %v5242_v54 = vpop.trf.xlu0 }
 0x2a1   : > { %v5246_v33 = vunpack.i.h.bf16 %v5242_v54  ;;  %v5243_v29 = vunpack.i.l.bf16 %v5242_v54 }
 0x2a3   : > { %3653 = vmatprep.mubr.f32.mxu1 %v5243_v29 }
 0x2a4   : > { %v5247_v35 = vpop.trf.xlu0  ;;  %3654 = vmatmul.mubr.f32.vlgmr.msra.gmra.mrb[32].mxu1 %v5246_v33 }
 0x2a5   : > { %v5248_v51 = vunpack.i.l.bf16 %v5247_v35  ;;  %v5251_v9 = vunpack.i.h.bf16 %v5247_v35  ;;  %v3522_v35 = vld [vmem:[#allocation2 + $0x28] sm:$0xff] }
 0x2a7   : > { %3658 = vmatprep.mubr.f32.mxu1 %v5248_v51 }
 0x2a8   : > { %v5252_v34 = vpop.trf.xlu0  ;;  %3659 = vmatmul.mubr.f32.gmra.mrb[34].mxu1 %v5251_v9 }
 0x2a9   : > { %v5253_v44 = vunpack.i.l.bf16 %v5252_v34  ;;  %v5256_v20 = vunpack.i.h.bf16 %v5252_v34 }
 0x2ab   : > { %3663 = vmatprep.mubr.f32.mxu1 %v5253_v44 }
 0x2ac   : > { %v5257_v40 = vpop.trf.xlu0  ;;  %3664 = vmatmul.mubr.f32.gmra.mrb[36].mxu1 %v5256_v20 }
 0x2ad   : > { %v5258_v38 = vunpack.i.l.bf16 %v5257_v40  ;;  %v5261_v49 = vunpack.i.h.bf16 %v5257_v40 }
 0x2af   : > { %3668 = vmatprep.mubr.f32.mxu1 %v5258_v38 }
 0x2b0   : > { %v5262_v10 = vpop.trf.xlu0  ;;  %3669 = vmatmul.mubr.f32.gmra.mrb[38].mxu1 %v5261_v49  ;;  %v3523_v49 = vld [vmem:[#allocation2 + $0x30] sm:$0xff] }
 0x2b1   : > { %v5263_v23 = vunpack.i.l.bf16 %v5262_v10  ;;  %v5266_v45 = vunpack.i.h.bf16 %v5262_v10 }
 0x2b3   : > { %3673 = vmatprep.mubr.f32.mxu1 %v5263_v23 }
 0x2b4   : > { %v5267_v4 = vpop.trf.xlu0  ;;  %3674 = vmatmul.mubr.f32.gmra.mrb[40].mxu1 %v5266_v45 }
 0x2b5   : > { %v5268_v63 = vunpack.i.l.bf16 %v5267_v4  ;;  %v5271_v43 = vunpack.i.h.bf16 %v5267_v4 }
 0x2b7   : > { %3678 = vmatprep.mubr.f32.mxu1 %v5268_v63 }
 0x2b8   : > { %v5272_v8 = vpop.trf.xlu0  ;;  %3679 = vmatmul.mubr.f32.gmra.mrb[42].mxu1 %v5271_v43 }
 0x2b9   : > { %v5273_v50 = vunpack.i.l.bf16 %v5272_v8  ;;  %v5276_v14 = vunpack.i.h.bf16 %v5272_v8 }
 0x2bb   : > { %3683 = vmatprep.mubr.f32.mxu1 %v5273_v50  ;;  %v3524_v50 = vld [vmem:[#allocation2 + $0x38] sm:$0xff] }
 0x2bc   : > { %v5277_v6 = vpop.trf.xlu0  ;;  %3684 = vmatmul.mubr.f32.gmra.mrb[44].mxu1 %v5276_v14 }
 0x2bd   : > { %v5281_v52 = vunpack.i.h.bf16 %v5277_v6  ;;  %v5278_v22 = vunpack.i.l.bf16 %v5277_v6 }
 0x2bf   : > { %3688 = vmatprep.mubr.f32.mxu1 %v5278_v22 }
 0x2c0   : > { %3689 = vmatmul.mubr.f32.gmra.mrb[46].mxu1 %v5281_v52 }
 0x377   : > { %v4508_v60 = vpop.f32.mrb[32].mxu1 }
 0x378   : > { %v4509_v1 = vpop.f32.mrb[33].mxu1 }
 0x379   : > { %v4510_v17 = vadd.f32 %v4509_v1, %v4508_v60 }
 0x37b   : > { %v3694_v21 = vadd.f32 %v4510_v17, %v3517_v12  ;;  %v4511_v59 = vpop.f32.mrb[34].mxu1 }
 0x37c   : > { %v4512_v18 = vpop.f32.mrb[35].mxu1 }
 0x37d   : > { %3702 = vst.msk [vmem:[#allocation2] sm:$0xff] %vm393_vm1, %v3694_v21  ;;  %v4513_v3 = vadd.f32 %v4512_v18, %v4511_v59 }
 0x37f   : > { %v3695_v30 = vadd.f32 %v4513_v3, %v3518_v46  ;;  %v4514_v47 = vpop.f32.mrb[36].mxu1 }
 0x380   : > { %v4515_v19 = vpop.f32.mrb[37].mxu1 }
 0x381   : > { %3703 = vst.msk [vmem:[#allocation2 + $0x8] sm:$0xff] %vm393_vm1, %v3695_v30  ;;  %v4516_v13 = vadd.f32 %v4515_v19, %v4514_v47 }
 0x383   : > { %v3696_v7 = vadd.f32 %v4516_v13, %v3519_v28  ;;  %v4517_v24 = vpop.f32.mrb[38].mxu1 }
 0x384   : > { %v3794_v16 = vld [vmem:[#allocation2] sm:$0xff]  ;;  %v4518_v53 = vpop.f32.mrb[39].mxu1 }
 0x385   : > { %v3808_v27 = vmul.f32 %v7034_v32, %v3794_v16  ;;  %3704 = vst.msk [vmem:[#allocation2 + $0x10] sm:$0xff] %vm393_vm1, %v3696_v7  ;;  %v4519_v41 = vadd.f32 %v4518_v53, %v4517_v24 }
 0x387   : > { %v3822_v58 = vsel %vm3821_vm6, %v3808_v27, 0.0  ;;  %v3697_v11 = vadd.f32 %v4519_v41, %v3520_v15  ;;  %v4520_v37 = vpop.f32.mrb[40].mxu1 }
 0x388   : > { %3830 = vst.msk [vmem:[%s7039_s16] sm:$0xff] %vm393_vm1, %v3822_v58  ;;  %v3795_v55 = vld [vmem:[#allocation2 + $0x8] sm:$0xff]  ;;  %v4521_v2 = vpop.f32.mrb[41].mxu1 }
 0x389   : > { %v3809_v36 = vmul.f32 %v7034_v32, %v3795_v55  ;;  %3705 = vst.msk [vmem:[#allocation2 + $0x18] sm:$0xff] %vm393_vm1, %v3697_v11  ;;  %v4522_v57 = vadd.f32 %v4521_v2, %v4520_v37 }
 0x38b   : > { %v3823_v61 = vsel %vm3821_vm6, %v3809_v36, 0.0  ;;  %v3698_v54 = vadd.f32 %v4522_v57, %v3521_v5  ;;  %v4523_v33 = vpop.f32.mrb[42].mxu1 }
 0x38c   : > { %3831 = vst.msk [vmem:[%s7039_s16 + $0x8] sm:$0xff] %vm393_vm1, %v3823_v61  ;;  %v3796_v29 = vld [vmem:[#allocation2 + $0x10] sm:$0xff]  ;;  %v4524_v51 = vpop.f32.mrb[43].mxu1 }
 0x38d   : > { %v3810_v9 = vmul.f32 %v7034_v32, %v3796_v29  ;;  %3706 = vst.msk [vmem:[#allocation2 + $0x20] sm:$0xff] %vm393_vm1, %v3698_v54  ;;  %v4525_v34 = vadd.f32 %v4524_v51, %v4523_v33 }
 0x38f   : > { %v3824_v44 = vsel %vm3821_vm6, %v3810_v9, 0.0  ;;  %v3699_v20 = vadd.f32 %v4525_v34, %v3522_v35  ;;  %v4526_v40 = vpop.f32.mrb[44].mxu1 }
 0x390   : > { %3832 = vst.msk [vmem:[%s7039_s16 + $0x10] sm:$0xff] %vm393_vm1, %v3824_v44  ;;  %v3797_v38 = vld [vmem:[#allocation2 + $0x18] sm:$0xff]  ;;  %v4527_v10 = vpop.f32.mrb[45].mxu1 }
 0x391   : > { %v3811_v23 = vmul.f32 %v7034_v32, %v3797_v38  ;;  %3707 = vst.msk [vmem:[#allocation2 + $0x28] sm:$0xff] %vm393_vm1, %v3699_v20  ;;  %v4528_v45 = vadd.f32 %v4527_v10, %v4526_v40 }
 0x393   : > { %v3825_v4 = vsel %vm3821_vm6, %v3811_v23, 0.0  ;;  %v3700_v63 = vadd.f32 %v4528_v45, %v3523_v49  ;;  %v4529_v43 = vpop.f32.mrb[46].mxu1 }
 0x394   : > { %3833 = vst.msk [vmem:[%s7039_s16 + $0x18] sm:$0xff] %vm393_vm1, %v3825_v4  ;;  %v3798_v8 = vld [vmem:[#allocation2 + $0x20] sm:$0xff]  ;;  %v4530_v14 = vpop.f32.mrb[47].mxu1 }
 0x395   : > { %v3812_v6 = vmul.f32 %v7034_v32, %v3798_v8  ;;  %3708 = vst.msk [vmem:[#allocation2 + $0x30] sm:$0xff] %vm393_vm1, %v3700_v63  ;;  %v4531_v52 = vadd.f32 %v4530_v14, %v4529_v43 }
 0x397   : > { %v3826_v22 = vsel %vm3821_vm6, %v3812_v6, 0.0  ;;  %v3701_v62 = vadd.f32 %v4531_v52, %v3524_v50 }
 0x398   : > { %3834 = vst.msk [vmem:[%s7039_s16 + $0x20] sm:$0xff] %vm393_vm1, %v3826_v22  ;;  %v3799_v39 = vld [vmem:[#allocation2 + $0x28] sm:$0xff] }
 0x399   : > { %v3813_v0 = vmul.f32 %v7034_v32, %v3799_v39  ;;  %3709 = vst.msk [vmem:[#allocation2 + $0x38] sm:$0xff] %vm393_vm1, %v3701_v62 }
 0x39b   : > { %v3827_v26 = vsel %vm3821_vm6, %v3813_v0, 0.0 }
 0x39c   : > { %3835 = vst.msk [vmem:[%s7039_s16 + $0x28] sm:$0xff] %vm393_vm1, %v3827_v26  ;;  %v3800_v60 = vld [vmem:[#allocation2 + $0x30] sm:$0xff] }
 0x39d   : > { %v3814_v12 = vmul.f32 %v7034_v32, %v3800_v60 }
 0x39f   : > { %v3828_v1 = vsel %vm3821_vm6, %v3814_v12, 0.0 }
 0x3a0   : > { %3836 = vst.msk [vmem:[%s7039_s16 + $0x30] sm:$0xff] %vm393_vm1, %v3828_v1  ;;  %v3801_v17 = vld [vmem:[#allocation2 + $0x38] sm:$0xff] }
 0x3a1   : > { %v3815_v31 = vmul.f32 %v7034_v32, %v3801_v17 }
 0x3a3   : > { %v3829_v21 = vsel %vm3821_vm6, %v3815_v31, 0.0 }
 0x3a4   : > { %3837 = vst.msk [vmem:[%s7039_s16 + $0x38] sm:$0xff] %vm393_vm1, %v3829_v21 }
 0x3a5 PF: > { %s17_s26 = sadd.s32 1, %s5306_s26   ;;  %s7226_s24 = smov %s5302_s25 }
 0x3a6   : > { %p14_p5 = scmp.ge.s32.totalorder %s17_s26, 4   ;;  %s7227_s25 = smov %s7229_s27 }
 0x3a8   :  { %16 = sbr.rel (!%p14_p5) target bundleno = 2 (0x2), region = 105 }

// kernel: style_propagate_forward.5
= control target key start
LH: loop header
LB: loop body
LE: loop exit
PB: predicated region body
PF: predicated region fallthrough
CT: control target
= control target key end

     0   :  { %s7842_s21 = smov 0   ;;  %s10772_s0 = inlined_call_operand.vmem [shape: f32[2,18,18,128], index: 0, kind: input, shape index: {}]   ;;  %s10773_s1 = inlined_call_operand.vmem [shape: f32[2,18,18,64], index: 1, kind: input, shape index: {}]   ;;  %s10774_s2 = inlined_call_operand.vmem [shape: f32[9,128,128], index: 2, kind: input, shape index: {}]   ;;  %s10775_s3 = inlined_call_operand.vmem [shape: f32[1,128], index: 3, kind: input, shape index: {}]   ;;  %s10776_s4 = inlined_call_operand.vmem [shape: f32[9,64,64], index: 4, kind: input, shape index: {}]   ;;  %s10777_s5 = inlined_call_operand.vmem [shape: f32[1,64], index: 5, kind: input, shape index: {}]   ;;  %s10778_s6 = inlined_call_operand.vmem [shape: f32[2,64,256], index: 6, kind: output, shape index: {}]  }
   0x1 LB: > { %s5736_s22 = sadd.s32 4294967295, %s7804_s21   ;;  %p5740_p0 = scmp.ge.s32.totalorder %s7804_s21, 1  ;;  %s7804_s21 = sphi %s7842_s21, %s16_s21  }
   0x2   : > { %p222_p1 = scmp.lt.s32.totalorder %s7804_s21, 3 }
   0x4   : > { %p223_p2 = pnand %p5740_p0, %p222_p1 }
   0x6   : > { %226 = sbr.rel (%p223_p2) target bundleno = 1125 (0x465), region = 44 }
   0xd   : > { %v5745_v0 = vld [vmem:[%s10774_s2 + $0x80] sm:$0xff]  ;;  %v5746_v1 = vld [vmem:[%s10774_s2 + $0x88] sm:$0xff]  ;;  %p257_p3 = scmp.lt.s32.totalorder %s5736_s22, 1  ;;  %v5747_v5 = vld [vmem:[%s10774_s2 + $0x90] sm:$0xff]  ;;  %vm497_vm0 = vcmask 1046528   ;;  %vm1162_vm1 = vcmask 523264  }
   0xe   : > { %v5761_v2 = vld [vmem:[%s10776_s4 + $0x40] sm:$0xff]  ;;  %v803_v3 = vpack.c.bf16 %v5746_v1, %v5745_v0  ;;  %v5762_v4 = vld [vmem:[%s10776_s4 + $0x48] sm:$0xff]  ;;  %v5748_v6 = vld [vmem:[%s10774_s2 + $0x98] sm:$0xff]  ;;  %vm1581_vm2 = vcmask 1045504  }
   0xf   : > { %v1158_v7 = vpack.c.bf16 %v5762_v4, %v5761_v2  ;;  %v804_v8 = vpack.c.bf16 %v5748_v6, %v5747_v5  ;;  %v5763_v9 = vld [vmem:[%s10776_s4 + $0x50] sm:$0xff]  ;;  %v5764_v10 = vld [vmem:[%s10776_s4 + $0x58] sm:$0xff]  ;;  %v5749_v11 = vld [vmem:[%s10774_s2 + $0xa0] sm:$0xff]  ;;  %s11411_s22 = smov (!%p257_p3, %s5736_s22), 1 }
  0x10   : > { %6482 = vmatprep.subr.bf16.mxu0 %v803_v3  ;;  %v1159_v12 = vpack.c.bf16 %v5764_v10, %v5763_v9  ;;  %v5750_v13 = vld [vmem:[%s10774_s2 + $0xa8] sm:$0xff]  ;;  %v5765_v14 = vld [vmem:[%s10776_s4 + $0x60] sm:$0xff]  ;;  %s7786_s25 = smul.u32 432, %s11411_s22  ;;  %v5751_v17 = vld [vmem:[%s10774_s2 + $0xb0] sm:$0xff]  ;;  %s6085_s15 = sshll.u32 %s11411_s22, 7 }
  0x11   : > { %v5766_v15 = vld [vmem:[%s10776_s4 + $0x68] sm:$0xff]  ;;  %6578 = vmatprep.subr.bf16.mxu1 %v1158_v7  ;;  %6483 = vmatpush3.bf16.msra.mxu0 %v803_v3  ;;  %v805_v16 = vpack.c.bf16 %v5750_v13, %v5749_v11  ;;  %v5752_v19 = vld [vmem:[%s10774_s2 + $0xb8] sm:$0xff]  ;;  %v5767_v20 = vld [vmem:[%s10776_s4 + $0x70] sm:$0xff]  ;;  %s10751_s18 = scalar_lea.vmem %s10778_s6, %s6085_s15 }
  0x12   : > { %6579 = vmatpush3.bf16.msra.mxu1 %v1158_v7  ;;  %6484 = vmatprep.subr.bf16.mxu0 %v804_v8  ;;  %v1160_v18 = vpack.c.bf16 %v5766_v15, %v5765_v14  ;;  %v5768_v21 = vld [vmem:[%s10776_s4 + $0x78] sm:$0xff]  ;;  %s7906_s12 = scalar_lea.vmem %s10773_s1, %s7786_s25  ;;  %v806_v30 = vpack.c.bf16 %v5752_v19, %v5751_v17  ;;  %v5753_v31 = vld [vmem:[%s10774_s2 + $0xc0] sm:$0xff]  ;;  %v5754_v32 = vld [vmem:[%s10774_s2 + $0xc8] sm:$0xff]  ;;  %s7958_s23 = scalar_lea.vmem %s10772_s0, %s7786_s25 }
  0x13   : > { %6580 = vmatprep.subr.bf16.mxu1 %v1159_v12  ;;  %v7909_v22 = vld [vmem:[%s7906_s12] sm:$0xff]  ;;  %v7912_v23 = vld [vmem:[%s7906_s12 + $0x8] sm:$0xff]  ;;  %v7915_v24 = vld [vmem:[%s7906_s12 + $0x10] sm:$0x3]  ;;  %v1161_v36 = vpack.c.bf16 %v5768_v21, %v5767_v20  ;;  %v807_v55 = vpack.c.bf16 %v5754_v32, %v5753_v31 }
  0x14   : > { %11007 = vst [vmem:[#allocation2_spill] sm:$0xff] %v7915_v24  ;;  %v658_v25 = vrot.slane %v7909_v22, 1  ;;  %v659_v26 = vrot.slane %v7912_v23, 1  ;;  %v661_v27 = vrot.slane %v7915_v24, 1  ;;  %v7921_v28 = vld [vmem:[%s7906_s12 + $0x18] sm:$0xff]  ;;  %v7924_v29 = vld [vmem:[%s7906_s12 + $0x20] sm:$0xff] }
  0x15   : > { %6485 = vmatpush3.bf16.msra.mxu0 %v804_v8  ;;  %v7933_v33 = vld [vmem:[%s7906_s12 + $0x28] sm:$0x3]  ;;  %v663_v34 = vrot.slane %v7921_v28, 1  ;;  %v664_v35 = vrot.slane %v7924_v29, 1  ;;  %v7941_v40 = vld [vmem:[%s7906_s12 + $0x30] sm:$0xff]  ;;  %v7944_v41 = vld [vmem:[%s7906_s12 + $0x38] sm:$0xff] }
  0x16   : > { %6581 = vmatpush3.bf16.msra.mxu1 %v1159_v12  ;;  %6486 = vmatprep.subr.bf16.mxu0 %v805_v16  ;;  %11008 = vst [vmem:[#allocation3_spill] sm:$0xff] %v7933_v33  ;;  %v660_v37 = vsel %vm497_vm0, %v658_v25, %v659_v26  ;;  %v662_v38 = vsel %vm497_vm0, %v659_v26, %v661_v27  ;;  %v666_v39 = vrot.slane %v7933_v33, 1  ;;  %v7947_v42 = vld [vmem:[%s7906_s12 + $0x40] sm:$0x3]  ;;  %v5755_v45 = vld [vmem:[%s10774_s2 + $0xd0] sm:$0xff]  ;;  %v5756_v47 = vld [vmem:[%s10774_s2 + $0xd8] sm:$0xff] }
  0x17   : > { %6582 = vmatprep.subr.bf16.mxu1 %v1160_v18  ;;  %11009 = vst [vmem:[#allocation4_spill] sm:$0xff] %v7947_v42  ;;  %v1133_v43 = vpack.c.bf16 %v662_v38, %v660_v37  ;;  %v665_v44 = vsel %vm497_vm0, %v663_v34, %v664_v35  ;;  %v668_v48 = vrot.slane %v7941_v40, 1  ;;  %v669_v49 = vrot.slane %v7944_v41, 1  ;;  %v7968_v51 = vld [vmem:[%s7906_s12 + $0x48] sm:$0xff]  ;;  %v437_v52 = vld [vmem:[%s10776_s4] sm:$0xff]  ;;  %v7976_v56 = vld [vmem:[%s7906_s12 + $0x50] sm:$0xff] }
  0x18   : > { %v667_v46 = vsel %vm497_vm0, %v664_v35, %v666_v39  ;;  %v671_v50 = vrot.slane %v7947_v42, 1  ;;  %v7979_v57 = vld [vmem:[%s7906_s12 + $0x58] sm:$0x3]  ;;  %v438_v58 = vld [vmem:[%s10776_s4 + $0x8] sm:$0xff]  ;;  %v7989_v63 = vld [vmem:[%s7958_s23] sm:$0xff]  ;;  %v7999_v3 = vpack.c.bf16 %v5756_v47, %v5755_v45  ;;  %v673_v5 = vrot.slane %v7968_v51, 1 }
  0x19   : > { %6487 = vmatpush3.bf16.msra.mxu0 %v805_v16  ;;  %11010 = vst [vmem:[#allocation5_spill] sm:$0xff] %v7979_v57  ;;  %6586 = vmatprep.mubr.msk.bf16.mxu1 %vm1162_vm1, %v1133_v43  ;;  %v670_v60 = vsel %vm497_vm0, %v668_v48, %v669_v49  ;;  %v445_v62 = vpack.c.bf16 %v438_v58, %v437_v52  ;;  %v7992_v0 = vld [vmem:[%s7958_s23 + $0x8] sm:$0xff]  ;;  %v7995_v1 = vld [vmem:[%s7958_s23 + $0x10] sm:$0x3]  ;;  %v5757_v4 = vld [vmem:[%s10774_s2 + $0xe0] sm:$0xff]  ;;  %v498_v6 = vrot.slane %v7989_v63, 1 }
  0x1a   : > { %6583 = vmatpush3.bf16.msra.mxu1 %v1160_v18  ;;  %6488 = vmatprep.subr.bf16.mxu0 %v806_v30  ;;  %v672_v61 = vsel %vm497_vm0, %v669_v49, %v671_v50  ;;  %11011 = vst [vmem:[#allocation6_spill] sm:$0xff] %v7995_v1  ;;  %v7997_v2 = vpack.c.bf16 %v667_v46, %v665_v44  ;;  %v8007_v7 = vld [vmem:[%s7906_s12 + $0x60] sm:$0xff]  ;;  %v8010_v8 = vld [vmem:[%s7906_s12 + $0x68] sm:$0xff]  ;;  %v8013_v9 = vld [vmem:[%s7906_s12 + $0x70] sm:$0x3]  ;;  %v674_v10 = vrot.slane %v7976_v56, 1 }
  0x1b   : > { %6584 = vmatprep.subr.bf16.mxu1 %v1161_v36  ;;  %11013 = vst [vmem:[#allocation8_spill] sm:$0xff] %v8013_v9  ;;  %v676_v11 = vrot.slane %v7979_v57, 1  ;;  %v499_v12 = vrot.slane %v7992_v0, 1  ;;  %v501_v13 = vrot.slane %v7995_v1, 1  ;;  %v8020_v14 = vld [vmem:[%s7958_s23 + $0x18] sm:$0xff]  ;;  %v8023_v15 = vld [vmem:[%s7958_s23 + $0x20] sm:$0xff]  ;;  %v8025_v16 = vpack.c.bf16 %v672_v61, %v670_v60 }
  0x1c   : > { %11012 = vst [vmem:[#allocation7_spill] sm:$0xff] %v7997_v2  ;;  %v5758_v17 = vld [vmem:[%s10774_s2 + $0xe8] sm:$0xff]  ;;  %v678_v18 = vrot.slane %v8007_v7, 1  ;;  %v679_v19 = vrot.slane %v8010_v8, 1  ;;  %v681_v20 = vrot.slane %v8013_v9, 1  ;;  %v503_v27 = vrot.slane %v8020_v14, 1 }
  0x1d   : > { %6489 = vmatpush3.bf16.msra.mxu0 %v806_v30  ;;  %11014 = vst [vmem:[#allocation9_spill] sm:$0xff] %v8025_v16  ;;  %v8034_v21 = vld [vmem:[%s7958_s23 + $0x28] sm:$0x3]  ;;  %v500_v25 = vsel %vm497_vm0, %v498_v6, %v499_v12  ;;  %v502_v26 = vsel %vm497_vm0, %v499_v12, %v501_v13  ;;  %v504_v30 = vrot.slane %v8023_v15, 1  ;;  %v8041_v31 = vld [vmem:[%s7906_s12 + $0x78] sm:$0xff]  ;;  %v8044_v32 = vld [vmem:[%s7906_s12 + $0x80] sm:$0xff]  ;;  %v809_v44 = vpack.c.bf16 %v5758_v17, %v5757_v4 }
  0x1e   : > { %6585 = vmatpush3.bf16.msra.mxu1 %v1161_v36  ;;  %6490 = vmatprep.subr.bf16.mxu0 %v807_v55  ;;  %v770_v35 = vpack.c.bf16 %v502_v26, %v500_v25  ;;  %v506_v36 = vrot.slane %v8034_v21, 1  ;;  %v8049_v37 = vld [vmem:[%s7906_s12 + $0x88] sm:$0x3]  ;;  %v8052_v38 = vld [vmem:[%s7958_s23 + $0x30] sm:$0xff]  ;;  %v8055_v39 = vld [vmem:[%s7958_s23 + $0x38] sm:$0xff]  ;;  %v675_v45 = vsel %vm497_vm0, %v673_v5, %v674_v10  ;;  %v677_v46 = vsel %vm497_vm0, %v674_v10, %v676_v11 }
  0x1f   : > { %6618 = vmatprep.subr.bf16.mxu1 %v445_v62  ;;  %11015 = vst [vmem:[#allocation10_spill] sm:$0xff] %v8049_v37  ;;  %v8063_v47 = vld [vmem:[%s7958_s23 + $0x40] sm:$0x3]  ;;  %v8066_v48 = vld [vmem:[%s7906_s12 + $0x90] sm:$0xff]  ;;  %v8069_v49 = vld [vmem:[%s7906_s12 + $0x98] sm:$0xff]  ;;  %v680_v52 = vsel %vm497_vm0, %v678_v18, %v679_v19  ;;  %v505_v58 = vsel %vm497_vm0, %v503_v27, %v504_v30  ;;  %v683_v60 = vrot.slane %v8041_v31, 1  ;;  %v8105_v25 = vpack.c.bf16 %v677_v46, %v675_v45 }
  0x20   : > { %11016 = vst [vmem:[#allocation11_spill] sm:$0xff] %v8063_v47  ;;  %v5759_v50 = vld [vmem:[%s10774_s2 + $0xf0] sm:$0xff]  ;;  %v8082_v61 = vld [vmem:[%s7906_s12 + $0xa0] sm:$0x3]  ;;  %v5760_v4 = vld [vmem:[%s10774_s2 + $0xf8] sm:$0xff]  ;;  %6498 = vmatprep.mubr.bf16.mxu0 %v770_v35  ;;  %v507_v5 = vsel %vm497_vm0, %v504_v30, %v506_v36  ;;  %v686_v11 = vrot.slane %v8049_v37, 1 }
  0x21   : > { %6587 = vmatmul.mubr.msk.bf16.vlgmr.msra.gmra.mrb[0].mxu1 %vm1162_vm1, %v7997_v2  ;;  %6491 = vmatpush3.bf16.msra.mxu0 %v807_v55  ;;  %v682_v55 = vsel %vm497_vm0, %v679_v19, %v681_v20  ;;  %11017 = vst [vmem:[#allocation12_spill] sm:$0xff] %v8082_v61  ;;  %v397_v6 = vld [vmem:[%s10774_s2] sm:$0xff]  ;;  %v398_v10 = vld [vmem:[%s10774_s2 + $0x8] sm:$0xff]  ;;  %v508_v12 = vrot.slane %v8052_v38, 1  ;;  %v509_v13 = vrot.slane %v8055_v39, 1  ;;  %v511_v17 = vrot.slane %v8063_v47, 1 }
  0x22   : > { %6492 = vmatprep.subr.bf16.mxu0 %v7999_v3  ;;  %6590 = vmatprep.mubr.msk.bf16.mxu1 %vm1162_vm1, %v8025_v16  ;;  %v688_v18 = vrot.slane %v8066_v48, 1  ;;  %v689_v19 = vrot.slane %v8069_v49, 1  ;;  %v8102_v20 = vld [vmem:[%s7958_s23 + $0x48] sm:$0xff]  ;;  %11019 = vst [vmem:[#allocation14_spill] sm:$0xff] %v8105_v25  ;;  %v691_v30 = vrot.slane %v8082_v61, 1  ;;  %v8111_v35 = vld [vmem:[%s7958_s23 + $0x50] sm:$0xff]  ;;  %v8120_v45 = vpack.c.bf16 %v682_v55, %v680_v52 }
  0x23   : > { %6619 = vmatpush3.bf16.msra.mxu1 %v445_v62  ;;  %v684_v62 = vrot.slane %v8044_v32, 1  ;;  %11018 = vst [vmem:[#allocation13_spill] sm:$0xff] %v8102_v20  ;;  %11020 = vst [vmem:[#allocation15_spill] sm:$0xff] %v8111_v35  ;;  %v8114_v36 = vld [vmem:[%s7958_s23 + $0x58] sm:$0x3]  ;;  %v8117_v34 = vld [vmem:[%s7906_s12 + $0xa8] sm:$0xff]  ;;  %v8122_v46 = vpack.c.bf16 %v398_v10, %v397_v6  ;;  %v8133_v43 = vpack.c.bf16 %v507_v5, %v505_v58 }
  0x24   : > { %11021 = vst [vmem:[#allocation16_spill] sm:$0xff] %v8114_v36  ;;  %11022 = vst [vmem:[#allocation17_spill] sm:$0xff] %v8120_v45  ;;  %v512_v52 = vsel %vm497_vm0, %v509_v13, %v511_v17  ;;  %v513_v55 = vrot.slane %v8102_v20, 1  ;;  %v400_v6 = vld [vmem:[%s10774_s2 + $0x18] sm:$0xff]  ;;  %v8148_v59 = vld [vmem:[%s7958_s23 + $0x60] sm:$0xff]  ;;  %v514_v17 = vrot.slane %v8111_v35, 1 }
  0x25   : > { %6493 = vmatpush3.bf16.msra.mxu0 %v7999_v3  ;;  %v685_v26 = vsel %vm497_vm0, %v683_v60, %v684_v62  ;;  %v687_v27 = vsel %vm497_vm0, %v684_v62, %v686_v11  ;;  %v810_v3 = vpack.c.bf16 %v5760_v4, %v5759_v50  ;;  %v8125_v60 = vld [vmem:[%s7906_s12 + $0xb0] sm:$0xff]  ;;  %v440_v11 = vld [vmem:[%s10776_s4 + $0x18] sm:$0xff]  ;;  %11024 = vst [vmem:[#allocation19_spill] sm:$0xff] %v8133_v43  ;;  %11026 = vst [vmem:[#allocation21_spill] sm:$0xff] %v8148_v59 }
  0x26   : > { %6494 = vmatprep.subr.bf16.mxu0 %v809_v44  ;;  %11023 = vst [vmem:[#allocation18_spill] sm:$0xff] %v8125_v60  ;;  %v439_v62 = vld [vmem:[%s10776_s4 + $0x10] sm:$0xff]  ;;  %v510_v50 = vsel %vm497_vm0, %v508_v12, %v509_v13  ;;  %v8145_v10 = vld [vmem:[%s7906_s12 + $0xb8] sm:$0x3]  ;;  %v8151_v58 = vld [vmem:[%s7958_s23 + $0x68] sm:$0xff]  ;;  %v8153_v5 = vpack.c.bf16 %v687_v27, %v685_v26  ;;  %v690_v12 = vsel %vm497_vm0, %v688_v18, %v689_v19  ;;  %v516_v26 = vrot.slane %v8114_v36, 1 }
  0x27   : > { %v399_v4 = vld [vmem:[%s10774_s2 + $0x10] sm:$0xff]  ;;  %11025 = vst [vmem:[#allocation20_spill] sm:$0xff] %v8145_v10  ;;  %11027 = vst [vmem:[#allocation22_spill] sm:$0xff] %v8151_v58  ;;  %v692_v13 = vsel %vm497_vm0, %v689_v19, %v691_v30  ;;  %v8162_v54 = vld [vmem:[%s7906_s12 + $0xc0] sm:$0xff]  ;;  %v693_v18 = vrot.slane %v8117_v34, 1  ;;  %v694_v19 = vrot.slane %v8125_v60, 1  ;;  %v446_v27 = vpack.c.bf16 %v440_v11, %v439_v62 }
  0x28   : > { %11028 = vst [vmem:[#allocation23_spill] sm:$0xff] %v8153_v5  ;;  %v8159_v53 = vld [vmem:[%s7958_s23 + $0x70] sm:$0x3]  ;;  %11030 = vst [vmem:[#allocation25_spill] sm:$0xff] %v8162_v54  ;;  %v8165_v16 = vld [vmem:[%s7906_s12 + $0xc8] sm:$0xff]  ;;  %v8180_v61 = vpack.c.bf16 %v512_v52, %v510_v50  ;;  %v519_v36 = vrot.slane %v8151_v58, 1  ;;  %v8191_v11 = vpack.c.bf16 %v692_v13, %v690_v12  ;;  %v8197_v37 = vpack.c.bf16 %v400_v6, %v399_v4 }
  0x29   : > { %11029 = vst [vmem:[#allocation24_spill] sm:$0xff] %v8159_v53  ;;  %11031 = vst [vmem:[#allocation26_spill] sm:$0xff] %v8165_v16  ;;  %6591 = vmatmul.mubr.msk.bf16.gmra.mrb[4].mxu1 %vm1162_vm1, %v8105_v25  ;;  %6495 = vmatpush3.bf16.msra.mxu0 %v809_v44  ;;  %v8173_v30 = vld [vmem:[%s7906_s12 + $0xd0] sm:$0x3]  ;;  %v8176_v2 = vld [vmem:[%s7958_s23 + $0x78] sm:$0xff]  ;;  %v696_v44 = vrot.slane %v8145_v10, 1  ;;  %v515_v10 = vsel %vm497_vm0, %v513_v55, %v514_v17  ;;  %v695_v42 = vsel %vm497_vm0, %v693_v18, %v694_v19 }
  0x2a   : > { %11032 = vst [vmem:[#allocation27_spill] sm:$0xff] %v8173_v30  ;;  %11033 = vst [vmem:[#allocation28_spill] sm:$0xff] %v8176_v2  ;;  %6496 = vmatprep.subr.bf16.mxu0 %v810_v3  ;;  %6594 = vmatprep.mubr.msk.bf16.mxu1 %vm1162_vm1, %v8120_v45  ;;  %v518_v25 = vrot.slane %v8148_v59, 1  ;;  %v8186_v47 = vld [vmem:[%s7958_s23 + $0x80] sm:$0xff]  ;;  %v8189_v62 = vld [vmem:[%s7958_s23 + $0x88] sm:$0x3] }
  0x2b   : > { %11034 = vst [vmem:[#allocation29_spill] sm:$0xff] %v8180_v61  ;;  %11035 = vst [vmem:[#allocation30_spill] sm:$0xff] %v8186_v47  ;;  %6620 = vmatprep.subr.bf16.mxu1 %v446_v27  ;;  %v521_v45 = vrot.slane %v8159_v53, 1  ;;  %v698_v50 = vrot.slane %v8162_v54, 1  ;;  %v699_v52 = vrot.slane %v8165_v16, 1  ;;  %v701_v9 = vrot.slane %v8173_v30, 1 }
  0x2c   : > { %11036 = vst [vmem:[#allocation31_spill] sm:$0xff] %v8189_v62  ;;  %11037 = vst [vmem:[#allocation32_spill] sm:$0xff] %v8191_v11  ;;  %6621 = vmatpush3.bf16.msra.mxu1 %v446_v27  ;;  %v523_v12 = vrot.slane %v8176_v2, 1  ;;  %v8202_v13 = vld [vmem:[%s7906_s12 + $0xd8] sm:$0xff]  ;;  %v8205_v57 = vld [vmem:[%s7906_s12 + $0xe0] sm:$0xff]  ;;  %v517_v53 = vsel %vm497_vm0, %v514_v17, %v516_v26  ;;  %v524_v33 = vrot.slane %v8186_v47, 1  ;;  %v520_v17 = vsel %vm497_vm0, %v518_v25, %v519_v36 }
  0x2d   : > { %11038 = vst [vmem:[#allocation33_spill] sm:$0xff] %v8202_v13  ;;  %11039 = vst [vmem:[#allocation34_spill] sm:$0xff] %v8205_v57  ;;  %6497 = vmatpush3.bf16.msra.mxu0 %v810_v3  ;;  %v526_v55 = vrot.slane %v8189_v62, 1  ;;  %v8212_v4 = vld [vmem:[%s7906_s12 + $0xe8] sm:$0x3]  ;;  %v8215_v6 = vld [vmem:[%s7958_s23 + $0x90] sm:$0xff]  ;;  %v697_v3 = vsel %vm497_vm0, %v694_v19, %v696_v44  ;;  %v522_v26 = vsel %vm497_vm0, %v519_v36, %v521_v45 }
  0x2e   : > { %11040 = vst [vmem:[#allocation35_spill] sm:$0xff] %v8212_v4  ;;  %11041 = vst [vmem:[#allocation36_spill] sm:$0xff] %v8215_v6  ;;  %v8218_v27 = vld [vmem:[%s7958_s23 + $0x98] sm:$0xff]  ;;  %6530 = vmatprep.subr.bf16.mxu0 %v8122_v46  ;;  %v700_v18 = vsel %vm497_vm0, %v698_v50, %v699_v52  ;;  %v401_v62 = vld [vmem:[%s10774_s2 + $0x20] sm:$0xff]  ;;  %v702_v24 = vsel %vm497_vm0, %v699_v52, %v701_v9  ;;  %v525_v47 = vsel %vm497_vm0, %v523_v12, %v524_v33 }
  0x2f   : > { %11042 = vst [vmem:[#allocation37_spill] sm:$0xff] %v8218_v27  ;;  %v8229_v30 = vld [vmem:[%s7958_s23 + $0xa0] sm:$0x3]  ;;  %v402_v19 = vld [vmem:[%s10774_s2 + $0x28] sm:$0xff]  ;;  %v703_v25 = vrot.slane %v8202_v13, 1  ;;  %v704_v36 = vrot.slane %v8205_v57, 1  ;;  %v527_v9 = vsel %vm497_vm0, %v524_v33, %v526_v55  ;;  %v8258_v33 = vpack.c.bf16 %v697_v3, %v695_v42 }
  0x30   : > { %11043 = vst [vmem:[#allocation38_spill] sm:$0xff] %v8229_v30  ;;  %v8239_v45 = vld [vmem:[%s7906_s12 + $0xf0] sm:$0xff]  ;;  %v8242_v44 = vld [vmem:[%s7906_s12 + $0xf8] sm:$0xff]  ;;  %6499 = vmatmul.mubr.bf16.vlgmr.msra.gmra.mrb[0].mxu0 %v8133_v43  ;;  %v706_v50 = vrot.slane %v8212_v4, 1  ;;  %v528_v52 = vrot.slane %v8215_v6, 1  ;;  %v529_v12 = vrot.slane %v8218_v27, 1  ;;  %v8256_v43 = vpack.c.bf16 %v517_v53, %v515_v10 }
  0x31   : > { %11044 = vst [vmem:[#allocation39_spill] sm:$0xff] %v8239_v45  ;;  %11045 = vst [vmem:[#allocation40_spill] sm:$0xff] %v8242_v44  ;;  %v8250_v13 = vld [vmem:[%s7906_s12 + $0x100] sm:$0x3]  ;;  %6595 = vmatmul.mubr.msk.bf16.gmra.mrb[8].mxu1 %vm1162_vm1, %v8153_v5  ;;  %6531 = vmatpush3.bf16.msra.mxu0 %v8122_v46  ;;  %v531_v55 = vrot.slane %v8229_v30, 1  ;;  %v8262_v4 = vld [vmem:[%s7958_s23 + $0xa8] sm:$0xff]  ;;  %v8273_v46 = vpack.c.bf16 %v522_v26, %v520_v17  ;;  %v415_v53 = vpack.c.bf16 %v402_v19, %v401_v62 }
  0x32   : > { %11046 = vst [vmem:[#allocation41_spill] sm:$0xff] %v8250_v13  ;;  %11047 = vst [vmem:[#allocation42_spill] sm:$0xff] %v8256_v43  ;;  %v8265_v27 = vld [vmem:[%s7958_s23 + $0xb0] sm:$0xff]  ;;  %v8268_v6 = vld [vmem:[%s7958_s23 + $0xb8] sm:$0x3]  ;;  %6502 = vmatprep.mubr.bf16.mxu0 %v8180_v61  ;;  %6598 = vmatprep.mubr.msk.bf16.mxu1 %vm1162_vm1, %v8191_v11  ;;  %v708_v42 = vrot.slane %v8239_v45, 1  ;;  %v8293_v26 = vpack.c.bf16 %v702_v24, %v700_v18  ;;  %v8295_v19 = vpack.c.bf16 %v527_v9, %v525_v47 }
  0x33   : > { %11048 = vst [vmem:[#allocation43_spill] sm:$0xff] %v8258_v33  ;;  %11049 = vst [vmem:[#allocation44_spill] sm:$0xff] %v8262_v4  ;;  %v709_v10 = vrot.slane %v8242_v44, 1  ;;  %v403_v3 = vld [vmem:[%s10774_s2 + $0x30] sm:$0xff]  ;;  %v404_v57 = vld [vmem:[%s10774_s2 + $0x38] sm:$0xff]  ;;  %6532 = vmatprep.subr.bf16.mxu0 %v8197_v37  ;;  %v8298_v11 = vsel %vm497_vm0, %v703_v25, %v704_v36  ;;  %v711_v5 = vrot.slane %v8250_v13, 1  ;;  %v707_v24 = vsel %vm497_vm0, %v704_v36, %v706_v50 }
  0x34   : > { %11050 = vst [vmem:[#allocation45_spill] sm:$0xff] %v8265_v27  ;;  %11051 = vst [vmem:[#allocation46_spill] sm:$0xff] %v8268_v6  ;;  %v8284_v61 = vld [vmem:[%s7906_s12 + $0x108] sm:$0xff]  ;;  %v8287_v17 = vld [vmem:[%s7906_s12 + $0x110] sm:$0xff]  ;;  %v8312_v47 = vsel %vm497_vm0, %v528_v52, %v529_v12  ;;  %v533_v18 = vrot.slane %v8262_v4, 1  ;;  %v534_v25 = vrot.slane %v8265_v27, 1  ;;  %v532_v2 = vsel %vm497_vm0, %v529_v12, %v531_v55 }
  0x35   : > { %11052 = vst [vmem:[#allocation47_spill] sm:$0xff] %v8273_v46  ;;  %11053 = vst [vmem:[#allocation48_spill] sm:$0xff] %v8284_v61  ;;  %v8290_v62 = vld [vmem:[%s7906_s12 + $0x118] sm:$0x3]  ;;  %v441_v30 = vld [vmem:[%s10776_s4 + $0x20] sm:$0xff]  ;;  %6533 = vmatpush3.bf16.msra.mxu0 %v8197_v37  ;;  %v536_v36 = vrot.slane %v8268_v6, 1  ;;  %v710_v16 = vsel %vm497_vm0, %v708_v42, %v709_v10  ;;  %v712_v55 = vsel %vm497_vm0, %v709_v10, %v711_v5 }
  0x36   : > { %11054 = vst [vmem:[#allocation49_spill] sm:$0xff] %v8287_v17  ;;  %11055 = vst [vmem:[#allocation50_spill] sm:$0xff] %v8290_v62  ;;  %v442_v1 = vld [vmem:[%s10776_s4 + $0x28] sm:$0xff]  ;;  %v8308_v44 = vld [vmem:[%s7958_s23 + $0xc0] sm:$0xff]  ;;  %v713_v50 = vrot.slane %v8284_v61, 1  ;;  %v714_v52 = vrot.slane %v8287_v17, 1  ;;  %6534 = vmatprep.subr.bf16.mxu0 %v415_v53  ;;  %v416_v6 = vpack.c.bf16 %v404_v57, %v403_v3 }
  0x37   : > { %11056 = vst [vmem:[#allocation51_spill] sm:$0xff] %v8293_v26  ;;  %11057 = vst [vmem:[#allocation52_spill] sm:$0xff] %v8295_v19  ;;  %v8317_v9 = vld [vmem:[%s7958_s23 + $0xc8] sm:$0xff]  ;;  %v8320_v13 = vld [vmem:[%s7958_s23 + $0xd0] sm:$0x3]  ;;  %v716_v37 = vrot.slane %v8290_v62, 1  ;;  %v447_v54 = vpack.c.bf16 %v442_v1, %v441_v30  ;;  %v535_v1 = vsel %vm497_vm0, %v533_v18, %v534_v25  ;;  %v537_v18 = vsel %vm497_vm0, %v534_v25, %v536_v36 }
  0x38   : > { %11058 = vst [vmem:[#allocation53_spill] sm:$0xff] %v8308_v44  ;;  %11059 = vst [vmem:[#allocation54_spill] sm:$0xff] %v8317_v9  ;;  %v8323_v45 = vld [vmem:[%s7906_s12 + $0x120] sm:$0xff]  ;;  %v8331_v27 = vld [vmem:[%s7906_s12 + $0x128] sm:$0xff]  ;;  %v538_v12 = vrot.slane %v8308_v44, 1  ;;  %v539_v58 = vrot.slane %v8317_v9, 1  ;;  %6503 = vmatmul.mubr.bf16.gmra.mrb[4].mxu0 %v8256_v43  ;;  %v715_v43 = vsel %vm497_vm0, %v713_v50, %v714_v52 }
  0x39   : > { %11060 = vst [vmem:[#allocation55_spill] sm:$0xff] %v8320_v13  ;;  %11061 = vst [vmem:[#allocation56_spill] sm:$0xff] %v8331_v27  ;;  %v8334_v4 = vld [vmem:[%s7906_s12 + $0x130] sm:$0x3]  ;;  %v541_v61 = vrot.slane %v8320_v13, 1  ;;  %v8343_v17 = vld [vmem:[%s7958_s23 + $0xd8] sm:$0xff]  ;;  %6622 = vmatprep.subr.bf16.mxu1 %v447_v54  ;;  %6599 = vmatmul.mubr.msk.bf16.gmra.mrb[12].mxu1 %vm1162_vm1, %v8258_v33  ;;  %v8400_v33 = vpack.c.bf16 %v707_v24, %v8298_v11 }
  0x3a   : > { %11062 = vst [vmem:[#allocation57_spill] sm:$0xff] %v8334_v4  ;;  %11063 = vst [vmem:[#allocation58_spill] sm:$0xff] %v8343_v17  ;;  %v8346_v59 = vld [vmem:[%s7958_s23 + $0xe0] sm:$0xff]  ;;  %v8349_v60 = vld [vmem:[%s7958_s23 + $0xe8] sm:$0x3]  ;;  %v718_v57 = vrot.slane %v8323_v45, 1  ;;  %6506 = vmatprep.mubr.bf16.mxu0 %v8273_v46  ;;  %6602 = vmatprep.mubr.msk.bf16.mxu1 %vm1162_vm1, %v8293_v26  ;;  %v540_v3 = vsel %vm497_vm0, %v538_v12, %v539_v58 }
  0x3b   : > { %11064 = vst [vmem:[#allocation59_spill] sm:$0xff] %v8346_v59  ;;  %11065 = vst [vmem:[#allocation60_spill] sm:$0xff] %v8349_v60  ;;  %v719_v5 = vrot.slane %v8331_v27, 1  ;;  %v721_v30 = vrot.slane %v8334_v4, 1  ;;  %v405_v42 = vld [vmem:[%s10774_s2 + $0x40] sm:$0xff]  ;;  %v406_v10 = vld [vmem:[%s10774_s2 + $0x48] sm:$0xff]  ;;  %v717_v4 = vsel %vm497_vm0, %v714_v52, %v716_v37  ;;  %6535 = vmatpush3.bf16.msra.mxu0 %v415_v53  ;;  %v542_v25 = vsel %vm497_vm0, %v539_v58, %v541_v61 }
  0x3c   : > { %v8370_v13 = vld [vmem:[%s7906_s12 + $0x138] sm:$0xff]  ;;  %v8373_v62 = vld [vmem:[%s7906_s12 + $0x140] sm:$0xff]  ;;  %v8376_v27 = vld [vmem:[%s7906_s12 + $0x148] sm:$0x3]  ;;  %v543_v36 = vrot.slane %v8343_v17, 1  ;;  %v544_v50 = vrot.slane %v8346_v59, 1  ;;  %6536 = vmatprep.subr.bf16.mxu0 %v416_v6  ;;  %6623 = vmatpush3.bf16.msra.mxu1 %v447_v54  ;;  %v417_v12 = vpack.c.bf16 %v406_v10, %v405_v42  ;;  %v8412_v10 = vpack.c.bf16 %v532_v2, %v8312_v47 }
  0x3d   : > { %11066 = vst [vmem:[#allocation61_spill] sm:$0xff] %v8370_v13  ;;  %11067 = vst [vmem:[#allocation62_spill] sm:$0xff] %v8373_v62  ;;  %v8385_v52 = vld [vmem:[%s7958_s23 + $0xf0] sm:$0xff]  ;;  %v720_v37 = vsel %vm497_vm0, %v718_v57, %v719_v5  ;;  %v722_v46 = vsel %vm497_vm0, %v719_v5, %v721_v30  ;;  %v546_v53 = vrot.slane %v8349_v60, 1  ;;  %v8391_v61 = vld [vmem:[%s7958_s23 + $0xf8] sm:$0xff]  ;;  %v723_v54 = vrot.slane %v8370_v13, 1 }
  0x3e   : > { %11068 = vst [vmem:[#allocation63_spill] sm:$0xff] %v8376_v27  ;;  %11069 = vst [vmem:[#allocation64_spill] sm:$0xff] %v8391_v61  ;;  %v8394_v58 = vld [vmem:[%s7958_s23 + $0x100] sm:$0x3]  ;;  %v8397_v26 = vld [vmem:[%s7906_s12 + $0x150] sm:$0xff]  ;;  %v724_v57 = vrot.slane %v8373_v62, 1  ;;  %v8414_v60 = vpack.c.bf16 %v712_v55, %v710_v16  ;;  %v8416_v59 = vpack.c.bf16 %v537_v18, %v535_v1  ;;  %v8418_v11 = vpack.c.bf16 %v717_v4, %v715_v43 }
  0x3f   : > { %11070 = vst [vmem:[#allocation65_spill] sm:$0xff] %v8394_v58  ;;  %11071 = vst [vmem:[#allocation66_spill] sm:$0xff] %v8397_v26  ;;  %v726_v5 = vrot.slane %v8376_v27, 1  ;;  %v8406_v30 = vld [vmem:[%s7906_s12 + $0x158] sm:$0xff]  ;;  %v8409_v42 = vld [vmem:[%s7906_s12 + $0x160] sm:$0x3]  ;;  %6537 = vmatpush3.bf16.msra.mxu0 %v416_v6  ;;  %v8429_v13 = vpack.c.bf16 %v542_v25, %v540_v3  ;;  %v8431_v17 = vpack.c.bf16 %v722_v46, %v720_v37 }
  0x40   : > { %11072 = vst [vmem:[#allocation67_spill] sm:$0xff] %v8400_v33  ;;  %11073 = vst [vmem:[#allocation68_spill] sm:$0xff] %v8406_v30  ;;  %v8421_v24 = vld [vmem:[%s7958_s23 + $0x108] sm:$0xff]  ;;  %v8424_v62 = vld [vmem:[%s7958_s23 + $0x110] sm:$0xff]  ;;  %v545_v2 = vsel %vm497_vm0, %v543_v36, %v544_v50  ;;  %v548_v16 = vrot.slane %v8385_v52, 1  ;;  %v547_v6 = vsel %vm497_vm0, %v544_v50, %v546_v53  ;;  %6538 = vmatprep.subr.bf16.mxu0 %v417_v12  ;;  %v549_v46 = vrot.slane %v8391_v61, 1 }
  0x41   : > { %11074 = vst [vmem:[#allocation69_spill] sm:$0xff] %v8409_v42  ;;  %11075 = vst [vmem:[#allocation70_spill] sm:$0xff] %v8412_v10  ;;  %v8427_v27 = vld [vmem:[%s7958_s23 + $0x118] sm:$0x3]  ;;  %v407_v43 = vld [vmem:[%s10774_s2 + $0x50] sm:$0xff]  ;;  %v551_v55 = vrot.slane %v8394_v58, 1  ;;  %6507 = vmatmul.mubr.bf16.gmra.mrb[8].mxu0 %v8295_v19  ;;  %v725_v25 = vsel %vm497_vm0, %v723_v54, %v724_v57  ;;  %v727_v36 = vsel %vm497_vm0, %v724_v57, %v726_v5  ;;  %6603 = vmatmul.mubr.msk.bf16.gmra.mrb[16].mxu1 %vm1162_vm1, %v8400_v33 }
  0x42   : > { %11076 = vst [vmem:[#allocation71_spill] sm:$0xff] %v8414_v60  ;;  %11077 = vst [vmem:[#allocation72_spill] sm:$0xff] %v8416_v59  ;;  %v408_v4 = vld [vmem:[%s10774_s2 + $0x58] sm:$0xff]  ;;  %v8442_v47 = vld [vmem:[%s7906_s12 + $0x168] sm:$0xff]  ;;  %v728_v1 = vrot.slane %v8397_v26, 1  ;;  %v729_v50 = vrot.slane %v8406_v30, 1  ;;  %6510 = vmatprep.mubr.bf16.mxu0 %v8412_v10  ;;  %6606 = vmatprep.mubr.msk.bf16.mxu1 %vm1162_vm1, %v8414_v60  ;;  %v8482_v61 = vpack.c.bf16 %v547_v6, %v545_v2 }
  0x43   : > { %11078 = vst [vmem:[#allocation73_spill] sm:$0xff] %v8418_v11  ;;  %11079 = vst [vmem:[#allocation74_spill] sm:$0xff] %v8424_v62  ;;  %v8449_v3 = vld [vmem:[%s7906_s12 + $0x170] sm:$0xff]  ;;  %v8452_v18 = vld [vmem:[%s7906_s12 + $0x178] sm:$0x3]  ;;  %v731_v37 = vrot.slane %v8409_v42, 1  ;;  %v418_v19 = vpack.c.bf16 %v408_v4, %v407_v43  ;;  %6539 = vmatpush3.bf16.msra.mxu0 %v417_v12  ;;  %v550_v43 = vsel %vm497_vm0, %v548_v16, %v549_v46 }
  0x44   : > { %11080 = vst [vmem:[#allocation75_spill] sm:$0xff] %v8427_v27  ;;  %11081 = vst [vmem:[#allocation76_spill] sm:$0xff] %v8429_v13  ;;  %v443_v53 = vld [vmem:[%s10776_s4 + $0x30] sm:$0xff]  ;;  %v444_v58 = vld [vmem:[%s10776_s4 + $0x38] sm:$0xff]  ;;  %v553_v54 = vrot.slane %v8421_v24, 1  ;;  %v554_v57 = vrot.slane %v8424_v62, 1  ;;  %v552_v4 = vsel %vm497_vm0, %v549_v46, %v551_v55  ;;  %v730_v6 = vsel %vm497_vm0, %v728_v1, %v729_v50 }
  0x45   : > { %11082 = vst [vmem:[#allocation77_spill] sm:$0xff] %v8431_v17  ;;  %11083 = vst [vmem:[#allocation78_spill] sm:$0xff] %v8449_v3  ;;  %v8466_v26 = vld [vmem:[%s7958_s23 + $0x120] sm:$0xff]  ;;  %v556_v5 = vrot.slane %v8427_v27, 1  ;;  %v8475_v42 = vld [vmem:[%s7958_s23 + $0x128] sm:$0xff]  ;;  %v733_v10 = vrot.slane %v8442_v47, 1  ;;  %v8487_v27 = vpack.c.bf16 %v727_v36, %v725_v25  ;;  %6540 = vmatprep.subr.bf16.mxu0 %v418_v19  ;;  %v448_v60 = vpack.c.bf16 %v444_v58, %v443_v53 }
  0x46   : > { %11084 = vst [vmem:[#allocation79_spill] sm:$0xff] %v8452_v18  ;;  %11085 = vst [vmem:[#allocation80_spill] sm:$0xff] %v8466_v26  ;;  %v8478_v30 = vld [vmem:[%s7958_s23 + $0x130] sm:$0x3]  ;;  %v734_v33 = vrot.slane %v8449_v3, 1  ;;  %v736_v62 = vrot.slane %v8452_v18, 1  ;;  %v732_v55 = vsel %vm497_vm0, %v729_v50, %v731_v37  ;;  %v555_v53 = vsel %vm497_vm0, %v553_v54, %v554_v57 }
  0x47   : > { %11086 = vst [vmem:[#allocation81_spill] sm:$0xff] %v8475_v42  ;;  %11087 = vst [vmem:[#allocation82_spill] sm:$0xff] %v8478_v30  ;;  %v409_v12 = vld [vmem:[%s10774_s2 + $0x60] sm:$0xff]  ;;  %v410_v2 = vld [vmem:[%s10774_s2 + $0x68] sm:$0xff]  ;;  %v558_v25 = vrot.slane %v8466_v26, 1  ;;  %v559_v36 = vrot.slane %v8475_v42, 1  ;;  %v557_v18 = vsel %vm497_vm0, %v554_v57, %v556_v5  ;;  %6624 = vmatprep.subr.bf16.mxu1 %v448_v60  ;;  %6541 = vmatpush3.bf16.msra.mxu0 %v418_v19 }
  0x48   : > { %11088 = vst [vmem:[#allocation83_spill] sm:$0xff] %v8482_v61  ;;  %11089 = vst [vmem:[#allocation84_spill] sm:$0xff] %v8487_v27  ;;  %v561_v16 = vrot.slane %v8478_v30, 1  ;;  %v8502_v46 = vld [vmem:[%s7958_s23 + $0x138] sm:$0xff]  ;;  %v8505_v58 = vld [vmem:[%s7958_s23 + $0x140] sm:$0xff]  ;;  %v735_v30 = vsel %vm497_vm0, %v733_v10, %v734_v33  ;;  %v737_v3 = vsel %vm497_vm0, %v734_v33, %v736_v62  ;;  %6625 = vmatpush3.bf16.msra.mxu1 %v448_v60 }
  0x49   : > { %11090 = vst [vmem:[#allocation85_spill] sm:$0xff] %v8502_v46  ;;  %11091 = vst [vmem:[#allocation86_spill] sm:$0xff] %v8505_v58  ;;  %v8513_v26 = vld [vmem:[%s7958_s23 + $0x148] sm:$0x3]  ;;  %v419_v50 = vpack.c.bf16 %v410_v2, %v409_v12  ;;  %v8519_v37 = vld [vmem:[%s7958_s23 + $0x150] sm:$0xff]  ;;  %v8521_v54 = vpack.c.bf16 %v552_v4, %v550_v43  ;;  %v563_v57 = vrot.slane %v8502_v46, 1  ;;  %v8527_v1 = vpack.c.bf16 %v7924_v29, %v7921_v28 }
  0x4a   : > { %11092 = vst [vmem:[#allocation87_spill] sm:$0xff] %v8513_v26  ;;  %v564_v5 = vrot.slane %v8505_v58, 1  ;;  %v8530_v42 = vld [vmem:[%s7958_s23 + $0x158] sm:$0xff]  ;;  %v411_v33 = vld [vmem:[%s10774_s2 + $0x70] sm:$0xff]  ;;  %6511 = vmatmul.mubr.bf16.gmra.mrb[12].mxu0 %v8416_v59  ;;  %v560_v62 = vsel %vm497_vm0, %v558_v25, %v559_v36  ;;  %v562_v19 = vsel %vm497_vm0, %v559_v36, %v561_v16  ;;  %v566_v10 = vrot.slane %v8513_v26, 1  ;;  %v5817_v4 = vld [vmem:[%s10776_s4 + $0x80] sm:$0xff]  ;;  %6607 = vmatmul.mubr.msk.bf16.gmra.mrb[20].mxu1 %vm1162_vm1, %v8418_v11 }
  0x4b   : > { %11093 = vst [vmem:[#allocation88_spill] sm:$0xff] %v8521_v54  ;;  %v412_v60 = vld [vmem:[%s10774_s2 + $0x78] sm:$0xff]  ;;  %6542 = vmatprep.subr.bf16.mxu0 %v419_v50  ;;  %v8544_v43 = vpack.c.bf16 %v7944_v41, %v7941_v40  ;;  %v5818_v12 = vld [vmem:[%s10776_s4 + $0x88] sm:$0xff]  ;;  %6514 = vmatprep.mubr.bf16.mxu0 %v8429_v13  ;;  %v8556_v25 = vpack.c.bf16 %v732_v55, %v730_v6  ;;  %v8565_v59 = vld [vmem:[%s7958_s23 + $0x160] sm:$0x3]  ;;  %v568_v2 = vrot.slane %v8519_v37, 1 }
  0x4c   : > { %v8558_v36 = vpack.c.bf16 %v557_v18, %v555_v53  ;;  %v8560_v16 = vpack.c.bf16 %v737_v3, %v735_v30  ;;  %6610 = vmatprep.mubr.msk.bf16.mxu1 %vm1162_vm1, %v8431_v17  ;;  %6543 = vmatpush3.bf16.msra.mxu0 %v419_v50  ;;  %11098 = vst [vmem:[#allocation93_spill] sm:$0xff] %v8565_v59  ;;  %v569_v26 = vrot.slane %v8530_v42, 1  ;;  %v5801_v30 = vld [vmem:[%s10774_s2 + $0x100] sm:$0xff]  ;;  %v5802_v3 = vld [vmem:[%s10774_s2 + $0x108] sm:$0xff]  ;;  %v8619_v13 = vld [vmem:[%s7958_s23 + $0x178] sm:$0x3] }
  0x4d   : > { %11094 = vst [vmem:[#allocation89_spill] sm:$0xff] %v8544_v43  ;;  %11095 = vst [vmem:[#allocation90_spill] sm:$0xff] %v8556_v25  ;;  %v420_v11 = vpack.c.bf16 %v412_v60, %v411_v33  ;;  %v8571_v6 = vpack.c.bf16 %v7976_v56, %v7968_v51  ;;  %v8579_v18 = vpack.c.bf16 %v562_v19, %v560_v62  ;;  %v8583_v53 = vld [vmem:[%s7958_s23 + $0x168] sm:$0xff]  ;;  %v571_v19 = vrot.slane %v8565_v59, 1 }
  0x4e   : > { %11096 = vst [vmem:[#allocation91_spill] sm:$0xff] %v8558_v36  ;;  %11097 = vst [vmem:[#allocation92_spill] sm:$0xff] %v8560_v16  ;;  %v565_v55 = vsel %vm497_vm0, %v563_v57, %v564_v5  ;;  %v8585_v50 = vpack.c.bf16 %v5818_v12, %v5817_v4  ;;  %v567_v60 = vsel %vm497_vm0, %v564_v5, %v566_v10  ;;  %v8604_v4 = vld [vmem:[%s7958_s23 + $0x170] sm:$0xff]  ;;  %v573_v59 = vrot.slane %v8583_v53, 1 }
  0x4f   : > { %11099 = vst [vmem:[#allocation94_spill] sm:$0xff] %v8571_v6  ;;  %11100 = vst [vmem:[#allocation95_spill] sm:$0xff] %v8579_v18  ;;  %6544 = vmatprep.subr.bf16.mxu0 %v420_v11  ;;  %v8592_v17 = vpack.c.bf16 %v8010_v8, %v8007_v7  ;;  %v8596_v62 = vpack.c.bf16 %v8023_v15, %v8020_v14  ;;  %v8600_v57 = vpack.c.bf16 %v8044_v32, %v8041_v31 }
  0x50   : > { %11101 = vst [vmem:[#allocation96_spill] sm:$0xff] %v8585_v50  ;;  %6706 = vmatprep.subr.bf16.mxu1 %v8585_v50  ;;  %v8607_v5 = vpack.c.bf16 %v5802_v3, %v5801_v30  ;;  %v8611_v10 = vpack.c.bf16 %v8055_v39, %v8052_v38  ;;  %v8615_v12 = vpack.c.bf16 %v8069_v49, %v8066_v48  ;;  %11108 = vst [vmem:[#allocation103_spill] sm:$0xff] %v8619_v13  ;;  %v11110_v30 = vld [vmem:[#allocation18_spill] sm:$0xff]  ;;  %v11118_v50 = vld [vmem:[#allocation28_spill] sm:$0xff] }
  0x51   : > { %11102 = vst [vmem:[#allocation97_spill] sm:$0xff] %v8592_v17  ;;  %11103 = vst [vmem:[#allocation98_spill] sm:$0xff] %v8596_v62  ;;  %v570_v33 = vsel %vm497_vm0, %v568_v2, %v569_v26  ;;  %6545 = vmatpush3.bf16.msra.mxu0 %v420_v11  ;;  %v8628_v3 = vpack.c.bf16 %v11110_v30, %v8117_v34  ;;  %v11113_v62 = vld [vmem:[#allocation22_spill] sm:$0xff]  ;;  %v11115_v2 = vld [vmem:[#allocation25_spill] sm:$0xff] }
  0x52   : > { %11104 = vst [vmem:[#allocation99_spill] sm:$0xff] %v8600_v57  ;;  %11105 = vst [vmem:[#allocation100_spill] sm:$0xff] %v8607_v5  ;;  %v8624_v57 = vpack.c.bf16 %v8111_v35, %v8102_v20  ;;  %6658 = vmatprep.subr.bf16.mxu0 %v8607_v5  ;;  %v11116_v17 = vld [vmem:[#allocation26_spill] sm:$0xff]  ;;  %v11121_v35 = vld [vmem:[#allocation33_spill] sm:$0xff]  ;;  %6515 = vmatmul.mubr.bf16.gmra.mrb[16].mxu0 %v8482_v61  ;;  %v572_v61 = vsel %vm497_vm0, %v569_v26, %v571_v19 }
  0x53   : > { %11106 = vst [vmem:[#allocation101_spill] sm:$0xff] %v8611_v10  ;;  %11107 = vst [vmem:[#allocation102_spill] sm:$0xff] %v8615_v12  ;;  %v11112_v10 = vld [vmem:[#allocation21_spill] sm:$0xff]  ;;  %v8637_v6 = vpack.c.bf16 %v11116_v17, %v11115_v2  ;;  %v11119_v11 = vld [vmem:[#allocation30_spill] sm:$0xff]  ;;  %6611 = vmatmul.mubr.msk.bf16.gmra.mrb[24].mxu1 %vm1162_vm1, %v8487_v27  ;;  %6518 = vmatprep.mubr.bf16.mxu0 %v8521_v54 }
  0x54   : > { %11109 = vst [vmem:[#allocation104_spill] sm:$0xff] %v8624_v57  ;;  %11111 = vst [vmem:[#allocation105_spill] sm:$0xff] %v8628_v3  ;;  %v8633_v12 = vpack.c.bf16 %v11113_v62, %v11112_v10  ;;  %v8641_v43 = vpack.c.bf16 %v11119_v11, %v11118_v50  ;;  %v11122_v57 = vld [vmem:[#allocation34_spill] sm:$0xff]  ;;  %v574_v3 = vrot.slane %v8604_v4, 1  ;;  %v11124_v5 = vld [vmem:[#allocation36_spill] sm:$0xff]  ;;  %6614 = vmatprep.mubr.msk.bf16.mxu1 %vm1162_vm1, %v8556_v25 }
  0x55   : > { %11117 = vst [vmem:[#allocation107_spill] sm:$0xff] %v8637_v6  ;;  %v8645_v20 = vpack.c.bf16 %v11122_v57, %v11121_v35  ;;  %v11125_v30 = vld [vmem:[#allocation37_spill] sm:$0xff]  ;;  %v11128_v10 = vld [vmem:[#allocation40_spill] sm:$0xff]  ;;  %v11139_v54 = vld [vmem:[#allocation58_spill] sm:$0xff] }
  0x56   : > { %11114 = vst [vmem:[#allocation106_spill] sm:$0xff] %v8633_v12  ;;  %11120 = vst [vmem:[#allocation28_spill] sm:$0xff] %v8641_v43  ;;  %v8651_v62 = vpack.c.bf16 %v11125_v30, %v11124_v5  ;;  %v11127_v12 = vld [vmem:[#allocation39_spill] sm:$0xff]  ;;  %v11130_v6 = vld [vmem:[#allocation44_spill] sm:$0xff] }
  0x57   : > { %11123 = vst [vmem:[#allocation33_spill] sm:$0xff] %v8645_v20  ;;  %v8655_v17 = vpack.c.bf16 %v11128_v10, %v11127_v12  ;;  %v11131_v2 = vld [vmem:[#allocation45_spill] sm:$0xff]  ;;  %v576_v20 = vrot.slane %v8619_v13, 1  ;;  %v11133_v43 = vld [vmem:[#allocation48_spill] sm:$0xff]  ;;  %v11140_v26 = vld [vmem:[#allocation59_spill] sm:$0xff] }
  0x58   : > { %11126 = vst [vmem:[#allocation34_spill] sm:$0xff] %v8651_v62  ;;  %v8659_v11 = vpack.c.bf16 %v11131_v2, %v11130_v6  ;;  %v11134_v30 = vld [vmem:[#allocation49_spill] sm:$0xff]  ;;  %v11137_v27 = vld [vmem:[#allocation56_spill] sm:$0xff]  ;;  %v8682_v19 = vpack.c.bf16 %v11140_v26, %v11139_v54  ;;  %v11143_v2 = vld [vmem:[#allocation62_spill] sm:$0xff]  ;;  %v8702_v26 = vpack.c.bf16 %v572_v61, %v570_v33 }
  0x59   : > { %11129 = vst [vmem:[#allocation36_spill] sm:$0xff] %v8655_v17  ;;  %v8668_v62 = vpack.c.bf16 %v11134_v30, %v11133_v43  ;;  %v8678_v17 = vpack.c.bf16 %v11137_v27, %v8323_v45  ;;  %v11142_v13 = vld [vmem:[#allocation61_spill] sm:$0xff]  ;;  %v11146_v25 = vld [vmem:[#allocation64_spill] sm:$0xff]  ;;  %v11162_v61 = vld [vmem:[#allocation2_spill] sm:$0xff] }
  0x5a   : > { %11132 = vst [vmem:[#allocation39_spill] sm:$0xff] %v8659_v11  ;;  %v8674_v11 = vpack.c.bf16 %v8317_v9, %v8308_v44  ;;  %11141 = vst [vmem:[#allocation58_spill] sm:$0xff] %v8682_v19  ;;  %v8686_v30 = vpack.c.bf16 %v11143_v2, %v11142_v13  ;;  %v8692_v43 = vpack.c.bf16 %v11146_v25, %v8385_v52  ;;  %v11148_v9 = vld [vmem:[#allocation66_spill] sm:$0xff]  ;;  %v11157_v2 = vld [vmem:[#allocation81_spill] sm:$0xff]  ;;  %v11163_v33 = vrot.slane %v11162_v61, 2 }
  0x5b   : > { %11135 = vst [vmem:[#allocation40_spill] sm:$0xff] %v8668_v62  ;;  %11138 = vst [vmem:[#allocation108_spill] sm:$0xff] %v8678_v17  ;;  %v8688_v62 = vpack.c.bf16 %v567_v60, %v565_v55  ;;  %v11151_v17 = vld [vmem:[#allocation74_spill] sm:$0xff]  ;;  %v575_v19 = vsel %vm497_vm0, %v573_v59, %v574_v3  ;;  %v11156_v60 = vld [vmem:[#allocation80_spill] sm:$0xff]  ;;  %v11168_v61 = vrot.slane %v7921_v28, 2  ;;  %6519 = vmatmul.mubr.bf16.gmra.mrb[20].mxu0 %v8558_v36  ;;  %6615 = vmatmul.mubr.msk.bf16.gmra.mrb[28].mxu1 %vm1162_vm1, %v8560_v16 }
  0x5c   : > { %11136 = vst [vmem:[#allocation44_spill] sm:$0xff] %v8674_v11  ;;  %11144 = vst [vmem:[#allocation61_spill] sm:$0xff] %v8686_v30  ;;  %v11149_v11 = vld [vmem:[#allocation68_spill] sm:$0xff]  ;;  %v8700_v27 = vpack.c.bf16 %v11151_v17, %v8421_v24  ;;  %v11154_v30 = vld [vmem:[#allocation78_spill] sm:$0xff]  ;;  %v8711_v25 = vpack.c.bf16 %v11157_v2, %v11156_v60  ;;  %6522 = vmatprep.mubr.bf16.mxu0 %v8579_v18 }
  0x5d   : > { %11145 = vst [vmem:[#allocation109_spill] sm:$0xff] %v8688_v62  ;;  %11147 = vst [vmem:[#allocation110_spill] sm:$0xff] %v8692_v43  ;;  %v8696_v44 = vpack.c.bf16 %v11149_v11, %v11148_v9  ;;  %v8707_v55 = vpack.c.bf16 %v11154_v30, %v8442_v47  ;;  %v577_v43 = vsel %vm497_vm0, %v574_v3, %v576_v20  ;;  %v11160_v11 = vrot.slane %v7909_v22, 2  ;;  %v5819_v20 = vld [vmem:[%s10776_s4 + $0x90] sm:$0xff] }
  0x5e   : > { %11152 = vst [vmem:[#allocation74_spill] sm:$0xff] %v8700_v27  ;;  %11153 = vst [vmem:[#allocation111_spill] sm:$0xff] %v8702_v26  ;;  %v1704_v3 = vrot.slane %v7941_v40, 2 }
  0x5f   : > { %11150 = vst [vmem:[#allocation66_spill] sm:$0xff] %v8696_v44  ;;  %11155 = vst [vmem:[#allocation112_spill] sm:$0xff] %v8707_v55  ;;  %v11159_v44 = vrot.slane %v7912_v23, 2  ;;  %v8730_v55 = vpack.c.bf16 %v8505_v58, %v8502_v46  ;;  %v8752_v46 = vpack.c.bf16 %v8530_v42, %v8519_v37 }
  0x60   : > { %11158 = vst [vmem:[#allocation80_spill] sm:$0xff] %v8711_v25 }
  0x61   : > { %v8719_v27 = vsel %vm1581_vm2, %v11160_v11, %v11159_v44  ;;  %v11164_v59 = vmov %v11159_v44  ;;  %11166 = vst [vmem:[#allocation114_spill] sm:$0xff] %v8730_v55  ;;  %v5820_v44 = vld [vmem:[%s10776_s4 + $0x98] sm:$0xff]  ;;  %v11167_v11 = vrot.slane %v7924_v29, 2  ;;  %v8764_v29 = vpack.c.bf16 %v8604_v4, %v8583_v53 }
  0x62   : > { %11161 = vst [vmem:[#allocation113_spill] sm:$0xff] %v8719_v27  ;;  %v8726_v30 = vsel %vm1581_vm2, %v11164_v59, %v11163_v33  ;;  %v11169_v59 = vld [vmem:[#allocation3_spill] sm:$0xff]  ;;  %v1705_v27 = vrot.slane %v7944_v41, 2  ;;  %v8771_v40 = vpack.c.bf16 %v5820_v44, %v5819_v20  ;;  %v1583_v20 = vrot.slane %v7992_v0, 2 }
  0x63   : > { %11165 = vst [vmem:[#allocation2_spill] sm:$0xff] %v8726_v30  ;;  %v1701_v33 = vsel %vm1581_vm2, %v11168_v61, %v11167_v11  ;;  %v11170_v25 = vrot.slane %v11169_v59, 2  ;;  %v11171_v55 = vmov %v11167_v11  ;;  %11172 = vst [vmem:[#allocation3_spill] sm:$0xff] %v8752_v46  ;;  %v11173_v30 = vld [vmem:[#allocation4_spill] sm:$0xff]  ;;  %v8760_v11 = vpack.c.bf16 %v577_v43, %v575_v19  ;;  %v11176_v43 = vld [vmem:[#allocation5_spill] sm:$0xff]  ;;  %6523 = vmatmul.mubr.bf16.gmra.mrb[24].mxu0 %v8688_v62 }
  0x64   : > { %v1707_v28 = vrot.slane %v11173_v30, 2  ;;  %11175 = vst [vmem:[#allocation115_spill] sm:$0xff] %v8764_v29  ;;  %v1706_v41 = vsel %vm1581_vm2, %v1704_v3, %v1705_v27  ;;  %v1712_v30 = vrot.slane %v11176_v43, 2  ;;  %v11177_v19 = vpack.c.bf16 %v7912_v23, %v7909_v22  ;;  %v5821_v22 = vld [vmem:[%s10776_s4 + $0xa0] sm:$0xff]  ;;  %v5822_v23 = vld [vmem:[%s10776_s4 + $0xa8] sm:$0xff]  ;;  %6526 = vmatprep.mubr.bf16.mxu0 %v8702_v26 }
  0x65   : > { %v1703_v58 = vsel %vm1581_vm2, %v11171_v55, %v11170_v25  ;;  %11174 = vst [vmem:[#allocation4_spill] sm:$0xff] %v8760_v11  ;;  %v1709_v25 = vrot.slane %v7968_v51, 2  ;;  %v1710_v55 = vrot.slane %v7976_v56, 2  ;;  %v1582_v61 = vrot.slane %v7989_v63, 2 }
  0x66   : > { %v8754_v2 = vpack.c.bf16 %v1703_v58, %v1701_v33  ;;  %v1708_v58 = vsel %vm1581_vm2, %v1705_v27, %v1707_v28  ;;  %6626 = vmatprep.mubr.msk.bf16.mxu1 %vm1162_vm1, %v11177_v19  ;;  %v1714_v3 = vrot.slane %v8007_v7, 2  ;;  %v1715_v27 = vrot.slane %v8010_v8, 2  ;;  %v11179_v33 = vld [vmem:[#allocation8_spill] sm:$0xff] }
  0x67   : > { %v8780_v51 = vpack.c.bf16 %v1708_v58, %v1706_v41  ;;  %v1711_v56 = vsel %vm1581_vm2, %v1709_v25, %v1710_v55  ;;  %v1713_v44 = vsel %vm1581_vm2, %v1710_v55, %v1712_v30  ;;  %v1717_v59 = vrot.slane %v11179_v33, 2  ;;  %v11180_v55 = vld [vmem:[#allocation6_spill] sm:$0xff]  ;;  %6627 = vmatmul.mubr.msk.bf16.vlgmr.msra.gmra.mrb[0].mxu1 %vm1162_vm1, %v8527_v1 }
  0x68   : > { %v8795_v28 = vpack.c.bf16 %v1713_v44, %v1711_v56  ;;  %v8798_v25 = vsel %vm1581_vm2, %v1582_v61, %v1583_v20  ;;  %v11181_v41 = vrot.slane %v11180_v55, 2  ;;  %v11182_v8 = vrot.slane %v8023_v15, 2 }
  0x69   : > { %11178 = vst [vmem:[#allocation5_spill] sm:$0xff] %v8780_v51  ;;  %v11183_v58 = vrot.slane %v8020_v14, 2  ;;  %v1716_v19 = vsel %vm1581_vm2, %v1714_v3, %v1715_v27  ;;  %v1718_v56 = vsel %vm1581_vm2, %v1715_v27, %v1717_v59  ;;  %v11184_v61 = vrot.slane %v8034_v21, 2  ;;  %v11187_v21 = vld [vmem:[#allocation11_spill] sm:$0xff] }
  0x6a   : > { %v8803_v7 = vsel %vm1581_vm2, %v1583_v20, %v11181_v41  ;;  %v11185_v44 = vmov %v11182_v8  ;;  %v8819_v33 = vpack.c.bf16 %v1718_v56, %v1716_v19  ;;  %v1719_v14 = vrot.slane %v8041_v31, 2  ;;  %v5803_v31 = vld [vmem:[%s10774_s2 + $0x110] sm:$0xff] }
  0x6b   : > { %v1589_v43 = vsel %vm1581_vm2, %v11183_v58, %v11182_v8  ;;  %v1591_v20 = vsel %vm1581_vm2, %v11185_v44, %v11184_v61  ;;  %v1720_v41 = vrot.slane %v8044_v32, 2  ;;  %v2067_v8 = vpack.c.bf16 %v5822_v23, %v5821_v22  ;;  %v11186_v58 = vld [vmem:[#allocation10_spill] sm:$0xff]  ;;  %v11189_v23 = vld [vmem:[#allocation13_spill] sm:$0xff]  ;;  %v5823_v44 = vld [vmem:[%s10776_s4 + $0xb0] sm:$0xff]  ;;  %6527 = vmatmul.mubr.bf16.gmra.mrb[28].mxu0 %v8760_v11 }
  0x6c   : > { %v8821_v55 = vpack.c.bf16 %v1591_v20, %v1589_v43  ;;  %v1722_v30 = vrot.slane %v11186_v58, 2  ;;  %v1592_v3 = vrot.slane %v8052_v38, 2  ;;  %v1593_v27 = vrot.slane %v8055_v39, 2  ;;  %v11188_v39 = vld [vmem:[#allocation12_spill] sm:$0xff]  ;;  %v5804_v61 = vld [vmem:[%s10774_s2 + $0x118] sm:$0xff]  ;;  %v11192_v58 = vld [vmem:[#allocation15_spill] sm:$0xff] }
  0x6d   : > { %v1721_v15 = vsel %vm1581_vm2, %v1719_v14, %v1720_v41  ;;  %v1595_v59 = vrot.slane %v11187_v21, 2  ;;  %v1724_v43 = vrot.slane %v8066_v48, 2  ;;  %v1725_v19 = vrot.slane %v8069_v49, 2  ;;  %v11190_v48 = vld [vmem:[#allocation89_spill] sm:$0xff]  ;;  %v11191_v49 = vld [vmem:[#allocation96_spill] sm:$0xff] }
  0x6e   : > { %v1723_v32 = vsel %vm1581_vm2, %v1720_v41, %v1722_v30  ;;  %v1594_v38 = vsel %vm1581_vm2, %v1592_v3, %v1593_v27  ;;  %v1727_v22 = vrot.slane %v11188_v39, 2  ;;  %v1597_v56 = vrot.slane %v11189_v23, 2  ;;  %6630 = vmatprep.mubr.msk.bf16.mxu1 %vm1162_vm1, %v11190_v48  ;;  %6707 = vmatpush3.bf16.msra.mxu1 %v11191_v49  ;;  %v5824_v30 = vld [vmem:[%s10776_s4 + $0xb8] sm:$0xff]  ;;  %v11193_v23 = vld [vmem:[#allocation16_spill] sm:$0xff] }
  0x6f   : > { %v8855_v20 = vpack.c.bf16 %v1723_v32, %v1721_v15  ;;  %v1596_v14 = vsel %vm1581_vm2, %v1593_v27, %v1595_v59  ;;  %v1726_v41 = vsel %vm1581_vm2, %v1724_v43, %v1725_v19  ;;  %v1598_v3 = vrot.slane %v11192_v58, 2  ;;  %6708 = vmatprep.subr.bf16.mxu1 %v8771_v40  ;;  %v11194_v32 = vld [vmem:[#allocation18_spill] sm:$0xff]  ;;  %v11195_v59 = vld [vmem:[#allocation20_spill] sm:$0xff]  ;;  %v11221_v11 = vld [vmem:[#allocation53_spill] sm:$0xff] }
  0x70   : > { %v8861_v21 = vpack.c.bf16 %v1596_v14, %v1594_v38  ;;  %v1728_v39 = vsel %vm1581_vm2, %v1725_v19, %v1727_v22  ;;  %v1600_v49 = vrot.slane %v11193_v23, 2  ;;  %v1729_v26 = vrot.slane %v8117_v34, 2  ;;  %v11196_v14 = vld [vmem:[#allocation21_spill] sm:$0xff] }
  0x71   : > { %v8866_v62 = vpack.c.bf16 %v1728_v39, %v1726_v41  ;;  %v1599_v15 = vsel %vm1581_vm2, %v1597_v56, %v1598_v3  ;;  %v1730_v27 = vrot.slane %v11194_v32, 2  ;;  %v1732_v43 = vrot.slane %v11195_v59, 2  ;;  %v11197_v56 = vld [vmem:[#allocation22_spill] sm:$0xff] }
  0x72   : > { %v8871_v18 = vpack.c.bf16 %v5804_v61, %v5803_v31  ;;  %v2068_v58 = vpack.c.bf16 %v5824_v30, %v5823_v44  ;;  %v1601_v38 = vsel %vm1581_vm2, %v1598_v3, %v1600_v49  ;;  %v1602_v16 = vrot.slane %v11196_v14, 2  ;;  %6709 = vmatpush3.bf16.msra.mxu1 %v8771_v40  ;;  %v11198_v31 = vld [vmem:[#allocation24_spill] sm:$0xff]  ;;  %v11199_v44 = vld [vmem:[#allocation25_spill] sm:$0xff]  ;;  %v11200_v3 = vld [vmem:[#allocation26_spill] sm:$0xff] }
  0x73   : > { %v8876_v19 = vpack.c.bf16 %v1601_v38, %v1599_v15  ;;  %v1731_v34 = vsel %vm1581_vm2, %v1729_v26, %v1730_v27  ;;  %v1733_v22 = vsel %vm1581_vm2, %v1730_v27, %v1732_v43  ;;  %v1603_v41 = vrot.slane %v11197_v56, 2  ;;  %6710 = vmatprep.subr.bf16.mxu1 %v2067_v8  ;;  %v5857_v40 = vld [vmem:[%s10776_s4 + $0xc0] sm:$0xff]  ;;  %v5858_v26 = vld [vmem:[%s10776_s4 + $0xc8] sm:$0xff] }
  0x74   : > { %v8881_v39 = vpack.c.bf16 %v1733_v22, %v1731_v34  ;;  %v1605_v61 = vrot.slane %v11198_v31, 2  ;;  %v1734_v30 = vrot.slane %v11199_v44, 2  ;;  %v1735_v23 = vrot.slane %v11200_v3, 2  ;;  %v11201_v15 = vld [vmem:[#allocation27_spill] sm:$0xff]  ;;  %v11202_v59 = vld [vmem:[#allocation30_spill] sm:$0xff]  ;;  %v11206_v44 = vld [vmem:[#allocation97_spill] sm:$0xff] }
  0x75   : > { %v1604_v49 = vsel %vm1581_vm2, %v1602_v16, %v1603_v41  ;;  %v1737_v32 = vrot.slane %v11201_v15, 2  ;;  %v1607_v27 = vrot.slane %v11118_v50, 2  ;;  %v1608_v43 = vrot.slane %v11202_v59, 2  ;;  %v11203_v38 = vld [vmem:[#allocation94_spill] sm:$0xff]  ;;  %v11205_v56 = vld [vmem:[#allocation31_spill] sm:$0xff] }
  0x76   : > { %6631 = vmatmul.mubr.msk.bf16.gmra.mrb[4].mxu1 %vm1162_vm1, %v11203_v38  ;;  %v11204_v14 = vpack.c.bf16 %v7992_v0, %v7989_v63  ;;  %v1606_v34 = vsel %vm1581_vm2, %v1603_v41, %v1605_v61  ;;  %v1736_v22 = vsel %vm1581_vm2, %v1734_v30, %v1735_v23  ;;  %v1610_v31 = vrot.slane %v11205_v56, 2 }
  0x77   : > { %v1739_v16 = vrot.slane %v11121_v35, 2  ;;  %6634 = vmatprep.mubr.msk.bf16.mxu1 %vm1162_vm1, %v11206_v44  ;;  %6711 = vmatpush3.bf16.msra.mxu1 %v2067_v8  ;;  %v8908_v50 = vpack.c.bf16 %v1606_v34, %v1604_v49  ;;  %v1738_v3 = vsel %vm1581_vm2, %v1735_v23, %v1737_v32  ;;  %v1609_v15 = vsel %vm1581_vm2, %v1607_v27, %v1608_v43  ;;  %v11207_v35 = vld [vmem:[#allocation35_spill] sm:$0xff]  ;;  %v11208_v23 = vld [vmem:[#allocation37_spill] sm:$0xff] }
  0x78   : > { %6546 = vmatprep.mubr.bf16.mxu0 %v11204_v14  ;;  %v1740_v63 = vrot.slane %v11122_v57, 2  ;;  %6712 = vmatprep.subr.bf16.mxu1 %v2068_v58  ;;  %v8913_v0 = vpack.c.bf16 %v5858_v26, %v5857_v40  ;;  %v8915_v41 = vpack.c.bf16 %v1738_v3, %v1736_v22  ;;  %v1611_v61 = vsel %vm1581_vm2, %v1608_v43, %v1610_v31  ;;  %v11209_v57 = vld [vmem:[#allocation38_spill] sm:$0xff]  ;;  %v11210_v22 = vld [vmem:[#allocation41_spill] sm:$0xff] }
  0x79   : > { %v1742_v30 = vrot.slane %v11207_v35, 2  ;;  %v8919_v59 = vpack.c.bf16 %v1611_v61, %v1609_v15  ;;  %v1612_v49 = vrot.slane %v11124_v5, 2  ;;  %v1613_v32 = vrot.slane %v11208_v23, 2  ;;  %v5805_v5 = vld [vmem:[%s10774_s2 + $0x120] sm:$0xff]  ;;  %v5808_v35 = vld [vmem:[%s10774_s2 + $0x138] sm:$0xff] }
  0x7a   : > { %v1741_v8 = vsel %vm1581_vm2, %v1739_v16, %v1740_v63  ;;  %v1615_v14 = vrot.slane %v11209_v57, 2  ;;  %v1744_v40 = vrot.slane %v11127_v12, 2  ;;  %v1745_v26 = vrot.slane %v11128_v10, 2  ;;  %v5806_v16 = vld [vmem:[%s10774_s2 + $0x128] sm:$0xff]  ;;  %v11212_v15 = vld [vmem:[#allocation46_spill] sm:$0xff] }
  0x7b   : > { %v1743_v27 = vsel %vm1581_vm2, %v1740_v63, %v1742_v30  ;;  %6713 = vmatpush3.bf16.msra.mxu1 %v2068_v58  ;;  %v1614_v34 = vsel %vm1581_vm2, %v1612_v49, %v1613_v32  ;;  %v1747_v56 = vrot.slane %v11210_v22, 2  ;;  %v1617_v31 = vrot.slane %v11130_v6, 2  ;;  %v11211_v58 = vld [vmem:[#allocation45_spill] sm:$0xff]  ;;  %v11213_v61 = vld [vmem:[#allocation98_spill] sm:$0xff]  ;;  %v5807_v6 = vld [vmem:[%s10774_s2 + $0x130] sm:$0xff] }
  0x7c   : > { %v8928_v43 = vpack.c.bf16 %v1743_v27, %v1741_v8  ;;  %6794 = vmatprep.subr.bf16.mxu1 %v8913_v0  ;;  %v1616_v10 = vsel %vm1581_vm2, %v1613_v32, %v1615_v14  ;;  %v1746_v12 = vsel %vm1581_vm2, %v1744_v40, %v1745_v26  ;;  %v1618_v3 = vrot.slane %v11211_v58, 2  ;;  %6547 = vmatmul.mubr.bf16.vlgmr.msra.gmra.mrb[0].mxu0 %v11213_v61  ;;  %v11214_v49 = vld [vmem:[#allocation48_spill] sm:$0xff]  ;;  %v11215_v32 = vld [vmem:[#allocation49_spill] sm:$0xff]  ;;  %v11216_v57 = vld [vmem:[#allocation99_spill] sm:$0xff] }
  0x7d   : > { %v1620_v63 = vrot.slane %v11212_v15, 2  ;;  %v8951_v30 = vpack.c.bf16 %v1616_v10, %v1614_v34  ;;  %v1748_v8 = vsel %vm1581_vm2, %v1745_v26, %v1747_v56  ;;  %v1749_v23 = vrot.slane %v11214_v49, 2  ;;  %v11217_v14 = vld [vmem:[#allocation100_spill] sm:$0xff]  ;;  %v11218_v15 = vld [vmem:[#allocation50_spill] sm:$0xff]  ;;  %v11219_v10 = vld [vmem:[#allocation101_spill] sm:$0xff] }
  0x7e   : > { %v1750_v27 = vrot.slane %v11215_v32, 2  ;;  %6635 = vmatmul.mubr.msk.bf16.gmra.mrb[8].mxu1 %vm1162_vm1, %v11216_v57  ;;  %6659 = vmatpush3.bf16.msra.mxu0 %v11217_v14  ;;  %v8959_v40 = vpack.c.bf16 %v1748_v8, %v1746_v12  ;;  %v1619_v22 = vsel %vm1581_vm2, %v1617_v31, %v1618_v3  ;;  %v1752_v34 = vrot.slane %v11218_v15, 2  ;;  %v11220_v26 = vld [vmem:[#allocation102_spill] sm:$0xff]  ;;  %v11223_v8 = vld [vmem:[#allocation55_spill] sm:$0xff] }
  0x7f   : > { %v1621_v58 = vsel %vm1581_vm2, %v1618_v3, %v1620_v63  ;;  %6550 = vmatprep.mubr.bf16.mxu0 %v11219_v10  ;;  %6638 = vmatprep.mubr.msk.bf16.mxu1 %vm1162_vm1, %v11220_v26  ;;  %v1841_v56 = vpack.c.bf16 %v5806_v16, %v5805_v5  ;;  %v1622_v14 = vrot.slane %v11221_v11, 2  ;;  %v1842_v12 = vpack.c.bf16 %v5808_v35, %v5807_v6  ;;  %v11222_v3 = vld [vmem:[#allocation54_spill] sm:$0xff]  ;;  %v11224_v5 = vld [vmem:[#allocation56_spill] sm:$0xff]  ;;  %v5810_v6 = vld [vmem:[%s10774_s2 + $0x148] sm:$0xff] }
  0x80   : > { %v8967_v49 = vpack.c.bf16 %v1621_v58, %v1619_v22  ;;  %v1751_v32 = vsel %vm1581_vm2, %v1749_v23, %v1750_v27  ;;  %6660 = vmatprep.subr.bf16.mxu0 %v8871_v18  ;;  %v1753_v31 = vsel %vm1581_vm2, %v1750_v27, %v1752_v34  ;;  %v1623_v63 = vrot.slane %v11222_v3, 2  ;;  %v11225_v22 = vld [vmem:[#allocation57_spill] sm:$0xff]  ;;  %v5809_v11 = vld [vmem:[%s10774_s2 + $0x140] sm:$0xff]  ;;  %v11226_v27 = vld [vmem:[#allocation59_spill] sm:$0xff] }
  0x81   : > { %v1625_v15 = vrot.slane %v11223_v8, 2  ;;  %v8975_v36 = vpack.c.bf16 %v1753_v31, %v1751_v32  ;;  %v1754_v26 = vrot.slane %v8323_v45, 2  ;;  %v1755_v16 = vrot.slane %v11224_v5, 2  ;;  %v11227_v3 = vld [vmem:[#allocation60_spill] sm:$0xff] }
  0x82   : > { %v1757_v58 = vrot.slane %v11225_v22, 2  ;;  %6661 = vmatpush3.bf16.msra.mxu0 %v8871_v18  ;;  %v1624_v35 = vsel %vm1581_vm2, %v1622_v14, %v1623_v63  ;;  %v1627_v45 = vrot.slane %v11139_v54, 2  ;;  %v1628_v34 = vrot.slane %v11226_v27, 2  ;;  %v11229_v54 = vld [vmem:[#allocation104_spill] sm:$0xff] }
  0x83   : > { %v1626_v23 = vsel %vm1581_vm2, %v1623_v63, %v1625_v15  ;;  %6662 = vmatprep.subr.bf16.mxu0 %v1841_v56  ;;  %v1756_v18 = vsel %vm1581_vm2, %v1754_v26, %v1755_v16  ;;  %v1630_v8 = vrot.slane %v11227_v3, 2  ;;  %v1759_v14 = vrot.slane %v11142_v13, 2  ;;  %v11228_v63 = vld [vmem:[#allocation62_spill] sm:$0xff]  ;;  %v11234_v3 = vld [vmem:[#allocation65_spill] sm:$0xff] }
  0x84   : > { %v8991_v32 = vpack.c.bf16 %v1626_v23, %v1624_v35  ;;  %v1758_v31 = vsel %vm1581_vm2, %v1755_v16, %v1757_v58  ;;  %v1629_v22 = vsel %vm1581_vm2, %v1627_v45, %v1628_v34  ;;  %v1760_v15 = vrot.slane %v11228_v63, 2  ;;  %6551 = vmatmul.mubr.bf16.gmra.mrb[4].mxu0 %v11229_v54  ;;  %v11230_v23 = vld [vmem:[#allocation63_spill] sm:$0xff]  ;;  %v11231_v16 = vld [vmem:[#allocation105_spill] sm:$0xff]  ;;  %v11232_v58 = vld [vmem:[#allocation106_spill] sm:$0xff] }
  0x85   : > { %v8996_v5 = vpack.c.bf16 %v1758_v31, %v1756_v18  ;;  %v1843_v27 = vpack.c.bf16 %v5810_v6, %v5809_v11  ;;  %v1631_v35 = vsel %vm1581_vm2, %v1628_v34, %v1630_v8  ;;  %v1762_v10 = vrot.slane %v11230_v23, 2  ;;  %6554 = vmatprep.mubr.bf16.mxu0 %v11232_v58  ;;  %v11233_v45 = vld [vmem:[#allocation64_spill] sm:$0xff]  ;;  %v11235_v11 = vld [vmem:[#allocation107_spill] sm:$0xff]  ;;  %v11237_v23 = vld [vmem:[#allocation69_spill] sm:$0xff] }
  0x86   : > { %v1632_v26 = vrot.slane %v8385_v52, 2  ;;  %6639 = vmatmul.mubr.msk.bf16.gmra.mrb[12].mxu1 %vm1162_vm1, %v11231_v16  ;;  %v9008_v18 = vpack.c.bf16 %v1631_v35, %v1629_v22  ;;  %v1761_v13 = vsel %vm1581_vm2, %v1759_v14, %v1760_v15  ;;  %v1633_v31 = vrot.slane %v11233_v45, 2  ;;  %6663 = vmatpush3.bf16.msra.mxu0 %v1841_v56  ;;  %v11236_v34 = vld [vmem:[#allocation68_spill] sm:$0xff]  ;;  %v5812_v14 = vld [vmem:[%s10774_s2 + $0x158] sm:$0xff] }
  0x87   : > { %v1635_v63 = vrot.slane %v11234_v3, 2  ;;  %6642 = vmatprep.mubr.msk.bf16.mxu1 %vm1162_vm1, %v11235_v11  ;;  %v1763_v6 = vsel %vm1581_vm2, %v1760_v15, %v1762_v10  ;;  %v1764_v52 = vrot.slane %v11148_v9, 2  ;;  %v1765_v8 = vrot.slane %v11236_v34, 2  ;;  %6664 = vmatprep.subr.bf16.mxu0 %v1842_v12  ;;  %v5811_v22 = vld [vmem:[%s10774_s2 + $0x150] sm:$0xff]  ;;  %v11238_v11 = vld [vmem:[#allocation75_spill] sm:$0xff] }
  0x88   : > { %v1767_v58 = vrot.slane %v11237_v23, 2  ;;  %v9025_v35 = vpack.c.bf16 %v1763_v6, %v1761_v13  ;;  %v1634_v56 = vsel %vm1581_vm2, %v1632_v26, %v1633_v31  ;;  %v1637_v9 = vrot.slane %v8421_v24, 2  ;;  %v11239_v6 = vld [vmem:[#allocation78_spill] sm:$0xff] }
  0x89   : > { %v1636_v10 = vsel %vm1581_vm2, %v1633_v31, %v1635_v63  ;;  %v1766_v45 = vsel %vm1581_vm2, %v1764_v52, %v1765_v8  ;;  %v1638_v34 = vrot.slane %v11151_v17, 2  ;;  %v1640_v16 = vrot.slane %v11238_v11, 2  ;;  %v11240_v63 = vld [vmem:[#allocation79_spill] sm:$0xff]  ;;  %v11241_v52 = vld [vmem:[#allocation81_spill] sm:$0xff] }
  0x8a   : > { %v9030_v15 = vpack.c.bf16 %v1636_v10, %v1634_v56  ;;  %v1768_v3 = vsel %vm1581_vm2, %v1765_v8, %v1767_v58  ;;  %v1769_v13 = vrot.slane %v8442_v47, 2  ;;  %v1770_v26 = vrot.slane %v11239_v6, 2  ;;  %6665 = vmatpush3.bf16.msra.mxu0 %v1842_v12  ;;  %v5813_v58 = vld [vmem:[%s10774_s2 + $0x160] sm:$0xff]  ;;  %v5814_v17 = vld [vmem:[%s10774_s2 + $0x168] sm:$0xff] }
  0x8b   : > { %v9035_v23 = vpack.c.bf16 %v1768_v3, %v1766_v45  ;;  %v1844_v31 = vpack.c.bf16 %v5812_v14, %v5811_v22  ;;  %v1639_v24 = vsel %vm1581_vm2, %v1637_v9, %v1638_v34  ;;  %v1772_v56 = vrot.slane %v11240_v63, 2  ;;  %6666 = vmatprep.subr.bf16.mxu0 %v1843_v27  ;;  %v11242_v22 = vld [vmem:[#allocation28_spill] sm:$0xff]  ;;  %v11243_v9 = vld [vmem:[#allocation82_spill] sm:$0xff]  ;;  %v11244_v3 = vld [vmem:[#allocation85_spill] sm:$0xff] }
  0x8c   : > { %v1641_v11 = vsel %vm1581_vm2, %v1638_v34, %v1640_v16  ;;  %v1771_v47 = vsel %vm1581_vm2, %v1769_v13, %v1770_v26  ;;  %v1642_v12 = vrot.slane %v11156_v60, 2  ;;  %v1643_v8 = vrot.slane %v11241_v52, 2  ;;  %6555 = vmatmul.mubr.bf16.gmra.mrb[8].mxu0 %v11242_v22  ;;  %v11245_v63 = vld [vmem:[#allocation33_spill] sm:$0xff]  ;;  %v11246_v16 = vld [vmem:[#allocation34_spill] sm:$0xff]  ;;  %v11248_v22 = vld [vmem:[#allocation87_spill] sm:$0xff] }
  0x8d   : > { %v9053_v14 = vpack.c.bf16 %v1641_v11, %v1639_v24  ;;  %v1773_v10 = vsel %vm1581_vm2, %v1770_v26, %v1772_v56  ;;  %v1645_v45 = vrot.slane %v11243_v9, 2  ;;  %v1647_v6 = vrot.slane %v11244_v3, 2  ;;  %6558 = vmatprep.mubr.bf16.mxu0 %v11246_v16  ;;  %v11247_v13 = vld [vmem:[#allocation86_spill] sm:$0xff]  ;;  %v11249_v11 = vld [vmem:[#allocation36_spill] sm:$0xff] }
  0x8e   : > { %6643 = vmatmul.mubr.msk.bf16.gmra.mrb[16].mxu1 %vm1162_vm1, %v11245_v63  ;;  %v9061_v34 = vpack.c.bf16 %v1773_v10, %v1771_v47  ;;  %v1644_v60 = vsel %vm1581_vm2, %v1642_v12, %v1643_v8  ;;  %v1648_v52 = vrot.slane %v11247_v13, 2  ;;  %v1650_v24 = vrot.slane %v11248_v22, 2  ;;  %6667 = vmatpush3.bf16.msra.mxu0 %v1843_v27  ;;  %v11250_v13 = vld [vmem:[#allocation93_spill] sm:$0xff]  ;;  %v5815_v27 = vld [vmem:[%s10774_s2 + $0x170] sm:$0xff] }
  0x8f   : > { %6646 = vmatprep.mubr.msk.bf16.mxu1 %vm1162_vm1, %v11249_v11  ;;  %v1845_v26 = vpack.c.bf16 %v5814_v17, %v5813_v58  ;;  %v1646_v56 = vsel %vm1581_vm2, %v1643_v8, %v1645_v45  ;;  %v1652_v9 = vrot.slane %v8519_v37, 2  ;;  %v1653_v3 = vrot.slane %v8530_v42, 2  ;;  %6668 = vmatprep.subr.bf16.mxu0 %v1844_v31  ;;  %v5816_v58 = vld [vmem:[%s10774_s2 + $0x178] sm:$0xff] }
  0x90   : > { %v9071_v47 = vpack.c.bf16 %v1646_v56, %v1644_v60  ;;  %v1649_v12 = vsel %vm1581_vm2, %v1647_v6, %v1648_v52  ;;  %v1651_v10 = vsel %vm1581_vm2, %v1648_v52, %v1650_v24  ;;  %v1655_v22 = vrot.slane %v11250_v13, 2  ;;  %v11251_v6 = vld [vmem:[#allocation103_spill] sm:$0xff]  ;;  %v11255_v13 = vld [vmem:[#allocation108_spill] sm:$0xff] }
  0x91   : > { %v9082_v37 = vpack.c.bf16 %v1651_v10, %v1649_v12  ;;  %v1654_v42 = vsel %vm1581_vm2, %v1652_v9, %v1653_v3  ;;  %v1657_v17 = vrot.slane %v8583_v53, 2  ;;  %v1658_v8 = vrot.slane %v8604_v4, 2  ;;  %v11252_v10 = vld [vmem:[#allocation39_spill] sm:$0xff]  ;;  %v5841_v53 = vld [vmem:[%s10774_s2 + $0x180] sm:$0xff] }
  0x92   : > { %v1656_v45 = vsel %vm1581_vm2, %v1653_v3, %v1655_v22  ;;  %v1660_v60 = vrot.slane %v11251_v6, 2  ;;  %6669 = vmatpush3.bf16.msra.mxu0 %v1844_v31  ;;  %v1846_v56 = vpack.c.bf16 %v5816_v58, %v5815_v27  ;;  %v5842_v4 = vld [vmem:[%s10774_s2 + $0x188] sm:$0xff]  ;;  %v11253_v31 = vld [vmem:[#allocation40_spill] sm:$0xff]  ;;  %v11256_v27 = vld [vmem:[#allocation58_spill] sm:$0xff] }
  0x93   : > { %v9089_v52 = vpack.c.bf16 %v1656_v45, %v1654_v42  ;;  %v1659_v24 = vsel %vm1581_vm2, %v1657_v17, %v1658_v8  ;;  %6670 = vmatprep.subr.bf16.mxu0 %v1845_v26  ;;  %v11254_v3 = vld [vmem:[#allocation44_spill] sm:$0xff]  ;;  %v2328_v22 = vpack.c.bf16 %v5842_v4, %v5841_v53  ;;  %v11257_v58 = vld [vmem:[#allocation61_spill] sm:$0xff]  ;;  %v11258_v42 = vld [vmem:[#allocation110_spill] sm:$0xff] }
  0x94   : > { %v1661_v12 = vsel %vm1581_vm2, %v1658_v8, %v1660_v60  ;;  %6559 = vmatmul.mubr.bf16.gmra.mrb[12].mxu0 %v11252_v10  ;;  %v11259_v17 = vld [vmem:[#allocation66_spill] sm:$0xff]  ;;  %v11261_v45 = vld [vmem:[#allocation112_spill] sm:$0xff]  ;;  %v11264_v60 = vld [vmem:[#allocation113_spill] sm:$0xff] }
  0x95   : > { %v9100_v9 = vpack.c.bf16 %v1661_v12, %v1659_v24  ;;  %6562 = vmatprep.mubr.bf16.mxu0 %v11254_v3  ;;  %v11260_v8 = vld [vmem:[#allocation74_spill] sm:$0xff]  ;;  %v5860_v12 = vld [vmem:[%s10776_s4 + $0xd8] sm:$0xff] }
  0x96   : > { %6647 = vmatmul.mubr.msk.bf16.gmra.mrb[20].mxu1 %vm1162_vm1, %v11253_v31  ;;  %6671 = vmatpush3.bf16.msra.mxu0 %v1845_v26  ;;  %v11262_v26 = vld [vmem:[#allocation80_spill] sm:$0xff]  ;;  %v11263_v6 = vld [vmem:[#allocation2_spill] sm:$0xff] }
  0x97   : > { %6650 = vmatprep.mubr.msk.bf16.mxu1 %vm1162_vm1, %v11255_v13  ;;  %6672 = vmatprep.subr.bf16.mxu0 %v1846_v56  ;;  %v11265_v24 = vpack.c.bf16 %v11263_v6, %v11264_v60  ;;  %v11266_v4 = vld [vmem:[#allocation114_spill] sm:$0xff]  ;;  %v5862_v6 = vld [vmem:[%s10776_s4 + $0xe8] sm:$0xff] }
  0x9a   : > { %6673 = vmatpush3.bf16.msra.mxu0 %v1846_v56  ;;  %v5859_v56 = vld [vmem:[%s10776_s4 + $0xd0] sm:$0xff] }
  0x9b   : > { %6746 = vmatprep.subr.bf16.mxu0 %v2328_v22  ;;  %v2540_v53 = vpack.c.bf16 %v5860_v12, %v5859_v56  ;;  %v5864_v56 = vld [vmem:[%s10776_s4 + $0xf8] sm:$0xff] }
  0x9c   : > { %6563 = vmatmul.mubr.bf16.gmra.mrb[16].mxu0 %v11256_v27 }
  0x9d   : > { %6566 = vmatprep.mubr.bf16.mxu0 %v11258_v42 }
  0x9e   : > { %6651 = vmatmul.mubr.msk.bf16.gmra.mrb[24].mxu1 %vm1162_vm1, %v11257_v58 }
  0x9f   : > { %6654 = vmatprep.mubr.msk.bf16.mxu1 %vm1162_vm1, %v11259_v17 }
  0xa4   : > { %6567 = vmatmul.mubr.bf16.gmra.mrb[20].mxu0 %v11260_v8 }
  0xa5   : > { %6570 = vmatprep.mubr.bf16.mxu0 %v11262_v26  ;;  %v5861_v26 = vld [vmem:[%s10776_s4 + $0xe0] sm:$0xff] }
  0xa6   : > { %6655 = vmatmul.mubr.msk.bf16.gmra.mrb[28].mxu1 %vm1162_vm1, %v11261_v45  ;;  %v2541_v60 = vpack.c.bf16 %v5862_v6, %v5861_v26  ;;  %v11267_v26 = vpack.c.bf16 %v8803_v7, %v8798_v25  ;;  %v5843_v6 = vld [vmem:[%s10774_s2 + $0x190] sm:$0xff]  ;;  %v5845_v25 = vld [vmem:[%s10774_s2 + $0x1a0] sm:$0xff]  ;;  %v5846_v7 = vld [vmem:[%s10774_s2 + $0x1a8] sm:$0xff] }
  0xa7   : > { %6714 = vmatprep.mubr.msk.bf16.mxu1 %vm1162_vm1, %v11265_v24  ;;  %v5863_v24 = vld [vmem:[%s10776_s4 + $0xf0] sm:$0xff] }
  0xa8   : > { %v2542_v12 = vpack.c.bf16 %v5864_v56, %v5863_v24  ;;  %v5844_v24 = vld [vmem:[%s10774_s2 + $0x198] sm:$0xff] }
  0xa9   : > { %v2329_v56 = vpack.c.bf16 %v5844_v24, %v5843_v6  ;;  %v5851_v24 = vld [vmem:[%s10774_s2 + $0x1d0] sm:$0xff] }
  0xac   : > { %6571 = vmatmul.mubr.bf16.gmra.mrb[24].mxu0 %v11266_v4 }
  0xad   : > { %6574 = vmatprep.mubr.bf16.mxu0 %v8752_v46 }
  0xae   : > { %6715 = vmatmul.mubr.msk.bf16.vlgmr.msra.gmra.mrb[0].mxu1 %vm1162_vm1, %v8754_v2 }
  0xaf   : > { %6718 = vmatprep.mubr.msk.bf16.mxu1 %vm1162_vm1, %v8780_v51  ;;  %6795 = vmatpush3.bf16.msra.mxu1 %v8913_v0  ;;  %v5897_v51 = vld [vmem:[%s10776_s4 + $0x100] sm:$0xff]  ;;  %v5898_v0 = vld [vmem:[%s10776_s4 + $0x108] sm:$0xff] }
  0xb0   : > { %6796 = vmatprep.subr.bf16.mxu1 %v2540_v53 }
  0xb3   : > { %6797 = vmatpush3.bf16.msra.mxu1 %v2540_v53  ;;  %v9160_v53 = vpack.c.bf16 %v5898_v0, %v5897_v51  ;;  %v2330_v51 = vpack.c.bf16 %v5846_v7, %v5845_v25  ;;  %v5853_v7 = vld [vmem:[%s10774_s2 + $0x1e0] sm:$0xff] }
  0xb4   : > { %6798 = vmatprep.subr.bf16.mxu1 %v2541_v60  ;;  %6575 = vmatmul.mubr.bf16.gmra.mrb[28].mxu0 %v8764_v29 }
  0xb5   : > { %6674 = vmatprep.mubr.bf16.mxu0 %v11267_v26  ;;  %v5850_v26 = vld [vmem:[%s10774_s2 + $0x1c8] sm:$0xff] }
  0xb6   : > { %6719 = vmatmul.mubr.msk.bf16.gmra.mrb[4].mxu1 %vm1162_vm1, %v8795_v28 }
  0xb7   : > { %6722 = vmatprep.mubr.msk.bf16.mxu1 %vm1162_vm1, %v8819_v33  ;;  %6799 = vmatpush3.bf16.msra.mxu1 %v2541_v60  ;;  %v5847_v60 = vld [vmem:[%s10774_s2 + $0x1b0] sm:$0xff] }
  0xb8   : > { %6800 = vmatprep.subr.bf16.mxu1 %v2542_v12 }
  0xbb   : > { %6801 = vmatpush3.bf16.msra.mxu1 %v2542_v12  ;;  %v5848_v12 = vld [vmem:[%s10774_s2 + $0x1b8] sm:$0xff] }
  0xbc   : > { %6882 = vmatprep.subr.bf16.mxu1 %v9160_v53  ;;  %6675 = vmatmul.mubr.bf16.vlgmr.msra.gmra.mrb[0].mxu0 %v8821_v55  ;;  %v2331_v0 = vpack.c.bf16 %v5848_v12, %v5847_v60  ;;  %v5855_v12 = vld [vmem:[%s10774_s2 + $0x1f0] sm:$0xff] }
  0xbd   : > { %6747 = vmatpush3.bf16.msra.mxu0 %v2328_v22  ;;  %6678 = vmatprep.mubr.bf16.mxu0 %v8861_v21  ;;  %v5849_v22 = vld [vmem:[%s10774_s2 + $0x1c0] sm:$0xff] }
  0xbe   : > { %6723 = vmatmul.mubr.msk.bf16.gmra.mrb[8].mxu1 %vm1162_vm1, %v8855_v20  ;;  %6748 = vmatprep.subr.bf16.mxu0 %v2329_v56  ;;  %v2332_v6 = vpack.c.bf16 %v5850_v26, %v5849_v22  ;;  %v5881_v26 = vld [vmem:[%s10774_s2 + $0x200] sm:$0xff] }
  0xbf   : > { %6726 = vmatprep.mubr.msk.bf16.mxu1 %vm1162_vm1, %v8866_v62 }
  0xc1   : > { %6749 = vmatpush3.bf16.msra.mxu0 %v2329_v56  ;;  %v5852_v56 = vld [vmem:[%s10774_s2 + $0x1d8] sm:$0xff] }
  0xc2   : > { %6750 = vmatprep.subr.bf16.mxu0 %v2330_v51  ;;  %v2333_v25 = vpack.c.bf16 %v5852_v56, %v5851_v24  ;;  %v5899_v56 = vld [vmem:[%s10776_s4 + $0x110] sm:$0xff] }
  0xc4   : > { %6679 = vmatmul.mubr.bf16.gmra.mrb[4].mxu0 %v8876_v19 }
  0xc5   : > { %6682 = vmatprep.mubr.bf16.mxu0 %v8908_v50  ;;  %6751 = vmatpush3.bf16.msra.mxu0 %v2330_v51  ;;  %v5854_v51 = vld [vmem:[%s10774_s2 + $0x1e8] sm:$0xff] }
  0xc6   : > { %6727 = vmatmul.mubr.msk.bf16.gmra.mrb[12].mxu1 %vm1162_vm1, %v8881_v39  ;;  %6752 = vmatprep.subr.bf16.mxu0 %v2331_v0  ;;  %v2334_v60 = vpack.c.bf16 %v5854_v51, %v5853_v7  ;;  %v5901_v51 = vld [vmem:[%s10776_s4 + $0x120] sm:$0xff] }
  0xc7   : > { %6730 = vmatprep.mubr.msk.bf16.mxu1 %vm1162_vm1, %v8915_v41 }
  0xc9   : > { %6753 = vmatpush3.bf16.msra.mxu0 %v2331_v0  ;;  %v5856_v0 = vld [vmem:[%s10774_s2 + $0x1f8] sm:$0xff] }
  0xca   : > { %6754 = vmatprep.subr.bf16.mxu0 %v2332_v6  ;;  %v2335_v22 = vpack.c.bf16 %v5856_v0, %v5855_v12  ;;  %v5903_v12 = vld [vmem:[%s10776_s4 + $0x130] sm:$0xff]  ;;  %v5904_v0 = vld [vmem:[%s10776_s4 + $0x138] sm:$0xff] }
  0xcc   : > { %6683 = vmatmul.mubr.bf16.gmra.mrb[8].mxu0 %v8919_v59 }
  0xcd   : > { %6686 = vmatprep.mubr.bf16.mxu0 %v8951_v30  ;;  %6755 = vmatpush3.bf16.msra.mxu0 %v2332_v6  ;;  %v5882_v6 = vld [vmem:[%s10774_s2 + $0x208] sm:$0xff] }
  0xce   : > { %6731 = vmatmul.mubr.msk.bf16.gmra.mrb[16].mxu1 %vm1162_vm1, %v8928_v43  ;;  %6756 = vmatprep.subr.bf16.mxu0 %v2333_v25  ;;  %v2777_v24 = vpack.c.bf16 %v5882_v6, %v5881_v26  ;;  %v5937_v26 = vld [vmem:[%s10776_s4 + $0x140] sm:$0xff] }
  0xcf   : > { %6734 = vmatprep.mubr.msk.bf16.mxu1 %vm1162_vm1, %v8959_v40 }
  0xd1   : > { %6757 = vmatpush3.bf16.msra.mxu0 %v2333_v25  ;;  %v5900_v25 = vld [vmem:[%s10776_s4 + $0x118] sm:$0xff] }
  0xd2   : > { %6758 = vmatprep.subr.bf16.mxu0 %v2334_v60  ;;  %v2989_v7 = vpack.c.bf16 %v5900_v25, %v5899_v56  ;;  %v5883_v56 = vld [vmem:[%s10774_s2 + $0x210] sm:$0xff]  ;;  %v5884_v25 = vld [vmem:[%s10774_s2 + $0x218] sm:$0xff] }
  0xd4   : > { %6687 = vmatmul.mubr.bf16.gmra.mrb[12].mxu0 %v8967_v49 }
  0xd5   : > { %6690 = vmatprep.mubr.bf16.mxu0 %v8991_v32  ;;  %6759 = vmatpush3.bf16.msra.mxu0 %v2334_v60  ;;  %v5902_v60 = vld [vmem:[%s10776_s4 + $0x128] sm:$0xff] }
  0xd6   : > { %6735 = vmatmul.mubr.msk.bf16.gmra.mrb[20].mxu1 %vm1162_vm1, %v8975_v36  ;;  %6760 = vmatprep.subr.bf16.mxu0 %v2335_v22 }
  0xd7   : > { %6738 = vmatprep.mubr.msk.bf16.mxu1 %vm1162_vm1, %v8996_v5 }
  0xd9   : > { %6761 = vmatpush3.bf16.msra.mxu0 %v2335_v22  ;;  %v2991_v22 = vpack.c.bf16 %v5904_v0, %v5903_v12  ;;  %v11270_v12 = vld [vmem:[#allocation105_spill] sm:$0xff] }
  0xda   : > { %6834 = vmatprep.subr.bf16.mxu0 %v2777_v24 }
  0xdc   : > { %6691 = vmatmul.mubr.bf16.gmra.mrb[16].mxu0 %v9008_v18 }
  0xdd   : > { %6694 = vmatprep.mubr.bf16.mxu0 %v9030_v15 }
  0xde   : > { %6739 = vmatmul.mubr.msk.bf16.gmra.mrb[24].mxu1 %vm1162_vm1, %v9025_v35 }
  0xdf   : > { %6742 = vmatprep.mubr.msk.bf16.mxu1 %vm1162_vm1, %v9035_v23 }
  0xe4   : > { %6695 = vmatmul.mubr.bf16.gmra.mrb[20].mxu0 %v9053_v14 }
  0xe5   : > { %6698 = vmatprep.mubr.bf16.mxu0 %v9071_v47 }
  0xe6   : > { %6743 = vmatmul.mubr.msk.bf16.gmra.mrb[28].mxu1 %vm1162_vm1, %v9061_v34 }
  0xe7   : > { %6802 = vmatprep.mubr.msk.bf16.mxu1 %vm1162_vm1, %v8527_v1  ;;  %v2990_v1 = vpack.c.bf16 %v5902_v60, %v5901_v51  ;;  %v5886_v51 = vld [vmem:[%s10774_s2 + $0x228] sm:$0xff]  ;;  %v11268_v60 = vld [vmem:[#allocation101_spill] sm:$0xff] }
  0xec   : > { %6699 = vmatmul.mubr.bf16.gmra.mrb[24].mxu0 %v9082_v37 }
  0xed   : > { %6702 = vmatprep.mubr.bf16.mxu0 %v9089_v52 }
  0xee   : > { %6803 = vmatmul.mubr.msk.bf16.vlgmr.msra.gmra.mrb[0].mxu1 %vm1162_vm1, %v11190_v48 }
  0xef   : > { %6806 = vmatprep.mubr.msk.bf16.mxu1 %vm1162_vm1, %v11203_v38  ;;  %6883 = vmatpush3.bf16.msra.mxu1 %v9160_v53  ;;  %v5938_v53 = vld [vmem:[%s10776_s4 + $0x148] sm:$0xff] }
  0xf0   : > { %6884 = vmatprep.subr.bf16.mxu1 %v2989_v7  ;;  %v9284_v6 = vpack.c.bf16 %v5938_v53, %v5937_v26  ;;  %v5888_v26 = vld [vmem:[%s10774_s2 + $0x238] sm:$0xff] }
  0xf3   : > { %6885 = vmatpush3.bf16.msra.mxu1 %v2989_v7  ;;  %v2778_v7 = vpack.c.bf16 %v5884_v25, %v5883_v56  ;;  %v11271_v56 = vld [vmem:[#allocation106_spill] sm:$0xff]  ;;  %v5890_v25 = vld [vmem:[%s10774_s2 + $0x248] sm:$0xff] }
  0xf4   : > { %6886 = vmatprep.subr.bf16.mxu1 %v2990_v1  ;;  %6703 = vmatmul.mubr.bf16.gmra.mrb[28].mxu0 %v9100_v9 }
  0xf5   : > { %6762 = vmatprep.mubr.bf16.mxu0 %v11213_v61  ;;  %v5885_v61 = vld [vmem:[%s10774_s2 + $0x220] sm:$0xff] }
  0xf6   : > { %6807 = vmatmul.mubr.msk.bf16.gmra.mrb[4].mxu1 %vm1162_vm1, %v11206_v44  ;;  %v2779_v0 = vpack.c.bf16 %v5886_v51, %v5885_v61  ;;  %v11272_v61 = vld [vmem:[#allocation107_spill] sm:$0xff]  ;;  %v11273_v51 = vld [vmem:[#allocation28_spill] sm:$0xff] }
  0xf7   : > { %6810 = vmatprep.mubr.msk.bf16.mxu1 %vm1162_vm1, %v11216_v57  ;;  %6887 = vmatpush3.bf16.msra.mxu1 %v2990_v1  ;;  %v11269_v1 = vld [vmem:[#allocation102_spill] sm:$0xff] }
  0xf8   : > { %6888 = vmatprep.subr.bf16.mxu1 %v2991_v22 }
  0xfb   : > { %6889 = vmatpush3.bf16.msra.mxu1 %v2991_v22  ;;  %v5887_v22 = vld [vmem:[%s10774_s2 + $0x230] sm:$0xff] }
  0xfc   : > { %6970 = vmatprep.subr.bf16.mxu1 %v9284_v6  ;;  %6763 = vmatmul.mubr.bf16.vlgmr.msra.gmra.mrb[0].mxu0 %v11268_v60  ;;  %v2780_v53 = vpack.c.bf16 %v5888_v26, %v5887_v22  ;;  %v5891_v22 = vld [vmem:[%s10774_s2 + $0x250] sm:$0xff]  ;;  %v5892_v26 = vld [vmem:[%s10774_s2 + $0x258] sm:$0xff] }
  0xfd   : > { %6835 = vmatpush3.bf16.msra.mxu0 %v2777_v24  ;;  %6766 = vmatprep.mubr.bf16.mxu0 %v11229_v54  ;;  %v5889_v24 = vld [vmem:[%s10774_s2 + $0x240] sm:$0xff] }
  0xfe   : > { %6811 = vmatmul.mubr.msk.bf16.gmra.mrb[8].mxu1 %vm1162_vm1, %v11269_v1  ;;  %6836 = vmatprep.subr.bf16.mxu0 %v2778_v7 }
  0xff   : > { %6814 = vmatprep.mubr.msk.bf16.mxu1 %vm1162_vm1, %v11270_v12 }
 0x101   : > { %6837 = vmatpush3.bf16.msra.mxu0 %v2778_v7  ;;  %v2781_v7 = vpack.c.bf16 %v5890_v25, %v5889_v24  ;;  %v5895_v24 = vld [vmem:[%s10774_s2 + $0x270] sm:$0xff]  ;;  %v5896_v25 = vld [vmem:[%s10774_s2 + $0x278] sm:$0xff] }
 0x102   : > { %6838 = vmatprep.subr.bf16.mxu0 %v2779_v0 }
 0x104   : > { %6767 = vmatmul.mubr.bf16.gmra.mrb[4].mxu0 %v11271_v56  ;;  %v2782_v56 = vpack.c.bf16 %v5892_v26, %v5891_v22  ;;  %v2784_v22 = vpack.c.bf16 %v5896_v25, %v5895_v24  ;;  %v9367_v26 = vld [vmem:[%s7906_s12 + $0x180] sm:$0xff]  ;;  %v9377_v25 = vld [vmem:[%s7906_s12 + $0x190] sm:$0x3] }
 0x105   : > { %6770 = vmatprep.mubr.bf16.mxu0 %v11273_v51  ;;  %6839 = vmatpush3.bf16.msra.mxu0 %v2779_v0  ;;  %v5894_v0 = vld [vmem:[%s10774_s2 + $0x268] sm:$0xff] }
 0x106   : > { %6815 = vmatmul.mubr.msk.bf16.gmra.mrb[12].mxu1 %vm1162_vm1, %v11272_v61  ;;  %6840 = vmatprep.subr.bf16.mxu0 %v2780_v53 }
 0x107   : > { %6818 = vmatprep.mubr.msk.bf16.mxu1 %vm1162_vm1, %v11245_v63  ;;  %v5893_v63 = vld [vmem:[%s10774_s2 + $0x260] sm:$0xff] }
 0x109   : > { %6841 = vmatpush3.bf16.msra.mxu0 %v2780_v53  ;;  %v2783_v53 = vpack.c.bf16 %v5894_v0, %v5893_v63  ;;  %v5922_v63 = vld [vmem:[%s10774_s2 + $0x288] sm:$0xff] }
 0x10a   : > { %6842 = vmatprep.subr.bf16.mxu0 %v2781_v7  ;;  %v9370_v0 = vld [vmem:[%s7906_s12 + $0x188] sm:$0xff] }
 0x10b   : > { %v3196_v24 = vrot.slane %v9370_v0, 2 }
 0x10c   : > { %6771 = vmatmul.mubr.bf16.gmra.mrb[8].mxu0 %v11246_v16 }
 0x10d   : > { %6774 = vmatprep.mubr.bf16.mxu0 %v11252_v10  ;;  %6843 = vmatpush3.bf16.msra.mxu0 %v2781_v7  ;;  %v5921_v7 = vld [vmem:[%s10774_s2 + $0x280] sm:$0xff]  ;;  %v11280_v10 = vld [vmem:[#allocation19_spill] sm:$0xff] }
 0x10e   : > { %6819 = vmatmul.mubr.msk.bf16.gmra.mrb[16].mxu1 %vm1162_vm1, %v11249_v11  ;;  %6844 = vmatprep.subr.bf16.mxu0 %v2782_v56 }
 0x10f   : > { %6822 = vmatprep.mubr.msk.bf16.mxu1 %vm1162_vm1, %v11253_v31  ;;  %v11279_v31 = vld [vmem:[#allocation17_spill] sm:$0xff] }
 0x111   : > { %6845 = vmatpush3.bf16.msra.mxu0 %v2782_v56  ;;  %v9359_v56 = vpack.c.bf16 %v5922_v63, %v5921_v7  ;;  %v9382_v7 = vpack.c.bf16 %v9370_v0, %v9367_v26 }
 0x112   : > { %6846 = vmatprep.subr.bf16.mxu0 %v2783_v53 }
 0x113   : > { %11274 = vst [vmem:[#allocation8_spill] sm:$0xff] %v9382_v7 }
 0x114   : > { %6775 = vmatmul.mubr.bf16.gmra.mrb[12].mxu0 %v11254_v3 }
 0x115   : > { %6778 = vmatprep.mubr.bf16.mxu0 %v11256_v27  ;;  %6847 = vmatpush3.bf16.msra.mxu0 %v2783_v53  ;;  %v3195_v53 = vrot.slane %v9367_v26, 2  ;;  %v9419_v27 = vld [vmem:[%s7958_s23 + $0x190] sm:$0x3] }
 0x116   : > { %6823 = vmatmul.mubr.msk.bf16.gmra.mrb[20].mxu1 %vm1162_vm1, %v11255_v13  ;;  %6848 = vmatprep.subr.bf16.mxu0 %v2784_v22  ;;  %v11278_v13 = vld [vmem:[#allocation14_spill] sm:$0xff] }
 0x117   : > { %6826 = vmatprep.mubr.msk.bf16.mxu1 %vm1162_vm1, %v11257_v58  ;;  %v3197_v63 = vsel %vm1581_vm2, %v3195_v53, %v3196_v24  ;;  %v5939_v58 = vld [vmem:[%s10776_s4 + $0x150] sm:$0xff]  ;;  %v9401_v53 = vld [vmem:[%s7958_s23 + $0x180] sm:$0xff] }
 0x119   : > { %6849 = vmatpush3.bf16.msra.mxu0 %v2784_v22  ;;  %v3198_v22 = vrot.slane %v9377_v25, 2 }
 0x11a   : > { %6922 = vmatprep.subr.bf16.mxu0 %v9359_v56 }
 0x11c   : > { %6779 = vmatmul.mubr.bf16.gmra.mrb[16].mxu0 %v11258_v42  ;;  %v11276_v42 = vld [vmem:[#allocation7_spill] sm:$0xff] }
 0x11d   : > { %6782 = vmatprep.mubr.bf16.mxu0 %v11260_v8  ;;  %v3199_v8 = vsel %vm1581_vm2, %v3196_v24, %v3198_v22  ;;  %v9404_v24 = vld [vmem:[%s7958_s23 + $0x188] sm:$0xff]  ;;  %v3188_v22 = vrot.slane %v9401_v53, 2 }
 0x11e   : > { %6827 = vmatmul.mubr.msk.bf16.gmra.mrb[24].mxu1 %vm1162_vm1, %v11259_v17  ;;  %v9386_v17 = vpack.c.bf16 %v3199_v8, %v3197_v63  ;;  %v5940_v8 = vld [vmem:[%s10776_s4 + $0x158] sm:$0xff]  ;;  %v3189_v63 = vrot.slane %v9404_v24, 2  ;;  %v9428_v3 = vpack.c.bf16 %v9404_v24, %v9401_v53 }
 0x11f   : > { %6830 = vmatprep.mubr.msk.bf16.mxu1 %vm1162_vm1, %v11261_v45  ;;  %v11275_v45 = vld [vmem:[#allocation80_spill] sm:$0xff] }
 0x124   : > { %6783 = vmatmul.mubr.bf16.gmra.mrb[20].mxu0 %v11275_v45  ;;  %v11277_v45 = vld [vmem:[#allocation9_spill] sm:$0xff] }
 0x125   : > { %6786 = vmatprep.mubr.bf16.mxu0 %v11266_v4  ;;  %v3432_v4 = vpack.c.bf16 %v5940_v8, %v5939_v58  ;;  %v3190_v58 = vsel %vm1581_vm2, %v3188_v22, %v3189_v63  ;;  %v3191_v8 = vrot.slane %v9419_v27, 2 }
 0x126   : > { %6831 = vmatmul.mubr.msk.bf16.gmra.mrb[28].mxu1 %vm1162_vm1, %v9382_v7  ;;  %v5942_v7 = vld [vmem:[%s10776_s4 + $0x168] sm:$0xff] }
 0x127   : > { %6890 = vmatprep.mubr.msk.bf16.mxu1 %vm1162_vm1, %v11276_v42  ;;  %v5941_v42 = vld [vmem:[%s10776_s4 + $0x160] sm:$0xff] }
 0x12c   : > { %6787 = vmatmul.mubr.bf16.gmra.mrb[24].mxu0 %v8752_v46  ;;  %v3433_v46 = vpack.c.bf16 %v5942_v7, %v5941_v42  ;;  %v5977_v7 = vld [vmem:[%s10776_s4 + $0x180] sm:$0xff]  ;;  %v5978_v42 = vld [vmem:[%s10776_s4 + $0x188] sm:$0xff] }
 0x12d   : > { %6790 = vmatprep.mubr.bf16.mxu0 %v8764_v29  ;;  %v5943_v29 = vld [vmem:[%s10776_s4 + $0x170] sm:$0xff] }
 0x12e   : > { %6891 = vmatmul.mubr.msk.bf16.vlgmr.msra.gmra.mrb[0].mxu1 %vm1162_vm1, %v11277_v45 }
 0x12f   : > { %6894 = vmatprep.mubr.msk.bf16.mxu1 %vm1162_vm1, %v11278_v13  ;;  %6971 = vmatpush3.bf16.msra.mxu1 %v9284_v6  ;;  %v5944_v13 = vld [vmem:[%s10776_s4 + $0x178] sm:$0xff]  ;;  %v3192_v6 = vsel %vm1581_vm2, %v3189_v63, %v3191_v8  ;;  %v11281_v63 = vld [vmem:[#allocation23_spill] sm:$0xff] }
 0x130   : > { %6972 = vmatprep.subr.bf16.mxu1 %v3432_v4  ;;  %v9437_v45 = vpack.c.bf16 %v3192_v6, %v3190_v58  ;;  %v3434_v22 = vpack.c.bf16 %v5944_v13, %v5943_v29  ;;  %v9451_v29 = vpack.c.bf16 %v5978_v42, %v5977_v7  ;;  %v5923_v13 = vld [vmem:[%s10774_s2 + $0x290] sm:$0xff]  ;;  %v11282_v8 = vld [vmem:[#allocation29_spill] sm:$0xff]  ;;  %v11284_v7 = vld [vmem:[#allocation42_spill] sm:$0xff] }
 0x131   : > { %v11283_v6 = vld [vmem:[#allocation32_spill] sm:$0xff] }
 0x133   : > { %6973 = vmatpush3.bf16.msra.mxu1 %v3432_v4  ;;  %v5924_v4 = vld [vmem:[%s10774_s2 + $0x298] sm:$0xff] }
 0x134   : > { %6974 = vmatprep.subr.bf16.mxu1 %v3433_v46  ;;  %6791 = vmatmul.mubr.bf16.gmra.mrb[28].mxu0 %v9428_v3  ;;  %v3221_v58 = vpack.c.bf16 %v5924_v4, %v5923_v13  ;;  %v5927_v13 = vld [vmem:[%s10774_s2 + $0x2b0] sm:$0xff]  ;;  %v5928_v4 = vld [vmem:[%s10774_s2 + $0x2b8] sm:$0xff] }
 0x135   : > { %6850 = vmatprep.mubr.bf16.mxu0 %v11280_v10  ;;  %v5925_v10 = vld [vmem:[%s10774_s2 + $0x2a0] sm:$0xff] }
 0x136   : > { %6895 = vmatmul.mubr.msk.bf16.gmra.mrb[4].mxu1 %vm1162_vm1, %v11279_v31  ;;  %v11299_v31 = vld [vmem:[#allocation90_spill] sm:$0xff] }
 0x137   : > { %6898 = vmatprep.mubr.msk.bf16.mxu1 %vm1162_vm1, %v11281_v63  ;;  %6975 = vmatpush3.bf16.msra.mxu1 %v3433_v46  ;;  %v5926_v46 = vld [vmem:[%s10774_s2 + $0x2a8] sm:$0xff]  ;;  %v11298_v63 = vld [vmem:[#allocation88_spill] sm:$0xff] }
 0x138   : > { %6976 = vmatprep.subr.bf16.mxu1 %v3434_v22  ;;  %v3222_v42 = vpack.c.bf16 %v5926_v46, %v5925_v10  ;;  %v5930_v10 = vld [vmem:[%s10774_s2 + $0x2c8] sm:$0xff] }
 0x139   : > { %v11287_v46 = vld [vmem:[#allocation51_spill] sm:$0xff] }
 0x13b   : > { %6977 = vmatpush3.bf16.msra.mxu1 %v3434_v22  ;;  %v11285_v22 = vld [vmem:[#allocation43_spill] sm:$0xff] }
 0x13c   : > { %7058 = vmatprep.subr.bf16.mxu1 %v9451_v29  ;;  %6851 = vmatmul.mubr.bf16.vlgmr.msra.gmra.mrb[0].mxu0 %v11282_v8  ;;  %v11286_v8 = vld [vmem:[#allocation47_spill] sm:$0xff] }
 0x13d   : > { %6923 = vmatpush3.bf16.msra.mxu0 %v9359_v56  ;;  %6854 = vmatprep.mubr.bf16.mxu0 %v11284_v7  ;;  %v5929_v56 = vld [vmem:[%s10774_s2 + $0x2c0] sm:$0xff]  ;;  %v11289_v7 = vld [vmem:[#allocation67_spill] sm:$0xff] }
 0x13e   : > { %6899 = vmatmul.mubr.msk.bf16.gmra.mrb[8].mxu1 %vm1162_vm1, %v11283_v6  ;;  %6924 = vmatprep.subr.bf16.mxu0 %v3221_v58  ;;  %v3223_v6 = vpack.c.bf16 %v5928_v4, %v5927_v13  ;;  %v5931_v13 = vld [vmem:[%s10774_s2 + $0x2d0] sm:$0xff]  ;;  %v5932_v4 = vld [vmem:[%s10774_s2 + $0x2d8] sm:$0xff] }
 0x13f   : > { %6902 = vmatprep.mubr.msk.bf16.mxu1 %vm1162_vm1, %v11285_v22  ;;  %v11288_v22 = vld [vmem:[#allocation52_spill] sm:$0xff] }
 0x141   : > { %6925 = vmatpush3.bf16.msra.mxu0 %v3221_v58  ;;  %v3224_v58 = vpack.c.bf16 %v5930_v10, %v5929_v56  ;;  %v11291_v56 = vld [vmem:[#allocation71_spill] sm:$0xff]  ;;  %v11292_v10 = vld [vmem:[#allocation72_spill] sm:$0xff] }
 0x142   : > { %6926 = vmatprep.subr.bf16.mxu0 %v3222_v42 }
 0x144   : > { %6855 = vmatmul.mubr.bf16.gmra.mrb[4].mxu0 %v11286_v8  ;;  %v3225_v8 = vpack.c.bf16 %v5932_v4, %v5931_v13  ;;  %v5935_v13 = vld [vmem:[%s10774_s2 + $0x2f0] sm:$0xff]  ;;  %v5936_v4 = vld [vmem:[%s10774_s2 + $0x2f8] sm:$0xff] }
 0x145   : > { %6858 = vmatprep.mubr.bf16.mxu0 %v11288_v22  ;;  %6927 = vmatpush3.bf16.msra.mxu0 %v3222_v42  ;;  %v5934_v42 = vld [vmem:[%s10774_s2 + $0x2e8] sm:$0xff]  ;;  %v11293_v22 = vld [vmem:[#allocation73_spill] sm:$0xff] }
 0x146   : > { %6903 = vmatmul.mubr.msk.bf16.gmra.mrb[12].mxu1 %vm1162_vm1, %v11287_v46  ;;  %6928 = vmatprep.subr.bf16.mxu0 %v3223_v6  ;;  %v11290_v46 = vld [vmem:[#allocation70_spill] sm:$0xff] }
 0x147   : > { %6906 = vmatprep.mubr.msk.bf16.mxu1 %vm1162_vm1, %v11289_v7  ;;  %v5933_v7 = vld [vmem:[%s10774_s2 + $0x2e0] sm:$0xff] }
 0x149   : > { %6929 = vmatpush3.bf16.msra.mxu0 %v3223_v6  ;;  %v3226_v6 = vpack.c.bf16 %v5934_v42, %v5933_v7  ;;  %v5962_v7 = vld [vmem:[%s10774_s2 + $0x308] sm:$0xff] }
 0x14a   : > { %6930 = vmatprep.subr.bf16.mxu0 %v3224_v58  ;;  %v11296_v42 = vld [vmem:[#allocation83_spill] sm:$0xff] }
 0x14c   : > { %6859 = vmatmul.mubr.bf16.gmra.mrb[8].mxu0 %v11290_v46  ;;  %v3227_v46 = vpack.c.bf16 %v5936_v4, %v5935_v13  ;;  %v2752_v13 = vrot.slane %v9367_v26, 1  ;;  %v2753_v4 = vrot.slane %v9370_v0, 1  ;;  %v11303_v0 = vld [vmem:[#allocation95_spill] sm:$0xff] }
 0x14d   : > { %6862 = vmatprep.mubr.bf16.mxu0 %v11292_v10  ;;  %6931 = vmatpush3.bf16.msra.mxu0 %v3224_v58  ;;  %v11295_v58 = vld [vmem:[#allocation77_spill] sm:$0xff]  ;;  %v11297_v10 = vld [vmem:[#allocation84_spill] sm:$0xff] }
 0x14e   : > { %6907 = vmatmul.mubr.msk.bf16.gmra.mrb[16].mxu1 %vm1162_vm1, %v11291_v56  ;;  %6932 = vmatprep.subr.bf16.mxu0 %v3225_v8  ;;  %v11294_v56 = vld [vmem:[#allocation76_spill] sm:$0xff] }
 0x14f   : > { %6910 = vmatprep.mubr.msk.bf16.mxu1 %vm1162_vm1, %v11293_v22  ;;  %v5961_v22 = vld [vmem:[%s10774_s2 + $0x300] sm:$0xff] }
 0x151   : > { %6933 = vmatpush3.bf16.msra.mxu0 %v3225_v8  ;;  %v3649_v8 = vpack.c.bf16 %v5962_v7, %v5961_v22  ;;  %v2754_v22 = vsel %vm497_vm0, %v2752_v13, %v2753_v4  ;;  %v2742_v7 = vrot.slane %v9401_v53, 1  ;;  %v2743_v13 = vrot.slane %v9404_v24, 1 }
 0x152   : > { %6934 = vmatprep.subr.bf16.mxu0 %v3226_v6 }
 0x153   : > { %v2744_v53 = vsel %vm497_vm0, %v2742_v7, %v2743_v13 }
 0x154   : > { %6863 = vmatmul.mubr.bf16.gmra.mrb[12].mxu0 %v11294_v56  ;;  %v2755_v56 = vrot.slane %v9377_v25, 1  ;;  %v11304_v25 = vld [vmem:[#allocation109_spill] sm:$0xff] }
 0x155   : > { %6866 = vmatprep.mubr.bf16.mxu0 %v11296_v42  ;;  %6935 = vmatpush3.bf16.msra.mxu0 %v3226_v6  ;;  %v11300_v42 = vld [vmem:[#allocation91_spill] sm:$0xff] }
 0x156   : > { %6911 = vmatmul.mubr.msk.bf16.gmra.mrb[20].mxu1 %vm1162_vm1, %v11295_v58  ;;  %6936 = vmatprep.subr.bf16.mxu0 %v3227_v46  ;;  %v11301_v58 = vld [vmem:[#allocation92_spill] sm:$0xff]  ;;  %v2756_v26 = vsel %vm497_vm0, %v2753_v4, %v2755_v56  ;;  %v5980_v56 = vld [vmem:[%s10776_s4 + $0x198] sm:$0xff]  ;;  %v2745_v4 = vrot.slane %v9419_v27, 1 }
 0x157   : > { %6914 = vmatprep.mubr.msk.bf16.mxu1 %vm1162_vm1, %v11297_v10  ;;  %v9538_v6 = vpack.c.bf16 %v2756_v26, %v2754_v22  ;;  %v11305_v26 = vld [vmem:[#allocation111_spill] sm:$0xff] }
 0x158   : > { %v2746_v27 = vsel %vm497_vm0, %v2743_v13, %v2745_v4  ;;  %v5963_v13 = vld [vmem:[%s10774_s2 + $0x310] sm:$0xff]  ;;  %v5964_v4 = vld [vmem:[%s10774_s2 + $0x318] sm:$0xff] }
 0x159   : > { %6937 = vmatpush3.bf16.msra.mxu0 %v3227_v46  ;;  %11302 = vst [vmem:[#allocation6_spill] sm:$0xff] %v9538_v6  ;;  %v5979_v46 = vld [vmem:[%s10776_s4 + $0x190] sm:$0xff] }
 0x15a   : > { %7010 = vmatprep.subr.bf16.mxu0 %v3649_v8  ;;  %v3861_v22 = vpack.c.bf16 %v5980_v56, %v5979_v46  ;;  %v9570_v46 = vpack.c.bf16 %v2746_v27, %v2744_v53  ;;  %v5983_v56 = vld [vmem:[%s10776_s4 + $0x1b0] sm:$0xff] }
 0x15b   : > { %v5967_v27 = vld [vmem:[%s10774_s2 + $0x330] sm:$0xff] }
 0x15c   : > { %6867 = vmatmul.mubr.bf16.gmra.mrb[16].mxu0 %v11298_v63 }
 0x15d   : > { %6870 = vmatprep.mubr.bf16.mxu0 %v11300_v42 }
 0x15e   : > { %6915 = vmatmul.mubr.msk.bf16.gmra.mrb[24].mxu1 %vm1162_vm1, %v11299_v31 }
 0x15f   : > { %6918 = vmatprep.mubr.msk.bf16.mxu1 %vm1162_vm1, %v11301_v58 }
 0x164   : > { %6871 = vmatmul.mubr.bf16.gmra.mrb[20].mxu0 %v11303_v0  ;;  %v11307_v0 = vld [vmem:[#allocation4_spill] sm:$0xff] }
 0x165   : > { %6874 = vmatprep.mubr.bf16.mxu0 %v11304_v25  ;;  %v5982_v25 = vld [vmem:[%s10776_s4 + $0x1a8] sm:$0xff] }
 0x166   : > { %6919 = vmatmul.mubr.msk.bf16.gmra.mrb[28].mxu1 %vm1162_vm1, %v9538_v6  ;;  %v11306_v6 = vld [vmem:[#allocation5_spill] sm:$0xff] }
 0x167   : > { %6978 = vmatprep.mubr.msk.bf16.mxu1 %vm1162_vm1, %v8754_v2  ;;  %v5981_v2 = vld [vmem:[%s10776_s4 + $0x1a0] sm:$0xff] }
 0x168   : > { %v3862_v24 = vpack.c.bf16 %v5982_v25, %v5981_v2  ;;  %v6018_v25 = vld [vmem:[%s10776_s4 + $0x1c8] sm:$0xff] }
 0x169   : > { %v5966_v2 = vld [vmem:[%s10774_s2 + $0x328] sm:$0xff] }
 0x16c   : > { %6875 = vmatmul.mubr.bf16.gmra.mrb[24].mxu0 %v11305_v26 }
 0x16d   : > { %6878 = vmatprep.mubr.bf16.mxu0 %v11307_v0  ;;  %v5984_v0 = vld [vmem:[%s10776_s4 + $0x1b8] sm:$0xff] }
 0x16e   : > { %6979 = vmatmul.mubr.msk.bf16.vlgmr.msra.gmra.mrb[0].mxu1 %vm1162_vm1, %v11306_v6  ;;  %v3863_v7 = vpack.c.bf16 %v5984_v0, %v5983_v56 }
 0x16f   : > { %6982 = vmatprep.mubr.msk.bf16.mxu1 %vm1162_vm1, %v8795_v28  ;;  %7059 = vmatpush3.bf16.msra.mxu1 %v9451_v29  ;;  %v6017_v29 = vld [vmem:[%s10776_s4 + $0x1c0] sm:$0xff] }
 0x170   : > { %7060 = vmatprep.subr.bf16.mxu1 %v3861_v22  ;;  %v9590_v0 = vpack.c.bf16 %v6018_v25, %v6017_v29  ;;  %v5971_v25 = vld [vmem:[%s10774_s2 + $0x350] sm:$0xff] }
 0x173   : > { %7061 = vmatpush3.bf16.msra.mxu1 %v3861_v22  ;;  %v3650_v22 = vpack.c.bf16 %v5964_v4, %v5963_v13  ;;  %v5972_v13 = vld [vmem:[%s10774_s2 + $0x358] sm:$0xff] }
 0x174   : > { %7062 = vmatprep.subr.bf16.mxu1 %v3862_v24  ;;  %6879 = vmatmul.mubr.bf16.gmra.mrb[28].mxu0 %v9570_v46  ;;  %v3654_v4 = vpack.c.bf16 %v5972_v13, %v5971_v25  ;;  %v6020_v25 = vld [vmem:[%s10776_s4 + $0x1d8] sm:$0xff] }
 0x175   : > { %6938 = vmatprep.mubr.bf16.mxu0 %v8821_v55  ;;  %v5965_v55 = vld [vmem:[%s10774_s2 + $0x320] sm:$0xff] }
 0x176   : > { %6983 = vmatmul.mubr.msk.bf16.gmra.mrb[4].mxu1 %vm1162_vm1, %v8819_v33  ;;  %v3651_v53 = vpack.c.bf16 %v5966_v2, %v5965_v55  ;;  %v5974_v55 = vld [vmem:[%s10774_s2 + $0x368] sm:$0xff] }
 0x177   : > { %6986 = vmatprep.mubr.msk.bf16.mxu1 %vm1162_vm1, %v8855_v20  ;;  %7063 = vmatpush3.bf16.msra.mxu1 %v3862_v24  ;;  %v5968_v24 = vld [vmem:[%s10774_s2 + $0x338] sm:$0xff] }
 0x178   : > { %7064 = vmatprep.subr.bf16.mxu1 %v3863_v7  ;;  %v3652_v56 = vpack.c.bf16 %v5968_v24, %v5967_v27  ;;  %v5976_v27 = vld [vmem:[%s10774_s2 + $0x378] sm:$0xff] }
 0x17b   : > { %7065 = vmatpush3.bf16.msra.mxu1 %v3863_v7  ;;  %v5970_v7 = vld [vmem:[%s10774_s2 + $0x348] sm:$0xff] }
 0x17c   : > { %7146 = vmatprep.subr.bf16.mxu1 %v9590_v0  ;;  %6939 = vmatmul.mubr.bf16.vlgmr.msra.gmra.mrb[0].mxu0 %v8861_v21 }
 0x17d   : > { %7011 = vmatpush3.bf16.msra.mxu0 %v3649_v8  ;;  %6942 = vmatprep.mubr.bf16.mxu0 %v8876_v19  ;;  %v5969_v8 = vld [vmem:[%s10774_s2 + $0x340] sm:$0xff] }
 0x17e   : > { %6987 = vmatmul.mubr.msk.bf16.gmra.mrb[8].mxu1 %vm1162_vm1, %v8866_v62  ;;  %7012 = vmatprep.subr.bf16.mxu0 %v3650_v22  ;;  %v3653_v29 = vpack.c.bf16 %v5970_v7, %v5969_v8  ;;  %v6002_v8 = vld [vmem:[%s10774_s2 + $0x388] sm:$0xff] }
 0x17f   : > { %6990 = vmatprep.mubr.msk.bf16.mxu1 %vm1162_vm1, %v8881_v39 }
 0x181   : > { %7013 = vmatpush3.bf16.msra.mxu0 %v3650_v22  ;;  %v5973_v22 = vld [vmem:[%s10774_s2 + $0x360] sm:$0xff] }
 0x182   : > { %7014 = vmatprep.subr.bf16.mxu0 %v3651_v53  ;;  %v3655_v2 = vpack.c.bf16 %v5974_v55, %v5973_v22  ;;  %v6022_v22 = vld [vmem:[%s10776_s4 + $0x1e8] sm:$0xff]  ;;  %v6023_v55 = vld [vmem:[%s10776_s4 + $0x1f0] sm:$0xff] }
 0x184   : > { %6943 = vmatmul.mubr.bf16.gmra.mrb[4].mxu0 %v8908_v50 }
 0x185   : > { %6946 = vmatprep.mubr.bf16.mxu0 %v8919_v59  ;;  %7015 = vmatpush3.bf16.msra.mxu0 %v3651_v53  ;;  %v5975_v53 = vld [vmem:[%s10774_s2 + $0x370] sm:$0xff] }
 0x186   : > { %6991 = vmatmul.mubr.msk.bf16.gmra.mrb[12].mxu1 %vm1162_vm1, %v8915_v41  ;;  %7016 = vmatprep.subr.bf16.mxu0 %v3652_v56  ;;  %v3656_v24 = vpack.c.bf16 %v5976_v27, %v5975_v53  ;;  %v6003_v27 = vld [vmem:[%s10774_s2 + $0x390] sm:$0xff] }
 0x187   : > { %6994 = vmatprep.mubr.msk.bf16.mxu1 %vm1162_vm1, %v8928_v43 }
 0x189   : > { %7017 = vmatpush3.bf16.msra.mxu0 %v3652_v56  ;;  %v6001_v56 = vld [vmem:[%s10774_s2 + $0x380] sm:$0xff] }
 0x18a   : > { %7018 = vmatprep.subr.bf16.mxu0 %v3653_v29  ;;  %v4098_v7 = vpack.c.bf16 %v6002_v8, %v6001_v56 }
 0x18c   : > { %6947 = vmatmul.mubr.bf16.gmra.mrb[8].mxu0 %v8951_v30 }
 0x18d   : > { %6950 = vmatprep.mubr.bf16.mxu0 %v8967_v49  ;;  %7019 = vmatpush3.bf16.msra.mxu0 %v3653_v29  ;;  %v6019_v29 = vld [vmem:[%s10776_s4 + $0x1d0] sm:$0xff] }
 0x18e   : > { %6995 = vmatmul.mubr.msk.bf16.gmra.mrb[16].mxu1 %vm1162_vm1, %v8959_v40  ;;  %7020 = vmatprep.subr.bf16.mxu0 %v3654_v4  ;;  %v4310_v13 = vpack.c.bf16 %v6020_v25, %v6019_v29  ;;  %v6007_v29 = vld [vmem:[%s10774_s2 + $0x3b0] sm:$0xff]  ;;  %v6008_v25 = vld [vmem:[%s10774_s2 + $0x3b8] sm:$0xff] }
 0x18f   : > { %6998 = vmatprep.mubr.msk.bf16.mxu1 %vm1162_vm1, %v8975_v36 }
 0x191   : > { %7021 = vmatpush3.bf16.msra.mxu0 %v3654_v4  ;;  %v6021_v4 = vld [vmem:[%s10776_s4 + $0x1e0] sm:$0xff] }
 0x192   : > { %7022 = vmatprep.subr.bf16.mxu0 %v3655_v2 }
 0x194   : > { %6951 = vmatmul.mubr.bf16.gmra.mrb[12].mxu0 %v8991_v32 }
 0x195   : > { %6954 = vmatprep.mubr.bf16.mxu0 %v9008_v18  ;;  %7023 = vmatpush3.bf16.msra.mxu0 %v3655_v2  ;;  %v6024_v2 = vld [vmem:[%s10776_s4 + $0x1f8] sm:$0xff] }
 0x196   : > { %6999 = vmatmul.mubr.msk.bf16.gmra.mrb[20].mxu1 %vm1162_vm1, %v8996_v5  ;;  %7024 = vmatprep.subr.bf16.mxu0 %v3656_v24 }
 0x197   : > { %7002 = vmatprep.mubr.msk.bf16.mxu1 %vm1162_vm1, %v9025_v35 }
 0x199   : > { %7025 = vmatpush3.bf16.msra.mxu0 %v3656_v24  ;;  %v6004_v24 = vld [vmem:[%s10774_s2 + $0x398] sm:$0xff] }
 0x19a   : > { %7098 = vmatprep.subr.bf16.mxu0 %v4098_v7  ;;  %v4099_v56 = vpack.c.bf16 %v6004_v24, %v6003_v27  ;;  %v6016_v27 = vld [vmem:[%s10774_s2 + $0x3f8] sm:$0xff] }
 0x19c   : > { %6955 = vmatmul.mubr.bf16.gmra.mrb[16].mxu0 %v9030_v15 }
 0x19d   : > { %6958 = vmatprep.mubr.bf16.mxu0 %v9053_v14 }
 0x19e   : > { %7003 = vmatmul.mubr.msk.bf16.gmra.mrb[24].mxu1 %vm1162_vm1, %v9035_v23 }
 0x19f   : > { %7006 = vmatprep.mubr.msk.bf16.mxu1 %vm1162_vm1, %v9061_v34 }
 0x1a4   : > { %6959 = vmatmul.mubr.bf16.gmra.mrb[20].mxu0 %v9071_v47 }
 0x1a5   : > { %6962 = vmatprep.mubr.bf16.mxu0 %v9082_v37 }
 0x1a6   : > { %7007 = vmatmul.mubr.msk.bf16.gmra.mrb[28].mxu1 %vm1162_vm1, %v9386_v17 }
 0x1a7   : > { %7066 = vmatprep.mubr.msk.bf16.mxu1 %vm1162_vm1, %v11190_v48  ;;  %v4311_v48 = vpack.c.bf16 %v6022_v22, %v6021_v4  ;;  %v6012_v4 = vld [vmem:[%s10774_s2 + $0x3d8] sm:$0xff] }
 0x1ac   : > { %6963 = vmatmul.mubr.bf16.gmra.mrb[24].mxu0 %v9089_v52 }
 0x1ad   : > { %6966 = vmatprep.mubr.bf16.mxu0 %v9100_v9 }
 0x1ae   : > { %7067 = vmatmul.mubr.msk.bf16.vlgmr.msra.gmra.mrb[0].mxu1 %vm1162_vm1, %v11203_v38  ;;  %v4312_v38 = vpack.c.bf16 %v6024_v2, %v6023_v55  ;;  %v11311_v55 = vld [vmem:[#allocation40_spill] sm:$0xff] }
 0x1af   : > { %7070 = vmatprep.mubr.msk.bf16.mxu1 %vm1162_vm1, %v11206_v44  ;;  %7147 = vmatpush3.bf16.msra.mxu1 %v9590_v0  ;;  %v6057_v44 = vld [vmem:[%s10776_s4 + $0x200] sm:$0xff]  ;;  %v6058_v0 = vld [vmem:[%s10776_s4 + $0x208] sm:$0xff]  ;;  %v11312_v2 = vld [vmem:[#allocation44_spill] sm:$0xff] }
 0x1b0   : > { %7148 = vmatprep.subr.bf16.mxu1 %v4310_v13  ;;  %v9714_v53 = vpack.c.bf16 %v6058_v0, %v6057_v44  ;;  %v6015_v0 = vld [vmem:[%s10774_s2 + $0x3f0] sm:$0xff] }
 0x1b1   : > { %v4105_v24 = vpack.c.bf16 %v6016_v27, %v6015_v0  ;;  %v11323_v0 = vld [vmem:[#allocation3_spill] sm:$0xff]  ;;  %v11324_v27 = vld [vmem:[#allocation9_spill] sm:$0xff] }
 0x1b3   : > { %7149 = vmatpush3.bf16.msra.mxu1 %v4310_v13 }
 0x1b4   : > { %7150 = vmatprep.subr.bf16.mxu1 %v4311_v48  ;;  %6967 = vmatmul.mubr.bf16.gmra.mrb[28].mxu0 %v9437_v45 }
 0x1b5   : > { %7026 = vmatprep.mubr.bf16.mxu0 %v11268_v60  ;;  %v6006_v60 = vld [vmem:[%s10774_s2 + $0x3a8] sm:$0xff] }
 0x1b6   : > { %7071 = vmatmul.mubr.msk.bf16.gmra.mrb[4].mxu1 %vm1162_vm1, %v11216_v57  ;;  %v6005_v57 = vld [vmem:[%s10774_s2 + $0x3a0] sm:$0xff] }
 0x1b7   : > { %7074 = vmatprep.mubr.msk.bf16.mxu1 %vm1162_vm1, %v11269_v1  ;;  %7151 = vmatpush3.bf16.msra.mxu1 %v4311_v48  ;;  %v11308_v1 = vld [vmem:[#allocation106_spill] sm:$0xff]  ;;  %v4100_v8 = vpack.c.bf16 %v6006_v60, %v6005_v57  ;;  %v11310_v48 = vld [vmem:[#allocation39_spill] sm:$0xff] }
 0x1b8   : > { %7152 = vmatprep.subr.bf16.mxu1 %v4312_v38  ;;  %v6041_v57 = vld [vmem:[%s10774_s2 + $0x400] sm:$0xff]  ;;  %v6042_v60 = vld [vmem:[%s10774_s2 + $0x408] sm:$0xff] }
 0x1bb   : > { %7153 = vmatpush3.bf16.msra.mxu1 %v4312_v38  ;;  %v11313_v38 = vld [vmem:[#allocation108_spill] sm:$0xff] }
 0x1bc   : > { %7234 = vmatprep.subr.bf16.mxu1 %v9714_v53  ;;  %7027 = vmatmul.mubr.bf16.vlgmr.msra.gmra.mrb[0].mxu0 %v11229_v54  ;;  %v4101_v54 = vpack.c.bf16 %v6008_v25, %v6007_v29  ;;  %v11317_v29 = vld [vmem:[#allocation66_spill] sm:$0xff]  ;;  %v4541_v25 = vpack.c.bf16 %v6042_v60, %v6041_v57  ;;  %v6059_v57 = vld [vmem:[%s10776_s4 + $0x210] sm:$0xff]  ;;  %v6060_v60 = vld [vmem:[%s10776_s4 + $0x218] sm:$0xff] }
 0x1bd   : > { %7099 = vmatpush3.bf16.msra.mxu0 %v4098_v7  ;;  %7030 = vmatprep.mubr.bf16.mxu0 %v11308_v1  ;;  %v11309_v7 = vld [vmem:[#allocation33_spill] sm:$0xff] }
 0x1be   : > { %7075 = vmatmul.mubr.msk.bf16.gmra.mrb[8].mxu1 %vm1162_vm1, %v11270_v12  ;;  %7100 = vmatprep.subr.bf16.mxu0 %v4099_v56  ;;  %v6009_v12 = vld [vmem:[%s10774_s2 + $0x3c0] sm:$0xff]  ;;  %v11315_v1 = vld [vmem:[#allocation61_spill] sm:$0xff] }
 0x1bf   : > { %7078 = vmatprep.mubr.msk.bf16.mxu1 %vm1162_vm1, %v11272_v61  ;;  %v6010_v61 = vld [vmem:[%s10774_s2 + $0x3c8] sm:$0xff] }
 0x1c0   : > { %v4102_v13 = vpack.c.bf16 %v6010_v61, %v6009_v12  ;;  %v11319_v12 = vld [vmem:[#allocation112_spill] sm:$0xff] }
 0x1c1   : > { %7101 = vmatpush3.bf16.msra.mxu0 %v4099_v56  ;;  %v11314_v56 = vld [vmem:[#allocation58_spill] sm:$0xff]  ;;  %v11320_v61 = vld [vmem:[#allocation80_spill] sm:$0xff] }
 0x1c2   : > { %7102 = vmatprep.subr.bf16.mxu0 %v4100_v8 }
 0x1c4   : > { %7031 = vmatmul.mubr.bf16.gmra.mrb[4].mxu0 %v11273_v51  ;;  %v6011_v51 = vld [vmem:[%s10774_s2 + $0x3d0] sm:$0xff] }
 0x1c5   : > { %7034 = vmatprep.mubr.bf16.mxu0 %v11246_v16  ;;  %7103 = vmatpush3.bf16.msra.mxu0 %v4100_v8  ;;  %v4103_v22 = vpack.c.bf16 %v6012_v4, %v6011_v51  ;;  %v6013_v16 = vld [vmem:[%s10774_s2 + $0x3e0] sm:$0xff]  ;;  %v11321_v51 = vld [vmem:[#allocation8_spill] sm:$0xff] }
 0x1c6   : > { %7079 = vmatmul.mubr.msk.bf16.gmra.mrb[12].mxu1 %vm1162_vm1, %v11309_v7  ;;  %7104 = vmatprep.subr.bf16.mxu0 %v4101_v54  ;;  %v11316_v8 = vld [vmem:[#allocation110_spill] sm:$0xff]  ;;  %v9794_v7 = vld [vmem:[%s7906_s12 + $0x198] sm:$0xff] }
 0x1c7   : > { %7082 = vmatprep.mubr.msk.bf16.mxu1 %vm1162_vm1, %v11249_v11  ;;  %v6014_v11 = vld [vmem:[%s10774_s2 + $0x3e8] sm:$0xff]  ;;  %v4516_v4 = vrot.slane %v9794_v7, 2 }
 0x1c8   : > { %v4104_v44 = vpack.c.bf16 %v6014_v11, %v6013_v16 }
 0x1c9   : > { %7105 = vmatpush3.bf16.msra.mxu0 %v4101_v54  ;;  %v11318_v54 = vld [vmem:[#allocation74_spill] sm:$0xff] }
 0x1ca   : > { %7106 = vmatprep.subr.bf16.mxu0 %v4102_v13 }
 0x1cc   : > { %7035 = vmatmul.mubr.bf16.gmra.mrb[8].mxu0 %v11310_v48  ;;  %v9804_v48 = vld [vmem:[%s7906_s12 + $0x1a8] sm:$0x3] }
 0x1cd   : > { %7038 = vmatprep.mubr.bf16.mxu0 %v11312_v2  ;;  %7107 = vmatpush3.bf16.msra.mxu0 %v4102_v13  ;;  %v9797_v13 = vld [vmem:[%s7906_s12 + $0x1a0] sm:$0xff]  ;;  %v4519_v16 = vrot.slane %v9804_v48, 2  ;;  %s7806_s12 = smov 64  }
 0x1ce   : > { %7083 = vmatmul.mubr.msk.bf16.gmra.mrb[16].mxu1 %vm1162_vm1, %v11311_v55  ;;  %7108 = vmatprep.subr.bf16.mxu0 %v4103_v22  ;;  %v3850_v11 = vpack.c.bf16 %v9797_v13, %v9794_v7 }
 0x1cf   : > { %7086 = vmatprep.mubr.msk.bf16.mxu1 %vm1162_vm1, %v11313_v38 }
 0x1d1   : > { %7109 = vmatpush3.bf16.msra.mxu0 %v4103_v22  ;;  %v4517_v22 = vrot.slane %v9797_v13, 2 }
 0x1d2   : > { %7110 = vmatprep.subr.bf16.mxu0 %v4104_v44 }
 0x1d3   : > { %v9810_v55 = vsel %vm1581_vm2, %v4516_v4, %v4517_v22  ;;  %v9813_v2 = vsel %vm1581_vm2, %v4517_v22, %v4519_v16  ;;  %v11326_v4 = vld [vmem:[#allocation14_spill] sm:$0xff] }
 0x1d4   : > { %7039 = vmatmul.mubr.bf16.gmra.mrb[12].mxu0 %v11314_v56  ;;  %v4742_v38 = vpack.c.bf16 %v9813_v2, %v9810_v55  ;;  %v9826_v56 = vld [vmem:[%s7958_s23 + $0x1a0] sm:$0xff] }
 0x1d5   : > { %7042 = vmatprep.mubr.bf16.mxu0 %v11316_v8  ;;  %7111 = vmatpush3.bf16.msra.mxu0 %v4104_v44  ;;  %v11322_v44 = vld [vmem:[#allocation114_spill] sm:$0xff]  ;;  %v4510_v8 = vrot.slane %v9826_v56, 2 }
 0x1d6   : > { %7087 = vmatmul.mubr.msk.bf16.gmra.mrb[20].mxu1 %vm1162_vm1, %v11315_v1  ;;  %7112 = vmatprep.subr.bf16.mxu0 %v4105_v24 }
 0x1d7   : > { %7090 = vmatprep.mubr.msk.bf16.mxu1 %vm1162_vm1, %v11317_v29  ;;  %v4753_v29 = vpack.c.bf16 %v6060_v60, %v6059_v57  ;;  %v6064_v57 = vld [vmem:[%s10776_s4 + $0x238] sm:$0xff] }
 0x1d9   : > { %7113 = vmatpush3.bf16.msra.mxu0 %v4105_v24  ;;  %v9823_v24 = vld [vmem:[%s7958_s23 + $0x198] sm:$0xff] }
 0x1da   : > { %7186 = vmatprep.subr.bf16.mxu0 %v4541_v25  ;;  %v4509_v1 = vrot.slane %v9823_v24, 2 }
 0x1dc   : > { %7043 = vmatmul.mubr.bf16.gmra.mrb[16].mxu0 %v11318_v54  ;;  %v11325_v54 = vld [vmem:[#allocation115_spill] sm:$0xff]  ;;  %v9850_v22 = vsel %vm1581_vm2, %v4509_v1, %v4510_v8 }
 0x1dd   : > { %7046 = vmatprep.mubr.bf16.mxu0 %v11320_v61  ;;  %v6062_v61 = vld [vmem:[%s10776_s4 + $0x228] sm:$0xff] }
 0x1de   : > { %7091 = vmatmul.mubr.msk.bf16.gmra.mrb[24].mxu1 %vm1162_vm1, %v11319_v12  ;;  %v6061_v12 = vld [vmem:[%s10776_s4 + $0x220] sm:$0xff]  ;;  %v11328_v1 = vld [vmem:[#allocation23_spill] sm:$0xff] }
 0x1df   : > { %7094 = vmatprep.mubr.msk.bf16.mxu1 %vm1162_vm1, %v11321_v51  ;;  %v9844_v51 = vld [vmem:[%s7958_s23 + $0x1a8] sm:$0x3] }
 0x1e0   : > { %v4512_v16 = vrot.slane %v9844_v51, 2 }
 0x1e4   : > { %7047 = vmatmul.mubr.bf16.gmra.mrb[20].mxu0 %v11322_v44  ;;  %v4754_v44 = vpack.c.bf16 %v6062_v61, %v6061_v12  ;;  %v6043_v12 = vld [vmem:[%s10774_s2 + $0x410] sm:$0xff] }
 0x1e5   : > { %7050 = vmatprep.mubr.bf16.mxu0 %v11323_v0  ;;  %v9857_v0 = vsel %vm1581_vm2, %v4510_v8, %v4512_v16  ;;  %v11329_v8 = vld [vmem:[#allocation29_spill] sm:$0xff]  ;;  %v6046_v16 = vld [vmem:[%s10774_s2 + $0x428] sm:$0xff] }
 0x1e6   : > { %7095 = vmatmul.mubr.msk.bf16.gmra.mrb[28].mxu1 %vm1162_vm1, %v3850_v11  ;;  %v11327_v11 = vld [vmem:[#allocation17_spill] sm:$0xff]  ;;  %v4523_v60 = vpack.c.bf16 %v9857_v0, %v9850_v22 }
 0x1e7   : > { %7154 = vmatprep.mubr.msk.bf16.mxu1 %vm1162_vm1, %v11324_v27  ;;  %v3631_v27 = vpack.c.bf16 %v9826_v56, %v9823_v24 }
 0x1ec   : > { %7051 = vmatmul.mubr.bf16.gmra.mrb[24].mxu0 %v11325_v54  ;;  %v11330_v54 = vld [vmem:[#allocation32_spill] sm:$0xff] }
 0x1ed   : > { %7054 = vmatprep.mubr.bf16.mxu0 %v9428_v3  ;;  %v6063_v3 = vld [vmem:[%s10776_s4 + $0x230] sm:$0xff] }
 0x1ee   : > { %7155 = vmatmul.mubr.msk.bf16.vlgmr.msra.gmra.mrb[0].mxu1 %vm1162_vm1, %v11326_v4  ;;  %v6045_v4 = vld [vmem:[%s10774_s2 + $0x420] sm:$0xff] }
 0x1ef   : > { %7158 = vmatprep.mubr.msk.bf16.mxu1 %vm1162_vm1, %v11327_v11  ;;  %7235 = vmatpush3.bf16.msra.mxu1 %v9714_v53  ;;  %v4755_v53 = vpack.c.bf16 %v6064_v57, %v6063_v3  ;;  %v11331_v11 = vld [vmem:[#allocation42_spill] sm:$0xff]  ;;  %v11334_v3 = vld [vmem:[#allocation51_spill] sm:$0xff]  ;;  %v4543_v57 = vpack.c.bf16 %v6046_v16, %v6045_v4 }
 0x1f0   : > { %7236 = vmatprep.subr.bf16.mxu1 %v4753_v29  ;;  %v11337_v4 = vld [vmem:[#allocation70_spill] sm:$0xff]  ;;  %v11338_v16 = vld [vmem:[#allocation71_spill] sm:$0xff] }
 0x1f3   : > { %7237 = vmatpush3.bf16.msra.mxu1 %v4753_v29  ;;  %v6044_v29 = vld [vmem:[%s10774_s2 + $0x418] sm:$0xff] }
 0x1f4   : > { %7238 = vmatprep.subr.bf16.mxu1 %v4754_v44  ;;  %7055 = vmatmul.mubr.bf16.gmra.mrb[28].mxu0 %v3631_v27  ;;  %v4542_v61 = vpack.c.bf16 %v6044_v29, %v6043_v12  ;;  %v11333_v27 = vld [vmem:[#allocation47_spill] sm:$0xff] }
 0x1f5   : > { %7114 = vmatprep.mubr.bf16.mxu0 %v11329_v8  ;;  %v6050_v12 = vld [vmem:[%s10774_s2 + $0x448] sm:$0xff] }
 0x1f6   : > { %7159 = vmatmul.mubr.msk.bf16.gmra.mrb[4].mxu1 %vm1162_vm1, %v11328_v1  ;;  %v6048_v1 = vld [vmem:[%s10774_s2 + $0x438] sm:$0xff]  ;;  %v11336_v29 = vld [vmem:[#allocation67_spill] sm:$0xff] }
 0x1f7   : > { %7162 = vmatprep.mubr.msk.bf16.mxu1 %vm1162_vm1, %v11330_v54  ;;  %7239 = vmatpush3.bf16.msra.mxu1 %v4754_v44  ;;  %v11332_v44 = vld [vmem:[#allocation43_spill] sm:$0xff]  ;;  %v11335_v54 = vld [vmem:[#allocation52_spill] sm:$0xff] }
 0x1f8   : > { %7240 = vmatprep.subr.bf16.mxu1 %v4755_v53 }
 0x1fb   : > { %7241 = vmatpush3.bf16.msra.mxu1 %v4755_v53  ;;  %v6047_v53 = vld [vmem:[%s10774_s2 + $0x430] sm:$0xff] }
 0x1fc   : > { %7115 = vmatmul.mubr.bf16.vlgmr.msra.gmra.mrb[0].mxu0 %v11331_v11  ;;  %v4544_v8 = vpack.c.bf16 %v6048_v1, %v6047_v53  ;;  %v6051_v11 = vld [vmem:[%s10774_s2 + $0x450] sm:$0xff]  ;;  %v6053_v53 = vld [vmem:[%s10774_s2 + $0x460] sm:$0xff]  ;;  %v11340_v1 = vld [vmem:[#allocation73_spill] sm:$0xff] }
 0x1fd   : > { %7187 = vmatpush3.bf16.msra.mxu0 %v4541_v25  ;;  %7118 = vmatprep.mubr.bf16.mxu0 %v11333_v27  ;;  %v6049_v25 = vld [vmem:[%s10774_s2 + $0x440] sm:$0xff] }
 0x1fe   : > { %7163 = vmatmul.mubr.msk.bf16.gmra.mrb[8].mxu1 %vm1162_vm1, %v11332_v44  ;;  %7188 = vmatprep.subr.bf16.mxu0 %v4542_v61  ;;  %v6052_v44 = vld [vmem:[%s10774_s2 + $0x458] sm:$0xff] }
 0x1ff   : > { %7166 = vmatprep.mubr.msk.bf16.mxu1 %vm1162_vm1, %v11334_v3  ;;  %v4546_v27 = vpack.c.bf16 %v6052_v44, %v6051_v11  ;;  %v11339_v3 = vld [vmem:[#allocation72_spill] sm:$0xff]  ;;  %v4074_v11 = vrot.slane %v9797_v13, 1  ;;  %v4076_v44 = vrot.slane %v9804_v48, 1  ;;  %v4066_v13 = vrot.slane %v9844_v51, 1 }
 0x200   : > { %v11347_v48 = vld [vmem:[#allocation4_spill] sm:$0xff] }
 0x201   : > { %7189 = vmatpush3.bf16.msra.mxu0 %v4542_v61  ;;  %v4545_v61 = vpack.c.bf16 %v6050_v12, %v6049_v25  ;;  %v11342_v25 = vld [vmem:[#allocation77_spill] sm:$0xff]  ;;  %v6055_v12 = vld [vmem:[%s10774_s2 + $0x470] sm:$0xff] }
 0x202   : > { %7190 = vmatprep.subr.bf16.mxu0 %v4543_v57 }
 0x204   : > { %7119 = vmatmul.mubr.bf16.gmra.mrb[4].mxu0 %v11335_v54  ;;  %v11341_v54 = vld [vmem:[#allocation76_spill] sm:$0xff] }
 0x205   : > { %7122 = vmatprep.mubr.bf16.mxu0 %v11337_v4  ;;  %7191 = vmatpush3.bf16.msra.mxu0 %v4543_v57  ;;  %v6054_v57 = vld [vmem:[%s10774_s2 + $0x468] sm:$0xff] }
 0x206   : > { %7167 = vmatmul.mubr.msk.bf16.gmra.mrb[12].mxu1 %vm1162_vm1, %v11336_v29  ;;  %7192 = vmatprep.subr.bf16.mxu0 %v4544_v8  ;;  %v6056_v29 = vld [vmem:[%s10774_s2 + $0x478] sm:$0xff] }
 0x207   : > { %7170 = vmatprep.mubr.msk.bf16.mxu1 %vm1162_vm1, %v11338_v16  ;;  %v4548_v4 = vpack.c.bf16 %v6056_v29, %v6055_v12  ;;  %v11343_v16 = vld [vmem:[#allocation83_spill] sm:$0xff] }
 0x209   : > { %7193 = vmatpush3.bf16.msra.mxu0 %v4544_v8  ;;  %v4547_v8 = vpack.c.bf16 %v6054_v57, %v6053_v53 }
 0x20a   : > { %7194 = vmatprep.subr.bf16.mxu0 %v4545_v61 }
 0x20c   : > { %7123 = vmatmul.mubr.bf16.gmra.mrb[8].mxu0 %v11339_v3  ;;  %v11346_v3 = vld [vmem:[#allocation109_spill] sm:$0xff] }
 0x20d   : > { %7126 = vmatprep.mubr.bf16.mxu0 %v11341_v54  ;;  %7195 = vmatpush3.bf16.msra.mxu0 %v4545_v61  ;;  %v4073_v61 = vrot.slane %v9794_v7, 1 }
 0x20e   : > { %7171 = vmatmul.mubr.msk.bf16.gmra.mrb[16].mxu1 %vm1162_vm1, %v11340_v1  ;;  %7196 = vmatprep.subr.bf16.mxu0 %v4546_v27 }
 0x20f   : > { %7174 = vmatprep.mubr.msk.bf16.mxu1 %vm1162_vm1, %v11342_v25 }
 0x211   : > { %7197 = vmatpush3.bf16.msra.mxu0 %v4546_v27  ;;  %v4077_v27 = vsel %vm497_vm0, %v4074_v11, %v4076_v44 }
 0x212   : > { %7198 = vmatprep.subr.bf16.mxu0 %v4547_v8 }
 0x214   : > { %7127 = vmatmul.mubr.bf16.gmra.mrb[12].mxu0 %v11343_v16 }
 0x215   : > { %7130 = vmatprep.mubr.bf16.mxu0 %v11298_v63  ;;  %7199 = vmatpush3.bf16.msra.mxu0 %v4547_v8  ;;  %v11345_v63 = vld [vmem:[#allocation6_spill] sm:$0xff] }
 0x216   : > { %7175 = vmatmul.mubr.msk.bf16.gmra.mrb[20].mxu1 %vm1162_vm1, %v11297_v10  ;;  %7200 = vmatprep.subr.bf16.mxu0 %v4548_v4  ;;  %v11344_v10 = vld [vmem:[#allocation95_spill] sm:$0xff] }
 0x217   : > { %7178 = vmatprep.mubr.msk.bf16.mxu1 %vm1162_vm1, %v11299_v31  ;;  %v4075_v31 = vsel %vm497_vm0, %v4073_v61, %v4074_v11 }
 0x218   : > { %v4299_v7 = vpack.c.bf16 %v4077_v27, %v4075_v31 }
 0x219   : > { %7201 = vmatpush3.bf16.msra.mxu0 %v4548_v4 }
 0x21c   : > { %7131 = vmatmul.mubr.bf16.gmra.mrb[16].mxu0 %v11300_v42  ;;  %v4064_v42 = vrot.slane %v9826_v56, 1 }
 0x21d   : > { %7134 = vmatprep.mubr.bf16.mxu0 %v11344_v10 }
 0x21e   : > { %7179 = vmatmul.mubr.msk.bf16.gmra.mrb[24].mxu1 %vm1162_vm1, %v11301_v58  ;;  %v4063_v58 = vrot.slane %v9823_v24, 1 }
 0x21f   : > { %7182 = vmatprep.mubr.msk.bf16.mxu1 %vm1162_vm1, %v11345_v63 }
 0x220   : > { %v4065_v53 = vsel %vm497_vm0, %v4063_v58, %v4064_v42 }
 0x224   : > { %7135 = vmatmul.mubr.bf16.gmra.mrb[20].mxu0 %v11346_v3 }
 0x225   : > { %7138 = vmatprep.mubr.bf16.mxu0 %v11305_v26  ;;  %v4067_v26 = vsel %vm497_vm0, %v4064_v42, %v4066_v13 }
 0x226   : > { %7183 = vmatmul.mubr.msk.bf16.gmra.mrb[28].mxu1 %vm1162_vm1, %v4299_v7 }
 0x227   : > { %7242 = vmatprep.mubr.msk.bf16.mxu1 %vm1162_vm1, %v11306_v6  ;;  %v4080_v6 = vpack.c.bf16 %v4067_v26, %v4065_v53 }
 0x22c   : > { %7139 = vmatmul.mubr.bf16.gmra.mrb[24].mxu0 %v11347_v48 }
 0x22d   : > { %7142 = vmatprep.mubr.bf16.mxu0 %v9570_v46 }
 0x22e   : > { %7243 = vmatmul.mubr.msk.bf16.vlgmr.msra.gmra.mrb[0].mxu1 %vm1162_vm1, %v8795_v28 }
 0x22f   : > { %7246 = vmatprep.mubr.msk.bf16.mxu1 %vm1162_vm1, %v8819_v33 }
 0x234   : > { %7143 = vmatmul.mubr.bf16.gmra.mrb[28].mxu0 %v4080_v6 }
 0x235   : > { %7202 = vmatprep.mubr.bf16.mxu0 %v8861_v21 }
 0x236   : > { %7247 = vmatmul.mubr.msk.bf16.gmra.mrb[4].mxu1 %vm1162_vm1, %v8855_v20 }
 0x237   : > { %7250 = vmatprep.mubr.msk.bf16.mxu1 %vm1162_vm1, %v8866_v62 }
 0x23c   : > { %7203 = vmatmul.mubr.bf16.vlgmr.msra.gmra.mrb[0].mxu0 %v8876_v19 }
 0x23d   : > { %7206 = vmatprep.mubr.bf16.mxu0 %v8908_v50 }
 0x23e   : > { %7251 = vmatmul.mubr.msk.bf16.gmra.mrb[8].mxu1 %vm1162_vm1, %v8881_v39 }
 0x23f   : > { %7254 = vmatprep.mubr.msk.bf16.mxu1 %vm1162_vm1, %v8915_v41 }
 0x244   : > { %7207 = vmatmul.mubr.bf16.gmra.mrb[4].mxu0 %v8919_v59 }
 0x245   : > { %7210 = vmatprep.mubr.bf16.mxu0 %v8951_v30 }
 0x246   : > { %7255 = vmatmul.mubr.msk.bf16.gmra.mrb[12].mxu1 %vm1162_vm1, %v8928_v43 }
 0x247   : > { %7258 = vmatprep.mubr.msk.bf16.mxu1 %vm1162_vm1, %v8959_v40 }
 0x24c   : > { %7211 = vmatmul.mubr.bf16.gmra.mrb[8].mxu0 %v8967_v49 }
 0x24d   : > { %7214 = vmatprep.mubr.bf16.mxu0 %v8991_v32 }
 0x24e   : > { %7259 = vmatmul.mubr.msk.bf16.gmra.mrb[16].mxu1 %vm1162_vm1, %v8975_v36  ;;  %v10016_v36 = vld [vmem:[%s10777_s5] ss:$0 sm:$0xff] }
 0x24f   : > { %7262 = vmatprep.mubr.msk.bf16.mxu1 %vm1162_vm1, %v8996_v5 }
 0x254   : > { %7215 = vmatmul.mubr.bf16.gmra.mrb[12].mxu0 %v9008_v18 }
 0x255   : > { %7218 = vmatprep.mubr.bf16.mxu0 %v9030_v15 }
 0x256   : > { %7263 = vmatmul.mubr.msk.bf16.gmra.mrb[20].mxu1 %vm1162_vm1, %v9025_v35 }
 0x257   : > { %7266 = vmatprep.mubr.msk.bf16.mxu1 %vm1162_vm1, %v9035_v23 }
 0x25c   : > { %7219 = vmatmul.mubr.bf16.gmra.mrb[16].mxu0 %v9053_v14 }
 0x25d   : > { %7222 = vmatprep.mubr.bf16.mxu0 %v9071_v47 }
 0x25e   : > { %7267 = vmatmul.mubr.msk.bf16.gmra.mrb[24].mxu1 %vm1162_vm1, %v9061_v34 }
 0x25f   : > { %7270 = vmatprep.mubr.msk.bf16.mxu1 %vm1162_vm1, %v9386_v17 }
 0x264   : > { %7223 = vmatmul.mubr.bf16.gmra.mrb[20].mxu0 %v9082_v37 }
 0x265   : > { %7226 = vmatprep.mubr.bf16.mxu0 %v9089_v52  ;;  %v10052_v52 = vld [vmem:[%s10775_s3] ss:$0 sm:$0xff] }
 0x266   : > { %7271 = vmatmul.mubr.msk.bf16.gmra.mrb[28].mxu1 %vm1162_vm1, %v4742_v38 }
 0x26c   : > { %7227 = vmatmul.mubr.bf16.gmra.mrb[24].mxu0 %v9100_v9 }
 0x26d   : > { %7230 = vmatprep.mubr.bf16.mxu0 %v9437_v45 }
 0x274   : > { %7231 = vmatmul.mubr.bf16.gmra.mrb[28].mxu0 %v4523_v60 }
 0x301   : > { %v7244_v62 = vpop.f32.mrb[0].mxu1 }
 0x302   : > { %v4793_v28 = vpop.f32.mrb[1].mxu1  ;;  %v10022_v19 = vadd.f32 %v7244_v62, %v10016_v36 }
 0x303   : > { %v10019_v33 = vadd.f32 %v10016_v36, %v4793_v28  ;;  %v7245_v20 = vpop.f32.mrb[2].mxu1 }
 0x304   : > { %v4796_v21 = vpop.f32.mrb[3].mxu1  ;;  %v10030_v41 = vadd.f32 %v7245_v20, %v10016_v36  ;;  %v5033_v30 = vsel %vm1162_vm1, %v10022_v19, 0.0 }
 0x305   : > { %v10025_v39 = vadd.f32 %v10016_v36, %v4796_v21  ;;  %v5030_v50 = vsel %vm1162_vm1, %v10019_v33, 0.0 }
 0x306   : > { %v5035_v5 = vsel %vm1162_vm1, %v10030_v41, 0.0 }
 0x307   : > { %v5031_v59 = vsel %vm1162_vm1, %v10025_v39, 0.0 }
 0x308   : > { %v5032_v43 = vadd.f32 %v5031_v59, %v5030_v50 }
 0x309   : > { %v7248_v40 = vpop.f32.mrb[4].mxu1 }
 0x30a   : > { %v5034_v49 = vadd.f32 %v5033_v30, %v5032_v43  ;;  %v4809_v32 = vpop.f32.mrb[5].mxu1  ;;  %v10042_v14 = vadd.f32 %v7248_v40, %v10016_v36 }
 0x30b   : > { %v10039_v18 = vadd.f32 %v10016_v36, %v4809_v32  ;;  %v7249_v35 = vpop.f32.mrb[6].mxu1 }
 0x30c   : > { %v5036_v15 = vadd.f32 %v5035_v5, %v5034_v49  ;;  %v4812_v23 = vpop.f32.mrb[7].mxu1  ;;  %v10055_v9 = vadd.f32 %v7249_v35, %v10016_v36  ;;  %v5041_v55 = vsel %vm1162_vm1, %v10042_v14, 0.0 }
 0x30d   : > { %v5037_v34 = vsel %vm1162_vm1, %v10039_v18, 0.0  ;;  %v10047_v47 = vadd.f32 %v10016_v36, %v4812_v23 }
 0x30e   : > { %v5038_v37 = vadd.f32 %v5037_v34, %v5036_v15  ;;  %v5043_v0 = vsel %vm1162_vm1, %v10055_v9, 0.0 }
 0x30f   : > { %v5039_v17 = vsel %vm1162_vm1, %v10047_v47, 0.0  ;;  %v7204_v46 = vpop.f32.mrb[0].mxu0 }
 0x310   : > { %v5040_v45 = vadd.f32 %v5039_v17, %v5038_v37  ;;  %v10062_v2 = vadd.f32 %v7204_v46, %v10052_v52  ;;  %v4583_v24 = vpop.f32.mrb[1].mxu0 }
 0x311   : > { %v7252_v38 = vpop.f32.mrb[8].mxu1  ;;  %v7205_v22 = vpop.f32.mrb[2].mxu0  ;;  %v10075_v12 = vadd.f32 %v10052_v52, %v4583_v24 }
 0x312   : > { %v5042_v56 = vadd.f32 %v5041_v55, %v5040_v45  ;;  %v4825_v51 = vpop.f32.mrb[9].mxu1  ;;  %5369 = vrot.lane.b32.xlu0 %v10062_v2, %s7806_s12  ;;  %v4586_v1 = vpop.f32.mrb[3].mxu0  ;;  %v10072_v54 = vadd.f32 %v7252_v38, %v10016_v36  ;;  %v10097_v27 = vadd.f32 %v7205_v22, %v10052_v52 }
 0x313   : > { %v10067_v60 = vadd.f32 %v10016_v36, %v4825_v51  ;;  %v7253_v57 = vpop.f32.mrb[10].mxu1  ;;  %v10083_v16 = vadd.f32 %v10052_v52, %v4586_v1 }
 0x314   : > { %v5044_v25 = vadd.f32 %v5043_v0, %v5042_v56  ;;  %v4828_v8 = vpop.f32.mrb[11].mxu1  ;;  %v10086_v11 = vadd.f32 %v7253_v57, %v10016_v36  ;;  %v5049_v31 = vsel %vm1162_vm1, %v10072_v54, 0.0 }
 0x315   : > { %v5045_v29 = vsel %vm1162_vm1, %v10067_v60, 0.0  ;;  %v10080_v4 = vadd.f32 %v10016_v36, %v4828_v8  ;;  %5367 = vrot.lane.b32.xlu1 %v10083_v16, %s7806_s12 }
 0x316   : > { %v5046_v61 = vadd.f32 %v5045_v29, %v5044_v25  ;;  %5365 = vrot.lane.b32.xlu0 %v10075_v12, %s7806_s12  ;;  %v5051_v48 = vsel %vm1162_vm1, %v10086_v11, 0.0 }
 0x317   : > { %v5047_v44 = vsel %vm1162_vm1, %v10080_v4, 0.0  ;;  %v7208_v63 = vpop.f32.mrb[4].mxu0 }
 0x318   : > { %v5048_v10 = vadd.f32 %v5047_v44, %v5046_v61  ;;  %v4599_v3 = vpop.f32.mrb[5].mxu0  ;;  %v10107_v20 = vadd.f32 %v7208_v63, %v10052_v52 }
 0x319   : > { %v7256_v7 = vpop.f32.mrb[12].mxu1  ;;  %v7209_v13 = vpop.f32.mrb[6].mxu0  ;;  %v10127_v35 = vadd.f32 %v10052_v52, %v4599_v3 }
 0x31a   : > { %v5050_v58 = vadd.f32 %v5049_v31, %v5048_v10  ;;  %v4841_v42 = vpop.f32.mrb[13].mxu1  ;;  %5371 = vrot.lane.b32.xlu0 %v10097_v27, %s7806_s12  ;;  %v4602_v6 = vpop.f32.mrb[7].mxu0  ;;  %v10110_v21 = vadd.f32 %v7256_v7, %v10016_v36  ;;  %v10139_v51 = vadd.f32 %v7209_v13, %v10052_v52 }
 0x31b   : > { %v10102_v53 = vadd.f32 %v10016_v36, %v4841_v42  ;;  %v7257_v26 = vpop.f32.mrb[14].mxu1  ;;  %v10159_v44 = vadd.f32 %v10052_v52, %v4602_v6 }
 0x31c   : > { %v5052_v62 = vadd.f32 %v5051_v48, %v5050_v58  ;;  %v4844_v28 = vpop.f32.mrb[15].mxu1  ;;  %v10118_v30 = vadd.f32 %v7257_v26, %v10016_v36  ;;  %v5057_v5 = vsel %vm1162_vm1, %v10110_v21, 0.0 }
 0x31d   : > { %v5053_v50 = vsel %vm1162_vm1, %v10102_v53, 0.0  ;;  %v10115_v59 = vadd.f32 %v10016_v36, %v4844_v28 }
 0x31e   : > { %v5054_v43 = vadd.f32 %v5053_v50, %v5052_v62  ;;  %5377 = vrot.lane.b32.xlu0 %v10107_v20, %s7806_s12  ;;  %v5059_v45 = vsel %vm1162_vm1, %v10118_v30, 0.0 }
 0x31f   : > { %v5055_v40 = vsel %vm1162_vm1, %v10115_v59, 0.0  ;;  %v7212_v32 = vpop.f32.mrb[8].mxu0 }
 0x320   : > { %v5056_v49 = vadd.f32 %v5055_v40, %v5054_v43  ;;  %v4615_v23 = vpop.f32.mrb[9].mxu0  ;;  %v10177_v28 = vadd.f32 %v7212_v32, %v10052_v52 }
 0x321   : > { %v7260_v15 = vpop.f32.mrb[16].mxu1  ;;  %v7213_v17 = vpop.f32.mrb[10].mxu0 }
 0x322   : > { %v5058_v34 = vadd.f32 %v5057_v5, %v5056_v49  ;;  %v4857_v37 = vpop.f32.mrb[17].mxu1  ;;  %5373 = vrot.lane.b32.xlu0 %v10127_v35, %s7806_s12  ;;  %v10136_v38 = vpop.f32.mrb[11].mxu0  ;;  %v10142_v22 = vadd.f32 %v7260_v15, %v10016_v36  ;;  %11348 = vst [vmem:[#allocation10_spill] sm:$0xff] %v10177_v28 }
 0x323   : > { %v10132_v46 = vadd.f32 %v10016_v36, %v4857_v37  ;;  %v7261_v55 = vpop.f32.mrb[18].mxu1  ;;  %v10195_v37 = vadd.f32 %v10052_v52, %v4615_v23 }
 0x324   : > { %v5060_v24 = vadd.f32 %v5059_v45, %v5058_v34  ;;  %v4860_v56 = vpop.f32.mrb[19].mxu1  ;;  %v10150_v25 = vadd.f32 %v7261_v55, %v10016_v36  ;;  %v5065_v10 = vsel %vm1162_vm1, %v10142_v22, 0.0 }
 0x325   : > { %v5061_v0 = vsel %vm1162_vm1, %v10132_v46, 0.0  ;;  %v10147_v57 = vadd.f32 %v10016_v36, %v4860_v56  ;;  %11349 = vst [vmem:[#allocation11_spill] sm:$0xff] %v10195_v37 }
 0x326   : > { %v5062_v1 = vadd.f32 %v5061_v0, %v5060_v24  ;;  %5379 = vrot.lane.b32.xlu0 %v10139_v51, %s7806_s12  ;;  %v5067_v42 = vsel %vm1162_vm1, %v10150_v25, 0.0 }
 0x327   : > { %v5063_v8 = vsel %vm1162_vm1, %v10147_v57, 0.0  ;;  %v10156_v61 = vpop.f32.mrb[12].mxu0 }
 0x328   : > { %v5064_v29 = vadd.f32 %v5063_v8, %v5062_v1  ;;  %v10163_v31 = vpop.f32.mrb[13].mxu0 }
 0x329   : > { %v7264_v63 = vpop.f32.mrb[20].mxu1  ;;  %v10165_v58 = vpop.f32.mrb[14].mxu0 }
 0x32a   : > { %v5066_v7 = vadd.f32 %v5065_v10, %v5064_v29  ;;  %v4873_v3 = vpop.f32.mrb[21].mxu1  ;;  %5375 = vrot.lane.b32.xlu0 %v10159_v44, %s7806_s12  ;;  %v10174_v26 = vpop.f32.mrb[15].mxu0  ;;  %v10180_v50 = vadd.f32 %v7264_v63, %v10016_v36 }
 0x32b   : > { %v10170_v13 = vadd.f32 %v10016_v36, %v4873_v3  ;;  %v7265_v48 = vpop.f32.mrb[22].mxu1 }
 0x32c   : > { %v5068_v6 = vadd.f32 %v5067_v42, %v5066_v7  ;;  %v4876_v62 = vpop.f32.mrb[23].mxu1  ;;  %v10188_v5 = vadd.f32 %v7265_v48, %v10016_v36  ;;  %v5073_v45 = vsel %vm1162_vm1, %v10180_v50, 0.0  ;;  %v10214_v7 = vadd.f32 %v7213_v17, %v10052_v52 }
 0x32d   : > { %v5069_v43 = vsel %vm1162_vm1, %v10170_v13, 0.0  ;;  %v10185_v40 = vadd.f32 %v10016_v36, %v4876_v62 }
 0x32e   : > { %v5070_v49 = vadd.f32 %v5069_v43, %v5068_v6  ;;  %5385 = vrot.lane.b32.xlu0 %v10177_v28, %s7806_s12  ;;  %v5075_v29 = vsel %vm1162_vm1, %v10188_v5, 0.0  ;;  %11350 = vst [vmem:[#allocation12_spill] sm:$0xff] %v10214_v7 }
 0x32f   : > { %v5071_v15 = vsel %vm1162_vm1, %v10185_v40, 0.0  ;;  %v7220_v34 = vpop.f32.mrb[16].mxu0 }
 0x330   : > { %v5072_v32 = vadd.f32 %v5071_v15, %v5070_v49  ;;  %v10200_v55 = vadd.f32 %v7220_v34, %v10052_v52  ;;  %v10202_v56 = vpop.f32.mrb[17].mxu0 }
 0x331   : > { %v7268_v24 = vpop.f32.mrb[24].mxu1  ;;  %v7221_v8 = vpop.f32.mrb[18].mxu0 }
 0x332   : > { %v5074_v0 = vadd.f32 %v5073_v45, %v5072_v32  ;;  %v4889_v1 = vpop.f32.mrb[25].mxu1  ;;  %5381 = vrot.lane.b32.xlu0 %v10195_v37, %s7806_s12  ;;  %5401 = vrot.lane.b32.xlu1 %v10200_v55, %s7806_s12  ;;  %v4650_v63 = vpop.f32.mrb[19].mxu0  ;;  %v10217_v48 = vadd.f32 %v7268_v24, %v10016_v36  ;;  %v10222_v62 = vadd.f32 %v7221_v8, %v10052_v52 }
 0x333   : > { %v10207_v10 = vadd.f32 %v10016_v36, %v4889_v1  ;;  %v7269_v23 = vpop.f32.mrb[26].mxu1  ;;  %v10238_v45 = vadd.f32 %v10052_v52, %v10136_v38 }
 0x334   : > { %v5076_v3 = vadd.f32 %v5075_v29, %v5074_v0  ;;  %v4892_v42 = vpop.f32.mrb[27].mxu1  ;;  %v10228_v15 = vadd.f32 %v7269_v23, %v10016_v36  ;;  %v5081_v24 = vsel %vm1162_vm1, %v10217_v48, 0.0  ;;  %v10243_v0 = vadd.f32 %v10052_v52, %v4650_v63 }
 0x335   : > { %v5077_v6 = vsel %vm1162_vm1, %v10207_v10, 0.0  ;;  %v10225_v43 = vadd.f32 %v10016_v36, %v4892_v42  ;;  %11351 = vst [vmem:[#allocation13_spill] sm:$0xff] %v10238_v45  ;;  %v10256_v63 = vadd.f32 %v10156_v61, %v10052_v52 }
 0x336   : > { %v5078_v49 = vadd.f32 %v5077_v6, %v5076_v3  ;;  %5387 = vrot.lane.b32.xlu0 %v10214_v7, %s7806_s12  ;;  %5403 = vrot.lane.b32.xlu1 %v10222_v62, %s7806_s12  ;;  %v5083_v42 = vsel %vm1162_vm1, %v10228_v15, 0.0 }
 0x337   : > { %v5079_v17 = vsel %vm1162_vm1, %v10225_v43, 0.0  ;;  %v7224_v34 = vpop.f32.mrb[20].mxu0 }
 0x338   : > { %v5080_v32 = vadd.f32 %v5079_v17, %v5078_v49  ;;  %v4663_v8 = vpop.f32.mrb[21].mxu0 }
 0x339   : > { %v7272_v1 = vpop.f32.mrb[28].mxu1  ;;  %v7225_v3 = vpop.f32.mrb[22].mxu0 }
 0x33a   : > { %v5082_v29 = vadd.f32 %v5081_v24, %v5080_v32  ;;  %v4905_v23 = vpop.f32.mrb[29].mxu1  ;;  %5383 = vrot.lane.b32.xlu0 %v10238_v45, %s7806_s12  ;;  %5399 = vrot.lane.b32.xlu1 %v10243_v0, %s7806_s12  ;;  %v4666_v38 = vpop.f32.mrb[23].mxu0  ;;  %v10259_v24 = vadd.f32 %v7224_v34, %v10052_v52 }
 0x33b   : > { %v10248_v6 = vadd.f32 %v10016_v36, %v4905_v23  ;;  %v7273_v49 = vpop.f32.mrb[30].mxu1  ;;  %v10262_v23 = vadd.f32 %v7272_v1, %v10016_v36 }
 0x33c   : > { %v5084_v17 = vadd.f32 %v5083_v42, %v5082_v29  ;;  %v4908_v32 = vpop.f32.mrb[31].mxu1  ;;  %11352 = vst [vmem:[#allocation89_spill] sm:$0xff] %v10259_v24  ;;  %v10270_v37 = vadd.f32 %v7273_v49, %v10016_v36  ;;  %v10280_v29 = vadd.f32 %v10052_v52, %v10163_v31 }
 0x33d   : > { %v5085_v7 = vsel %vm1162_vm1, %v10248_v6, 0.0  ;;  %v10267_v45 = vadd.f32 %v10016_v36, %v4908_v32  ;;  %v10285_v36 = vadd.f32 %v10052_v52, %v4663_v8 }
 0x33e   : > { %v5086_v28 = vadd.f32 %v5085_v7, %v5084_v17  ;;  %5393 = vrot.lane.b32.xlu0 %v10256_v63, %s7806_s12  ;;  %5409 = vrot.lane.b32.xlu1 %v10259_v24, %s7806_s12  ;;  %11353 = vst [vmem:[#allocation96_spill] sm:$0xff] %v10280_v29  ;;  %v5089_v7 = vsel %vm1162_vm1, %v10262_v23, 0.0 }
 0x33f   : > { %v5087_v61 = vsel %vm1162_vm1, %v10267_v45, 0.0  ;;  %v7228_v1 = vpop.f32.mrb[24].mxu0  ;;  %11354 = vst [vmem:[#allocation15_spill] sm:$0xff] %v10285_v36 }
 0x340   : > { %v5088_v34 = vadd.f32 %v5087_v61, %v5086_v28  ;;  %v4679_v42 = vpop.f32.mrb[25].mxu0  ;;  %v5091_v28 = vsel %vm1162_vm1, %v10270_v37, 0.0 }
 0x341   : > { %v10288_v17 = vadd.f32 %v10052_v52, %v4679_v42  ;;  %v7229_v32 = vpop.f32.mrb[26].mxu0  ;;  %v10307_v42 = vadd.f32 %v7225_v3, %v10052_v52 }
 0x342   : > { %v5090_v49 = vadd.f32 %v5089_v7, %v5088_v34  ;;  %v10293_v61 = vadd.f32 %v7229_v32, %v10052_v52  ;;  %5389 = vrot.lane.b32.xlu0 %v10280_v29, %s7806_s12  ;;  %5405 = vrot.lane.b32.xlu1 %v10285_v36, %s7806_s12  ;;  %v4682_v31 = vpop.f32.mrb[27].mxu0  ;;  %v10304_v7 = vadd.f32 %v10052_v52, %v10174_v26 }
 0x343   : > { %11355 = vst [vmem:[#allocation16_spill] sm:$0xff] %v10288_v17  ;;  %v10300_v34 = vadd.f32 %v10052_v52, %v4682_v31  ;;  %11359 = vst [vmem:[#allocation22_spill] sm:$0xff] %v10307_v42 }
 0x344   : > { %11356 = vst [vmem:[#allocation18_spill] sm:$0xff] %v10293_v61  ;;  %v5092_v8 = vadd.f32 %v5091_v28, %v5090_v49  ;;  %11358 = vst [vmem:[#allocation21_spill] sm:$0xff] %v10304_v7  ;;  %v10315_v49 = vadd.f32 %v10052_v52, %v10202_v56  ;;  %v10318_v28 = vadd.f32 %v10052_v52, %v4666_v38 }
 0x345   : > { %11357 = vst [vmem:[#allocation20_spill] sm:$0xff] %v10300_v34 }
 0x346   : > { %v5093_v32 = vrot.slane %v5092_v8, 4  ;;  %5391 = vrot.lane.b32.xlu0 %v10304_v7, %s7806_s12  ;;  %5411 = vrot.lane.b32.xlu1 %v10307_v42, %s7806_s12  ;;  %11360 = vst [vmem:[#allocation24_spill] sm:$0xff] %v10318_v28 }
 0x347   : > { %v7232_v36 = vpop.f32.mrb[28].mxu0 }
 0x348   : > { %v5094_v29 = vadd.f32 %v5093_v32, %v5092_v8  ;;  %v10321_v26 = vadd.f32 %v7232_v36, %v10052_v52  ;;  %v4695_v3 = vpop.f32.mrb[29].mxu0  ;;  %v10338_v8 = vadd.f32 %v10165_v58, %v10052_v52  ;;  %v10341_v32 = vadd.f32 %v7228_v1, %v10052_v52 }
 0x349   : > { %v10324_v24 = vadd.f32 %v10052_v52, %v4695_v3  ;;  %v7233_v7 = vpop.f32.mrb[30].mxu0 }
 0x34a   : > { %v5095_v31 = vrot.slane %v5094_v29, 2  ;;  %v10327_v42 = vadd.f32 %v7233_v7, %v10052_v52  ;;  %5397 = vrot.lane.b32.xlu0 %v10315_v49, %s7806_s12  ;;  %5407 = vrot.lane.b32.xlu1 %v10318_v28, %s7806_s12  ;;  %v4698_v56 = vpop.f32.mrb[31].mxu0  ;;  %11362 = vst [vmem:[#allocation26_spill] sm:$0xff] %v10341_v32 }
 0x34b   : > { %v10334_v36 = vadd.f32 %v10052_v52, %v4698_v56 }
 0x34c   : > { %v5096_v38 = vadd.f32 %v5095_v31, %v5094_v29 }
 0x34d   : > { %11361 = vst [vmem:[#allocation25_spill] sm:$0xff] %v10334_v36 }
 0x34e   : > { %v5097_v7 = vrot.slane %v5096_v38, 1  ;;  %5395 = vrot.lane.b32.xlu0 %v10338_v8, %s7806_s12  ;;  %5417 = vrot.lane.b32.xlu1 %v10341_v32, %s7806_s12 }
 0x350   : > { %v5098_v3 = vadd.f32 %v5097_v7, %v5096_v38 }
 0x352   : > { %v5100_v28 = vmul.f32 0.00390625, %v5098_v3  ;;  %5413 = vrot.lane.b32.xlu1 %v10288_v17, %s7806_s12 }
 0x354   : > { %v10350_v29 = vsub.f32 %v10080_v4, %v5100_v28  ;;  %v10353_v58 = vsub.f32 %v10086_v11, %v5100_v28  ;;  %v10356_v52 = vsub.f32 %v10102_v53, %v5100_v28  ;;  %v10359_v1 = vsub.f32 %v10115_v59, %v5100_v28 }
 0x355   : > { %v10362_v31 = vsub.f32 %v10110_v21, %v5100_v28  ;;  %v10365_v56 = vsub.f32 %v10118_v30, %v5100_v28  ;;  %v10370_v4 = vsub.f32 %v10132_v46, %v5100_v28  ;;  %v10373_v11 = vsub.f32 %v10147_v57, %v5100_v28 }
 0x356   : > { %11363 = vst [vmem:[#allocation27_spill] sm:$0xff] %v10350_v29  ;;  %11364 = vst [vmem:[#allocation30_spill] sm:$0xff] %v10353_v58  ;;  %5419 = vrot.lane.b32.xlu1 %v10293_v61, %s7806_s12  ;;  %v10376_v53 = vsub.f32 %v10142_v22, %v5100_v28  ;;  %v10379_v59 = vsub.f32 %v10150_v25, %v5100_v28  ;;  %v10382_v21 = vsub.f32 %v10170_v13, %v5100_v28 }
 0x357   : > { %11365 = vst [vmem:[#allocation94_spill] sm:$0xff] %v10356_v52  ;;  %11366 = vst [vmem:[#allocation31_spill] sm:$0xff] %v10359_v1  ;;  %v10385_v30 = vsub.f32 %v10185_v40, %v5100_v28  ;;  %v10388_v38 = vsub.f32 %v10180_v50, %v5100_v28  ;;  %v10391_v46 = vsub.f32 %v10188_v5, %v5100_v28 }
 0x358   : > { %v10394_v57 = vsub.f32 %v10207_v10, %v5100_v28  ;;  %v10397_v22 = vsub.f32 %v10225_v43, %v5100_v28  ;;  %v10400_v25 = vsub.f32 %v10217_v48, %v5100_v28  ;;  %v10403_v13 = vsub.f32 %v10228_v15, %v5100_v28 }
 0x359   : > { %11367 = vst [vmem:[#allocation97_spill] sm:$0xff] %v10391_v46  ;;  %v10406_v40 = vsub.f32 %v10248_v6, %v5100_v28  ;;  %v10409_v50 = vsub.f32 %v10267_v45, %v5100_v28  ;;  %v10412_v5 = vsub.f32 %v10262_v23, %v5100_v28  ;;  %v10415_v10 = vsub.f32 %v10270_v37, %v5100_v28 }
 0x35a   : > { %11368 = vst [vmem:[#allocation35_spill] sm:$0xff] %v10394_v57  ;;  %11369 = vst [vmem:[#allocation37_spill] sm:$0xff] %v10397_v22  ;;  %5415 = vrot.lane.b32.xlu1 %v10300_v34, %s7806_s12  ;;  %v10420_v48 = vsub.f32 %v10019_v33, %v5100_v28  ;;  %v10423_v43 = vsub.f32 %v10025_v39, %v5100_v28  ;;  %v10426_v15 = vsub.f32 %v10022_v19, %v5100_v28 }
 0x35b   : > { %11370 = vst [vmem:[#allocation38_spill] sm:$0xff] %v10400_v25  ;;  %11371 = vst [vmem:[#allocation41_spill] sm:$0xff] %v10403_v13  ;;  %v10431_v45 = vsub.f32 %v10030_v41, %v5100_v28  ;;  %v10438_v33 = vsub.f32 %v10039_v18, %v5100_v28  ;;  %v10445_v19 = vsub.f32 %v10047_v47, %v5100_v28 }
 0x35c   : > { %11372 = vst [vmem:[#allocation45_spill] sm:$0xff] %v10409_v50  ;;  %v5133_v37 = vmul.f32 %v10420_v48, %v10420_v48  ;;  %v5134_v6 = vmul.f32 %v10423_v43, %v10423_v43  ;;  %v5135_v39 = vmul.f32 %v10426_v15, %v10426_v15  ;;  %v10452_v18 = vsub.f32 %v10042_v14, %v5100_v28 }
 0x35d   : > { %v5136_v41 = vmul.f32 %v10431_v45, %v10431_v45  ;;  %v5137_v61 = vmul.f32 %v10438_v33, %v10438_v33  ;;  %v10460_v47 = vsub.f32 %v10055_v9, %v5100_v28  ;;  %v10466_v14 = vsub.f32 %v10067_v60, %v5100_v28 }
 0x35e   : > { %5425 = vrot.lane.b32.xlu1 %v10321_v26, %s7806_s12  ;;  %v5165_v23 = vsel %vm1162_vm1, %v5133_v37, 0.0  ;;  %v5166_v7 = vsel %vm1162_vm1, %v5134_v6, 0.0  ;;  %v5168_v32 = vsel %vm1162_vm1, %v5135_v39, 0.0  ;;  %v5138_v37 = vmul.f32 %v10445_v19, %v10445_v19 }
 0x35f   : > { %v5167_v3 = vadd.f32 %v5166_v7, %v5165_v23  ;;  %v5170_v6 = vsel %vm1162_vm1, %v5136_v41, 0.0  ;;  %v5139_v7 = vmul.f32 %v10452_v18, %v10452_v18  ;;  %v5140_v9 = vmul.f32 %v10460_v47, %v10460_v47 }
 0x360   : > { %v5141_v60 = vmul.f32 %v10466_v14, %v10466_v14 }
 0x361   : > { %v5169_v34 = vadd.f32 %v5168_v32, %v5167_v3  ;;  %v5172_v32 = vsel %vm1162_vm1, %v5137_v61, 0.0  ;;  %v5174_v3 = vsel %vm1162_vm1, %v5138_v37, 0.0  ;;  %v5176_v41 = vsel %vm1162_vm1, %v5139_v7, 0.0 }
 0x362   : > { %5421 = vrot.lane.b32.xlu1 %v10324_v24, %s7806_s12  ;;  %v5142_v61 = vmul.f32 %v10350_v29, %v10350_v29  ;;  %v5180_v37 = vsel %vm1162_vm1, %v5141_v60, 0.0  ;;  %v5147_v60 = vmul.f32 %v10362_v31, %v10362_v31 }
 0x363   : > { %v5171_v23 = vadd.f32 %v5170_v6, %v5169_v34  ;;  %v10477_v34 = vsub.f32 %v10072_v54, %v5100_v28  ;;  %v5144_v54 = vmul.f32 %v10353_v58, %v10353_v58 }
 0x364   : > { %v5182_v28 = vsel %vm1162_vm1, %v5142_v61, 0.0  ;;  %v5148_v61 = vmul.f32 %v10365_v56, %v10365_v56 }
 0x365   : > { %v5173_v39 = vadd.f32 %v5172_v32, %v5171_v23  ;;  %11373 = vst [vmem:[#allocation46_spill] sm:$0xff] %v10477_v34  ;;  %v5178_v23 = vsel %vm1162_vm1, %v5140_v9, 0.0  ;;  %v5146_v9 = vmul.f32 %v10359_v1, %v10359_v1  ;;  %v5158_v1 = vmul.f32 %v10397_v22, %v10397_v22 }
 0x366   : > { %5427 = vrot.lane.b32.xlu1 %v10327_v42, %s7806_s12 }
 0x367   : > { %v5175_v17 = vadd.f32 %v5174_v3, %v5173_v39 }
 0x369   : > { %v5177_v6 = vadd.f32 %v5176_v41, %v5175_v17  ;;  %v5145_v17 = vmul.f32 %v10356_v52, %v10356_v52  ;;  %v5160_v52 = vmul.f32 %v10403_v13, %v10403_v13  ;;  %v5164_v13 = vmul.f32 %v10415_v10, %v10415_v10 }
 0x36a   : > { %5423 = vrot.lane.b32.xlu1 %v10334_v36, %s7806_s12  ;;  %v5143_v36 = vmul.f32 %v10477_v34, %v10477_v34 }
 0x36b   : > { %v5179_v32 = vadd.f32 %v5178_v23, %v5177_v6  ;;  %v5186_v6 = vsel %vm1162_vm1, %v5144_v54, 0.0  ;;  %v5150_v54 = vmul.f32 %v10373_v11, %v10373_v11 }
 0x36c   : > { %v5184_v7 = vsel %vm1162_vm1, %v5143_v36, 0.0  ;;  %v5149_v36 = vmul.f32 %v10370_v4, %v10370_v4 }
 0x36d   : > { %v5181_v39 = vadd.f32 %v5180_v37, %v5179_v32  ;;  %v5188_v32 = vsel %vm1162_vm1, %v5145_v17, 0.0  ;;  %v5151_v17 = vmul.f32 %v10376_v53, %v10376_v53 }
 0x36f   : > { %v5183_v3 = vadd.f32 %v5182_v28, %v5181_v39  ;;  %v5190_v39 = vsel %vm1162_vm1, %v5146_v9, 0.0  ;;  %v5152_v9 = vmul.f32 %v10379_v59, %v10379_v59 }
 0x371   : > { %v5185_v41 = vadd.f32 %v5184_v7, %v5183_v3  ;;  %v5192_v3 = vsel %vm1162_vm1, %v5147_v60, 0.0 }
 0x373   : > { %v5187_v23 = vadd.f32 %v5186_v6, %v5185_v41  ;;  %v5194_v41 = vsel %vm1162_vm1, %v5148_v61, 0.0  ;;  %v5200_v61 = vsel %vm1162_vm1, %v5151_v17, 0.0 }
 0x375   : > { %v5189_v37 = vadd.f32 %v5188_v32, %v5187_v23  ;;  %v5196_v23 = vsel %vm1162_vm1, %v5149_v36, 0.0  ;;  %v5202_v36 = vsel %vm1162_vm1, %v5152_v9, 0.0  ;;  %v5157_v9 = vmul.f32 %v10394_v57, %v10394_v57 }
 0x377   : > { %v5191_v28 = vadd.f32 %v5190_v39, %v5189_v37  ;;  %v5198_v37 = vsel %vm1162_vm1, %v5150_v54, 0.0  ;;  %v5155_v54 = vmul.f32 %v10388_v38, %v10388_v38 }
 0x379   : > { %v5193_v7 = vadd.f32 %v5192_v3, %v5191_v28  ;;  %v5153_v28 = vmul.f32 %v10382_v21, %v10382_v21 }
 0x37b   : > { %v5195_v6 = vadd.f32 %v5194_v41, %v5193_v7  ;;  %v5154_v7 = vmul.f32 %v10385_v30, %v10385_v30 }
 0x37d   : > { %v5197_v32 = vadd.f32 %v5196_v23, %v5195_v6  ;;  %v5204_v23 = vsel %vm1162_vm1, %v5153_v28, 0.0  ;;  %v5206_v17 = vsel %vm1162_vm1, %v5154_v7, 0.0  ;;  %v5159_v7 = vmul.f32 %v10400_v25, %v10400_v25 }
 0x37e   : > { %v5162_v25 = vmul.f32 %v10409_v50, %v10409_v50 }
 0x37f   : > { %v5199_v39 = vadd.f32 %v5198_v37, %v5197_v32  ;;  %v5156_v37 = vmul.f32 %v10391_v46, %v10391_v46 }
 0x381   : > { %v5201_v3 = vadd.f32 %v5200_v61, %v5199_v39  ;;  %v5210_v28 = vsel %vm1162_vm1, %v5156_v37, 0.0  ;;  %v5161_v37 = vmul.f32 %v10406_v40, %v10406_v40 }
 0x383   : > { %v5203_v41 = vadd.f32 %v5202_v36, %v5201_v3  ;;  %v5208_v3 = vsel %vm1162_vm1, %v5155_v54, 0.0  ;;  %v5214_v54 = vsel %vm1162_vm1, %v5158_v1, 0.0  ;;  %v5220_v1 = vsel %vm1162_vm1, %v5161_v37, 0.0 }
 0x384   : > { %v10515_v60 = vpop.permute.xlu0 %5369 }
 0x385   : > { %v5205_v32 = vadd.f32 %v5204_v23, %v5203_v41 }
 0x387   : > { %v5207_v39 = vadd.f32 %v5206_v17, %v5205_v32  ;;  %v5212_v32 = vsel %vm1162_vm1, %v5157_v9, 0.0  ;;  %v5218_v9 = vsel %vm1162_vm1, %v5160_v52, 0.0  ;;  %v5226_v52 = vsel %vm1162_vm1, %v5164_v13, 0.0  ;;  %v5368_v34 = vpop.permute.xlu1 %5367 }
 0x388   : > { %v10523_v6 = vpop.permute.xlu0 %5365 }
 0x389   : > { %v5209_v36 = vadd.f32 %v5208_v3, %v5207_v39 }
 0x38b   : > { %v5211_v41 = vadd.f32 %v5210_v28, %v5209_v36  ;;  %v5216_v36 = vsel %vm1162_vm1, %v5159_v7, 0.0  ;;  %v5222_v7 = vsel %vm1162_vm1, %v5162_v25, 0.0 }
 0x38c   : > { %v10531_v61 = vpop.permute.xlu0 %5371 }
 0x38d   : > { %v5213_v17 = vadd.f32 %v5212_v32, %v5211_v41  ;;  %v5163_v32 = vmul.f32 %v10412_v5, %v10412_v5 }
 0x38f   : > { %v5215_v39 = vadd.f32 %v5214_v54, %v5213_v17 }
 0x390   : > { %v10539_v23 = vpop.permute.xlu0 %5377 }
 0x391   : > { %v5217_v28 = vadd.f32 %v5216_v36, %v5215_v39  ;;  %v5224_v36 = vsel %vm1162_vm1, %v5163_v32, 0.0 }
 0x393   : > { %v5219_v41 = vadd.f32 %v5218_v9, %v5217_v28 }
 0x394   : > { %v10547_v3 = vpop.permute.xlu0 %5373 }
 0x395   : > { %v5221_v17 = vadd.f32 %v5220_v1, %v5219_v41 }
 0x397   : > { %v5223_v39 = vadd.f32 %v5222_v7, %v5221_v17 }
 0x398   : > { %v10558_v54 = vpop.permute.xlu0 %5379 }
 0x399   : > { %v5225_v22 = vadd.f32 %v5224_v36, %v5223_v39 }
 0x39b   : > { %v5227_v28 = vadd.f32 %v5226_v52, %v5225_v22 }
 0x39c   : > { %v10565_v9 = vpop.permute.xlu0 %5375 }
 0x39d   : > { %v5228_v58 = vrot.slane %v5227_v28, 4 }
 0x39f   : > { %v5229_v57 = vadd.f32 %v5228_v58, %v5227_v28 }
 0x3a0   : > { %v10567_v41 = vpop.permute.xlu0 %5385 }
 0x3a1   : > { %v5230_v37 = vrot.slane %v5229_v57, 2  ;;  %11374 = vst [vmem:[#allocation98_spill] sm:$0xff] %v10567_v41 }
 0x3a3   : > { %v5231_v1 = vadd.f32 %v5230_v37, %v5229_v57 }
 0x3a4   : > { %v10569_v50 = vpop.permute.xlu0 %5381  ;;  %v10571_v25 = vpop.permute.xlu1 %5401 }
 0x3a5   : > { %v5232_v46 = vrot.slane %v5231_v1, 1 }
 0x3a7   : > { %v5233_v29 = vadd.f32 %v5232_v46, %v5231_v1  ;;  %v5270_v1 = vadd.f32 1.0, %v10083_v16 }
 0x3a8   : > { %v10573_v7 = vpop.permute.xlu0 %5387  ;;  %v10575_v22 = vpop.permute.xlu1 %5403 }
 0x3a9   : > { %v5234_v32 = vmul.f32 0.00390625, %v5233_v29  ;;  %11375 = vst [vmem:[#allocation48_spill] sm:$0xff] %v10573_v7  ;;  %v5269_v29 = vadd.f32 1.0, %v10075_v12 }
 0x3ab   : > { %v5235_v17 = vadd.f32 1e-05, %v5234_v32 }
 0x3ac   : > { %v10577_v13 = vpop.permute.xlu0 %5383  ;;  %v5400_v58 = vpop.permute.xlu1 %5399 }
 0x3ad   : > { %7796 = vrsqrt.f32 %v5235_v17  ;;  %11376 = vst [vmem:[#allocation49_spill] sm:$0xff] %v10577_v13  ;;  %v5283_v17 = vadd.f32 1.0, %v10256_v63  ;;  %v5272_v63 = vadd.f32 1.0, %v10097_v27 }
 0x3b0   : > { %v10579_v39 = vpop.permute.xlu0 %5393  ;;  %v10581_v57 = vpop.permute.xlu1 %5409 }
 0x3b1   : > { %11377 = vst [vmem:[#allocation99_spill] sm:$0xff] %v10579_v39 }
 0x3b4   : > { %v10590_v28 = vpop.permute.xlu0 %5389  ;;  %v10592_v37 = vpop.permute.xlu1 %5405 }
 0x3b5   : > { %11378 = vst [vmem:[#allocation100_spill] sm:$0xff] %v10590_v28 }
 0x3b7   : > { %v10583_v36 = vpop.eup %7796 }
 0x3b8   : > { %v5237_v46 = vmul.f32 %v10583_v36, %v10420_v48  ;;  %v5238_v52 = vmul.f32 %v10583_v36, %v10423_v43  ;;  %v5251_v39 = vmul.f32 %v10583_v36, %v10362_v31  ;;  %v5239_v48 = vmul.f32 %v10583_v36, %v10426_v15  ;;  %v10604_v41 = vpop.permute.xlu0 %5391  ;;  %v10606_v13 = vpop.permute.xlu1 %5411 }
 0x3b9   : > { %v5271_v43 = vadd.f32 1.0, %v10062_v2  ;;  %v5254_v16 = vmul.f32 %v10583_v36, %v10373_v11  ;;  %v5240_v15 = vmul.f32 %v10583_v36, %v10431_v45  ;;  %v5273_v2 = vadd.f32 1.0, %v10127_v35 }
 0x3ba   : > { %v5301_v32 = vmul.f32 %v5269_v29, %v5237_v46  ;;  %v5302_v7 = vmul.f32 %v5270_v1, %v5238_v52  ;;  %v10600_v12 = vmul.f32 %v5283_v17, %v5251_v39  ;;  %v5275_v39 = vadd.f32 1.0, %v10107_v20 }
 0x3bb   : > { %v5303_v31 = vmul.f32 %v5271_v43, %v5239_v48  ;;  %v5286_v29 = vadd.f32 1.0, %v10243_v0  ;;  %v5274_v52 = vadd.f32 1.0, %v10159_v44  ;;  %v5285_v11 = vadd.f32 1.0, %v10315_v49  ;;  %v11379_v48 = vld [vmem:[#allocation89_spill] sm:$0xff] }
 0x3bc   : > { %v5461_v28 = vadd.f32 %v10523_v6, %v5301_v32  ;;  %v5462_v46 = vadd.f32 %v5368_v34, %v5302_v7  ;;  %v10616_v6 = vadd.f32 1.0, %v10139_v51  ;;  %v5241_v34 = vmul.f32 %v10583_v36, %v10438_v33  ;;  %v5398_v44 = vpop.permute.xlu0 %5397  ;;  %v10628_v32 = vpop.permute.xlu1 %5407 }
 0x3bd   : > { %v5255_v45 = vmul.f32 %v10583_v36, %v10376_v53  ;;  %v5318_v20 = vmul.f32 %v5286_v29, %v5254_v16  ;;  %v5253_v35 = vmul.f32 %v10583_v36, %v10370_v4  ;;  %v5463_v51 = vadd.f32 %v10515_v60, %v5303_v31 }
 0x3be   : > { %vm5493_vm3 = vcmp.ge.f32.partialorder %v5461_v28, 0.0  ;;  %v5525_v27 = vmul.f32 0.2, %v5461_v28  ;;  %v5526_v7 = vmul.f32 0.2, %v5462_v46  ;;  %v5304_v0 = vmul.f32 %v5272_v63, %v5240_v15 }
 0x3bf   : > { %v5284_v49 = vadd.f32 1.0, %v10338_v8  ;;  %v5287_v17 = vadd.f32 1.0, %v10200_v55  ;;  %v5288_v33 = vadd.f32 1.0, %v10222_v62  ;;  %v5317_v53 = vmul.f32 %v5285_v11, %v5253_v35 }
 0x3c0   : > { %v5557_v1 = vsel %vm5493_vm3, %v5461_v28, %v5525_v27  ;;  %v10634_v43 = vadd.f32 1.0, %v11379_v48  ;;  %v5242_v4 = vmul.f32 %v10583_v36, %v10445_v19  ;;  %v5256_v60 = vmul.f32 %v10583_v36, %v10379_v59  ;;  %v11380_v59 = vld [vmem:[#allocation15_spill] sm:$0xff] }
 0x3c1   : > { %5589 = vxpose.xlu0.b32.start [1/16] (narrow) %v5557_v1, 64  ;;  %vm5494_vm4 = vcmp.ge.f32.partialorder %v5462_v46, 0.0  ;;  %v5305_v28 = vmul.f32 %v5273_v2, %v5241_v34  ;;  %v5319_v16 = vmul.f32 %v5287_v17, %v5255_v45  ;;  %v5478_v63 = vadd.f32 %v5400_v58, %v5318_v20  ;;  %v10648_v34 = vpop.permute.xlu1 %5417 }
 0x3c2   : > { %v5477_v8 = vadd.f32 %v5398_v44, %v5317_v53  ;;  %v5527_v31 = vmul.f32 0.2, %v5463_v51  ;;  %v5464_v55 = vadd.f32 %v10531_v61, %v5304_v0  ;;  %v5558_v62 = vsel %vm5494_vm4, %v5462_v46, %v5526_v7  ;;  %v11381_v7 = vld [vmem:[#allocation24_spill] sm:$0xff] }
 0x3c3   : > { %v5252_v15 = vmul.f32 %v10583_v36, %v10365_v56  ;;  %v5243_v29 = vmul.f32 %v10583_v36, %v10452_v18  ;;  %vm5495_vm5 = vcmp.ge.f32.partialorder %v5463_v51, 0.0  ;;  %v5289_v11 = vadd.f32 1.0, %v11380_v59 }
 0x3c4   : > { %vm5509_vm6 = vcmp.ge.f32.partialorder %v5477_v8, 0.0  ;;  %v5541_v19 = vmul.f32 0.2, %v5477_v8  ;;  %v5306_v2 = vmul.f32 %v5274_v52, %v5242_v4  ;;  %v5320_v27 = vmul.f32 %v5288_v33, %v5256_v60 }
 0x3c5   : > { %5590 = vxpose.xlu0.b32.cont [2/16] (narrow) %v5558_v62, 64  ;;  %v10646_v58 = vmul.f32 %v5284_v49, %v5252_v15  ;;  %v5479_v61 = vadd.f32 %v10571_v25, %v5319_v16  ;;  %v5542_v46 = vmul.f32 0.2, %v5478_v63  ;;  %v5257_v56 = vmul.f32 %v10583_v36, %v10382_v21 }
 0x3c6   : > { %v5573_v45 = vsel %vm5509_vm6, %v5477_v8, %v5541_v19  ;;  %v5528_v18 = vmul.f32 0.2, %v5464_v55  ;;  %v5465_v20 = vadd.f32 %v10547_v3, %v5305_v28  ;;  %v5559_v35 = vsel %vm5495_vm5, %v5463_v51, %v5527_v31  ;;  %v11383_v8 = vld [vmem:[#allocation25_spill] sm:$0xff] }
 0x3c7   : > { %5621 = vxpose.xlu1.b32.start [1/16] (narrow) %v5573_v45, 64  ;;  %vm5510_vm7 = vcmp.ge.f32.partialorder %v5478_v63, 0.0  ;;  %v5290_v52 = vadd.f32 1.0, %v11381_v7  ;;  %v5307_v0 = vmul.f32 %v5275_v39, %v5243_v29  ;;  %v5244_v1 = vmul.f32 %v10583_v36, %v10460_v47  ;;  %v10662_v39 = vpop.permute.xlu1 %5413  ;;  %v11389_v7 = vld [vmem:[#allocation22_spill] sm:$0xff] }
 0x3c8   : > { %vm5496_vm8 = vcmp.ge.f32.partialorder %v5464_v55, 0.0  ;;  %v5299_v25 = vadd.f32 1.0, %v10321_v26  ;;  %v5297_v44 = vadd.f32 1.0, %v10324_v24  ;;  %v5300_v21 = vadd.f32 1.0, %v10327_v42 }
 0x3c9   : > { %5591 = vxpose.xlu0.b32.cont [3/16] (narrow) %v5559_v35, 64  ;;  %v5466_v49 = vadd.f32 %v10565_v9, %v5306_v2  ;;  %v5543_v3 = vmul.f32 0.2, %v5479_v61  ;;  %v5480_v51 = vadd.f32 %v10575_v22, %v5320_v27  ;;  %v5321_v17 = vmul.f32 %v5289_v11, %v5257_v56  ;;  %v11384_v11 = vld [vmem:[#allocation45_spill] sm:$0xff] }
 0x3ca   : > { %v5574_v33 = vsel %vm5510_vm7, %v5478_v63, %v5542_v46  ;;  %v5529_v53 = vmul.f32 0.2, %v5465_v20  ;;  %v5560_v48 = vsel %vm5496_vm8, %v5464_v55, %v5528_v18  ;;  %vm5511_vm9 = vcmp.ge.f32.partialorder %v5479_v61, 0.0  ;;  %v11382_v63 = vld [vmem:[#allocation11_spill] sm:$0xff]  ;;  %v11387_v18 = vld [vmem:[#allocation10_spill] sm:$0xff] }
 0x3cb   : > { %5622 = vxpose.xlu1.b32.cont [2/16] (narrow) %v5574_v33, 64  ;;  %v5267_v26 = vmul.f32 %v10583_v36, %v10412_v5  ;;  %v5467_v24 = vadd.f32 %v10539_v23, %v5307_v0  ;;  %v5308_v42 = vmul.f32 %v10616_v6, %v5244_v1  ;;  %v5258_v47 = vmul.f32 %v10583_v36, %v10385_v30  ;;  %v10687_v15 = vpop.permute.xlu1 %5419  ;;  %v11390_v0 = vld [vmem:[#allocation46_spill] sm:$0xff] }
 0x3cc   : > { %vm5497_vm10 = vcmp.ge.f32.partialorder %v5465_v20, 0.0  ;;  %v5245_v9 = vmul.f32 %v10583_v36, %v10466_v14  ;;  %v5259_v22 = vmul.f32 %v10583_v36, %v10388_v38  ;;  %v5265_v5 = vmul.f32 %v10583_v36, %v10406_v40 }
 0x3cd   : > { %5592 = vxpose.xlu0.b32.cont [4/16] (narrow) %v5560_v48, 64  ;;  %v10674_v4 = vmul.f32 %v5299_v25, %v5267_v26  ;;  %v5530_v60 = vmul.f32 0.2, %v5466_v49  ;;  %v5544_v23 = vmul.f32 0.2, %v5480_v51  ;;  %v5481_v6 = vadd.f32 %v10592_v37, %v5321_v17  ;;  %v11391_v48 = vld [vmem:[#allocation35_spill] sm:$0xff] }
 0x3ce   : > { %v5575_v28 = vsel %vm5511_vm9, %v5479_v61, %v5543_v3  ;;  %v5561_v16 = vsel %vm5497_vm10, %v5465_v20, %v5529_v53  ;;  %vm5512_vm11 = vcmp.ge.f32.partialorder %v5480_v51, 0.0  ;;  %v10679_v30 = vmul.f32 %v5297_v44, %v5265_v5  ;;  %v11385_v61 = vld [vmem:[#allocation27_spill] sm:$0xff]  ;;  %v11388_v20 = vld [vmem:[#allocation13_spill] sm:$0xff] }
 0x3cf   : > { %5623 = vxpose.xlu1.b32.cont [3/16] (narrow) %v5575_v28, 64  ;;  %v5268_v14 = vmul.f32 %v10583_v36, %v10415_v10  ;;  %v5277_v38 = vadd.f32 1.0, %v11382_v63  ;;  %v5298_v31 = vadd.f32 1.0, %v11383_v8  ;;  %v5322_v55 = vmul.f32 %v5290_v52, %v5258_v47  ;;  %v5416_v17 = vpop.permute.xlu1 %5415 }
 0x3d0   : > { %vm5498_vm12 = vcmp.ge.f32.partialorder %v5466_v49, 0.0  ;;  %v5531_v40 = vmul.f32 0.2, %v5467_v24  ;;  %v5468_v62 = vadd.f32 %v10558_v54, %v5308_v42  ;;  %v5323_v37 = vmul.f32 %v10634_v43, %v5259_v22  ;;  %v11386_v54 = vld [vmem:[#allocation97_spill] sm:$0xff]  ;;  %v11392_v42 = vld [vmem:[#allocation16_spill] sm:$0xff]  ;;  %v11393_v22 = vld [vmem:[#allocation30_spill] sm:$0xff] }
 0x3d1   : > { %5593 = vxpose.xlu0.b32.cont [5/16] (narrow) %v5561_v16, 64  ;;  %v10689_v29 = vmul.f32 %v5300_v21, %v5268_v14  ;;  %v5545_v19 = vmul.f32 0.2, %v5481_v6  ;;  %v5482_v59 = vadd.f32 %v10628_v32, %v5322_v55  ;;  %v5576_v10 = vsel %vm5512_vm11, %v5480_v51, %v5544_v23  ;;  %v11395_v16 = vld [vmem:[#allocation12_spill] sm:$0xff] }
 0x3d2   : > { %v5266_v2 = vmul.f32 %v10583_v36, %v11384_v11  ;;  %v5309_v27 = vmul.f32 %v5277_v38, %v5245_v9  ;;  %v5246_v46 = vmul.f32 %v10583_v36, %v11385_v61  ;;  %v5562_v56 = vsel %vm5498_vm12, %v5466_v49, %v5530_v60  ;;  %v11396_v38 = vld [vmem:[#allocation37_spill] sm:$0xff] }
 0x3d3   : > { %5624 = vxpose.xlu1.b32.cont [4/16] (narrow) %v5576_v10, 64  ;;  %vm5513_vm13 = vcmp.ge.f32.partialorder %v5481_v6, 0.0  ;;  %v5260_v43 = vmul.f32 %v10583_v36, %v11386_v54  ;;  %vm5499_vm14 = vcmp.ge.f32.partialorder %v5467_v24, 0.0  ;;  %v5279_v32 = vadd.f32 1.0, %v11387_v18 }
 0x3d4   : > { %v10698_v45 = vmul.f32 %v5298_v31, %v5266_v2  ;;  %v5278_v35 = vadd.f32 1.0, %v11388_v20  ;;  %v5292_v52 = vadd.f32 1.0, %v11389_v7  ;;  %v5247_v1 = vmul.f32 %v10583_v36, %v11390_v0  ;;  %v11397_v31 = vld [vmem:[#allocation20_spill] sm:$0xff]  ;;  %v11399_v2 = vld [vmem:[#allocation94_spill] sm:$0xff] }
 0x3d5   : > { %5594 = vxpose.xlu0.b32.cont [6/16] (narrow) %v5562_v56, 64  ;;  %v5532_v25 = vmul.f32 0.2, %v5468_v62  ;;  %v5483_v44 = vadd.f32 %v10581_v57, %v5323_v37  ;;  %v5546_v21 = vmul.f32 0.2, %v5482_v59  ;;  %v5577_v49 = vsel %vm5513_vm13, %v5481_v6, %v5545_v19  ;;  %v11403_v0 = vld [vmem:[#allocation48_spill] sm:$0xff] }
 0x3d6   : > { %v5469_v3 = vadd.f32 %v10569_v50, %v5309_v27  ;;  %v5310_v51 = vmul.f32 %v5278_v35, %v5246_v46  ;;  %v5563_v33 = vsel %vm5499_vm14, %v5467_v24, %v5531_v40  ;;  %vm5514_vm15 = vcmp.ge.f32.partialorder %v5482_v59, 0.0  ;;  %v11394_v24 = vld [vmem:[#allocation49_spill] sm:$0xff]  ;;  %v11398_v40 = vld [vmem:[#allocation98_spill] sm:$0xff] }
 0x3d7   : > { %5625 = vxpose.xlu1.b32.cont [5/16] (narrow) %v5577_v49, 64  ;;  %v5324_v53 = vmul.f32 %v5292_v52, %v5260_v43  ;;  %v5261_v26 = vmul.f32 %v10583_v36, %v11391_v48  ;;  %vm5500_vm0 = vcmp.ge.f32.partialorder %v5468_v62, 0.0  ;;  %v5293_v47 = vadd.f32 1.0, %v11392_v42  ;;  %v11400_v46 = vld [vmem:[#allocation38_spill] sm:$0xff]  ;;  %v11401_v43 = vld [vmem:[#allocation96_spill] sm:$0xff]  ;;  %v11406_v48 = vld [vmem:[#allocation31_spill] sm:$0xff] }
 0x3d8   : > { %v5311_v9 = vmul.f32 %v5279_v32, %v5247_v1  ;;  %v5248_v57 = vmul.f32 %v10583_v36, %v11393_v22  ;;  %v5547_v5 = vmul.f32 0.2, %v5483_v44  ;;  %v5578_v60 = vsel %vm5514_vm15, %v5482_v59, %v5546_v21  ;;  %v11402_v32 = vld [vmem:[#allocation26_spill] sm:$0xff] }
 0x3d9   : > { %5595 = vxpose.xlu0.b32.cont [7/16] (narrow) %v5563_v33, 64  ;;  %v5484_v50 = vadd.f32 %v10606_v13, %v5324_v53  ;;  %v5533_v23 = vmul.f32 0.2, %v5469_v3  ;;  %v5470_v6 = vadd.f32 %v11394_v24, %v5310_v51  ;;  %v5564_v28 = vsel %vm5500_vm0, %v5468_v62, %v5532_v25  ;;  %v10719_v13 = vpop.permute.xlu1 %5425  ;;  %v11405_v33 = vld [vmem:[#allocation21_spill] sm:$0xff] }
 0x3da   : > { %vm5515_vm1 = vcmp.ge.f32.partialorder %v5483_v44, 0.0  ;;  %v5280_v14 = vadd.f32 1.0, %v11395_v16  ;;  %v5325_v63 = vmul.f32 %v5293_v47, %v5261_v26  ;;  %v5262_v8 = vmul.f32 %v10583_v36, %v11396_v38 }
 0x3db   : > { %5626 = vxpose.xlu1.b32.cont [6/16] (narrow) %v5578_v60, 64  ;;  %vm5501_vm2 = vcmp.ge.f32.partialorder %v5469_v3, 0.0  ;;  %v5294_v55 = vadd.f32 1.0, %v11397_v31  ;;  %v5471_v37 = vadd.f32 %v11398_v40, %v5311_v9  ;;  %v5548_v59 = vmul.f32 0.2, %v5484_v50 }
 0x3dc   : > { %v5312_v19 = vmul.f32 %v5280_v14, %v5248_v57  ;;  %v5485_v62 = vadd.f32 %v10662_v39, %v5325_v63  ;;  %v5579_v10 = vsel %vm5515_vm1, %v5483_v44, %v5547_v5  ;;  %v5534_v11 = vmul.f32 0.2, %v5470_v6  ;;  %v11408_v5 = vld [vmem:[#allocation100_spill] sm:$0xff] }
 0x3dd   : > { %5596 = vxpose.xlu0.b32.cont [8/16] (narrow) %v5564_v28, 64  ;;  %v5249_v27 = vmul.f32 %v10583_v36, %v11399_v2  ;;  %v5565_v61 = vsel %vm5501_vm2, %v5469_v3, %v5533_v23  ;;  %vm5516_vm3 = vcmp.ge.f32.partialorder %v5484_v50, 0.0  ;;  %v5263_v56 = vmul.f32 %v10583_v36, %v11400_v46  ;;  %v5422_v44 = vpop.permute.xlu1 %5421  ;;  %v11404_v3 = vld [vmem:[#allocation41_spill] sm:$0xff] }
 0x3de   : > { %v5326_v54 = vmul.f32 %v5294_v55, %v5262_v8  ;;  %vm5502_vm4 = vcmp.ge.f32.partialorder %v5470_v6, 0.0  ;;  %v5281_v18 = vadd.f32 1.0, %v11401_v43  ;;  %v5295_v20 = vadd.f32 1.0, %v11402_v32  ;;  %v11409_v55 = vld [vmem:[#allocation99_spill] sm:$0xff] }
 0x3df   : > { %5627 = vxpose.xlu1.b32.cont [7/16] (narrow) %v5579_v10, 64  ;;  %v5535_v35 = vmul.f32 0.2, %v5471_v37  ;;  %v5549_v39 = vmul.f32 0.2, %v5485_v62  ;;  %v5580_v52 = vsel %vm5516_vm3, %v5484_v50, %v5548_v59  ;;  %v5472_v1 = vadd.f32 %v11403_v0, %v5312_v19 }
 0x3e0   : > { %v5486_v7 = vadd.f32 %v5416_v17, %v5326_v54  ;;  %v5313_v25 = vmul.f32 %v5281_v18, %v5249_v27  ;;  %v5566_v21 = vsel %vm5502_vm4, %v5470_v6, %v5534_v11  ;;  %vm5517_vm5 = vcmp.ge.f32.partialorder %v5485_v62, 0.0  ;;  %v11407_v17 = vld [vmem:[#allocation18_spill] sm:$0xff] }
 0x3e1   : > { %5597 = vxpose.xlu0.b32.cont [9/16] (narrow) %v5565_v61, 64  ;;  %v5327_v49 = vmul.f32 %v5295_v20, %v5263_v56  ;;  %v5264_v51 = vmul.f32 %v10583_v36, %v11404_v3  ;;  %vm5503_vm6 = vcmp.ge.f32.partialorder %v5471_v37, 0.0  ;;  %v5282_v53 = vadd.f32 1.0, %v11405_v33  ;;  %v5428_v6 = vpop.permute.xlu1 %5427 }
 0x3e2   : > { %v5250_v26 = vmul.f32 %v10583_v36, %v11406_v48  ;;  %v5296_v42 = vadd.f32 1.0, %v11407_v17  ;;  %v5550_v9 = vmul.f32 0.2, %v5486_v7  ;;  %v5581_v22 = vsel %vm5517_vm5, %v5485_v62, %v5549_v39 }
 0x3e3   : > { %5628 = vxpose.xlu1.b32.cont [8/16] (narrow) %v5580_v52, 64  ;;  %v5487_v47 = vadd.f32 %v10648_v34, %v5327_v49  ;;  %v5536_v57 = vmul.f32 0.2, %v5472_v1  ;;  %v5473_v50 = vadd.f32 %v11408_v5, %v5313_v25  ;;  %v5567_v60 = vsel %vm5503_vm6, %v5471_v37, %v5535_v35 }
 0x3e4   : > { %vm5518_vm7 = vcmp.ge.f32.partialorder %v5486_v7, 0.0  ;;  %v5328_v23 = vmul.f32 %v5296_v42, %v5264_v51  ;;  %vm5504_vm8 = vcmp.ge.f32.partialorder %v5472_v1, 0.0  ;;  %v5314_v24 = vmul.f32 %v5282_v53, %v5250_v26 }
 0x3e5   : > { %5598 = vxpose.xlu0.b32.cont [10/16] (narrow) %v5566_v21, 64  ;;  %v5551_v28 = vmul.f32 0.2, %v5487_v47  ;;  %v5582_v16 = vsel %vm5518_vm7, %v5486_v7, %v5550_v9  ;;  %v5537_v14 = vmul.f32 0.2, %v5473_v50  ;;  %v5568_v63 = vsel %vm5504_vm8, %v5472_v1, %v5536_v57  ;;  %v5424_v19 = vpop.permute.xlu1 %5423 }
 0x3e6   : > { %v5488_v36 = vadd.f32 %v10687_v15, %v5328_v23  ;;  %v5474_v34 = vadd.f32 %v10604_v41, %v5314_v24  ;;  %vm5519_vm9 = vcmp.ge.f32.partialorder %v5487_v47, 0.0  ;;  %vm5505_vm10 = vcmp.ge.f32.partialorder %v5473_v50, 0.0  ;;  %v5396_v15 = vpop.permute.xlu0 %5395 }
 0x3e7   : > { %5629 = vxpose.xlu1.b32.cont [9/16] (narrow) %v5581_v22, 64  ;;  %v5489_v8 = vadd.f32 %v5422_v44, %v10679_v30  ;;  %v5583_v31 = vsel %vm5519_vm9, %v5487_v47, %v5551_v28  ;;  %v5475_v40 = vadd.f32 %v11409_v55, %v10600_v12  ;;  %v5569_v59 = vsel %vm5505_vm10, %v5473_v50, %v5537_v14 }
 0x3e8   : > { %v5552_v38 = vmul.f32 0.2, %v5488_v36  ;;  %v5538_v37 = vmul.f32 0.2, %v5474_v34  ;;  %vm5520_vm11 = vcmp.ge.f32.partialorder %v5488_v36, 0.0  ;;  %vm5506_vm12 = vcmp.ge.f32.partialorder %v5474_v34, 0.0 }
 0x3e9   : > { %5599 = vxpose.xlu0.b32.cont [11/16] (narrow) %v5567_v60, 64  ;;  %v5553_v41 = vmul.f32 0.2, %v5489_v8  ;;  %v5490_v62 = vadd.f32 %v5424_v19, %v10698_v45  ;;  %v5539_v11 = vmul.f32 0.2, %v5475_v40  ;;  %v5476_v2 = vadd.f32 %v5396_v15, %v10646_v58 }
 0x3ea   : > { %v5584_v10 = vsel %vm5520_vm11, %v5488_v36, %v5552_v38  ;;  %v5570_v30 = vsel %vm5506_vm12, %v5474_v34, %v5538_v37  ;;  %vm5521_vm13 = vcmp.ge.f32.partialorder %v5489_v8, 0.0  ;;  %vm5507_vm14 = vcmp.ge.f32.partialorder %v5475_v40, 0.0 }
 0x3eb   : > { %5630 = vxpose.xlu1.b32.cont [10/16] (narrow) %v5582_v16, 64  ;;  %v5491_v12 = vadd.f32 %v10719_v13, %v10674_v4  ;;  %v5554_v27 = vmul.f32 0.2, %v5490_v62  ;;  %v5585_v61 = vsel %vm5521_vm13, %v5489_v8, %v5553_v41  ;;  %v5540_v46 = vmul.f32 0.2, %v5476_v2 }
 0x3ec   : > { %v5571_v56 = vsel %vm5507_vm14, %v5475_v40, %v5539_v11  ;;  %vm5522_vm15 = vcmp.ge.f32.partialorder %v5490_v62, 0.0  ;;  %vm5508_vm0 = vcmp.ge.f32.partialorder %v5476_v2, 0.0  ;;  %v5492_v58 = vadd.f32 %v5428_v6, %v10689_v29 }
 0x3ed   : > { %5600 = vxpose.xlu0.b32.cont [12/16] (narrow) %v5568_v63, 64  ;;  %v5555_v45 = vmul.f32 0.2, %v5491_v12  ;;  %v5586_v54 = vsel %vm5522_vm15, %v5490_v62, %v5554_v27  ;;  %v5572_v43 = vsel %vm5508_vm0, %v5476_v2, %v5540_v46  ;;  %vm5523_vm1 = vcmp.ge.f32.partialorder %v5491_v12, 0.0 }
 0x3ee   : > { %v5556_v18 = vmul.f32 0.2, %v5492_v58  ;;  %vm5524_vm2 = vcmp.ge.f32.partialorder %v5492_v58, 0.0 }
 0x3ef   : > { %5631 = vxpose.xlu1.b32.cont [11/16] (narrow) %v5583_v31, 64  ;;  %v5587_v32 = vsel %vm5523_vm1, %v5491_v12, %v5555_v45 }
 0x3f0   : > { %v5588_v4 = vsel %vm5524_vm2, %v5492_v58, %v5556_v18 }
 0x3f1   : > { %5601 = vxpose.xlu0.b32.cont [13/16] (narrow) %v5569_v59, 64 }
 0x3f3   : > { %5632 = vxpose.xlu1.b32.cont [12/16] (narrow) %v5584_v10, 64 }
 0x3f5   : > { %5602 = vxpose.xlu0.b32.cont [14/16] (narrow) %v5570_v30, 64 }
 0x3f7   : > { %5633 = vxpose.xlu1.b32.cont [13/16] (narrow) %v5585_v61, 64 }
 0x3f9   : > { %5603 = vxpose.xlu0.b32.cont [15/16] (narrow) %v5571_v56, 64 }
 0x3fb   : > { %5634 = vxpose.xlu1.b32.cont [14/16] (narrow) %v5586_v54, 64 }
 0x3fd   : > { %5604 = vxpose.xlu0.b32.end [16/16] (narrow) %v5572_v43, 64 }
 0x3ff   : > { %5635 = vxpose.xlu1.b32.cont [15/16] (narrow) %v5587_v32, 64 }
 0x403   : > { %5636 = vxpose.xlu1.b32.end [16/16] (narrow) %v5588_v4, 64 }
 0x441   : > { %v5605_v29 = vpop.trf.xlu0 }
 0x442   : > { %5653 = vst [vmem:[%s10751_s18] sm:$0xff] %v5605_v29 }
 0x445   : > { %v5606_v13 = vpop.trf.xlu0 }
 0x446   : > { %5655 = vst [vmem:[%s10751_s18 + $0x10] sm:$0xff] %v5606_v13 }
 0x447   : > { %v5637_v20 = vpop.trf.xlu1 }
 0x448   : > { %5654 = vst [vmem:[%s10751_s18 + $0x8] sm:$0xff] %v5637_v20 }
 0x449   : > { %v5607_v35 = vpop.trf.xlu0 }
 0x44a   : > { %5657 = vst [vmem:[%s10751_s18 + $0x20] sm:$0xff] %v5607_v35 }
 0x44b   : > { %v5638_v39 = vpop.trf.xlu1 }
 0x44c   : > { %5656 = vst [vmem:[%s10751_s18 + $0x18] sm:$0xff] %v5638_v39 }
 0x44d   : > { %v5608_v7 = vpop.trf.xlu0 }
 0x44e   : > { %5659 = vst [vmem:[%s10751_s18 + $0x30] sm:$0xff] %v5608_v7 }
 0x44f   : > { %v5639_v52 = vpop.trf.xlu1 }
 0x450   : > { %5658 = vst [vmem:[%s10751_s18 + $0x28] sm:$0xff] %v5639_v52 }
 0x451   : > { %v5609_v0 = vpop.trf.xlu0 }
 0x452   : > { %5661 = vst [vmem:[%s10751_s18 + $0x40] sm:$0xff] %v5609_v0 }
 0x453   : > { %v5640_v1 = vpop.trf.xlu1 }
 0x454   : > { %5660 = vst [vmem:[%s10751_s18 + $0x38] sm:$0xff] %v5640_v1 }
 0x455   : > { %v5610_v25 = vpop.trf.xlu0 }
 0x456   : > { %5663 = vst [vmem:[%s10751_s18 + $0x50] sm:$0xff] %v5610_v25 }
 0x457   : > { %v5641_v44 = vpop.trf.xlu1 }
 0x458   : > { %5662 = vst [vmem:[%s10751_s18 + $0x48] sm:$0xff] %v5641_v44 }
 0x459   : > { %v5611_v21 = vpop.trf.xlu0 }
 0x45a   : > { %5665 = vst [vmem:[%s10751_s18 + $0x60] sm:$0xff] %v5611_v21 }
 0x45b   : > { %v5642_v49 = vpop.trf.xlu1 }
 0x45c   : > { %5664 = vst [vmem:[%s10751_s18 + $0x58] sm:$0xff] %v5642_v49 }
 0x45d   : > { %v5612_v3 = vpop.trf.xlu0 }
 0x45e   : > { %5667 = vst [vmem:[%s10751_s18 + $0x70] sm:$0xff] %v5612_v3 }
 0x45f   : > { %v5643_v51 = vpop.trf.xlu1 }
 0x460   : > { %5666 = vst [vmem:[%s10751_s18 + $0x68] sm:$0xff] %v5643_v51 }
 0x463   : > { %v5644_v33 = vpop.trf.xlu1 }
 0x464   : > { %5668 = vst [vmem:[%s10751_s18 + $0x78] sm:$0xff] %v5644_v33 }
 0x465 PF: > { %s16_s21 = sadd.s32 1, %s7804_s21  }
 0x466   : > { %p13_p4 = scmp.ge.s32.totalorder %s16_s21, 4  }
 0x468   :  { %15 = sbr.rel (!%p13_p4) target bundleno = 1 (0x1), region = 93 }

</bundles_post_ra>
